<compile_context>
chip_gen: v7x
topology: tpu7x:2x2x1
jax: 0.10.0
libtpu: 0.0.40
codegen_flags: <defaults>
</compile_context>

<pallas_src>
import functools

import jax
import jax.numpy as jnp
from jax import lax
from jax.experimental import pallas as pl
from jax.experimental.pallas import tpu as pltpu

_REF_PREC = jax.lax.Precision.HIGHEST


def _round_up(a, m):
    return (a + m - 1) // m * m


def _pick_block_n(n):
    """Images per grid step: fold batch into M, but keep grid length >= 2."""
    for b in (8, 4, 2):
        if n % b == 0 and n // b >= 2:
            return b
    return 1


# ----------------------------------------------------------------------------
# fused kernel (B images per grid step)
# ----------------------------------------------------------------------------
def _reduction_a_kernel(xh_ref, b3am_ref, w3a_ref, w3b_ref, b3b_ref,
                        w3c_ref, b3c_ref, w2_ref, b2_ref,
                        out_ref, s1_ref, s2_ref,
                        *, B, S1W, R, M2a, LSp, OH, OW):
    """xh_ref  : (2, B, R, 128)  bf16  column-parity split, halo layout
                 xh[par, b, (h+1)*S1W + 1 + j, c] = x[b, c, h, 2j+par], 0 elsewhere
       b3am_ref: (2, R, 128)     f32   branch3 1x1 bias, masked to valid cells
       w3a_ref : (128, 128)      bf16  1x1 conv weight (Cout padded 96->128)
       w3b_ref : (3,3,128,128)   bf16  3x3 'same' conv weight (padded 96->128)
       w3c_ref : (3,3,128,128)   bf16  3x3/s2 conv weight (Cin padded 96->128)
       w2_ref  : (3,3,128,256)   bf16  3x3/s2 conv weight (Cout padded 192->256)
       out_ref : (B*OH*OW, 512)  f32   [pool 0:128 | br3 128:256 | br2 256:512]
       s1_ref  : (2, B, R, 128)   bf16  t1 in the same halo layout as xh
       s2_ref  : (2, B, M2a, 128) bf16  t2, flat rows of stride S1W
    """
    f32 = jnp.float32

    # ---------------- branch3 stage 1: 1x1 conv straight into halo layout ---
    w3a = w3a_ref[...]
    for par in range(2):
        lhs = xh_ref[par].reshape(B * R, 128)                       # bf16
        t1 = jnp.dot(lhs, w3a, preferred_element_type=f32)
        t1 = t1.reshape(B, R, 128) + b3am_ref[par][None]            # masked bias
        s1_ref[par] = t1.astype(s1_ref.dtype)

    # ---------------- branch3 stage 2: 3x3 conv, padding='same' -------------
    # output parity pe, tap kw  ->  (source column parity, column offset in s1)
    tap_tbl = (((1, 0), (0, 1), (1, 1)),     # even output columns
               ((0, 1), (1, 1), (0, 2)))     # odd  output columns
    w3b_t = [[w3b_ref[kh, kw] for kw in range(3)] for kh in range(3)]  # hoisted
    b3b = b3b_ref[...]
    for pe in range(2):
        acc = jnp.zeros((B * M2a, 128), f32)
        for kh in range(3):
            for kw in range(3):
                sp, c0 = tap_tbl[pe][kw]
                a0 = kh * S1W + c0
                lhs = s1_ref[sp, :, a0:a0 + M2a, :].reshape(B * M2a, 128)
                acc = acc + jnp.dot(lhs, w3b_t[kh][kw],
                                    preferred_element_type=f32)
        s2_ref[pe] = (acc + b3b).astype(s2_ref.dtype).reshape(B, M2a, 128)

    # ---------------- stride-2 stage ----------------------------------------
    # For every tap, the valid output rows (b, oh, ow) sit at the SAME
    # relative offsets 2*oh*S1W + ow of one contiguous slab, so each tap is a
    # single shifted load + one dot; valid rows are gathered once at the end.
    def gather_rows(v):
        pieces = []
        for b in range(B):
            for oh in range(OH):
                r0 = b * LSp + 2 * oh * S1W
                pieces.append(v[r0:r0 + OW])
        return jnp.concatenate(pieces, axis=0)          # (B*OH*OW, C)

    # pass A: max-pool (branch1) + 3x3/s2 conv (branch2), both from the input
    acc2 = jnp.zeros((B * LSp, 256), f32)
    mx = None
    for kh in range(3):
        for kw in range(3):
            par, dw = kw % 2, kw // 2
            st = (kh + 1) * S1W + 1 + dw
            xs = xh_ref[par, :, st:st + LSp, :].reshape(B * LSp, 128)
            mx = xs if mx is None else jnp.maximum(mx, xs)
            acc2 = acc2 + jnp.dot(xs, w2_ref[kh, kw],
                                  preferred_element_type=f32)
    out_ref[:, 0:128] = gather_rows(mx).astype(f32)
    out_ref[:, 256:512] = gather_rows(acc2 + b2_ref[...])

    # pass B: branch3 tail 3x3/s2 conv from t2
    acc3 = jnp.zeros((B * LSp, 128), f32)
    for kh in range(3):
        for kw in range(3):
            par, dw = kw % 2, kw // 2
            st = kh * S1W + dw
            ts = s2_ref[par, :, st:st + LSp, :].reshape(B * LSp, 128)
            acc3 = acc3 + jnp.dot(ts, w3c_ref[kh, kw],
                                  preferred_element_type=f32)
    out_ref[:, 128:256] = gather_rows(acc3 + b3c_ref[...])


# ----------------------------------------------------------------------------
# wrapper: layout prep + pallas_call + boundary transpose
# ----------------------------------------------------------------------------
def _prep_inputs(x_nchw, R, S1W):
    """(N,C,H,W) -> (2, N, R, C) bf16 column-parity-split halo layout."""
    N, C, H, W = x_nchw.shape
    We = (W + 1) // 2
    Hh = -(-R // S1W)
    xpad = jnp.pad(x_nchw, ((0, 0), (0, 0), (0, 0), (0, 2 * We - W)))
    xq = jnp.transpose(xpad.reshape(N, C, H, We, 2), (4, 0, 2, 3, 1))
    xh = jnp.pad(xq, ((0, 0), (0, 0), (1, Hh - H - 1),
                      (1, S1W - We - 1), (0, 0)))
    xh = xh.reshape(2, N, Hh * S1W, C)[:, :, :R, :]
    return xh.astype(jnp.bfloat16)


def _prep_params(p, R, S1W, H, W):
    """bf16 weights (zero-padded to lane-friendly channel counts) + f32 biases."""
    We, Wo = (W + 1) // 2, W // 2
    f32, bf16 = jnp.float32, jnp.bfloat16

    # branch2: 3x3/s2 conv, Cout padded 192 -> 256 for a lane-dense output tile
    w2 = jnp.pad(p['w2'].astype(bf16), ((0, 0), (0, 0), (0, 0), (0, 64)))
    b2 = jnp.pad(p['b2'].astype(f32), (0, 64)).reshape(1, 256)

    # branch3 1x1: Cout padded 96 -> 128; bias pre-masked onto the halo layout
    w3a = jnp.pad(p['w3a'].reshape(128, 96).astype(bf16), ((0, 0), (0, 32)))
    r = jnp.arange(R)
    hh = r // S1W - 1
    jj = r % S1W - 1
    def vmask(wv):
        return ((hh >= 0) & (hh < H) & (jj >= 0) & (jj < wv)).astype(f32)
    mask = jnp.stack([vmask(We), vmask(Wo)], axis=0)                   # (2, R)
    b3a = jnp.pad(p['b3a'].astype(f32), (0, 32))                       # (128,)
    b3am = mask[:, :, None] * b3a[None, None, :]                       # (2,R,128)

    # branch3 3x3 'same': Cin/Cout padded 96 -> 128
    w3b = jnp.pad(p['w3b'].astype(bf16), ((0, 0), (0, 0), (0, 32), (0, 32)))
    b3b = jnp.pad(p['b3b'].astype(f32), (0, 32)).reshape(1, 128)

    # branch3 3x3/s2: Cin padded 96 -> 128
    w3c = jnp.pad(p['w3c'].astype(bf16), ((0, 0), (0, 0), (0, 32), (0, 0)))
    b3c = p['b3c'].astype(f32).reshape(1, 128)
    return w2, b2, w3a, b3am, w3b, b3b, w3c, b3c


@jax.jit
def reduction_a_pallas(x_nchw, p):
    N, C, H, W = x_nchw.shape
    assert C == 128, "ReductionA expects 128 input channels"
    assert H >= 3 and W >= 3
    We = (W + 1) // 2
    S1W = We + 2
    OH = (H - 3) // 2 + 1
    OW = (W - 3) // 2 + 1
    # padded (8-aligned) row extents
    LSp = _round_up(2 * (OH - 1) * S1W + OW, 8)              # stride-2 slab rows
    M2a = _round_up(max((H - 1) * S1W + We, 2 * S1W + 1 + LSp), 8)   # t2 rows
    R = _round_up(max(H * S1W + We + 1, 2 * S1W + 2 + M2a,
                      3 * S1W + 2 + LSp), 8)                          # t1/x rows
    B = _pick_block_n(N)
    G = N // B

    xh = _prep_inputs(x_nchw, R, S1W)
    w2, b2, w3a, b3am, w3b, b3b, w3c, b3c = _prep_params(p, R, S1W, H, W)

    kernel = functools.partial(_reduction_a_kernel, B=B, S1W=S1W, R=R,
                               M2a=M2a, LSp=LSp, OH=OH, OW=OW)

    flops = 2 * N * (2 * R * 128 * 128                 # 1x1 conv
                     + 2 * 9 * M2a * 128 * 128         # 3x3 'same' conv
                     + 9 * LSp * 128 * (256 + 128))    # both stride-2 convs
    bytes_accessed = (2 * (xh.size + w2.size + w3a.size + w3b.size + w3c.size)
                      + 4 * (b3am.size + N * OH * OW * 512))
    cost = pl.CostEstimate(flops=flops, transcendentals=0,
                           bytes_accessed=bytes_accessed)

    out_flat = pl.pallas_call(
        kernel,
        out_shape=jax.ShapeDtypeStruct((N * OH * OW, 512), jnp.float32),
        grid=(G,),
        in_specs=[
            pl.BlockSpec((2, B, R, 128), lambda g: (0, g, 0, 0)),     # xh
            pl.BlockSpec((2, R, 128), lambda g: (0, 0, 0)),           # b3a mask
            pl.BlockSpec((128, 128), lambda g: (0, 0)),               # w3a
            pl.BlockSpec((3, 3, 128, 128), lambda g: (0, 0, 0, 0)),   # w3b
            pl.BlockSpec((1, 128), lambda g: (0, 0)),                 # b3b
            pl.BlockSpec((3, 3, 128, 128), lambda g: (0, 0, 0, 0)),   # w3c
            pl.BlockSpec((1, 128), lambda g: (0, 0)),                 # b3c
            pl.BlockSpec((3, 3, 128, 256), lambda g: (0, 0, 0, 0)),   # w2
            pl.BlockSpec((1, 256), lambda g: (0, 0)),                 # b2
        ],
        out_specs=pl.BlockSpec((B * OH * OW, 512), lambda g: (g, 0)),
        scratch_shapes=[
            pltpu.VMEM((2, B, R, 128), jnp.bfloat16),      # s1: t1, halo layout
            pltpu.VMEM((2, B, M2a, 128), jnp.bfloat16),    # s2: t2, flat layout
        ],
        compiler_params=pltpu.CompilerParams(
            dimension_semantics=("parallel",)),
        cost_estimate=cost,
    )(xh, b3am, w3a, w3b, b3b, w3c, b3c, w2, b2)

    # internal channel order [pool | branch3 | branch2(pad)] -> torch order, NCHW
    out = out_flat.reshape(N, OH, OW, 512)
    out_nhwc = jnp.concatenate(
        [out[..., 0:128], out[..., 256:448], out[..., 128:256]], axis=-1)
    return jnp.transpose(out_nhwc, (0, 3, 1, 2))


# ----------------------------------------------------------------------------
# parameters + pure-JAX reference (correctness check only)
# ----------------------------------------------------------------------------
def init_params(key):
    ks = jax.random.split(key, 8)

    def conv_init(kw_key, kb_key, K, cin, cout):
        fan_in = K * K * cin
        w = jax.random.normal(kw_key, (K, K, cin, cout), jnp.float32) / jnp.sqrt(fan_in)
        b = 0.1 * jax.random.normal(kb_key, (cout,), jnp.float32)
        return w, b

    p = {}
    p['w2'], p['b2'] = conv_init(ks[0], ks[1], 3, 128, 192)    # branch2: 3x3/s2
    p['w3a'], p['b3a'] = conv_init(ks[2], ks[3], 1, 128, 96)   # branch3: 1x1
    p['w3b'], p['b3b'] = conv_init(ks[4], ks[5], 3, 96, 96)    # branch3: 3x3 same
    p['w3c'], p['b3c'] = conv_init(ks[6], ks[7], 3, 96, 128)   # branch3: 3x3/s2
    return p


def reduction_a_ref(x_nchw, p):
    x = jnp.transpose(x_nchw, (0, 2, 3, 1)).astype(jnp.float32)
    dn = ('NHWC', 'HWIO', 'NHWC')
    mp = lax.reduce_window(x, -jnp.inf, lax.max, (1, 3, 3, 1), (1, 2, 2, 1), 'VALID')
    c2 = lax.conv_general_dilated(x, p['w2'], (2, 2), 'VALID',
                                  dimension_numbers=dn, precision=_REF_PREC) + p['b2']
    t = lax.conv_general_dilated(x, p['w3a'], (1, 1), 'VALID',
                                 dimension_numbers=dn, precision=_REF_PREC) + p['b3a']
    t = lax.conv_general_dilated(t, p['w3b'], (1, 1), 'SAME',
                                 dimension_numbers=dn, precision=_REF_PREC) + p['b3b']
    c3 = lax.conv_general_dilated(t, p['w3c'], (2, 2), 'VALID',
                                  dimension_numbers=dn, precision=_REF_PREC) + p['b3c']
    out = jnp.concatenate([mp, c2, c3], axis=-1)
    return jnp.transpose(out, (0, 3, 1, 2))


if __name__ == "__main__":
    key = jax.random.PRNGKey(0)
    kx, kp = jax.random.split(key)

    N, C, H, W = 4, 128, 9, 9          # Cin fixed to 128 by the module
    x = jax.random.normal(kx, (N, C, H, W), jnp.float32)
    params = init_params(kp)

    out = jax.block_until_ready(reduction_a_pallas(x, params))
    ref = jax.block_until_ready(reduction_a_ref(x, params))

    OH = (H - 3) // 2 + 1
    assert out.shape == (N, 128 + 192 + 128, OH, OH), out.shape
    # bf16 MXU operands through a 3-conv chain vs f32 HIGHEST-precision ref
    if not jnp.allclose(out, ref, rtol=1e-1, atol=1e-1):
        raise AssertionError(
            f"mismatch: max abs err = {float(jnp.max(jnp.abs(out - ref)))}")
    print("KERNEL_OK")
</pallas_src>

<mosaic_0001>
module attributes {stable_mosaic.version = 11 : i64} {
  func.func @_reduction_a_kernel(%arg0: i32, %arg1: memref<2x2x80x128xbf16, #tpu.memory_space<vmem>>, %arg2: memref<2x80x128xf32, #tpu.memory_space<vmem>>, %arg3: memref<128x128xbf16, #tpu.memory_space<vmem>>, %arg4: memref<3x3x128x128xbf16, #tpu.memory_space<vmem>>, %arg5: memref<1x128xf32, #tpu.memory_space<vmem>>, %arg6: memref<3x3x128x128xbf16, #tpu.memory_space<vmem>>, %arg7: memref<1x128xf32, #tpu.memory_space<vmem>>, %arg8: memref<3x3x128x256xbf16, #tpu.memory_space<vmem>>, %arg9: memref<1x256xf32, #tpu.memory_space<vmem>>, %arg10: memref<32x512xf32, #tpu.memory_space<vmem>>, %arg11: memref<2x2x80x128xbf16, #tpu.memory_space<vmem>>, %arg12: memref<2x2x64x128xbf16, #tpu.memory_space<vmem>>) attributes {dimension_semantics = [#tpu.dimension_semantics<parallel>], iteration_bounds = array<i64: 2>, scalar_prefetch = 0 : i64, scratch_operands = 2 : i64, tpu.core_type = #tpu.core_type<tc>, window_params = [{transform_indices = @transform_0, window_bounds = array<i64: 2, 2, 80, 128>}, {pipeline_mode = #tpu.pipeline_mode<synchronous>, transform_indices = @transform_1, window_bounds = array<i64: 2, 80, 128>}, {pipeline_mode = #tpu.pipeline_mode<synchronous>, transform_indices = @transform_2, window_bounds = array<i64: 128, 128>}, {pipeline_mode = #tpu.pipeline_mode<synchronous>, transform_indices = @transform_3, window_bounds = array<i64: 3, 3, 128, 128>}, {pipeline_mode = #tpu.pipeline_mode<synchronous>, transform_indices = @transform_4, window_bounds = array<i64: 1, 128>}, {pipeline_mode = #tpu.pipeline_mode<synchronous>, transform_indices = @transform_5, window_bounds = array<i64: 3, 3, 128, 128>}, {pipeline_mode = #tpu.pipeline_mode<synchronous>, transform_indices = @transform_6, window_bounds = array<i64: 1, 128>}, {pipeline_mode = #tpu.pipeline_mode<synchronous>, transform_indices = @transform_7, window_bounds = array<i64: 3, 3, 128, 256>}, {pipeline_mode = #tpu.pipeline_mode<synchronous>, transform_indices = @transform_8, window_bounds = array<i64: 1, 256>}, {transform_indices = @transform_9, window_bounds = array<i64: 32, 512>}]} {
    %c0 = arith.constant 0 : index
    %c0_0 = arith.constant 0 : index
    %0 = vector.load %arg3[%c0, %c0_0] : memref<128x128xbf16, #tpu.memory_space<vmem>>, vector<128x128xbf16>
    %c0_1 = arith.constant 0 : index
    %c0_2 = arith.constant 0 : index
    %c0_3 = arith.constant 0 : index
    %c0_4 = arith.constant 0 : index
    %1 = vector.load %arg1[%c0_1, %c0_2, %c0_3, %c0_4] : memref<2x2x80x128xbf16, #tpu.memory_space<vmem>>, vector<1x2x80x128xbf16>
    %2 = vector.shape_cast %1 : vector<1x2x80x128xbf16> to vector<2x80x128xbf16>
    %3 = vector.shape_cast %2 : vector<2x80x128xbf16> to vector<160x128xbf16>
    %cst = arith.constant dense<0.000000e+00> : vector<160x128xf32>
    %4 = tpu.matmul %3, %0, %cst {dimension_numbers = #tpu.dot_dimension_numbers<[1], [0], [0], [1], [0, 0, 1, 1], [], []>} : vector<160x128xbf16>, vector<128x128xbf16>, vector<160x128xf32> -> vector<160x128xf32>
    %5 = vector.shape_cast %4 : vector<160x128xf32> to vector<2x80x128xf32>
    %c0_5 = arith.constant 0 : index
    %c0_6 = arith.constant 0 : index
    %c0_7 = arith.constant 0 : index
    %6 = vector.load %arg2[%c0_5, %c0_6, %c0_7] : memref<2x80x128xf32, #tpu.memory_space<vmem>>, vector<1x80x128xf32>
    %7 = vector.shape_cast %6 : vector<1x80x128xf32> to vector<80x128xf32>
    %8 = vector.shape_cast %7 : vector<80x128xf32> to vector<1x80x128xf32>
    %9 = vector.broadcast %8 : vector<1x80x128xf32> to vector<2x80x128xf32>
    %10 = arith.addf %5, %9 : vector<2x80x128xf32>
    %11 = arith.truncf %10 : vector<2x80x128xf32> to vector<2x80x128xbf16>
    %c0_8 = arith.constant 0 : index
    %c0_9 = arith.constant 0 : index
    %c0_10 = arith.constant 0 : index
    %c0_11 = arith.constant 0 : index
    %12 = vector.load %arg11[%c0_8, %c0_9, %c0_10, %c0_11] : memref<2x2x80x128xbf16, #tpu.memory_space<vmem>>, vector<1x2x80x128xbf16>
    %13 = vector.shape_cast %12 : vector<1x2x80x128xbf16> to vector<2x80x128xbf16>
    %14 = vector.shape_cast %11 : vector<2x80x128xbf16> to vector<1x2x80x128xbf16>
    tpu.vector_store %arg11[%c0_8, %c0_9, %c0_10, %c0_11], %14 {strides = array<i32>} : memref<2x2x80x128xbf16, #tpu.memory_space<vmem>>, vector<1x2x80x128xbf16>,
    %c1 = arith.constant 1 : index
    %c0_12 = arith.constant 0 : index
    %c0_13 = arith.constant 0 : index
    %c0_14 = arith.constant 0 : index
    %15 = vector.load %arg1[%c1, %c0_12, %c0_13, %c0_14] : memref<2x2x80x128xbf16, #tpu.memory_space<vmem>>, vector<1x2x80x128xbf16>
    %16 = vector.shape_cast %15 : vector<1x2x80x128xbf16> to vector<2x80x128xbf16>
    %17 = vector.shape_cast %16 : vector<2x80x128xbf16> to vector<160x128xbf16>
    %cst_15 = arith.constant dense<0.000000e+00> : vector<160x128xf32>
    %18 = tpu.matmul %17, %0, %cst_15 {dimension_numbers = #tpu.dot_dimension_numbers<[1], [0], [0], [1], [0, 0, 1, 1], [], []>} : vector<160x128xbf16>, vector<128x128xbf16>, vector<160x128xf32> -> vector<160x128xf32>
    %19 = vector.shape_cast %18 : vector<160x128xf32> to vector<2x80x128xf32>
    %c1_16 = arith.constant 1 : index
    %c0_17 = arith.constant 0 : index
    %c0_18 = arith.constant 0 : index
    %20 = vector.load %arg2[%c1_16, %c0_17, %c0_18] : memref<2x80x128xf32, #tpu.memory_space<vmem>>, vector<1x80x128xf32>
    %21 = vector.shape_cast %20 : vector<1x80x128xf32> to vector<80x128xf32>
    %22 = vector.shape_cast %21 : vector<80x128xf32> to vector<1x80x128xf32>
    %23 = vector.broadcast %22 : vector<1x80x128xf32> to vector<2x80x128xf32>
    %24 = arith.addf %19, %23 : vector<2x80x128xf32>
    %25 = arith.truncf %24 : vector<2x80x128xf32> to vector<2x80x128xbf16>
    %c1_19 = arith.constant 1 : index
    %c0_20 = arith.constant 0 : index
    %c0_21 = arith.constant 0 : index
    %c0_22 = arith.constant 0 : index
    %26 = vector.load %arg11[%c1_19, %c0_20, %c0_21, %c0_22] : memref<2x2x80x128xbf16, #tpu.memory_space<vmem>>, vector<1x2x80x128xbf16>
    %27 = vector.shape_cast %26 : vector<1x2x80x128xbf16> to vector<2x80x128xbf16>
    %28 = vector.shape_cast %25 : vector<2x80x128xbf16> to vector<1x2x80x128xbf16>
    tpu.vector_store %arg11[%c1_19, %c0_20, %c0_21, %c0_22], %28 {strides = array<i32>} : memref<2x2x80x128xbf16, #tpu.memory_space<vmem>>, vector<1x2x80x128xbf16>,
    %c0_23 = arith.constant 0 : index
    %c0_24 = arith.constant 0 : index
    %c0_25 = arith.constant 0 : index
    %c0_26 = arith.constant 0 : index
    %29 = vector.load %arg4[%c0_23, %c0_24, %c0_25, %c0_26] : memref<3x3x128x128xbf16, #tpu.memory_space<vmem>>, vector<1x1x128x128xbf16>
    %30 = vector.shape_cast %29 : vector<1x1x128x128xbf16> to vector<128x128xbf16>
    %c0_27 = arith.constant 0 : index
    %c1_28 = arith.constant 1 : index
    %c0_29 = arith.constant 0 : index
    %c0_30 = arith.constant 0 : index
    %31 = vector.load %arg4[%c0_27, %c1_28, %c0_29, %c0_30] : memref<3x3x128x128xbf16, #tpu.memory_space<vmem>>, vector<1x1x128x128xbf16>
    %32 = vector.shape_cast %31 : vector<1x1x128x128xbf16> to vector<128x128xbf16>
    %c0_31 = arith.constant 0 : index
    %c2 = arith.constant 2 : index
    %c0_32 = arith.constant 0 : index
    %c0_33 = arith.constant 0 : index
    %33 = vector.load %arg4[%c0_31, %c2, %c0_32, %c0_33] : memref<3x3x128x128xbf16, #tpu.memory_space<vmem>>, vector<1x1x128x128xbf16>
    %34 = vector.shape_cast %33 : vector<1x1x128x128xbf16> to vector<128x128xbf16>
    %c1_34 = arith.constant 1 : index
    %c0_35 = arith.constant 0 : index
    %c0_36 = arith.constant 0 : index
    %c0_37 = arith.constant 0 : index
    %35 = vector.load %arg4[%c1_34, %c0_35, %c0_36, %c0_37] : memref<3x3x128x128xbf16, #tpu.memory_space<vmem>>, vector<1x1x128x128xbf16>
    %36 = vector.shape_cast %35 : vector<1x1x128x128xbf16> to vector<128x128xbf16>
    %c1_38 = arith.constant 1 : index
    %c1_39 = arith.constant 1 : index
    %c0_40 = arith.constant 0 : index
    %c0_41 = arith.constant 0 : index
    %37 = vector.load %arg4[%c1_38, %c1_39, %c0_40, %c0_41] : memref<3x3x128x128xbf16, #tpu.memory_space<vmem>>, vector<1x1x128x128xbf16>
    %38 = vector.shape_cast %37 : vector<1x1x128x128xbf16> to vector<128x128xbf16>
    %c1_42 = arith.constant 1 : index
    %c2_43 = arith.constant 2 : index
    %c0_44 = arith.constant 0 : index
    %c0_45 = arith.constant 0 : index
    %39 = vector.load %arg4[%c1_42, %c2_43, %c0_44, %c0_45] : memref<3x3x128x128xbf16, #tpu.memory_space<vmem>>, vector<1x1x128x128xbf16>
    %40 = vector.shape_cast %39 : vector<1x1x128x128xbf16> to vector<128x128xbf16>
    %c2_46 = arith.constant 2 : index
    %c0_47 = arith.constant 0 : index
    %c0_48 = arith.constant 0 : index
    %c0_49 = arith.constant 0 : index
    %41 = vector.load %arg4[%c2_46, %c0_47, %c0_48, %c0_49] : memref<3x3x128x128xbf16, #tpu.memory_space<vmem>>, vector<1x1x128x128xbf16>
    %42 = vector.shape_cast %41 : vector<1x1x128x128xbf16> to vector<128x128xbf16>
    %c2_50 = arith.constant 2 : index
    %c1_51 = arith.constant 1 : index
    %c0_52 = arith.constant 0 : index
    %c0_53 = arith.constant 0 : index
    %43 = vector.load %arg4[%c2_50, %c1_51, %c0_52, %c0_53] : memref<3x3x128x128xbf16, #tpu.memory_space<vmem>>, vector<1x1x128x128xbf16>
    %44 = vector.shape_cast %43 : vector<1x1x128x128xbf16> to vector<128x128xbf16>
    %c2_54 = arith.constant 2 : index
    %c2_55 = arith.constant 2 : index
    %c0_56 = arith.constant 0 : index
    %c0_57 = arith.constant 0 : index
    %45 = vector.load %arg4[%c2_54, %c2_55, %c0_56, %c0_57] : memref<3x3x128x128xbf16, #tpu.memory_space<vmem>>, vector<1x1x128x128xbf16>
    %46 = vector.shape_cast %45 : vector<1x1x128x128xbf16> to vector<128x128xbf16>
    %c0_58 = arith.constant 0 : index
    %c0_59 = arith.constant 0 : index
    %47 = vector.load %arg5[%c0_58, %c0_59] : memref<1x128xf32, #tpu.memory_space<vmem>>, vector<1x128xf32>
    %cst_60 = arith.constant 0.000000e+00 : f32
    %48 = vector.broadcast %cst_60 : f32 to vector<128x128xf32>
    %c1_61 = arith.constant 1 : index
    %c0_62 = arith.constant 0 : index
    %c0_63 = arith.constant 0 : index
    %c0_64 = arith.constant 0 : index
    %49 = vector.load %arg11[%c1_61, %c0_62, %c0_63, %c0_64] : memref<2x2x80x128xbf16, #tpu.memory_space<vmem>>, vector<1x2x64x128xbf16>
    %50 = vector.shape_cast %49 : vector<1x2x64x128xbf16> to vector<2x64x128xbf16>
    %51 = vector.shape_cast %50 : vector<2x64x128xbf16> to vector<128x128xbf16>
    %cst_65 = arith.constant dense<0.000000e+00> : vector<128x128xf32>
    %52 = tpu.matmul %51, %30, %cst_65 {dimension_numbers = #tpu.dot_dimension_numbers<[1], [0], [0], [1], [0, 0, 1, 1], [], []>} : vector<128x128xbf16>, vector<128x128xbf16>, vector<128x128xf32> -> vector<128x128xf32>
    %53 = arith.addf %48, %52 : vector<128x128xf32>
    %c0_66 = arith.constant 0 : index
    %c0_67 = arith.constant 0 : index
    %c1_68 = arith.constant 1 : index
    %c0_69 = arith.constant 0 : index
    %54 = vector.load %arg11[%c0_66, %c0_67, %c1_68, %c0_69] : memref<2x2x80x128xbf16, #tpu.memory_space<vmem>>, vector<1x2x64x128xbf16>
    %55 = vector.shape_cast %54 : vector<1x2x64x128xbf16> to vector<2x64x128xbf16>
    %56 = vector.shape_cast %55 : vector<2x64x128xbf16> to vector<128x128xbf16>
    %cst_70 = arith.constant dense<0.000000e+00> : vector<128x128xf32>
    %57 = tpu.matmul %56, %32, %cst_70 {dimension_numbers = #tpu.dot_dimension_numbers<[1], [0], [0], [1], [0, 0, 1, 1], [], []>} : vector<128x128xbf16>, vector<128x128xbf16>, vector<128x128xf32> -> vector<128x128xf32>
    %58 = arith.addf %53, %57 : vector<128x128xf32>
    %c1_71 = arith.constant 1 : index
    %c0_72 = arith.constant 0 : index
    %c1_73 = arith.constant 1 : index
    %c0_74 = arith.constant 0 : index
    %59 = vector.load %arg11[%c1_71, %c0_72, %c1_73, %c0_74] : memref<2x2x80x128xbf16, #tpu.memory_space<vmem>>, vector<1x2x64x128xbf16>
    %60 = vector.shape_cast %59 : vector<1x2x64x128xbf16> to vector<2x64x128xbf16>
    %61 = vector.shape_cast %60 : vector<2x64x128xbf16> to vector<128x128xbf16>
    %cst_75 = arith.constant dense<0.000000e+00> : vector<128x128xf32>
    %62 = tpu.matmul %61, %34, %cst_75 {dimension_numbers = #tpu.dot_dimension_numbers<[1], [0], [0], [1], [0, 0, 1, 1], [], []>} : vector<128x128xbf16>, vector<128x128xbf16>, vector<128x128xf32> -> vector<128x128xf32>
    %63 = arith.addf %58, %62 : vector<128x128xf32>
    %c1_76 = arith.constant 1 : index
    %c0_77 = arith.constant 0 : index
    %c7 = arith.constant 7 : index
    %c0_78 = arith.constant 0 : index
    %64 = vector.load %arg11[%c1_76, %c0_77, %c7, %c0_78] : memref<2x2x80x128xbf16, #tpu.memory_space<vmem>>, vector<1x2x64x128xbf16>
    %65 = vector.shape_cast %64 : vector<1x2x64x128xbf16> to vector<2x64x128xbf16>
    %66 = vector.shape_cast %65 : vector<2x64x128xbf16> to vector<128x128xbf16>
    %cst_79 = arith.constant dense<0.000000e+00> : vector<128x128xf32>
    %67 = tpu.matmul %66, %36, %cst_79 {dimension_numbers = #tpu.dot_dimension_numbers<[1], [0], [0], [1], [0, 0, 1, 1], [], []>} : vector<128x128xbf16>, vector<128x128xbf16>, vector<128x128xf32> -> vector<128x128xf32>
    %68 = arith.addf %63, %67 : vector<128x128xf32>
    %c0_80 = arith.constant 0 : index
    %c0_81 = arith.constant 0 : index
    %c8 = arith.constant 8 : index
    %c0_82 = arith.constant 0 : index
    %69 = vector.load %arg11[%c0_80, %c0_81, %c8, %c0_82] : memref<2x2x80x128xbf16, #tpu.memory_space<vmem>>, vector<1x2x64x128xbf16>
    %70 = vector.shape_cast %69 : vector<1x2x64x128xbf16> to vector<2x64x128xbf16>
    %71 = vector.shape_cast %70 : vector<2x64x128xbf16> to vector<128x128xbf16>
    %cst_83 = arith.constant dense<0.000000e+00> : vector<128x128xf32>
    %72 = tpu.matmul %71, %38, %cst_83 {dimension_numbers = #tpu.dot_dimension_numbers<[1], [0], [0], [1], [0, 0, 1, 1], [], []>} : vector<128x128xbf16>, vector<128x128xbf16>, vector<128x128xf32> -> vector<128x128xf32>
    %73 = arith.addf %68, %72 : vector<128x128xf32>
    %c1_84 = arith.constant 1 : index
    %c0_85 = arith.constant 0 : index
    %c8_86 = arith.constant 8 : index
    %c0_87 = arith.constant 0 : index
    %74 = vector.load %arg11[%c1_84, %c0_85, %c8_86, %c0_87] : memref<2x2x80x128xbf16, #tpu.memory_space<vmem>>, vector<1x2x64x128xbf16>
    %75 = vector.shape_cast %74 : vector<1x2x64x128xbf16> to vector<2x64x128xbf16>
    %76 = vector.shape_cast %75 : vector<2x64x128xbf16> to vector<128x128xbf16>
    %cst_88 = arith.constant dense<0.000000e+00> : vector<128x128xf32>
    %77 = tpu.matmul %76, %40, %cst_88 {dimension_numbers = #tpu.dot_dimension_numbers<[1], [0], [0], [1], [0, 0, 1, 1], [], []>} : vector<128x128xbf16>, vector<128x128xbf16>, vector<128x128xf32> -> vector<128x128xf32>
    %78 = arith.addf %73, %77 : vector<128x128xf32>
    %c1_89 = arith.constant 1 : index
    %c0_90 = arith.constant 0 : index
    %c14 = arith.constant 14 : index
    %c0_91 = arith.constant 0 : index
    %79 = vector.load %arg11[%c1_89, %c0_90, %c14, %c0_91] : memref<2x2x80x128xbf16, #tpu.memory_space<vmem>>, vector<1x2x64x128xbf16>
    %80 = vector.shape_cast %79 : vector<1x2x64x128xbf16> to vector<2x64x128xbf16>
    %81 = vector.shape_cast %80 : vector<2x64x128xbf16> to vector<128x128xbf16>
    %cst_92 = arith.constant dense<0.000000e+00> : vector<128x128xf32>
    %82 = tpu.matmul %81, %42, %cst_92 {dimension_numbers = #tpu.dot_dimension_numbers<[1], [0], [0], [1], [0, 0, 1, 1], [], []>} : vector<128x128xbf16>, vector<128x128xbf16>, vector<128x128xf32> -> vector<128x128xf32>
    %83 = arith.addf %78, %82 : vector<128x128xf32>
    %c0_93 = arith.constant 0 : index
    %c0_94 = arith.constant 0 : index
    %c15 = arith.constant 15 : index
    %c0_95 = arith.constant 0 : index
    %84 = vector.load %arg11[%c0_93, %c0_94, %c15, %c0_95] : memref<2x2x80x128xbf16, #tpu.memory_space<vmem>>, vector<1x2x64x128xbf16>
    %85 = vector.shape_cast %84 : vector<1x2x64x128xbf16> to vector<2x64x128xbf16>
    %86 = vector.shape_cast %85 : vector<2x64x128xbf16> to vector<128x128xbf16>
    %cst_96 = arith.constant dense<0.000000e+00> : vector<128x128xf32>
    %87 = tpu.matmul %86, %44, %cst_96 {dimension_numbers = #tpu.dot_dimension_numbers<[1], [0], [0], [1], [0, 0, 1, 1], [], []>} : vector<128x128xbf16>, vector<128x128xbf16>, vector<128x128xf32> -> vector<128x128xf32>
    %88 = arith.addf %83, %87 : vector<128x128xf32>
    %c1_97 = arith.constant 1 : index
    %c0_98 = arith.constant 0 : index
    %c15_99 = arith.constant 15 : index
    %c0_100 = arith.constant 0 : index
    %89 = vector.load %arg11[%c1_97, %c0_98, %c15_99, %c0_100] : memref<2x2x80x128xbf16, #tpu.memory_space<vmem>>, vector<1x2x64x128xbf16>
    %90 = vector.shape_cast %89 : vector<1x2x64x128xbf16> to vector<2x64x128xbf16>
    %91 = vector.shape_cast %90 : vector<2x64x128xbf16> to vector<128x128xbf16>
    %cst_101 = arith.constant dense<0.000000e+00> : vector<128x128xf32>
    %92 = tpu.matmul %91, %46, %cst_101 {dimension_numbers = #tpu.dot_dimension_numbers<[1], [0], [0], [1], [0, 0, 1, 1], [], []>} : vector<128x128xbf16>, vector<128x128xbf16>, vector<128x128xf32> -> vector<128x128xf32>
    %93 = arith.addf %88, %92 : vector<128x128xf32>
    %94 = vector.broadcast %47 : vector<1x128xf32> to vector<128x128xf32>
    %95 = arith.addf %93, %94 : vector<128x128xf32>
    %96 = arith.truncf %95 : vector<128x128xf32> to vector<128x128xbf16>
    %97 = vector.shape_cast %96 : vector<128x128xbf16> to vector<2x64x128xbf16>
    %c0_102 = arith.constant 0 : index
    %c0_103 = arith.constant 0 : index
    %c0_104 = arith.constant 0 : index
    %c0_105 = arith.constant 0 : index
    %98 = vector.load %arg12[%c0_102, %c0_103, %c0_104, %c0_105] : memref<2x2x64x128xbf16, #tpu.memory_space<vmem>>, vector<1x2x64x128xbf16>
    %99 = vector.shape_cast %98 : vector<1x2x64x128xbf16> to vector<2x64x128xbf16>
    %100 = vector.shape_cast %97 : vector<2x64x128xbf16> to vector<1x2x64x128xbf16>
    tpu.vector_store %arg12[%c0_102, %c0_103, %c0_104, %c0_105], %100 {strides = array<i32>} : memref<2x2x64x128xbf16, #tpu.memory_space<vmem>>, vector<1x2x64x128xbf16>,
    %cst_106 = arith.constant 0.000000e+00 : f32
    %101 = vector.broadcast %cst_106 : f32 to vector<128x128xf32>
    %c0_107 = arith.constant 0 : index
    %c0_108 = arith.constant 0 : index
    %c1_109 = arith.constant 1 : index
    %c0_110 = arith.constant 0 : index
    %102 = vector.load %arg11[%c0_107, %c0_108, %c1_109, %c0_110] : memref<2x2x80x128xbf16, #tpu.memory_space<vmem>>, vector<1x2x64x128xbf16>
    %103 = vector.shape_cast %102 : vector<1x2x64x128xbf16> to vector<2x64x128xbf16>
    %104 = vector.shape_cast %103 : vector<2x64x128xbf16> to vector<128x128xbf16>
    %cst_111 = arith.constant dense<0.000000e+00> : vector<128x128xf32>
    %105 = tpu.matmul %104, %30, %cst_111 {dimension_numbers = #tpu.dot_dimension_numbers<[1], [0], [0], [1], [0, 0, 1, 1], [], []>} : vector<128x128xbf16>, vector<128x128xbf16>, vector<128x128xf32> -> vector<128x128xf32>
    %106 = arith.addf %101, %105 : vector<128x128xf32>
    %c1_112 = arith.constant 1 : index
    %c0_113 = arith.constant 0 : index
    %c1_114 = arith.constant 1 : index
    %c0_115 = arith.constant 0 : index
    %107 = vector.load %arg11[%c1_112, %c0_113, %c1_114, %c0_115] : memref<2x2x80x128xbf16, #tpu.memory_space<vmem>>, vector<1x2x64x128xbf16>
    %108 = vector.shape_cast %107 : vector<1x2x64x128xbf16> to vector<2x64x128xbf16>
    %109 = vector.shape_cast %108 : vector<2x64x128xbf16> to vector<128x128xbf16>
    %cst_116 = arith.constant dense<0.000000e+00> : vector<128x128xf32>
    %110 = tpu.matmul %109, %32, %cst_116 {dimension_numbers = #tpu.dot_dimension_numbers<[1], [0], [0], [1], [0, 0, 1, 1], [], []>} : vector<128x128xbf16>, vector<128x128xbf16>, vector<128x128xf32> -> vector<128x128xf32>
    %111 = arith.addf %106, %110 : vector<128x128xf32>
    %c0_117 = arith.constant 0 : index
    %c0_118 = arith.constant 0 : index
    %c2_119 = arith.constant 2 : index
    %c0_120 = arith.constant 0 : index
    %112 = vector.load %arg11[%c0_117, %c0_118, %c2_119, %c0_120] : memref<2x2x80x128xbf16, #tpu.memory_space<vmem>>, vector<1x2x64x128xbf16>
    %113 = vector.shape_cast %112 : vector<1x2x64x128xbf16> to vector<2x64x128xbf16>
    %114 = vector.shape_cast %113 : vector<2x64x128xbf16> to vector<128x128xbf16>
    %cst_121 = arith.constant dense<0.000000e+00> : vector<128x128xf32>
    %115 = tpu.matmul %114, %34, %cst_121 {dimension_numbers = #tpu.dot_dimension_numbers<[1], [0], [0], [1], [0, 0, 1, 1], [], []>} : vector<128x128xbf16>, vector<128x128xbf16>, vector<128x128xf32> -> vector<128x128xf32>
    %116 = arith.addf %111, %115 : vector<128x128xf32>
    %c0_122 = arith.constant 0 : index
    %c0_123 = arith.constant 0 : index
    %c8_124 = arith.constant 8 : index
    %c0_125 = arith.constant 0 : index
    %117 = vector.load %arg11[%c0_122, %c0_123, %c8_124, %c0_125] : memref<2x2x80x128xbf16, #tpu.memory_space<vmem>>, vector<1x2x64x128xbf16>
    %118 = vector.shape_cast %117 : vector<1x2x64x128xbf16> to vector<2x64x128xbf16>
    %119 = vector.shape_cast %118 : vector<2x64x128xbf16> to vector<128x128xbf16>
    %cst_126 = arith.constant dense<0.000000e+00> : vector<128x128xf32>
    %120 = tpu.matmul %119, %36, %cst_126 {dimension_numbers = #tpu.dot_dimension_numbers<[1], [0], [0], [1], [0, 0, 1, 1], [], []>} : vector<128x128xbf16>, vector<128x128xbf16>, vector<128x128xf32> -> vector<128x128xf32>
    %121 = arith.addf %116, %120 : vector<128x128xf32>
    %c1_127 = arith.constant 1 : index
    %c0_128 = arith.constant 0 : index
    %c8_129 = arith.constant 8 : index
    %c0_130 = arith.constant 0 : index
    %122 = vector.load %arg11[%c1_127, %c0_128, %c8_129, %c0_130] : memref<2x2x80x128xbf16, #tpu.memory_space<vmem>>, vector<1x2x64x128xbf16>
    %123 = vector.shape_cast %122 : vector<1x2x64x128xbf16> to vector<2x64x128xbf16>
    %124 = vector.shape_cast %123 : vector<2x64x128xbf16> to vector<128x128xbf16>
    %cst_131 = arith.constant dense<0.000000e+00> : vector<128x128xf32>
    %125 = tpu.matmul %124, %38, %cst_131 {dimension_numbers = #tpu.dot_dimension_numbers<[1], [0], [0], [1], [0, 0, 1, 1], [], []>} : vector<128x128xbf16>, vector<128x128xbf16>, vector<128x128xf32> -> vector<128x128xf32>
    %126 = arith.addf %121, %125 : vector<128x128xf32>
    %c0_132 = arith.constant 0 : index
    %c0_133 = arith.constant 0 : index
    %c9 = arith.constant 9 : index
    %c0_134 = arith.constant 0 : index
    %127 = vector.load %arg11[%c0_132, %c0_133, %c9, %c0_134] : memref<2x2x80x128xbf16, #tpu.memory_space<vmem>>, vector<1x2x64x128xbf16>
    %128 = vector.shape_cast %127 : vector<1x2x64x128xbf16> to vector<2x64x128xbf16>
    %129 = vector.shape_cast %128 : vector<2x64x128xbf16> to vector<128x128xbf16>
    %cst_135 = arith.constant dense<0.000000e+00> : vector<128x128xf32>
    %130 = tpu.matmul %129, %40, %cst_135 {dimension_numbers = #tpu.dot_dimension_numbers<[1], [0], [0], [1], [0, 0, 1, 1], [], []>} : vector<128x128xbf16>, vector<128x128xbf16>, vector<128x128xf32> -> vector<128x128xf32>
    %131 = arith.addf %126, %130 : vector<128x128xf32>
    %c0_136 = arith.constant 0 : index
    %c0_137 = arith.constant 0 : index
    %c15_138 = arith.constant 15 : index
    %c0_139 = arith.constant 0 : index
    %132 = vector.load %arg11[%c0_136, %c0_137, %c15_138, %c0_139] : memref<2x2x80x128xbf16, #tpu.memory_space<vmem>>, vector<1x2x64x128xbf16>
    %133 = vector.shape_cast %132 : vector<1x2x64x128xbf16> to vector<2x64x128xbf16>
    %134 = vector.shape_cast %133 : vector<2x64x128xbf16> to vector<128x128xbf16>
    %cst_140 = arith.constant dense<0.000000e+00> : vector<128x128xf32>
    %135 = tpu.matmul %134, %42, %cst_140 {dimension_numbers = #tpu.dot_dimension_numbers<[1], [0], [0], [1], [0, 0, 1, 1], [], []>} : vector<128x128xbf16>, vector<128x128xbf16>, vector<128x128xf32> -> vector<128x128xf32>
    %136 = arith.addf %131, %135 : vector<128x128xf32>
    %c1_141 = arith.constant 1 : index
    %c0_142 = arith.constant 0 : index
    %c15_143 = arith.constant 15 : index
    %c0_144 = arith.constant 0 : index
    %137 = vector.load %arg11[%c1_141, %c0_142, %c15_143, %c0_144] : memref<2x2x80x128xbf16, #tpu.memory_space<vmem>>, vector<1x2x64x128xbf16>
    %138 = vector.shape_cast %137 : vector<1x2x64x128xbf16> to vector<2x64x128xbf16>
    %139 = vector.shape_cast %138 : vector<2x64x128xbf16> to vector<128x128xbf16>
    %cst_145 = arith.constant dense<0.000000e+00> : vector<128x128xf32>
    %140 = tpu.matmul %139, %44, %cst_145 {dimension_numbers = #tpu.dot_dimension_numbers<[1], [0], [0], [1], [0, 0, 1, 1], [], []>} : vector<128x128xbf16>, vector<128x128xbf16>, vector<128x128xf32> -> vector<128x128xf32>
    %141 = arith.addf %136, %140 : vector<128x128xf32>
    %c0_146 = arith.constant 0 : index
    %c0_147 = arith.constant 0 : index
    %c16 = arith.constant 16 : index
    %c0_148 = arith.constant 0 : index
    %142 = vector.load %arg11[%c0_146, %c0_147, %c16, %c0_148] : memref<2x2x80x128xbf16, #tpu.memory_space<vmem>>, vector<1x2x64x128xbf16>
    %143 = vector.shape_cast %142 : vector<1x2x64x128xbf16> to vector<2x64x128xbf16>
    %144 = vector.shape_cast %143 : vector<2x64x128xbf16> to vector<128x128xbf16>
    %cst_149 = arith.constant dense<0.000000e+00> : vector<128x128xf32>
    %145 = tpu.matmul %144, %46, %cst_149 {dimension_numbers = #tpu.dot_dimension_numbers<[1], [0], [0], [1], [0, 0, 1, 1], [], []>} : vector<128x128xbf16>, vector<128x128xbf16>, vector<128x128xf32> -> vector<128x128xf32>
    %146 = arith.addf %141, %145 : vector<128x128xf32>
    %147 = vector.broadcast %47 : vector<1x128xf32> to vector<128x128xf32>
    %148 = arith.addf %146, %147 : vector<128x128xf32>
    %149 = arith.truncf %148 : vector<128x128xf32> to vector<128x128xbf16>
    %150 = vector.shape_cast %149 : vector<128x128xbf16> to vector<2x64x128xbf16>
    %c1_150 = arith.constant 1 : index
    %c0_151 = arith.constant 0 : index
    %c0_152 = arith.constant 0 : index
    %c0_153 = arith.constant 0 : index
    %151 = vector.load %arg12[%c1_150, %c0_151, %c0_152, %c0_153] : memref<2x2x64x128xbf16, #tpu.memory_space<vmem>>, vector<1x2x64x128xbf16>
    %152 = vector.shape_cast %151 : vector<1x2x64x128xbf16> to vector<2x64x128xbf16>
    %153 = vector.shape_cast %150 : vector<2x64x128xbf16> to vector<1x2x64x128xbf16>
    tpu.vector_store %arg12[%c1_150, %c0_151, %c0_152, %c0_153], %153 {strides = array<i32>} : memref<2x2x64x128xbf16, #tpu.memory_space<vmem>>, vector<1x2x64x128xbf16>,
    %cst_154 = arith.constant 0.000000e+00 : f32
    %154 = vector.broadcast %cst_154 : f32 to vector<96x256xf32>
    %c0_155 = arith.constant 0 : index
    %c0_156 = arith.constant 0 : index
    %c8_157 = arith.constant 8 : index
    %c0_158 = arith.constant 0 : index
    %155 = vector.load %arg1[%c0_155, %c0_156, %c8_157, %c0_158] : memref<2x2x80x128xbf16, #tpu.memory_space<vmem>>, vector<1x2x48x128xbf16>
    %156 = vector.shape_cast %155 : vector<1x2x48x128xbf16> to vector<2x48x128xbf16>
    %157 = vector.shape_cast %156 : vector<2x48x128xbf16> to vector<96x128xbf16>
    %c0_159 = arith.constant 0 : index
    %c0_160 = arith.constant 0 : index
    %c0_161 = arith.constant 0 : index
    %c0_162 = arith.constant 0 : index
    %158 = vector.load %arg8[%c0_159, %c0_160, %c0_161, %c0_162] : memref<3x3x128x256xbf16, #tpu.memory_space<vmem>>, vector<1x1x128x256xbf16>
    %159 = vector.shape_cast %158 : vector<1x1x128x256xbf16> to vector<128x256xbf16>
    %cst_163 = arith.constant dense<0.000000e+00> : vector<96x256xf32>
    %160 = tpu.matmul %157, %159, %cst_163 {dimension_numbers = #tpu.dot_dimension_numbers<[1], [0], [0], [1], [0, 0, 1, 1], [], []>} : vector<96x128xbf16>, vector<128x256xbf16>, vector<96x256xf32> -> vector<96x256xf32>
    %161 = arith.addf %154, %160 : vector<96x256xf32>
    %c1_164 = arith.constant 1 : index
    %c0_165 = arith.constant 0 : index
    %c8_166 = arith.constant 8 : index
    %c0_167 = arith.constant 0 : index
    %162 = vector.load %arg1[%c1_164, %c0_165, %c8_166, %c0_167] : memref<2x2x80x128xbf16, #tpu.memory_space<vmem>>, vector<1x2x48x128xbf16>
    %163 = vector.shape_cast %162 : vector<1x2x48x128xbf16> to vector<2x48x128xbf16>
    %164 = vector.shape_cast %163 : vector<2x48x128xbf16> to vector<96x128xbf16>
    %165 = arith.maximumf %157, %164 : vector<96x128xbf16>
    %c0_168 = arith.constant 0 : index
    %c1_169 = arith.constant 1 : index
    %c0_170 = arith.constant 0 : index
    %c0_171 = arith.constant 0 : index
    %166 = vector.load %arg8[%c0_168, %c1_169, %c0_170, %c0_171] : memref<3x3x128x256xbf16, #tpu.memory_space<vmem>>, vector<1x1x128x256xbf16>
    %167 = vector.shape_cast %166 : vector<1x1x128x256xbf16> to vector<128x256xbf16>
    %cst_172 = arith.constant dense<0.000000e+00> : vector<96x256xf32>
    %168 = tpu.matmul %164, %167, %cst_172 {dimension_numbers = #tpu.dot_dimension_numbers<[1], [0], [0], [1], [0, 0, 1, 1], [], []>} : vector<96x128xbf16>, vector<128x256xbf16>, vector<96x256xf32> -> vector<96x256xf32>
    %169 = arith.addf %161, %168 : vector<96x256xf32>
    %c0_173 = arith.constant 0 : index
    %c0_174 = arith.constant 0 : index
    %c9_175 = arith.constant 9 : index
    %c0_176 = arith.constant 0 : index
    %170 = vector.load %arg1[%c0_173, %c0_174, %c9_175, %c0_176] : memref<2x2x80x128xbf16, #tpu.memory_space<vmem>>, vector<1x2x48x128xbf16>
    %171 = vector.shape_cast %170 : vector<1x2x48x128xbf16> to vector<2x48x128xbf16>
    %172 = vector.shape_cast %171 : vector<2x48x128xbf16> to vector<96x128xbf16>
    %173 = arith.maximumf %165, %172 : vector<96x128xbf16>
    %c0_177 = arith.constant 0 : index
    %c2_178 = arith.constant 2 : index
    %c0_179 = arith.constant 0 : index
    %c0_180 = arith.constant 0 : index
    %174 = vector.load %arg8[%c0_177, %c2_178, %c0_179, %c0_180] : memref<3x3x128x256xbf16, #tpu.memory_space<vmem>>, vector<1x1x128x256xbf16>
    %175 = vector.shape_cast %174 : vector<1x1x128x256xbf16> to vector<128x256xbf16>
    %cst_181 = arith.constant dense<0.000000e+00> : vector<96x256xf32>
    %176 = tpu.matmul %172, %175, %cst_181 {dimension_numbers = #tpu.dot_dimension_numbers<[1], [0], [0], [1], [0, 0, 1, 1], [], []>} : vector<96x128xbf16>, vector<128x256xbf16>, vector<96x256xf32> -> vector<96x256xf32>
    %177 = arith.addf %169, %176 : vector<96x256xf32>
    %c0_182 = arith.constant 0 : index
    %c0_183 = arith.constant 0 : index
    %c15_184 = arith.constant 15 : index
    %c0_185 = arith.constant 0 : index
    %178 = vector.load %arg1[%c0_182, %c0_183, %c15_184, %c0_185] : memref<2x2x80x128xbf16, #tpu.memory_space<vmem>>, vector<1x2x48x128xbf16>
    %179 = vector.shape_cast %178 : vector<1x2x48x128xbf16> to vector<2x48x128xbf16>
    %180 = vector.shape_cast %179 : vector<2x48x128xbf16> to vector<96x128xbf16>
    %181 = arith.maximumf %173, %180 : vector<96x128xbf16>
    %c1_186 = arith.constant 1 : index
    %c0_187 = arith.constant 0 : index
    %c0_188 = arith.constant 0 : index
    %c0_189 = arith.constant 0 : index
    %182 = vector.load %arg8[%c1_186, %c0_187, %c0_188, %c0_189] : memref<3x3x128x256xbf16, #tpu.memory_space<vmem>>, vector<1x1x128x256xbf16>
    %183 = vector.shape_cast %182 : vector<1x1x128x256xbf16> to vector<128x256xbf16>
    %cst_190 = arith.constant dense<0.000000e+00> : vector<96x256xf32>
    %184 = tpu.matmul %180, %183, %cst_190 {dimension_numbers = #tpu.dot_dimension_numbers<[1], [0], [0], [1], [0, 0, 1, 1], [], []>} : vector<96x128xbf16>, vector<128x256xbf16>, vector<96x256xf32> -> vector<96x256xf32>
    %185 = arith.addf %177, %184 : vector<96x256xf32>
    %c1_191 = arith.constant 1 : index
    %c0_192 = arith.constant 0 : index
    %c15_193 = arith.constant 15 : index
    %c0_194 = arith.constant 0 : index
    %186 = vector.load %arg1[%c1_191, %c0_192, %c15_193, %c0_194] : memref<2x2x80x128xbf16, #tpu.memory_space<vmem>>, vector<1x2x48x128xbf16>
    %187 = vector.shape_cast %186 : vector<1x2x48x128xbf16> to vector<2x48x128xbf16>
    %188 = vector.shape_cast %187 : vector<2x48x128xbf16> to vector<96x128xbf16>
    %189 = arith.maximumf %181, %188 : vector<96x128xbf16>
    %c1_195 = arith.constant 1 : index
    %c1_196 = arith.constant 1 : index
    %c0_197 = arith.constant 0 : index
    %c0_198 = arith.constant 0 : index
    %190 = vector.load %arg8[%c1_195, %c1_196, %c0_197, %c0_198] : memref<3x3x128x256xbf16, #tpu.memory_space<vmem>>, vector<1x1x128x256xbf16>
    %191 = vector.shape_cast %190 : vector<1x1x128x256xbf16> to vector<128x256xbf16>
    %cst_199 = arith.constant dense<0.000000e+00> : vector<96x256xf32>
    %192 = tpu.matmul %188, %191, %cst_199 {dimension_numbers = #tpu.dot_dimension_numbers<[1], [0], [0], [1], [0, 0, 1, 1], [], []>} : vector<96x128xbf16>, vector<128x256xbf16>, vector<96x256xf32> -> vector<96x256xf32>
    %193 = arith.addf %185, %192 : vector<96x256xf32>
    %c0_200 = arith.constant 0 : index
    %c0_201 = arith.constant 0 : index
    %c16_202 = arith.constant 16 : index
    %c0_203 = arith.constant 0 : index
    %194 = vector.load %arg1[%c0_200, %c0_201, %c16_202, %c0_203] : memref<2x2x80x128xbf16, #tpu.memory_space<vmem>>, vector<1x2x48x128xbf16>
    %195 = vector.shape_cast %194 : vector<1x2x48x128xbf16> to vector<2x48x128xbf16>
    %196 = vector.shape_cast %195 : vector<2x48x128xbf16> to vector<96x128xbf16>
    %197 = arith.maximumf %189, %196 : vector<96x128xbf16>
    %c1_204 = arith.constant 1 : index
    %c2_205 = arith.constant 2 : index
    %c0_206 = arith.constant 0 : index
    %c0_207 = arith.constant 0 : index
    %198 = vector.load %arg8[%c1_204, %c2_205, %c0_206, %c0_207] : memref<3x3x128x256xbf16, #tpu.memory_space<vmem>>, vector<1x1x128x256xbf16>
    %199 = vector.shape_cast %198 : vector<1x1x128x256xbf16> to vector<128x256xbf16>
    %cst_208 = arith.constant dense<0.000000e+00> : vector<96x256xf32>
    %200 = tpu.matmul %196, %199, %cst_208 {dimension_numbers = #tpu.dot_dimension_numbers<[1], [0], [0], [1], [0, 0, 1, 1], [], []>} : vector<96x128xbf16>, vector<128x256xbf16>, vector<96x256xf32> -> vector<96x256xf32>
    %201 = arith.addf %193, %200 : vector<96x256xf32>
    %c0_209 = arith.constant 0 : index
    %c0_210 = arith.constant 0 : index
    %c22 = arith.constant 22 : index
    %c0_211 = arith.constant 0 : index
    %202 = vector.load %arg1[%c0_209, %c0_210, %c22, %c0_211] : memref<2x2x80x128xbf16, #tpu.memory_space<vmem>>, vector<1x2x48x128xbf16>
    %203 = vector.shape_cast %202 : vector<1x2x48x128xbf16> to vector<2x48x128xbf16>
    %204 = vector.shape_cast %203 : vector<2x48x128xbf16> to vector<96x128xbf16>
    %205 = arith.maximumf %197, %204 : vector<96x128xbf16>
    %c2_212 = arith.constant 2 : index
    %c0_213 = arith.constant 0 : index
    %c0_214 = arith.constant 0 : index
    %c0_215 = arith.constant 0 : index
    %206 = vector.load %arg8[%c2_212, %c0_213, %c0_214, %c0_215] : memref<3x3x128x256xbf16, #tpu.memory_space<vmem>>, vector<1x1x128x256xbf16>
    %207 = vector.shape_cast %206 : vector<1x1x128x256xbf16> to vector<128x256xbf16>
    %cst_216 = arith.constant dense<0.000000e+00> : vector<96x256xf32>
    %208 = tpu.matmul %204, %207, %cst_216 {dimension_numbers = #tpu.dot_dimension_numbers<[1], [0], [0], [1], [0, 0, 1, 1], [], []>} : vector<96x128xbf16>, vector<128x256xbf16>, vector<96x256xf32> -> vector<96x256xf32>
    %209 = arith.addf %201, %208 : vector<96x256xf32>
    %c1_217 = arith.constant 1 : index
    %c0_218 = arith.constant 0 : index
    %c22_219 = arith.constant 22 : index
    %c0_220 = arith.constant 0 : index
    %210 = vector.load %arg1[%c1_217, %c0_218, %c22_219, %c0_220] : memref<2x2x80x128xbf16, #tpu.memory_space<vmem>>, vector<1x2x48x128xbf16>
    %211 = vector.shape_cast %210 : vector<1x2x48x128xbf16> to vector<2x48x128xbf16>
    %212 = vector.shape_cast %211 : vector<2x48x128xbf16> to vector<96x128xbf16>
    %213 = arith.maximumf %205, %212 : vector<96x128xbf16>
    %c2_221 = arith.constant 2 : index
    %c1_222 = arith.constant 1 : index
    %c0_223 = arith.constant 0 : index
    %c0_224 = arith.constant 0 : index
    %214 = vector.load %arg8[%c2_221, %c1_222, %c0_223, %c0_224] : memref<3x3x128x256xbf16, #tpu.memory_space<vmem>>, vector<1x1x128x256xbf16>
    %215 = vector.shape_cast %214 : vector<1x1x128x256xbf16> to vector<128x256xbf16>
    %cst_225 = arith.constant dense<0.000000e+00> : vector<96x256xf32>
    %216 = tpu.matmul %212, %215, %cst_225 {dimension_numbers = #tpu.dot_dimension_numbers<[1], [0], [0], [1], [0, 0, 1, 1], [], []>} : vector<96x128xbf16>, vector<128x256xbf16>, vector<96x256xf32> -> vector<96x256xf32>
    %217 = arith.addf %209, %216 : vector<96x256xf32>
    %c0_226 = arith.constant 0 : index
    %c0_227 = arith.constant 0 : index
    %c23 = arith.constant 23 : index
    %c0_228 = arith.constant 0 : index
    %218 = vector.load %arg1[%c0_226, %c0_227, %c23, %c0_228] : memref<2x2x80x128xbf16, #tpu.memory_space<vmem>>, vector<1x2x48x128xbf16>
    %219 = vector.shape_cast %218 : vector<1x2x48x128xbf16> to vector<2x48x128xbf16>
    %220 = vector.shape_cast %219 : vector<2x48x128xbf16> to vector<96x128xbf16>
    %221 = arith.maximumf %213, %220 : vector<96x128xbf16>
    %c2_229 = arith.constant 2 : index
    %c2_230 = arith.constant 2 : index
    %c0_231 = arith.constant 0 : index
    %c0_232 = arith.constant 0 : index
    %222 = vector.load %arg8[%c2_229, %c2_230, %c0_231, %c0_232] : memref<3x3x128x256xbf16, #tpu.memory_space<vmem>>, vector<1x1x128x256xbf16>
    %223 = vector.shape_cast %222 : vector<1x1x128x256xbf16> to vector<128x256xbf16>
    %cst_233 = arith.constant dense<0.000000e+00> : vector<96x256xf32>
    %224 = tpu.matmul %220, %223, %cst_233 {dimension_numbers = #tpu.dot_dimension_numbers<[1], [0], [0], [1], [0, 0, 1, 1], [], []>} : vector<96x128xbf16>, vector<128x256xbf16>, vector<96x256xf32> -> vector<96x256xf32>
    %225 = arith.addf %217, %224 : vector<96x256xf32>
    %226 = vector.extract_strided_slice %221 {offsets = [0, 0], sizes = [4, 128], strides = [1, 1]} : vector<96x128xbf16> to vector<4x128xbf16>
    %227 = vector.extract_strided_slice %221 {offsets = [14, 0], sizes = [4, 128], strides = [1, 1]} : vector<96x128xbf16> to vector<4x128xbf16>
    %228 = vector.extract_strided_slice %221 {offsets = [28, 0], sizes = [4, 128], strides = [1, 1]} : vector<96x128xbf16> to vector<4x128xbf16>
    %229 = vector.extract_strided_slice %221 {offsets = [42, 0], sizes = [4, 128], strides = [1, 1]} : vector<96x128xbf16> to vector<4x128xbf16>
    %230 = vector.extract_strided_slice %221 {offsets = [48, 0], sizes = [4, 128], strides = [1, 1]} : vector<96x128xbf16> to vector<4x128xbf16>
    %231 = vector.extract_strided_slice %221 {offsets = [62, 0], sizes = [4, 128], strides = [1, 1]} : vector<96x128xbf16> to vector<4x128xbf16>
    %232 = vector.extract_strided_slice %221 {offsets = [76, 0], sizes = [4, 128], strides = [1, 1]} : vector<96x128xbf16> to vector<4x128xbf16>
    %233 = vector.extract_strided_slice %221 {offsets = [90, 0], sizes = [4, 128], strides = [1, 1]} : vector<96x128xbf16> to vector<4x128xbf16>
    %234 = tpu.concatenate %226, %227, %228, %229, %230, %231, %232, %233 in 0 : vector<4x128xbf16>, vector<4x128xbf16>, vector<4x128xbf16>, vector<4x128xbf16>, vector<4x128xbf16>, vector<4x128xbf16>, vector<4x128xbf16>, vector<4x128xbf16> -> vector<32x128xbf16>
    %235 = arith.extf %234 : vector<32x128xbf16> to vector<32x128xf32>
    %c0_234 = arith.constant 0 : index
    %c0_235 = arith.constant 0 : index
    %236 = vector.load %arg10[%c0_234, %c0_235] : memref<32x512xf32, #tpu.memory_space<vmem>>, vector<32x128xf32>
    tpu.vector_store %arg10[%c0_234, %c0_235], %235 {strides = array<i32>} : memref<32x512xf32, #tpu.memory_space<vmem>>, vector<32x128xf32>,
    %c0_236 = arith.constant 0 : index
    %c0_237 = arith.constant 0 : index
    %237 = vector.load %arg9[%c0_236, %c0_237] : memref<1x256xf32, #tpu.memory_space<vmem>>, vector<1x256xf32>
    %238 = vector.broadcast %237 : vector<1x256xf32> to vector<96x256xf32>
    %239 = arith.addf %225, %238 : vector<96x256xf32>
    %240 = vector.extract_strided_slice %239 {offsets = [0, 0], sizes = [4, 256], strides = [1, 1]} : vector<96x256xf32> to vector<4x256xf32>
    %241 = vector.extract_strided_slice %239 {offsets = [14, 0], sizes = [4, 256], strides = [1, 1]} : vector<96x256xf32> to vector<4x256xf32>
    %242 = vector.extract_strided_slice %239 {offsets = [28, 0], sizes = [4, 256], strides = [1, 1]} : vector<96x256xf32> to vector<4x256xf32>
    %243 = vector.extract_strided_slice %239 {offsets = [42, 0], sizes = [4, 256], strides = [1, 1]} : vector<96x256xf32> to vector<4x256xf32>
    %244 = vector.extract_strided_slice %239 {offsets = [48, 0], sizes = [4, 256], strides = [1, 1]} : vector<96x256xf32> to vector<4x256xf32>
    %245 = vector.extract_strided_slice %239 {offsets = [62, 0], sizes = [4, 256], strides = [1, 1]} : vector<96x256xf32> to vector<4x256xf32>
    %246 = vector.extract_strided_slice %239 {offsets = [76, 0], sizes = [4, 256], strides = [1, 1]} : vector<96x256xf32> to vector<4x256xf32>
    %247 = vector.extract_strided_slice %239 {offsets = [90, 0], sizes = [4, 256], strides = [1, 1]} : vector<96x256xf32> to vector<4x256xf32>
    %248 = tpu.concatenate %240, %241, %242, %243, %244, %245, %246, %247 in 0 : vector<4x256xf32>, vector<4x256xf32>, vector<4x256xf32>, vector<4x256xf32>, vector<4x256xf32>, vector<4x256xf32>, vector<4x256xf32>, vector<4x256xf32> -> vector<32x256xf32>
    %c0_238 = arith.constant 0 : index
    %c256 = arith.constant 256 : index
    %249 = vector.load %arg10[%c0_238, %c256] : memref<32x512xf32, #tpu.memory_space<vmem>>, vector<32x256xf32>
    tpu.vector_store %arg10[%c0_238, %c256], %248 {strides = array<i32>} : memref<32x512xf32, #tpu.memory_space<vmem>>, vector<32x256xf32>,
    %cst_239 = arith.constant 0.000000e+00 : f32
    %250 = vector.broadcast %cst_239 : f32 to vector<96x128xf32>
    %c0_240 = arith.constant 0 : index
    %c0_241 = arith.constant 0 : index
    %c0_242 = arith.constant 0 : index
    %c0_243 = arith.constant 0 : index
    %251 = vector.load %arg12[%c0_240, %c0_241, %c0_242, %c0_243] : memref<2x2x64x128xbf16, #tpu.memory_space<vmem>>, vector<1x2x48x128xbf16>
    %252 = vector.shape_cast %251 : vector<1x2x48x128xbf16> to vector<2x48x128xbf16>
    %253 = vector.shape_cast %252 : vector<2x48x128xbf16> to vector<96x128xbf16>
    %c0_244 = arith.constant 0 : index
    %c0_245 = arith.constant 0 : index
    %c0_246 = arith.constant 0 : index
    %c0_247 = arith.constant 0 : index
    %254 = vector.load %arg6[%c0_244, %c0_245, %c0_246, %c0_247] : memref<3x3x128x128xbf16, #tpu.memory_space<vmem>>, vector<1x1x128x128xbf16>
    %255 = vector.shape_cast %254 : vector<1x1x128x128xbf16> to vector<128x128xbf16>
    %cst_248 = arith.constant dense<0.000000e+00> : vector<96x128xf32>
    %256 = tpu.matmul %253, %255, %cst_248 {dimension_numbers = #tpu.dot_dimension_numbers<[1], [0], [0], [1], [0, 0, 1, 1], [], []>} : vector<96x128xbf16>, vector<128x128xbf16>, vector<96x128xf32> -> vector<96x128xf32>
    %257 = arith.addf %250, %256 : vector<96x128xf32>
    %c1_249 = arith.constant 1 : index
    %c0_250 = arith.constant 0 : index
    %c0_251 = arith.constant 0 : index
    %c0_252 = arith.constant 0 : index
    %258 = vector.load %arg12[%c1_249, %c0_250, %c0_251, %c0_252] : memref<2x2x64x128xbf16, #tpu.memory_space<vmem>>, vector<1x2x48x128xbf16>
    %259 = vector.shape_cast %258 : vector<1x2x48x128xbf16> to vector<2x48x128xbf16>
    %260 = vector.shape_cast %259 : vector<2x48x128xbf16> to vector<96x128xbf16>
    %c0_253 = arith.constant 0 : index
    %c1_254 = arith.constant 1 : index
    %c0_255 = arith.constant 0 : index
    %c0_256 = arith.constant 0 : index
    %261 = vector.load %arg6[%c0_253, %c1_254, %c0_255, %c0_256] : memref<3x3x128x128xbf16, #tpu.memory_space<vmem>>, vector<1x1x128x128xbf16>
    %262 = vector.shape_cast %261 : vector<1x1x128x128xbf16> to vector<128x128xbf16>
    %cst_257 = arith.constant dense<0.000000e+00> : vector<96x128xf32>
    %263 = tpu.matmul %260, %262, %cst_257 {dimension_numbers = #tpu.dot_dimension_numbers<[1], [0], [0], [1], [0, 0, 1, 1], [], []>} : vector<96x128xbf16>, vector<128x128xbf16>, vector<96x128xf32> -> vector<96x128xf32>
    %264 = arith.addf %257, %263 : vector<96x128xf32>
    %c0_258 = arith.constant 0 : index
    %c0_259 = arith.constant 0 : index
    %c1_260 = arith.constant 1 : index
    %c0_261 = arith.constant 0 : index
    %265 = vector.load %arg12[%c0_258, %c0_259, %c1_260, %c0_261] : memref<2x2x64x128xbf16, #tpu.memory_space<vmem>>, vector<1x2x48x128xbf16>
    %266 = vector.shape_cast %265 : vector<1x2x48x128xbf16> to vector<2x48x128xbf16>
    %267 = vector.shape_cast %266 : vector<2x48x128xbf16> to vector<96x128xbf16>
    %c0_262 = arith.constant 0 : index
    %c2_263 = arith.constant 2 : index
    %c0_264 = arith.constant 0 : index
    %c0_265 = arith.constant 0 : index
    %268 = vector.load %arg6[%c0_262, %c2_263, %c0_264, %c0_265] : memref<3x3x128x128xbf16, #tpu.memory_space<vmem>>, vector<1x1x128x128xbf16>
    %269 = vector.shape_cast %268 : vector<1x1x128x128xbf16> to vector<128x128xbf16>
    %cst_266 = arith.constant dense<0.000000e+00> : vector<96x128xf32>
    %270 = tpu.matmul %267, %269, %cst_266 {dimension_numbers = #tpu.dot_dimension_numbers<[1], [0], [0], [1], [0, 0, 1, 1], [], []>} : vector<96x128xbf16>, vector<128x128xbf16>, vector<96x128xf32> -> vector<96x128xf32>
    %271 = arith.addf %264, %270 : vector<96x128xf32>
    %c0_267 = arith.constant 0 : index
    %c0_268 = arith.constant 0 : index
    %c7_269 = arith.constant 7 : index
    %c0_270 = arith.constant 0 : index
    %272 = vector.load %arg12[%c0_267, %c0_268, %c7_269, %c0_270] : memref<2x2x64x128xbf16, #tpu.memory_space<vmem>>, vector<1x2x48x128xbf16>
    %273 = vector.shape_cast %272 : vector<1x2x48x128xbf16> to vector<2x48x128xbf16>
    %274 = vector.shape_cast %273 : vector<2x48x128xbf16> to vector<96x128xbf16>
    %c1_271 = arith.constant 1 : index
    %c0_272 = arith.constant 0 : index
    %c0_273 = arith.constant 0 : index
    %c0_274 = arith.constant 0 : index
    %275 = vector.load %arg6[%c1_271, %c0_272, %c0_273, %c0_274] : memref<3x3x128x128xbf16, #tpu.memory_space<vmem>>, vector<1x1x128x128xbf16>
    %276 = vector.shape_cast %275 : vector<1x1x128x128xbf16> to vector<128x128xbf16>
    %cst_275 = arith.constant dense<0.000000e+00> : vector<96x128xf32>
    %277 = tpu.matmul %274, %276, %cst_275 {dimension_numbers = #tpu.dot_dimension_numbers<[1], [0], [0], [1], [0, 0, 1, 1], [], []>} : vector<96x128xbf16>, vector<128x128xbf16>, vector<96x128xf32> -> vector<96x128xf32>
    %278 = arith.addf %271, %277 : vector<96x128xf32>
    %c1_276 = arith.constant 1 : index
    %c0_277 = arith.constant 0 : index
    %c7_278 = arith.constant 7 : index
    %c0_279 = arith.constant 0 : index
    %279 = vector.load %arg12[%c1_276, %c0_277, %c7_278, %c0_279] : memref<2x2x64x128xbf16, #tpu.memory_space<vmem>>, vector<1x2x48x128xbf16>
    %280 = vector.shape_cast %279 : vector<1x2x48x128xbf16> to vector<2x48x128xbf16>
    %281 = vector.shape_cast %280 : vector<2x48x128xbf16> to vector<96x128xbf16>
    %c1_280 = arith.constant 1 : index
    %c1_281 = arith.constant 1 : index
    %c0_282 = arith.constant 0 : index
    %c0_283 = arith.constant 0 : index
    %282 = vector.load %arg6[%c1_280, %c1_281, %c0_282, %c0_283] : memref<3x3x128x128xbf16, #tpu.memory_space<vmem>>, vector<1x1x128x128xbf16>
    %283 = vector.shape_cast %282 : vector<1x1x128x128xbf16> to vector<128x128xbf16>
    %cst_284 = arith.constant dense<0.000000e+00> : vector<96x128xf32>
    %284 = tpu.matmul %281, %283, %cst_284 {dimension_numbers = #tpu.dot_dimension_numbers<[1], [0], [0], [1], [0, 0, 1, 1], [], []>} : vector<96x128xbf16>, vector<128x128xbf16>, vector<96x128xf32> -> vector<96x128xf32>
    %285 = arith.addf %278, %284 : vector<96x128xf32>
    %c0_285 = arith.constant 0 : index
    %c0_286 = arith.constant 0 : index
    %c8_287 = arith.constant 8 : index
    %c0_288 = arith.constant 0 : index
    %286 = vector.load %arg12[%c0_285, %c0_286, %c8_287, %c0_288] : memref<2x2x64x128xbf16, #tpu.memory_space<vmem>>, vector<1x2x48x128xbf16>
    %287 = vector.shape_cast %286 : vector<1x2x48x128xbf16> to vector<2x48x128xbf16>
    %288 = vector.shape_cast %287 : vector<2x48x128xbf16> to vector<96x128xbf16>
    %c1_289 = arith.constant 1 : index
    %c2_290 = arith.constant 2 : index
    %c0_291 = arith.constant 0 : index
    %c0_292 = arith.constant 0 : index
    %289 = vector.load %arg6[%c1_289, %c2_290, %c0_291, %c0_292] : memref<3x3x128x128xbf16, #tpu.memory_space<vmem>>, vector<1x1x128x128xbf16>
    %290 = vector.shape_cast %289 : vector<1x1x128x128xbf16> to vector<128x128xbf16>
    %cst_293 = arith.constant dense<0.000000e+00> : vector<96x128xf32>
    %291 = tpu.matmul %288, %290, %cst_293 {dimension_numbers = #tpu.dot_dimension_numbers<[1], [0], [0], [1], [0, 0, 1, 1], [], []>} : vector<96x128xbf16>, vector<128x128xbf16>, vector<96x128xf32> -> vector<96x128xf32>
    %292 = arith.addf %285, %291 : vector<96x128xf32>
    %c0_294 = arith.constant 0 : index
    %c0_295 = arith.constant 0 : index
    %c14_296 = arith.constant 14 : index
    %c0_297 = arith.constant 0 : index
    %293 = vector.load %arg12[%c0_294, %c0_295, %c14_296, %c0_297] : memref<2x2x64x128xbf16, #tpu.memory_space<vmem>>, vector<1x2x48x128xbf16>
    %294 = vector.shape_cast %293 : vector<1x2x48x128xbf16> to vector<2x48x128xbf16>
    %295 = vector.shape_cast %294 : vector<2x48x128xbf16> to vector<96x128xbf16>
    %c2_298 = arith.constant 2 : index
    %c0_299 = arith.constant 0 : index
    %c0_300 = arith.constant 0 : index
    %c0_301 = arith.constant 0 : index
    %296 = vector.load %arg6[%c2_298, %c0_299, %c0_300, %c0_301] : memref<3x3x128x128xbf16, #tpu.memory_space<vmem>>, vector<1x1x128x128xbf16>
    %297 = vector.shape_cast %296 : vector<1x1x128x128xbf16> to vector<128x128xbf16>
    %cst_302 = arith.constant dense<0.000000e+00> : vector<96x128xf32>
    %298 = tpu.matmul %295, %297, %cst_302 {dimension_numbers = #tpu.dot_dimension_numbers<[1], [0], [0], [1], [0, 0, 1, 1], [], []>} : vector<96x128xbf16>, vector<128x128xbf16>, vector<96x128xf32> -> vector<96x128xf32>
    %299 = arith.addf %292, %298 : vector<96x128xf32>
    %c1_303 = arith.constant 1 : index
    %c0_304 = arith.constant 0 : index
    %c14_305 = arith.constant 14 : index
    %c0_306 = arith.constant 0 : index
    %300 = vector.load %arg12[%c1_303, %c0_304, %c14_305, %c0_306] : memref<2x2x64x128xbf16, #tpu.memory_space<vmem>>, vector<1x2x48x128xbf16>
    %301 = vector.shape_cast %300 : vector<1x2x48x128xbf16> to vector<2x48x128xbf16>
    %302 = vector.shape_cast %301 : vector<2x48x128xbf16> to vector<96x128xbf16>
    %c2_307 = arith.constant 2 : index
    %c1_308 = arith.constant 1 : index
    %c0_309 = arith.constant 0 : index
    %c0_310 = arith.constant 0 : index
    %303 = vector.load %arg6[%c2_307, %c1_308, %c0_309, %c0_310] : memref<3x3x128x128xbf16, #tpu.memory_space<vmem>>, vector<1x1x128x128xbf16>
    %304 = vector.shape_cast %303 : vector<1x1x128x128xbf16> to vector<128x128xbf16>
    %cst_311 = arith.constant dense<0.000000e+00> : vector<96x128xf32>
    %305 = tpu.matmul %302, %304, %cst_311 {dimension_numbers = #tpu.dot_dimension_numbers<[1], [0], [0], [1], [0, 0, 1, 1], [], []>} : vector<96x128xbf16>, vector<128x128xbf16>, vector<96x128xf32> -> vector<96x128xf32>
    %306 = arith.addf %299, %305 : vector<96x128xf32>
    %c0_312 = arith.constant 0 : index
    %c0_313 = arith.constant 0 : index
    %c15_314 = arith.constant 15 : index
    %c0_315 = arith.constant 0 : index
    %307 = vector.load %arg12[%c0_312, %c0_313, %c15_314, %c0_315] : memref<2x2x64x128xbf16, #tpu.memory_space<vmem>>, vector<1x2x48x128xbf16>
    %308 = vector.shape_cast %307 : vector<1x2x48x128xbf16> to vector<2x48x128xbf16>
    %309 = vector.shape_cast %308 : vector<2x48x128xbf16> to vector<96x128xbf16>
    %c2_316 = arith.constant 2 : index
    %c2_317 = arith.constant 2 : index
    %c0_318 = arith.constant 0 : index
    %c0_319 = arith.constant 0 : index
    %310 = vector.load %arg6[%c2_316, %c2_317, %c0_318, %c0_319] : memref<3x3x128x128xbf16, #tpu.memory_space<vmem>>, vector<1x1x128x128xbf16>
    %311 = vector.shape_cast %310 : vector<1x1x128x128xbf16> to vector<128x128xbf16>
    %cst_320 = arith.constant dense<0.000000e+00> : vector<96x128xf32>
    %312 = tpu.matmul %309, %311, %cst_320 {dimension_numbers = #tpu.dot_dimension_numbers<[1], [0], [0], [1], [0, 0, 1, 1], [], []>} : vector<96x128xbf16>, vector<128x128xbf16>, vector<96x128xf32> -> vector<96x128xf32>
    %313 = arith.addf %306, %312 : vector<96x128xf32>
    %c0_321 = arith.constant 0 : index
    %c0_322 = arith.constant 0 : index
    %314 = vector.load %arg7[%c0_321, %c0_322] : memref<1x128xf32, #tpu.memory_space<vmem>>, vector<1x128xf32>
    %315 = vector.broadcast %314 : vector<1x128xf32> to vector<96x128xf32>
    %316 = arith.addf %313, %315 : vector<96x128xf32>
    %317 = vector.extract_strided_slice %316 {offsets = [0, 0], sizes = [4, 128], strides = [1, 1]} : vector<96x128xf32> to vector<4x128xf32>
    %318 = vector.extract_strided_slice %316 {offsets = [14, 0], sizes = [4, 128], strides = [1, 1]} : vector<96x128xf32> to vector<4x128xf32>
    %319 = vector.extract_strided_slice %316 {offsets = [28, 0], sizes = [4, 128], strides = [1, 1]} : vector<96x128xf32> to vector<4x128xf32>
    %320 = vector.extract_strided_slice %316 {offsets = [42, 0], sizes = [4, 128], strides = [1, 1]} : vector<96x128xf32> to vector<4x128xf32>
    %321 = vector.extract_strided_slice %316 {offsets = [48, 0], sizes = [4, 128], strides = [1, 1]} : vector<96x128xf32> to vector<4x128xf32>
    %322 = vector.extract_strided_slice %316 {offsets = [62, 0], sizes = [4, 128], strides = [1, 1]} : vector<96x128xf32> to vector<4x128xf32>
    %323 = vector.extract_strided_slice %316 {offsets = [76, 0], sizes = [4, 128], strides = [1, 1]} : vector<96x128xf32> to vector<4x128xf32>
    %324 = vector.extract_strided_slice %316 {offsets = [90, 0], sizes = [4, 128], strides = [1, 1]} : vector<96x128xf32> to vector<4x128xf32>
    %325 = tpu.concatenate %317, %318, %319, %320, %321, %322, %323, %324 in 0 : vector<4x128xf32>, vector<4x128xf32>, vector<4x128xf32>, vector<4x128xf32>, vector<4x128xf32>, vector<4x128xf32>, vector<4x128xf32>, vector<4x128xf32> -> vector<32x128xf32>
    %c0_323 = arith.constant 0 : index
    %c128 = arith.constant 128 : index
    %326 = vector.load %arg10[%c0_323, %c128] : memref<32x512xf32, #tpu.memory_space<vmem>>, vector<32x128xf32>
    tpu.vector_store %arg10[%c0_323, %c128], %325 {strides = array<i32>} : memref<32x512xf32, #tpu.memory_space<vmem>>, vector<32x128xf32>,
    return
  }
  func.func @transform_0(%arg0: i32) -> (i32, i32, i32, i32) {
    %c0_i32 = arith.constant 0 : i32
    %c0_i32_0 = arith.constant 0 : i32
    %c0_i32_1 = arith.constant 0 : i32
    %c0_i32_2 = arith.constant 0 : i32
    return %c0_i32, %arg0, %c0_i32_0, %c0_i32_1 : i32, i32, i32, i32
  }
  func.func @transform_1(%arg0: i32) -> (i32, i32, i32) {
    %c0_i32 = arith.constant 0 : i32
    %c0_i32_0 = arith.constant 0 : i32
    %c0_i32_1 = arith.constant 0 : i32
    %c0_i32_2 = arith.constant 0 : i32
    return %c0_i32, %c0_i32_0, %c0_i32_1 : i32, i32, i32
  }
  func.func @transform_2(%arg0: i32) -> (i32, i32) {
    %c0_i32 = arith.constant 0 : i32
    %c0_i32_0 = arith.constant 0 : i32
    %c0_i32_1 = arith.constant 0 : i32
    return %c0_i32, %c0_i32_0 : i32, i32
  }
  func.func @transform_3(%arg0: i32) -> (i32, i32, i32, i32) {
    %c0_i32 = arith.constant 0 : i32
    %c0_i32_0 = arith.constant 0 : i32
    %c0_i32_1 = arith.constant 0 : i32
    %c0_i32_2 = arith.constant 0 : i32
    %c0_i32_3 = arith.constant 0 : i32
    return %c0_i32, %c0_i32_0, %c0_i32_1, %c0_i32_2 : i32, i32, i32, i32
  }
  func.func @transform_4(%arg0: i32) -> (i32, i32) {
    %c0_i32 = arith.constant 0 : i32
    %c0_i32_0 = arith.constant 0 : i32
    %c0_i32_1 = arith.constant 0 : i32
    return %c0_i32, %c0_i32_0 : i32, i32
  }
  func.func @transform_5(%arg0: i32) -> (i32, i32, i32, i32) {
    %c0_i32 = arith.constant 0 : i32
    %c0_i32_0 = arith.constant 0 : i32
    %c0_i32_1 = arith.constant 0 : i32
    %c0_i32_2 = arith.constant 0 : i32
    %c0_i32_3 = arith.constant 0 : i32
    return %c0_i32, %c0_i32_0, %c0_i32_1, %c0_i32_2 : i32, i32, i32, i32
  }
  func.func @transform_6(%arg0: i32) -> (i32, i32) {
    %c0_i32 = arith.constant 0 : i32
    %c0_i32_0 = arith.constant 0 : i32
    %c0_i32_1 = arith.constant 0 : i32
    return %c0_i32, %c0_i32_0 : i32, i32
  }
  func.func @transform_7(%arg0: i32) -> (i32, i32, i32, i32) {
    %c0_i32 = arith.constant 0 : i32
    %c0_i32_0 = arith.constant 0 : i32
    %c0_i32_1 = arith.constant 0 : i32
    %c0_i32_2 = arith.constant 0 : i32
    %c0_i32_3 = arith.constant 0 : i32
    return %c0_i32, %c0_i32_0, %c0_i32_1, %c0_i32_2 : i32, i32, i32, i32
  }
  func.func @transform_8(%arg0: i32) -> (i32, i32) {
    %c0_i32 = arith.constant 0 : i32
    %c0_i32_0 = arith.constant 0 : i32
    %c0_i32_1 = arith.constant 0 : i32
    return %c0_i32, %c0_i32_0 : i32, i32
  }
  func.func @transform_9(%arg0: i32) -> (i32, i32) {
    %c0_i32 = arith.constant 0 : i32
    %c0_i32_0 = arith.constant 0 : i32
    return %arg0, %c0_i32 : i32, i32
  }
}

</mosaic_0001>

<bundles_post_ra>
// kernel: reduction_a_pallas.1
= control target key start
LH: loop header
LB: loop body
LE: loop exit
PB: predicated region body
PF: predicated region fallthrough
CT: control target
= control target key end

     0   :  { %s12651_s30 = smov 0   ;;  %s12653_s10 = smov 0   ;;  %s16440_s0 = inlined_call_operand.vmem [shape: bf16[2,4,80,128], index: 0, kind: input, shape index: {}]   ;;  %s16441_s1 = inlined_call_operand.vmem [shape: f32[2,80,128], index: 1, kind: input, shape index: {}]   ;;  %s16442_s2 = inlined_call_operand.vmem [shape: bf16[128,128], index: 2, kind: input, shape index: {}]   ;;  %s16443_s3 = inlined_call_operand.vmem [shape: bf16[3,3,128,128], index: 3, kind: input, shape index: {}]   ;;  %s16444_s4 = inlined_call_operand.vmem [shape: f32[1,128], index: 4, kind: input, shape index: {}]   ;;  %s16445_s5 = inlined_call_operand.vmem [shape: bf16[3,3,128,128], index: 5, kind: input, shape index: {}]   ;;  %s16446_s6 = inlined_call_operand.vmem [shape: f32[1,128], index: 6, kind: input, shape index: {}]   ;;  %s16447_s7 = inlined_call_operand.vmem [shape: bf16[3,3,128,256], index: 7, kind: input, shape index: {}]   ;;  %s16448_s8 = inlined_call_operand.vmem [shape: f32[1,256], index: 8, kind: input, shape index: {}]   ;;  %s16449_s9 = inlined_call_operand.vmem [shape: f32[64,512], index: 9, kind: output, shape index: {}]  }
   0x1   :  { %s12655_s11 = smov 0  }
   0x2 LB: > { %s9483_s12 = sadd.s32 4294967295, %s12598_s11   ;;  %s12668_s13 = sadd.s32 1, %s12598_s11   ;;  %s12598_s11 = sphi %s12655_s11, %s16789_s11   ;;  %s12594_s10 = sphi %s12653_s10, %s16788_s10   ;;  %s12590_s30 = sphi %s12651_s30, %s16787_s30  }
   0x3   : > { %s23_s14 = ssub.s32 %s12598_s11, %s12668_s13  ;;  %s26_s15 = sadd.s32 1, %s12594_s10 }
   0x4   : > { %p24_p0 = scmp.eq.s32.totalorder %s23_s14, 0  ;;  %p33_p1 = scmp.ne.s32.totalorder %s12594_s10, %s12590_s30 }
   0x5   : > { %p34_p2 = scmp.eq.s32.totalorder %s12598_s11, 0  ;;  %p9486_p4 = scmp.ge.s32.totalorder %s12598_s11, 2 }
   0x6   : > { %s12677_s16 = scalar_select %p24_p0, %s12594_s10, %s26_s15  }
   0x7   : > { %p35_p3 = por %p34_p2, %p33_p1  ;;  %277 = sbr.rel (%p9486_p4) target bundleno = 29 (0x1d), region = 48 }
   0xe   : > { %280 = sbr.rel (!%p35_p3) target bundleno = 29 (0x1d), region = 52  ;;  %s282_s17 = sand.u32 (%p35_p3), 1, %s12594_s10  }
   0xf   : > { %s12106_s18 = smul.u32 (%p35_p3), 80, %s12598_s11 }
  0x10   : > { %s12105_s19 = smul.u32 (%p35_p3), 160, %s282_s17 }
  0x11   : > { %s12685_s22 = scalar_lea.vmem (%p35_p3), %s16440_s0, %s12106_s18 }
  0x12   : > { %v304_v0 = vld [vmem:[%s12685_s22] sm:$0xff] (%p35_p3)   ;;  %v308_v1 = vld [vmem:[%s12685_s22 + $0x8] sm:$0xff] (%p35_p3)   ;;  %v312_v2 = vld [vmem:[%s12685_s22 + $0x10] sm:$0xff] (%p35_p3)   ;;  %s12690_s23 = scalar_lea.vmem (%p35_p3), [#allocation4], %s12105_s19 }
  0x13   : > { %305 = vst [vmem:[%s12690_s23] sm:$0xff] (%p35_p3), %v304_v0   ;;  %309 = vst [vmem:[%s12690_s23 + $0x8] sm:$0xff] (%p35_p3), %v308_v1   ;;  %v316_v3 = vld [vmem:[%s12685_s22 + $0x18] sm:$0xff] (%p35_p3)   ;;  %v320_v4 = vld [vmem:[%s12685_s22 + $0x20] sm:$0xff] (%p35_p3)  }
  0x14   : > { %313 = vst [vmem:[%s12690_s23 + $0x10] sm:$0xff] (%p35_p3), %v312_v2   ;;  %v324_v5 = vld [vmem:[%s12685_s22 + $0x28] sm:$0xff] (%p35_p3)   ;;  %317 = vst [vmem:[%s12690_s23 + $0x18] sm:$0xff] (%p35_p3), %v316_v3   ;;  %v328_v6 = vld [vmem:[%s12685_s22 + $0x30] sm:$0xff] (%p35_p3)  }
  0x15   : > { %321 = vst [vmem:[%s12690_s23 + $0x20] sm:$0xff] %v320_v4   ;;  %325 = vst [vmem:[%s12690_s23 + $0x28] sm:$0xff] %v324_v5   ;;  %v332_v7 = vld [vmem:[%s12685_s22 + $0x38] sm:$0xff]   ;;  %v336_v8 = vld [vmem:[%s12685_s22 + $0x40] sm:$0xff]  }
  0x16   : > { %329 = vst [vmem:[%s12690_s23 + $0x30] sm:$0xff] %v328_v6   ;;  %333 = vst [vmem:[%s12690_s23 + $0x38] sm:$0xff] %v332_v7   ;;  %v340_v9 = vld [vmem:[%s12685_s22 + $0x48] sm:$0xff]   ;;  %v344_v10 = vld [vmem:[%s12685_s22 + $0xa0] sm:$0xff]  }
  0x17   : > { %337 = vst [vmem:[%s12690_s23 + $0x40] sm:$0xff] %v336_v8   ;;  %v348_v11 = vld [vmem:[%s12685_s22 + $0xa8] sm:$0xff]   ;;  %341 = vst [vmem:[%s12690_s23 + $0x48] sm:$0xff] %v340_v9   ;;  %v352_v12 = vld [vmem:[%s12685_s22 + $0xb0] sm:$0xff]  }
  0x18   : > { %345 = vst [vmem:[%s12690_s23 + $0x50] sm:$0xff] %v344_v10   ;;  %349 = vst [vmem:[%s12690_s23 + $0x58] sm:$0xff] %v348_v11   ;;  %v356_v13 = vld [vmem:[%s12685_s22 + $0xb8] sm:$0xff]   ;;  %v360_v14 = vld [vmem:[%s12685_s22 + $0xc0] sm:$0xff]  }
  0x19   : > { %353 = vst [vmem:[%s12690_s23 + $0x60] sm:$0xff] %v352_v12   ;;  %357 = vst [vmem:[%s12690_s23 + $0x68] sm:$0xff] %v356_v13   ;;  %v364_v15 = vld [vmem:[%s12685_s22 + $0xc8] sm:$0xff]   ;;  %v368_v16 = vld [vmem:[%s12685_s22 + $0xd0] sm:$0xff]  }
  0x1a   : > { %361 = vst [vmem:[%s12690_s23 + $0x70] sm:$0xff] %v360_v14   ;;  %v372_v17 = vld [vmem:[%s12685_s22 + $0xd8] sm:$0xff]   ;;  %365 = vst [vmem:[%s12690_s23 + $0x78] sm:$0xff] %v364_v15   ;;  %v376_v18 = vld [vmem:[%s12685_s22 + $0xe0] sm:$0xff]  }
  0x1b   : > { %369 = vst [vmem:[%s12690_s23 + $0x80] sm:$0xff] %v368_v16   ;;  %373 = vst [vmem:[%s12690_s23 + $0x88] sm:$0xff] %v372_v17   ;;  %v380_v19 = vld [vmem:[%s12685_s22 + $0xe8] sm:$0xff]  }
  0x1c   : > { %377 = vst [vmem:[%s12690_s23 + $0x90] sm:$0xff] %v376_v18   ;;  %381 = vst [vmem:[%s12690_s23 + $0x98] sm:$0xff] %v380_v19  }
  0x1d PF: > { %p9490_p5 = scmp.ge.s32.totalorder %s12598_s11, 1  ;;  %p485_p6 = scmp.lt.s32.totalorder %s12598_s11, 3 }
  0x1f   : > { %p486_p7 = pnand %p9490_p5, %p485_p6 }
  0x21   : > { %489 = sbr.rel (%p486_p7) target bundleno = 1320 (0x528), region = 93 }
  0x28   : > { %v12133_v20 = vld [vmem:[%s16442_s2] sm:$0xff]   ;;  %s492_s26 = sand.u32 1, %s12590_s30   ;;  %v12134_v21 = vld [vmem:[%s16442_s2 + $0x8] sm:$0xff]   ;;  %v12135_v22 = vld [vmem:[%s16442_s2 + $0x10] sm:$0xff]   ;;  %vm1261_vm0 = vsmask.f32 7424 }
  0x29   : > { %s12107_s29 = smul.u32 160, %s492_s26  ;;  %10789 = vmatprep.subr.bf16.mxu0 %v12133_v20  ;;  %10825 = vmatprep.subr.bf16.mxu1 %v12133_v20  ;;  %v12136_v23 = vld [vmem:[%s16442_s2 + $0x18] sm:$0xff]   ;;  %v12137_v26 = vld [vmem:[%s16442_s2 + $0x20] sm:$0xff]   ;;  %v12138_v27 = vld [vmem:[%s16442_s2 + $0x28] sm:$0xff]   ;;  %vm1887_vm1 = vsmask.f32 4352 }
  0x2a   : > { %10790 = vmatpush3.bf16.msra.mxu0 %v12133_v20  ;;  %10826 = vmatpush3.bf16.msra.mxu1 %v12133_v20  ;;  %v12139_v28 = vld [vmem:[%s16442_s2 + $0x30] sm:$0xff]   ;;  %v12140_v29 = vld [vmem:[%s16442_s2 + $0x38] sm:$0xff]   ;;  %v12765_v32 = vld [vmem:[%s16443_s3 + $0x40] sm:$0xff]   ;;  %vm2129_vm2 = vcmask 1043456   ;;  %vm2524_vm3 = vcmask 1040384   ;;  %vm3565_vm6 = vcmask 1046528  }
  0x2b   : > { %10791 = vmatprep.subr.bf16.mxu0 %v12134_v21  ;;  %10827 = vmatprep.subr.bf16.mxu1 %v12134_v21  ;;  %s12744_s30 = scalar_lea.vmem [#allocation4], %s12107_s29  ;;  %v12162_v34 = vld [vmem:[%s16443_s3] sm:$0xff]   ;;  %v12163_v36 = vld [vmem:[%s16443_s3 + $0x48] sm:$0xff]   ;;  %v12166_v52 = vld [vmem:[%s16443_s3 + $0x10] sm:$0xff]   ;;  %vm2716_vm4 = vsmask.f32 256 }
  0x2c   : > { %v12141_v24 = vld [vmem:[%s12744_s30] sm:$0xff]   ;;  %v12142_v25 = vld [vmem:[%s12744_s30 + $0x50] sm:$0xff]   ;;  %v12143_v30 = vld [vmem:[%s12744_s30 + $0x8] sm:$0xff]   ;;  %vm4007_vm5 = vsmask.f32 3328  ;;  %vm6520_vm11 = vcmask 1044484  }
  0x2d   : > { %10805 = vmatprep.mubr.bf16.mxu0 %v12141_v24  ;;  %10841 = vmatprep.mubr.bf16.mxu1 %v12142_v25  ;;  %v12144_v31 = vld [vmem:[%s12744_s30 + $0x58] sm:$0xff]   ;;  %v12145_v33 = vld [vmem:[%s12744_s30 + $0x10] sm:$0xff]   ;;  %v12146_v35 = vld [vmem:[%s12744_s30 + $0x60] sm:$0xff]   ;;  %vm5158_vm7 = vsmask.f32 7440  ;;  %s15469_s29 = sshll.u32 %s9483_s12, 2 }
  0x2e   : > { %10792 = vmatpush3.bf16.msra.mxu0 %v12134_v21  ;;  %10828 = vmatpush3.bf16.msra.mxu1 %v12134_v21  ;;  %v12164_v37 = vld [vmem:[%s16443_s3 + $0x8] sm:$0xff]   ;;  %v12147_v38 = vld [vmem:[%s12744_s30 + $0x18] sm:$0xff]   ;;  %v12149_v40 = vld [vmem:[%s12744_s30 + $0x20] sm:$0xff]   ;;  %vm5542_vm9 = vsmask.f32 4368  ;;  %vm7522_vm13 = vcmask 1041408  }
  0x2f   : > { %10793 = vmatprep.subr.bf16.mxu0 %v12135_v22  ;;  %10829 = vmatprep.subr.bf16.mxu1 %v12135_v22  ;;  %v12148_v39 = vld [vmem:[%s12744_s30 + $0x68] sm:$0xff]   ;;  %v12150_v41 = vld [vmem:[%s12744_s30 + $0x70] sm:$0xff]   ;;  %v12152_v43 = vld [vmem:[%s12744_s30 + $0x78] sm:$0xff]   ;;  %p530_p8 = scmp.lt.s32.totalorder %s15469_s29, 7  ;;  %vm7529_vm14 = vcmask 1045504  }
  0x30   : > { %v12151_v42 = vld [vmem:[%s12744_s30 + $0x28] sm:$0xff]   ;;  %v12153_v44 = vld [vmem:[%s12744_s30 + $0x30] sm:$0xff]   ;;  %v12154_v45 = vld [vmem:[%s12744_s30 + $0x80] sm:$0xff]  }
  0x31   : > { %v12155_v46 = vld [vmem:[%s12744_s30 + $0x38] sm:$0xff]   ;;  %v12156_v47 = vld [vmem:[%s12744_s30 + $0x88] sm:$0xff]   ;;  %v12157_v48 = vld [vmem:[%s12744_s30 + $0x40] sm:$0xff]   ;;  %s16791_s29 = smov (!%p530_p8, %s15469_s29), 7 }
  0x32   : > { %10794 = vmatpush3.bf16.msra.mxu0 %v12135_v22  ;;  %10830 = vmatpush3.bf16.msra.mxu1 %v12135_v22  ;;  %v12158_v49 = vld [vmem:[%s12744_s30 + $0x90] sm:$0xff]   ;;  %v12159_v50 = vld [vmem:[%s12744_s30 + $0x48] sm:$0xff]   ;;  %v12160_v51 = vld [vmem:[%s12744_s30 + $0x98] sm:$0xff]   ;;  %s10338_s11 = sshll.u32 %s16791_s29, 5 }
  0x33   : > { %10795 = vmatprep.subr.bf16.mxu0 %v12136_v23  ;;  %10831 = vmatprep.subr.bf16.mxu1 %v12136_v23  ;;  %v12167_v53 = vld [vmem:[%s16443_s3 + $0x18] sm:$0xff]   ;;  %v12803_v54 = vld [vmem:[%s16443_s3 + $0x50] sm:$0xff]   ;;  %v12169_v55 = vld [vmem:[%s16443_s3 + $0x20] sm:$0xff]   ;;  %s15563_s20 = scalar_lea.vmem %s16449_s9, %s10338_s11 }
  0x34   : > { %v12813_v56 = vld [vmem:[%s16443_s3 + $0x58] sm:$0xff]   ;;  %v12171_v57 = vld [vmem:[%s16443_s3 + $0x28] sm:$0xff]   ;;  %v12823_v58 = vld [vmem:[%s16443_s3 + $0x60] sm:$0xff]  }
  0x35   : > { %v12173_v59 = vld [vmem:[%s16443_s3 + $0x30] sm:$0xff]   ;;  %v12833_v60 = vld [vmem:[%s16443_s3 + $0x68] sm:$0xff]   ;;  %v12175_v62 = vld [vmem:[%s16443_s3 + $0x38] sm:$0xff]  }
  0x36   : > { %10796 = vmatpush3.bf16.msra.mxu0 %v12136_v23  ;;  %10832 = vmatpush3.bf16.msra.mxu1 %v12136_v23  ;;  %v12840_v61 = vld [vmem:[%s16443_s3 + $0x70] sm:$0xff]   ;;  %v12176_v63 = vld [vmem:[%s16443_s3 + $0x80] sm:$0xff]   ;;  %v12853_v0 = vld [vmem:[%s16443_s3 + $0x78] sm:$0xff]  }
  0x37   : > { %10797 = vmatprep.subr.bf16.mxu0 %v12137_v26  ;;  %10833 = vmatprep.subr.bf16.mxu1 %v12137_v26  ;;  %v12861_v1 = vld [vmem:[%s16441_s1 + $0x60] sm:$0xff]  ;;  %v12866_v2 = vld [vmem:[%s16441_s1 + $0x50] sm:$0xff]  ;;  %v12876_v5 = vld [vmem:[%s16441_s1 + $0x18] sm:$0xff] }
  0x38   : > { %v12871_v4 = vld [vmem:[%s16441_s1 + $0x10] sm:$0xff]  ;;  %v12881_v7 = vld [vmem:[%s16441_s1 + $0x68] sm:$0xff]  ;;  %v12886_v9 = vld [vmem:[%s16441_s1] sm:$0xff] }
  0x39   : > { %v12891_v10 = vld [vmem:[%s16441_s1 + $0x8] sm:$0xff]  ;;  %v12897_v13 = vld [vmem:[%s16441_s1 + $0x58] sm:$0xff]  ;;  %vm14333_vm8 = vmor %vm4007_vm5, %vm5158_vm7 }
  0x3a   : > { %10798 = vmatpush3.bf16.msra.mxu0 %v12137_v26  ;;  %10834 = vmatpush3.bf16.msra.mxu1 %v12137_v26  ;;  %vm14378_vm10 = vmor %vm2716_vm4, %vm5542_vm9 }
  0x3b   : > { %10799 = vmatprep.subr.bf16.mxu0 %v12138_v27  ;;  %10835 = vmatprep.subr.bf16.mxu1 %v12138_v27  ;;  %vm15004_vm12 = vmor %vm2524_vm3, %vm6520_vm11 }
  0x3e   : > { %10800 = vmatpush3.bf16.msra.mxu0 %v12138_v27  ;;  %10836 = vmatpush3.bf16.msra.mxu1 %v12138_v27 }
  0x3f   : > { %10801 = vmatprep.subr.bf16.mxu0 %v12139_v28  ;;  %10837 = vmatprep.subr.bf16.mxu1 %v12139_v28 }
  0x42   : > { %10802 = vmatpush3.bf16.msra.mxu0 %v12139_v28  ;;  %10838 = vmatpush3.bf16.msra.mxu1 %v12139_v28 }
  0x43   : > { %10803 = vmatprep.subr.bf16.mxu0 %v12140_v29  ;;  %10839 = vmatprep.subr.bf16.mxu1 %v12140_v29 }
  0x46   : > { %10804 = vmatpush3.bf16.msra.mxu0 %v12140_v29  ;;  %10840 = vmatpush3.bf16.msra.mxu1 %v12140_v29  ;;  %v12915_v29 = vld [vmem:[%s16441_s1 + $0x80] sm:$0xff] }
  0x47   : > { %10861 = vmatprep.subr.bf16.mxu1 %v12765_v32  ;;  %10893 = vmatprep.subr.bf16.mxu0 %v12162_v34 }
  0x49   : > { %10806 = vmatmul.mubr.bf16.vlgmr.msra.gmra.mrb[0].mxu0 %v12143_v30  ;;  %10842 = vmatmul.mubr.bf16.vlgmr.msra.gmra.mrb[0].mxu1 %v12144_v31  ;;  %v12922_v30 = vld [vmem:[%s16441_s1 + $0x70] sm:$0xff] }
  0x4a   : > { %10809 = vmatprep.mubr.bf16.mxu0 %v12145_v33  ;;  %10845 = vmatprep.mubr.bf16.mxu1 %v12146_v35  ;;  %v12938_v35 = vld [vmem:[%s16441_s1 + $0x38] sm:$0xff] }
  0x4b   : > { %10862 = vmatpush3.bf16.msra.mxu1 %v12765_v32  ;;  %10894 = vmatpush3.bf16.msra.mxu0 %v12162_v34  ;;  %v12933_v34 = vld [vmem:[%s16441_s1 + $0x30] sm:$0xff] }
  0x4c   : > { %10863 = vmatprep.subr.bf16.mxu1 %v12163_v36  ;;  %10895 = vmatprep.subr.bf16.mxu0 %v12164_v37 }
  0x4f   : > { %10864 = vmatpush3.bf16.msra.mxu1 %v12163_v36  ;;  %10896 = vmatpush3.bf16.msra.mxu0 %v12164_v37  ;;  %v12944_v37 = vld [vmem:[%s16441_s1 + $0x88] sm:$0xff] }
  0x50   : > { %10897 = vmatprep.subr.bf16.mxu0 %v12166_v52  ;;  %10865 = vmatprep.subr.bf16.mxu1 %v12803_v54 }
  0x51   : > { %10810 = vmatmul.mubr.bf16.gmra.mrb[4].mxu0 %v12147_v38  ;;  %10846 = vmatmul.mubr.bf16.gmra.mrb[4].mxu1 %v12148_v39 }
  0x52   : > { %10813 = vmatprep.mubr.bf16.mxu0 %v12149_v40  ;;  %10849 = vmatprep.mubr.bf16.mxu1 %v12150_v41  ;;  %v12950_v40 = vld [vmem:[%s16441_s1 + $0x20] sm:$0xff]  ;;  %v12955_v41 = vld [vmem:[%s16441_s1 + $0x28] sm:$0xff] }
  0x53   : > { %10898 = vmatpush3.bf16.msra.mxu0 %v12166_v52  ;;  %10866 = vmatpush3.bf16.msra.mxu1 %v12803_v54 }
  0x54   : > { %10899 = vmatprep.subr.bf16.mxu0 %v12167_v53  ;;  %10867 = vmatprep.subr.bf16.mxu1 %v12813_v56 }
  0x57   : > { %10900 = vmatpush3.bf16.msra.mxu0 %v12167_v53  ;;  %10868 = vmatpush3.bf16.msra.mxu1 %v12813_v56 }
  0x58   : > { %10901 = vmatprep.subr.bf16.mxu0 %v12169_v55  ;;  %10869 = vmatprep.subr.bf16.mxu1 %v12823_v58 }
  0x59   : > { %10814 = vmatmul.mubr.bf16.gmra.mrb[8].mxu0 %v12151_v42  ;;  %10850 = vmatmul.mubr.bf16.gmra.mrb[8].mxu1 %v12152_v43 }
  0x5a   : > { %10817 = vmatprep.mubr.bf16.mxu0 %v12153_v44  ;;  %10853 = vmatprep.mubr.bf16.mxu1 %v12154_v45  ;;  %v12961_v44 = vld [vmem:[%s16441_s1 + $0x78] sm:$0xff] }
  0x5b   : > { %10902 = vmatpush3.bf16.msra.mxu0 %v12169_v55  ;;  %10870 = vmatpush3.bf16.msra.mxu1 %v12823_v58 }
  0x5c   : > { %10903 = vmatprep.subr.bf16.mxu0 %v12171_v57  ;;  %10871 = vmatprep.subr.bf16.mxu1 %v12833_v60 }
  0x5f   : > { %10904 = vmatpush3.bf16.msra.mxu0 %v12171_v57  ;;  %10872 = vmatpush3.bf16.msra.mxu1 %v12833_v60 }
  0x60   : > { %10905 = vmatprep.subr.bf16.mxu0 %v12173_v59  ;;  %10873 = vmatprep.subr.bf16.mxu1 %v12840_v61 }
  0x61   : > { %10818 = vmatmul.mubr.bf16.gmra.mrb[12].mxu0 %v12155_v46  ;;  %10854 = vmatmul.mubr.bf16.gmra.mrb[12].mxu1 %v12156_v47 }
  0x62   : > { %10821 = vmatprep.mubr.bf16.mxu0 %v12157_v48  ;;  %10857 = vmatprep.mubr.bf16.mxu1 %v12158_v49 }
  0x63   : > { %10906 = vmatpush3.bf16.msra.mxu0 %v12173_v59  ;;  %10874 = vmatpush3.bf16.msra.mxu1 %v12840_v61  ;;  %v12974_v59 = vld [vmem:[%s16443_s3 + $0x90] sm:$0xff]  }
  0x64   : > { %10907 = vmatprep.subr.bf16.mxu0 %v12175_v62  ;;  %10875 = vmatprep.subr.bf16.mxu1 %v12853_v0 }
  0x67   : > { %10908 = vmatpush3.bf16.msra.mxu0 %v12175_v62  ;;  %10876 = vmatpush3.bf16.msra.mxu1 %v12853_v0 }
  0x68   : > { %10925 = vmatprep.subr.bf16.mxu0 %v12176_v63  ;;  %11149 = vmatprep.subr.bf16.mxu1 %v12765_v32  ;;  %v12928_v32 = vld [vmem:[%s16443_s3 + $0x88] sm:$0xff]  }
  0x69   : > { %10822 = vmatmul.mubr.bf16.gmra.mrb[16].mxu0 %v12159_v50  ;;  %10858 = vmatmul.mubr.bf16.gmra.mrb[16].mxu1 %v12160_v51 }
 0x11c   : > { %v10807_v3 = vpop.f32.mrb[0].mxu0  ;;  %v10843_v6 = vpop.f32.mrb[0].mxu1 }
 0x11d   : > { %v715_v8 = vpop.f32.mrb[1].mxu0  ;;  %v1051_v11 = vadd.f32 %v10843_v6, %v12861_v1  ;;  %v959_v12 = vpop.f32.mrb[1].mxu1  ;;  %v806_v17 = vadd.f32 %v10807_v3, %v12871_v4 }
 0x11e   : > { %v10808_v14 = vpop.f32.mrb[2].mxu0  ;;  %v1049_v15 = vadd.f32 %v12866_v2, %v959_v12  ;;  %v10844_v16 = vpop.f32.mrb[2].mxu1  ;;  %v804_v22 = vadd.f32 %v12886_v9, %v715_v8 }
 0x11f   : > { %v807_v18 = vadd.f32 %v10808_v14, %v12876_v5  ;;  %v718_v19 = vpop.f32.mrb[3].mxu0  ;;  %v1052_v20 = vadd.f32 %v10844_v16, %v12881_v7  ;;  %v962_v21 = vpop.f32.mrb[3].mxu1  ;;  %v12996_v16 = vld [vmem:[%s16441_s1 + $0x90] sm:$0xff] }
 0x120   : > { %v805_v23 = vadd.f32 %v12891_v10, %v718_v19  ;;  %v1050_v24 = vadd.f32 %v12897_v13, %v962_v21  ;;  %v13004_v19 = vld [vmem:[%s16443_s3 + $0x98] sm:$0xff]   ;;  %v13010_v21 = vld [vmem:[%s16441_s1 + $0x40] sm:$0xff] }
 0x121   : > { %v12906_v25 = vpack.c.bf16 %v807_v18, %v806_v17  ;;  %v12908_v26 = vpack.c.bf16 %v1052_v20, %v1051_v11 }
 0x122   : > { %v824_v27 = vpack.c.bf16 %v805_v23, %v804_v22  ;;  %v12910_v28 = vpack.c.bf16 %v1050_v24, %v1049_v15 }
 0x123   : > { %835 = vst [vmem:[#allocation2 + $0x8] sm:$0xff] %v12906_v25  ;;  %1081 = vst [vmem:[#allocation2 + $0x58] sm:$0xff] %v12908_v26  ;;  %v16452_v31 = vshll.u32 %v12906_v25, 16  ;;  %v16453_v17 = vshrl.u32 %v12906_v25, 16 }
 0x124   : > { %834 = vst [vmem:[#allocation2] sm:$0xff] %v824_v27  ;;  %v10811_v33 = vpop.f32.mrb[4].mxu0  ;;  %1080 = vst [vmem:[#allocation2 + $0x50] sm:$0xff] %v12910_v28  ;;  %v10847_v36 = vpop.f32.mrb[4].mxu1  ;;  %v1265_v38 = vshll.u32 %v824_v27, 16  ;;  %10909 = vmatprep.mubr.bf16.mxu0 %v12910_v28  ;;  %v1263_v48 = vshrl.u32 %v824_v27, 16 }
 0x125   : > { %v731_v39 = vpop.f32.mrb[5].mxu0  ;;  %v1055_v42 = vadd.f32 %v10847_v36, %v12915_v29  ;;  %v975_v43 = vpop.f32.mrb[5].mxu1  ;;  %10910 = vmatmul.mubr.bf16.vlgmr.msra.gmra.mrb[20].mxu0 %v12908_v26  ;;  %v810_v50 = vadd.f32 %v10811_v33, %v12933_v34  ;;  %v1272_v57 = vrot.slane %v16452_v31, 1  ;;  %v13019_v27 = vld [vmem:[%s16441_s1 + $0x48] sm:$0xff] }
 0x126   : > { %v10812_v45 = vpop.f32.mrb[6].mxu0  ;;  %v1053_v46 = vadd.f32 %v12922_v30, %v975_v43  ;;  %v10848_v47 = vpop.f32.mrb[6].mxu1  ;;  %v1267_v49 = vrot.slane %v1265_v38, 1  ;;  %10926 = vmatpush3.bf16.msra.mxu0 %v12176_v63  ;;  %v808_v62 = vadd.f32 %v12950_v40, %v731_v39  ;;  %v13025_v38 = vld [vmem:[%s16441_s1 + $0x98] sm:$0xff] }
 0x127   : > { %v811_v51 = vadd.f32 %v10812_v45, %v12938_v35  ;;  %v734_v52 = vpop.f32.mrb[7].mxu0  ;;  %v1056_v53 = vadd.f32 %v10848_v47, %v12944_v37  ;;  %v978_v55 = vpop.f32.mrb[7].mxu1  ;;  %10927 = vmatprep.subr.bf16.mxu0 %v12928_v32  ;;  %v1276_v39 = vor.u32 %v16453_v17, %v1272_v57 }
 0x128   : > { %v809_v63 = vadd.f32 %v12955_v41, %v734_v52  ;;  %v1054_v3 = vadd.f32 %v12961_v44, %v978_v55  ;;  %v12979_v6 = vor.u32 %v1267_v49, %v1263_v48 }
 0x129   : > { %v12981_v8 = vpack.c.bf16 %v811_v51, %v810_v50  ;;  %v12983_v11 = vpack.c.bf16 %v1056_v53, %v1055_v42 }
 0x12a   : > { %v12985_v12 = vpack.c.bf16 %v809_v63, %v808_v62  ;;  %v12987_v14 = vpack.c.bf16 %v1054_v3, %v1053_v46  ;;  %v1273_v15 = vsel %vm1261_vm0, %v12979_v6, %v1272_v57  ;;  %10928 = vmatpush3.bf16.msra.mxu0 %v12928_v32 }
 0x12b   : > { %837 = vst [vmem:[#allocation2 + $0x18] sm:$0xff] %v12981_v8  ;;  %10877 = vmatprep.mubr.bf16.mxu1 %v1273_v15  ;;  %v16450_v18 = vshll.u32 %v12981_v8, 16  ;;  %10929 = vmatprep.subr.bf16.mxu0 %v12974_v59 }
 0x12c   : > { %836 = vst [vmem:[#allocation2 + $0x10] sm:$0xff] %v12985_v12  ;;  %v10815_v20 = vpop.f32.mrb[8].mxu0  ;;  %v10851_v22 = vpop.f32.mrb[8].mxu1  ;;  %v13013_v23 = vshll.u32 %v12985_v12, 16  ;;  %10913 = vmatprep.mubr.bf16.mxu0 %v12987_v14 }
 0x12d   : > { %v747_v24 = vpop.f32.mrb[9].mxu0  ;;  %v1059_v33 = vadd.f32 %v10851_v22, %v12866_v2  ;;  %v991_v36 = vpop.f32.mrb[9].mxu1  ;;  %10914 = vmatmul.mubr.bf16.gmra.mrb[24].mxu0 %v12983_v11  ;;  %v814_v42 = vadd.f32 %v10815_v20, %v12886_v9  ;;  %v13036_v2 = vshrl.u32 %v12985_v12, 16  ;;  %v13044_v52 = vrot.slane %v16450_v18, 1  ;;  %v12539_v22 = vld [vmem:[%s16443_s3 + $0x40] sm:$0xff]  }
 0x12e   : > { %16553 = vst [vmem:[#allocation5_spill] sm:$0xff] %v13013_v23  ;;  %v10816_v43 = vpop.f32.mrb[10].mxu0  ;;  %v1057_v45 = vadd.f32 %v12996_v16, %v991_v36  ;;  %v10852_v46 = vpop.f32.mrb[10].mxu1  ;;  %v13033_v47 = vrot.slane %v13013_v23, 1  ;;  %10930 = vmatpush3.bf16.msra.mxu0 %v12974_v59  ;;  %v812_v48 = vadd.f32 %v13010_v21, %v747_v24  ;;  %v12540_v24 = vld [vmem:[%s16443_s3 + $0x48] sm:$0xff]  }
 0x12f   : > { %16554 = vst [vmem:[#allocation6_spill] sm:$0xff] %v13036_v2  ;;  %v815_v49 = vadd.f32 %v10816_v43, %v12891_v10  ;;  %v750_v50 = vpop.f32.mrb[11].mxu0  ;;  %v1060_v51 = vadd.f32 %v10852_v46, %v12897_v13  ;;  %v994_v9 = vpop.f32.mrb[11].mxu1  ;;  %10931 = vmatprep.subr.bf16.mxu0 %v13004_v19  ;;  %v13058_v13 = vld [vmem:[%s16443_s3 + $0xa0] sm:$0xff]  }
 0x130   : > { %v813_v53 = vadd.f32 %v13019_v27, %v750_v50  ;;  %v1058_v55 = vadd.f32 %v13025_v38, %v994_v9  ;;  %v1281_v57 = vsel %vm1261_vm0, %v1276_v39, %v13033_v47  ;;  %v13053_v10 = vor.u32 %v13036_v2, %v13033_v47 }
 0x131   : > { %v13060_v62 = vpack.c.bf16 %v815_v49, %v814_v42  ;;  %v13062_v63 = vpack.c.bf16 %v1060_v51, %v1059_v33  ;;  %10878 = vmatmul.mubr.bf16.vlgmr.msra.gmra.mrb[20].mxu1 %v1281_v57  ;;  %v13079_v33 = vld [vmem:[%s16443_s3 + $0xa8] sm:$0xff]   ;;  %v1645_v42 = vshll.u32 %v12910_v28, 16 }
 0x132   : > { %v828_v3 = vpack.c.bf16 %v813_v53, %v812_v48  ;;  %v1073_v15 = vpack.c.bf16 %v1058_v55, %v1057_v45  ;;  %v1289_v20 = vsel %vm1261_vm0, %v13053_v10, %v13044_v52  ;;  %11150 = vmatpush3.bf16.msra.mxu1 %v12539_v22  ;;  %10932 = vmatpush3.bf16.msra.mxu0 %v13004_v19 }
 0x133   : > { %839 = vst [vmem:[#allocation2 + $0x28] sm:$0xff] %v13060_v62  ;;  %1085 = vst [vmem:[#allocation2 + $0x78] sm:$0xff] %v13062_v63  ;;  %10881 = vmatprep.mubr.bf16.mxu1 %v1289_v20  ;;  %11151 = vmatprep.subr.bf16.mxu1 %v12540_v24  ;;  %v1301_v49 = vshll.u32 %v13060_v62, 16  ;;  %v1647_v20 = vrot.slane %v1645_v42, 1 }
 0x134   : > { %838 = vst [vmem:[#allocation2 + $0x20] sm:$0xff] %v828_v3  ;;  %1084 = vst [vmem:[#allocation2 + $0x70] sm:$0xff] %v1073_v15  ;;  %v10819_v36 = vpop.f32.mrb[12].mxu0  ;;  %v10855_v39 = vpop.f32.mrb[12].mxu1  ;;  %10917 = vmatprep.mubr.bf16.mxu0 %v13062_v63  ;;  %10933 = vmatprep.subr.bf16.mxu0 %v13058_v13 }
 0x135   : > { %v818_v43 = vadd.f32 %v10819_v36, %v12950_v40  ;;  %v1063_v45 = vadd.f32 %v10855_v39, %v12922_v30  ;;  %v763_v46 = vpop.f32.mrb[13].mxu0  ;;  %v1007_v48 = vpop.f32.mrb[13].mxu1  ;;  %v13096_v30 = vld [vmem:[%s16443_s3 + $0xb0] sm:$0xff]   ;;  %v13100_v40 = vshll.u32 %v12908_v26, 16  ;;  %v1303_v36 = vrot.slane %v1301_v49, 1 }
 0x136   : > { %v1061_v50 = vadd.f32 %v12861_v1, %v1007_v48  ;;  %v10820_v51 = vpop.f32.mrb[14].mxu0  ;;  %v10856_v9 = vpop.f32.mrb[14].mxu1  ;;  %11152 = vmatpush3.bf16.msra.mxu1 %v12540_v24  ;;  %10934 = vmatpush3.bf16.msra.mxu0 %v13058_v13  ;;  %v1643_v1 = vshrl.u32 %v12910_v28, 16  ;;  %v13123_v28 = vld [vmem:[%s16443_s3 + $0xb8] sm:$0xff]  }
 0x137   : > { %v819_v53 = vadd.f32 %v10820_v51, %v12955_v41  ;;  %v1064_v55 = vadd.f32 %v10856_v9, %v12961_v44  ;;  %v766_v57 = vpop.f32.mrb[15].mxu0  ;;  %v1010_v3 = vpop.f32.mrb[15].mxu1  ;;  %11153 = vmatprep.subr.bf16.mxu1 %v12803_v54  ;;  %10935 = vmatprep.subr.bf16.mxu0 %v13079_v33  ;;  %16555 = vst [vmem:[#allocation7_spill] sm:$0xff] %v13100_v40 }
 0x138   : > { %v816_v41 = vadd.f32 %v12871_v4, %v763_v46  ;;  %v817_v44 = vadd.f32 %v12876_v5, %v766_v57  ;;  %v1062_v15 = vadd.f32 %v12881_v7, %v1010_v3  ;;  %v16451_v5 = vshrl.u32 %v12981_v8, 16 }
 0x139   : > { %v13105_v22 = vpack.c.bf16 %v819_v53, %v818_v43  ;;  %v13107_v24 = vpack.c.bf16 %v1064_v55, %v1063_v45  ;;  %v1299_v7 = vshrl.u32 %v13060_v62, 16  ;;  %v1648_v46 = vor.u32 %v1647_v20, %v1643_v1 }
 0x13a   : > { %v13109_v39 = vpack.c.bf16 %v817_v44, %v816_v41  ;;  %v13111_v48 = vpack.c.bf16 %v1062_v15, %v1061_v50  ;;  %11154 = vmatpush3.bf16.msra.mxu1 %v12803_v54  ;;  %10936 = vmatpush3.bf16.msra.mxu0 %v13079_v33  ;;  %v1652_v62 = vrot.slane %v13100_v40, 1  ;;  %v1292_v53 = vor.u32 %v16451_v5, %v13044_v52 }
 0x13b   : > { %841 = vst [vmem:[#allocation2 + $0x38] sm:$0xff] %v13105_v22  ;;  %v1255_v4 = vld [vmem:[#allocation2 + $0x20] sm:$0x1]  ;;  %11155 = vmatprep.subr.bf16.mxu1 %v12813_v56  ;;  %10937 = vmatprep.subr.bf16.mxu0 %v13096_v30  ;;  %v1304_v55 = vor.u32 %v1303_v36, %v1299_v7 }
 0x13c   : > { %840 = vst [vmem:[#allocation2 + $0x30] sm:$0xff] %v13109_v39  ;;  %v10823_v54 = vpop.f32.mrb[16].mxu0  ;;  %v10859_v42 = vpop.f32.mrb[16].mxu1  ;;  %v1294_v43 = vshll.u32 %v1255_v4, 16  ;;  %10918 = vmatmul.mubr.bf16.gmra.mrb[28].mxu0 %v13111_v48  ;;  %v13128_v45 = vshll.u32 %v13109_v39, 16 }
 0x13d   : > { %v822_v49 = vadd.f32 %v10823_v54, %v13010_v21  ;;  %v1067_v50 = vadd.f32 %v10859_v42, %v12996_v16  ;;  %v779_v51 = vpop.f32.mrb[17].mxu0  ;;  %v1023_v9 = vpop.f32.mrb[17].mxu1  ;;  %10921 = vmatprep.mubr.bf16.mxu0 %v13107_v24  ;;  %v13141_v16 = vshll.u32 %v13105_v22, 16  ;;  %v13164_v42 = vsel %vm1261_vm0, %v1648_v46, %v1652_v62 }
 0x13e   : > { %v1065_v57 = vadd.f32 %v12915_v29, %v1023_v9  ;;  %v10824_v3 = vpop.f32.mrb[18].mxu0  ;;  %v10860_v41 = vpop.f32.mrb[18].mxu1  ;;  %v1296_v1 = vrot.slane %v1294_v43, 1  ;;  %11156 = vmatpush3.bf16.msra.mxu1 %v12813_v56  ;;  %v1308_v21 = vrot.slane %v13128_v45, 1  ;;  %10938 = vmatpush3.bf16.msra.mxu0 %v13096_v30  ;;  %v820_v44 = vadd.f32 %v12933_v34, %v779_v51 }
 0x13f   : > { %v823_v52 = vadd.f32 %v10824_v3, %v13019_v27  ;;  %v1068_v15 = vadd.f32 %v10860_v41, %v13025_v38  ;;  %v782_v20 = vpop.f32.mrb[19].mxu0  ;;  %v1026_v29 = vpop.f32.mrb[19].mxu1  ;;  %11157 = vmatprep.subr.bf16.mxu1 %v12823_v58  ;;  %10939 = vmatprep.subr.bf16.mxu0 %v13123_v28  ;;  %v13150_v56 = vshll.u32 %v12987_v14, 16  ;;  %v13161_v27 = vld [vmem:[%s16443_s3 + $0xc0] sm:$0xff]   ;;  %v1316_v51 = vrot.slane %v13141_v16, 1 }
 0x140   : > { %v821_v36 = vadd.f32 %v12938_v35, %v782_v20  ;;  %v1066_v4 = vadd.f32 %v12944_v37, %v1026_v29  ;;  %v1297_v7 = vsel %vm1261_vm0, %v1292_v53, %v1296_v1  ;;  %v13156_v34 = vsel %vm1261_vm0, %v1304_v55, %v1308_v21  ;;  %v13220_v20 = vld [vmem:[%s16443_s3 + $0xc8] sm:$0xff]  }
 0x141   : > { %16556 = vst [vmem:[#allocation8_spill] sm:$0xff] %v13150_v56  ;;  %v833_v38 = vpack.c.bf16 %v823_v52, %v822_v49  ;;  %v1078_v54 = vpack.c.bf16 %v1068_v15, %v1067_v50  ;;  %10882 = vmatmul.mubr.bf16.gmra.mrb[24].mxu1 %v1297_v7  ;;  %v13172_v37 = vshrl.u32 %v13109_v39, 16  ;;  %v13179_v46 = vshrl.u32 %v12987_v14, 16  ;;  %v1636_v52 = vld [vmem:[#allocation2 + $0x70] sm:$0x1]  ;;  %16562 = vst [vmem:[#allocation14_spill] sm:$0xff] %v13220_v20 }
 0x142   : > { %v13166_v43 = vpack.c.bf16 %v821_v36, %v820_v44  ;;  %v13168_v35 = vpack.c.bf16 %v1066_v4, %v1065_v57  ;;  %10885 = vmatprep.mubr.bf16.mxu1 %v13156_v34  ;;  %11158 = vmatpush3.bf16.msra.mxu1 %v12823_v58  ;;  %v13182_v49 = vshll.u32 %v12983_v11, 16  ;;  %v13188_v58 = vshrl.u32 %v13105_v22, 16 }
 0x143   : > { %843 = vst [vmem:[#allocation2 + $0x48] sm:$0xff] %v833_v38  ;;  %1089 = vst [vmem:[#allocation2 + $0x98] sm:$0xff] %v1078_v54  ;;  %11159 = vmatprep.subr.bf16.mxu1 %v12833_v60  ;;  %10940 = vmatpush3.bf16.msra.mxu0 %v13123_v28  ;;  %v1312_v50 = vor.u32 %v13172_v37, %v1308_v21  ;;  %v1660_v53 = vrot.slane %v13150_v56, 1  ;;  %v13196_v55 = vshrl.u32 %v12908_v26, 16  ;;  %v1681_v1 = vshll.u32 %v13062_v63, 16 }
 0x144   : > { %16557 = vst [vmem:[#allocation9_spill] sm:$0xff] %v13166_v43  ;;  %16558 = vst [vmem:[#allocation10_spill] sm:$0xff] %v13168_v35  ;;  %10922 = vmatmul.mubr.bf16.gmra.mrb[32].mxu0 %v13168_v35  ;;  %v13191_v9 = vshll.u32 %v13166_v43, 16  ;;  %10957 = vmatprep.subr.bf16.mxu0 %v13161_v27  ;;  %v1320_v57 = vor.u32 %v13188_v58, %v1316_v51  ;;  %v1679_v29 = vshrl.u32 %v13062_v63, 16  ;;  %v13224_v4 = vshll.u32 %v13111_v48, 16 }
 0x145   : > { %16559 = vst [vmem:[#allocation11_spill] sm:$0xff] %v13179_v46  ;;  %16560 = vst [vmem:[#allocation12_spill] sm:$0xff] %v13182_v49  ;;  %10941 = vmatprep.mubr.bf16.mxu0 %v13164_v42  ;;  %v1664_v41 = vor.u32 %v13179_v46, %v1660_v53  ;;  %v1656_v21 = vor.u32 %v13196_v55, %v1652_v62  ;;  %v13207_v44 = vsel %vm1261_vm0, %v1312_v50, %v1316_v51 }
 0x146   : > { %842 = vst [vmem:[#allocation2 + $0x40] sm:$0xff] %v13166_v43  ;;  %16561 = vst [vmem:[#allocation13_spill] sm:$0xff] %v13196_v55  ;;  %11160 = vmatpush3.bf16.msra.mxu1 %v12833_v60  ;;  %v1324_v3 = vrot.slane %v13191_v9, 1  ;;  %v1668_v60 = vrot.slane %v13182_v49, 1  ;;  %v1683_v36 = vrot.slane %v1681_v1, 1  ;;  %v13227_v7 = vshrl.u32 %v13166_v43, 16 }
 0x147   : > { %11161 = vmatprep.subr.bf16.mxu1 %v12840_v61  ;;  %16563 = vst [vmem:[#allocation15_spill] sm:$0xff] %v13224_v4  ;;  %v1661_v54 = vsel %vm1261_vm0, %v1656_v21, %v1660_v53  ;;  %v13236_v63 = vshrl.u32 %v12983_v11, 16  ;;  %v13243_v53 = vld [vmem:[%s16443_s3 + $0xd0] sm:$0xff]   ;;  %v13331_v43 = vrot.slane %v12983_v11, 4 }
 0x148   : > { %v13210_v26 = vsel %vm1261_vm0, %v1320_v57, %v1324_v3  ;;  %v1669_v62 = vsel %vm1261_vm0, %v1664_v41, %v1668_v60  ;;  %v13232_v51 = vor.u32 %v13227_v7, %v1324_v3  ;;  %16565 = vst [vmem:[#allocation17_spill] sm:$0xff] %v13243_v53  ;;  %v1684_v57 = vor.u32 %v1683_v36, %v1679_v29  ;;  %v13265_v36 = vld [vmem:[%s16443_s3 + $0xd8] sm:$0xff]  }
 0x149   : > { %10886 = vmatmul.mubr.bf16.gmra.mrb[28].mxu1 %v13207_v44  ;;  %16564 = vst [vmem:[#allocation16_spill] sm:$0xff] %v13236_v63  ;;  %v1688_v3 = vrot.slane %v13224_v4, 1  ;;  %v13247_v41 = vshll.u32 %v13107_v24, 16  ;;  %v1672_v21 = vor.u32 %v13236_v63, %v1668_v60  ;;  %16568 = vst [vmem:[#allocation20_spill] sm:$0xff] %v13265_v36 }
 0x14a   : > { %10889 = vmatprep.mubr.bf16.mxu1 %v13210_v26  ;;  %v1260_v15 = vld [vmem:[#allocation2 + $0x48] sm:$0x1]  ;;  %11162 = vmatpush3.bf16.msra.mxu1 %v12840_v61  ;;  %v1674_v61 = vshll.u32 %v1636_v52, 16  ;;  %v1641_v31 = vld [vmem:[#allocation2 + $0x98] sm:$0x1]  ;;  %16574 = vst [vmem:[#allocation26_spill] sm:$0xff] %v13331_v43 }
 0x14b   : > { %v1330_v38 = vshll.u32 %v1260_v15, 16  ;;  %11163 = vmatprep.subr.bf16.mxu1 %v12853_v0  ;;  %16566 = vst [vmem:[#allocation18_spill] sm:$0xff] %v13247_v41  ;;  %v13257_v15 = vshrl.u32 %v13111_v48, 16  ;;  %v1689_v29 = vsel %vm1261_vm0, %v1684_v57, %v1688_v3  ;;  %v1696_v60 = vrot.slane %v13247_v41, 1 }
 0x14c   : > { %10942 = vmatmul.mubr.bf16.vlgmr.msra.gmra.mrb[20].mxu0 %v1661_v54  ;;  %v1676_v52 = vrot.slane %v1674_v61, 1  ;;  %v1710_v2 = vshll.u32 %v1641_v31, 16  ;;  %v1896_v31 = vrot.slane %v13196_v55, 3 }
 0x14d   : > { %v1332_v50 = vrot.slane %v1330_v38, 1  ;;  %10958 = vmatpush3.bf16.msra.mxu0 %v13161_v27  ;;  %10945 = vmatprep.mubr.bf16.mxu0 %v1669_v62  ;;  %16567 = vst [vmem:[#allocation19_spill] sm:$0xff] %v13257_v15  ;;  %v13269_v38 = vshll.u32 %v13168_v35, 16  ;;  %v1692_v57 = vor.u32 %v13257_v15, %v1688_v3 }
 0x14e   : > { %11164 = vmatpush3.bf16.msra.mxu1 %v12853_v0  ;;  %10959 = vmatprep.subr.bf16.mxu0 %v13220_v20  ;;  %v12541_v0 = vld [vmem:[%s16443_s3] sm:$0xff]   ;;  %v1677_v61 = vsel %vm1261_vm0, %v1672_v21, %v1676_v52 }
 0x14f   : > { %v1333_v1 = vsel %vm1261_vm0, %v13232_v51, %v1332_v50  ;;  %11181 = vmatprep.subr.bf16.mxu1 %v12541_v0  ;;  %16569 = vst [vmem:[#allocation21_spill] sm:$0xff] %v13269_v38  ;;  %v13273_v50 = vshrl.u32 %v13107_v24, 16  ;;  %v1704_v5 = vrot.slane %v13269_v38, 1  ;;  %v13283_v52 = vld [vmem:[%s16443_s3 + $0xe0] sm:$0xff]   ;;  %v13287_v3 = vsel %vm1261_vm0, %v1692_v57, %v1696_v60 }
 0x150   : > { %16571 = vst [vmem:[#allocation23_spill] sm:$0xff] %v13283_v52 }
 0x151   : > { %10890 = vmatmul.mubr.bf16.gmra.mrb[32].mxu1 %v1333_v1  ;;  %10960 = vmatpush3.bf16.msra.mxu0 %v13220_v20  ;;  %16570 = vst [vmem:[#allocation22_spill] sm:$0xff] %v13273_v50  ;;  %v1883_v1 = vld [vmem:[#allocation2 + $0x50] sm:$0xf8]  ;;  %v1700_v18 = vor.u32 %v13273_v50, %v1696_v60  ;;  %v13295_v20 = vld [vmem:[%s16443_s3 + $0xe8] sm:$0xff]   ;;  %v13302_v60 = vshrl.u32 %v13168_v35, 16 }
 0x152   : > { %11165 = vmatprep.mubr.bf16.mxu1 %v13164_v42  ;;  %10961 = vmatprep.subr.bf16.mxu0 %v13243_v53  ;;  %v3273_v42 = vld [vmem:[#allocation2 + $0x70] sm:$0x1]  ;;  %v1889_v17 = vshrl.u32 %v1883_v1, 16  ;;  %v1892_v23 = vshll.u32 %v1883_v1, 16  ;;  %v1712_v1 = vrot.slane %v1710_v2, 1 }
 0x153   : > { %16572 = vst [vmem:[#allocation24_spill] sm:$0xff] %v13302_v60  ;;  %v13310_v57 = vor.u32 %v13302_v60, %v1704_v5 }
 0x154   : > { %10946 = vmatmul.mubr.bf16.gmra.mrb[24].mxu0 %v1677_v61  ;;  %v3311_v61 = vshll.u32 %v3273_v42, 16  ;;  %v1894_v42 = vrot.slane %v1892_v23, 4 }
 0x155   : > { %10962 = vmatpush3.bf16.msra.mxu0 %v13243_v53  ;;  %10949 = vmatprep.mubr.bf16.mxu0 %v1689_v29  ;;  %v13290_v53 = vsel %vm1261_vm0, %v1700_v18, %v1704_v5  ;;  %v1897_v18 = vrot.slane %v13100_v40, 4  ;;  %v1901_v40 = vrot.slane %v13150_v56, 4  ;;  %v1713_v55 = vsel %vm1261_vm0, %v13310_v57, %v1712_v1 }
 0x156   : > { %10963 = vmatprep.subr.bf16.mxu0 %v13265_v36  ;;  %v13359_v56 = vrot.slane %v13111_v48, 4 }
 0x157   : > { %v1898_v23 = vor.u32 %v1897_v18, %v1896_v31  ;;  %v1904_v18 = vrot.slane %v13236_v63, 3 }
 0x158   : > { %16578 = vst [vmem:[#allocation30_spill] sm:$0xff] %v13359_v56 }
 0x159   : > { %11166 = vmatmul.mubr.bf16.vlgmr.msra.gmra.mrb[36].mxu1 %v1661_v54  ;;  %10964 = vmatpush3.bf16.msra.mxu0 %v13265_v36  ;;  %v12542_v54 = vld [vmem:[%s16443_s3 + $0x8] sm:$0xff]   ;;  %v13313_v36 = vld [vmem:[#allocation2 + $0x70] sm:$0xf] }
 0x15a   : > { %11182 = vmatpush3.bf16.msra.mxu1 %v12541_v0  ;;  %11169 = vmatprep.mubr.bf16.mxu1 %v1669_v62  ;;  %v3313_v62 = vrot.slane %v3311_v61, 1  ;;  %v1891_v0 = vrot.slane %v1889_v17, 3  ;;  %v12543_v61 = vld [vmem:[%s16443_s3 + $0x10] sm:$0xff]   ;;  %v2336_v31 = vrot.slane %v13313_v36, 4 }
 0x15b   : > { %11183 = vmatprep.subr.bf16.mxu1 %v12542_v54  ;;  %10965 = vmatprep.subr.bf16.mxu0 %v13283_v52  ;;  %v13321_v17 = vld [vmem:[%s16443_s3 + $0xf0] sm:$0xff]  }
 0x15c   : > { %10950 = vmatmul.mubr.bf16.gmra.mrb[28].mxu0 %v13287_v3  ;;  %16573 = vst [vmem:[#allocation25_spill] sm:$0xff] %v13321_v17  ;;  %v3314_v5 = vsel %vm1261_vm0, %v1672_v21, %v3313_v62  ;;  %v1895_v2 = vor.u32 %v1894_v42, %v1891_v0  ;;  %v13337_v21 = vld [vmem:[%s16443_s3 + $0xf8] sm:$0xff]   ;;  %v1905_v62 = vrot.slane %v13182_v49, 4  ;;  %v13356_v49 = vsel %vm2129_vm2, %v13331_v43, %v2336_v31 }
 0x15d   : > { %10966 = vmatpush3.bf16.msra.mxu0 %v13283_v52  ;;  %10953 = vmatprep.mubr.bf16.mxu0 %v13290_v53  ;;  %v16474_v52 = vrot.slane %v12987_v14, 4  ;;  %16575 = vst [vmem:[#allocation27_spill] sm:$0xff] %v13337_v21  ;;  %v13341_v0 = vld [vmem:[#allocation2 + $0x98] sm:$0xf]  ;;  %16577 = vst [vmem:[#allocation29_spill] sm:$0xff] %v13356_v49  ;;  %v1909_v49 = vshrl.u32 %v13313_v36, 16 }
 0x15e   : > { %11184 = vmatpush3.bf16.msra.mxu1 %v12542_v54  ;;  %10967 = vmatprep.subr.bf16.mxu0 %v13295_v20  ;;  %v1900_v54 = vrot.slane %v13179_v46, 3  ;;  %v12544_v42 = vld [vmem:[%s16443_s3 + $0x18] sm:$0xff]   ;;  %v13362_v46 = vld [vmem:[#allocation2 + $0x8] sm:$0xff] }
 0x15f   : > { %11185 = vmatprep.subr.bf16.mxu1 %v12543_v61  ;;  %v13351_v1 = vsel %vm2129_vm2, %v16474_v52, %v13331_v43  ;;  %v2341_v52 = vrot.slane %v13107_v24, 4  ;;  %v13370_v43 = vor.u32 %v1905_v62, %v1904_v18  ;;  %v13395_v62 = vshll.u32 %v13362_v46, 16 }
 0x160   : > { %16576 = vst [vmem:[#allocation28_spill] sm:$0xff] %v13351_v1  ;;  %v1902_v63 = vor.u32 %v1901_v40, %v1900_v54  ;;  %v12545_v40 = vld [vmem:[%s16443_s3 + $0x20] sm:$0xff]   ;;  %v1926_v1 = vrot.slane %v13224_v4, 4 }
 0x161   : > { %11170 = vmatmul.mubr.bf16.gmra.mrb[40].mxu1 %v3314_v5  ;;  %10968 = vmatpush3.bf16.msra.mxu0 %v13295_v20  ;;  %v1885_v5 = vld [vmem:[#allocation2 + $0x78] sm:$0xf8]  ;;  %v13380_v54 = vld [vmem:[%s16443_s3 + $0x100] sm:$0xff]  }
 0x162   : > { %11186 = vmatpush3.bf16.msra.mxu1 %v12543_v61  ;;  %11173 = vmatprep.mubr.bf16.mxu1 %v1689_v29  ;;  %v3278_v29 = vld [vmem:[#allocation2 + $0x98] sm:$0x1]  ;;  %v1899_v61 = vsel %vm1887_vm1, %v1895_v2, %v1898_v23  ;;  %v2345_v2 = vrot.slane %v13341_v0, 4 }
 0x163   : > { %11187 = vmatprep.subr.bf16.mxu1 %v12544_v42  ;;  %10969 = vmatprep.subr.bf16.mxu0 %v13321_v17  ;;  %v3347_v31 = vshll.u32 %v3278_v29, 16  ;;  %v13384_v29 = vsel %vm2129_vm2, %v13359_v56, %v2341_v52  ;;  %v13400_v56 = vshrl.u32 %v13362_v46, 16 }
 0x164   : > { %10954 = vmatmul.mubr.bf16.gmra.mrb[32].mxu0 %v1713_v55  ;;  %v13366_v55 = vrot.slane %v13168_v35, 4  ;;  %16580 = vst [vmem:[#allocation32_spill] sm:$0xff] %v13384_v29  ;;  %v12546_v29 = vld [vmem:[%s16443_s3 + $0x28] sm:$0xff]  }
 0x165   : > { %10970 = vmatpush3.bf16.msra.mxu0 %v13321_v17  ;;  %10973 = vmatprep.mubr.bf16.mxu0 %v1899_v61  ;;  %v1912_v61 = vshll.u32 %v13313_v36, 16  ;;  %v1921_v17 = vshll.u32 %v1885_v5, 16 }
 0x166   : > { %16579 = vst [vmem:[#allocation31_spill] sm:$0xff] %v13366_v55  ;;  %11188 = vmatpush3.bf16.msra.mxu1 %v12544_v42  ;;  %10971 = vmatprep.subr.bf16.mxu0 %v13337_v21  ;;  %v1918_v42 = vshrl.u32 %v1885_v5, 16  ;;  %v13388_v18 = vsel %vm2129_vm2, %v2341_v52, %v13366_v55  ;;  %v13392_v36 = vsel %vm2129_vm2, %v13366_v55, %v2345_v2  ;;  %v16486_v52 = vrot.slane %v12983_v11, 7  ;;  %v13412_v55 = vld [vmem:[%s16443_s3 + $0x108] sm:$0xff]  }
 0x167   : > { %11189 = vmatprep.subr.bf16.mxu1 %v12545_v40  ;;  %16581 = vst [vmem:[#allocation33_spill] sm:$0xff] %v13388_v18  ;;  %16582 = vst [vmem:[#allocation34_spill] sm:$0xff] %v13392_v36  ;;  %v3349_v2 = vrot.slane %v3347_v31, 1  ;;  %v1903_v5 = vsel %vm1887_vm1, %v1898_v23, %v1902_v63  ;;  %v1911_v36 = vrot.slane %v1909_v49, 3  ;;  %v16583_v23 = vrot.slane %v12987_v14, 7  ;;  %v13426_v49 = vld [vmem:[#allocation2 + $0x18] sm:$0xff] }
 0x168   : > { %v1920_v31 = vrot.slane %v1918_v42, 3  ;;  %v1923_v18 = vrot.slane %v1921_v17, 4  ;;  %v3199_v42 = vrot.slane %v13395_v62, 1  ;;  %v12547_v17 = vld [vmem:[%s16443_s3 + $0x30] sm:$0xff]  }
 0x169   : > { %11174 = vmatmul.mubr.bf16.gmra.mrb[44].mxu1 %v13287_v3  ;;  %10972 = vmatpush3.bf16.msra.mxu0 %v13337_v21  ;;  %v1907_v3 = vsel %vm1887_vm1, %v1902_v63, %v13370_v43  ;;  %v13423_v63 = vsel %vm2524_vm3, %v16583_v23, %v16486_v52  ;;  %v1925_v21 = vrot.slane %v13257_v15, 3  ;;  %v16584_v23 = vrot.slane %v13111_v48, 7 }
 0x16a   : > { %11190 = vmatpush3.bf16.msra.mxu1 %v12545_v40  ;;  %11177 = vmatprep.mubr.bf16.mxu1 %v13290_v53  ;;  %v1914_v53 = vrot.slane %v1912_v61, 4  ;;  %v2537_v40 = vrot.slane %v13107_v24, 7  ;;  %v16487_v61 = vrot.slane %v13168_v35, 7  ;;  %v4016_v15 = vrot.slane %v13400_v56, 4 }
 0x16b   : > { %11191 = vmatprep.subr.bf16.mxu1 %v12546_v29  ;;  %10989 = vmatprep.subr.bf16.mxu0 %v13380_v54  ;;  %v1927_v4 = vor.u32 %v1926_v1, %v1925_v21  ;;  %v4017_v35 = vrot.slane %v13395_v62, 5  ;;  %v1930_v21 = vrot.slane %v13247_v41, 4  ;;  %v1941_v41 = vshll.u32 %v13341_v0, 16 }
 0x16c   : > { %10974 = vmatmul.mubr.bf16.vlgmr.msra.gmra.mrb[20].mxu0 %v1903_v5  ;;  %v13436_v52 = vsel %vm2524_vm3, %v16584_v23, %v2537_v40  ;;  %v13442_v24 = vsel %vm2524_vm3, %v2537_v40, %v16487_v61  ;;  %v3350_v5 = vsel %vm1261_vm0, %v13310_v57, %v3349_v2  ;;  %v13455_v23 = vshll.u32 %v13426_v49, 16 }
 0x16d   : > { %10977 = vmatprep.mubr.bf16.mxu0 %v1907_v3  ;;  %10990 = vmatpush3.bf16.msra.mxu0 %v13380_v54  ;;  %v1915_v3 = vor.u32 %v1914_v53, %v1911_v36  ;;  %v13458_v40 = vshrl.u32 %v13426_v49, 16  ;;  %v1924_v61 = vor.u32 %v1923_v18, %v1920_v31  ;;  %v3200_v57 = vsel %vm1261_vm0, %v12979_v6, %v3199_v42  ;;  %v13468_v36 = vld [vmem:[%s16443_s3 + $0x118] sm:$0xff]  }
 0x16e   : > { %11192 = vmatpush3.bf16.msra.mxu1 %v12546_v29  ;;  %10991 = vmatprep.subr.bf16.mxu0 %v13412_v55  ;;  %v13452_v29 = vld [vmem:[%s16443_s3 + $0x110] sm:$0xff]   ;;  %v1929_v18 = vrot.slane %v13273_v50, 3  ;;  %v13472_v1 = vor.u32 %v4017_v35, %v4016_v15  ;;  %v3203_v2 = vor.u32 %v13400_v56, %v3199_v42  ;;  %v12548_v6 = vld [vmem:[%s16443_s3 + $0x38] sm:$0xff]   ;;  %v1933_v35 = vrot.slane %v13302_v60, 3 }
 0x16f   : > { %11193 = vmatprep.subr.bf16.mxu1 %v12547_v17  ;;  %v1916_v53 = vsel %vm1887_vm1, %v13370_v43, %v1915_v3  ;;  %v4024_v31 = vrot.slane %v13458_v40, 4  ;;  %v1934_v15 = vrot.slane %v13269_v38, 4  ;;  %v4025_v42 = vrot.slane %v13455_v23, 5  ;;  %v12549_v38 = vld [vmem:[%s16443_s3 + $0x80] sm:$0xff]  }
 0x170   : > { %v2742_v43 = vrot.slane %v13172_v37, 7  ;;  %v1931_v3 = vor.u32 %v1930_v21, %v1929_v18  ;;  %v2745_v18 = vrot.slane %v13188_v58, 7  ;;  %v3208_v21 = vsel %vm1261_vm0, %v3203_v2, %v13033_v47  ;;  %v13520_v47 = vld [vmem:[%s16443_s3 + $0x128] sm:$0xff]  }
 0x171   : > { %11178 = vmatmul.mubr.bf16.gmra.mrb[48].mxu1 %v3350_v5  ;;  %10992 = vmatpush3.bf16.msra.mxu0 %v13412_v55  ;;  %v3215_v5 = vrot.slane %v13455_v23, 1  ;;  %v4045_v50 = vrot.slane %v13172_v37, 4 }
 0x172   : > { %11194 = vmatpush3.bf16.msra.mxu1 %v12547_v17  ;;  %11197 = vmatprep.mubr.bf16.mxu1 %v3200_v57  ;;  %v1928_v17 = vsel %vm1887_vm1, %v1924_v61, %v1927_v4  ;;  %v13488_v57 = vld [vmem:[#allocation2 + $0x20] sm:$0x1]  ;;  %v1938_v61 = vshrl.u32 %v13341_v0, 16  ;;  %v2746_v0 = vor.u32 %v2745_v18, %v13141_v16 }
 0x173   : > { %11195 = vmatprep.subr.bf16.mxu1 %v12548_v6  ;;  %10993 = vmatprep.subr.bf16.mxu0 %v13452_v29  ;;  %v3216_v60 = vsel %vm1261_vm0, %v13053_v10, %v3215_v5  ;;  %v16498_v10 = vrot.slane %v13227_v7, 7 }
 0x174   : > { %10978 = vmatmul.mubr.bf16.gmra.mrb[24].mxu0 %v1916_v53  ;;  %v13493_v53 = vor.u32 %v4025_v42, %v4024_v31  ;;  %v3221_v31 = vshll.u32 %v13488_v57, 16  ;;  %v1935_v42 = vor.u32 %v1934_v15, %v1933_v35  ;;  %v1940_v2 = vrot.slane %v1938_v61, 3 }
 0x175   : > { %10981 = vmatprep.mubr.bf16.mxu0 %v1928_v17  ;;  %10994 = vmatpush3.bf16.msra.mxu0 %v13452_v29  ;;  %v13501_v17 = vld [vmem:[%s16443_s3 + $0x120] sm:$0xff]   ;;  %v4046_v35 = vrot.slane %v13128_v45, 5  ;;  %v1943_v15 = vrot.slane %v1941_v41, 4  ;;  %v13527_v37 = vsel %vm2716_vm4, %v2742_v43, %v2746_v0  ;;  %v4053_v0 = vrot.slane %v13227_v7, 4 }
 0x176   : > { %11196 = vmatpush3.bf16.msra.mxu1 %v12548_v6  ;;  %10995 = vmatprep.subr.bf16.mxu0 %v13468_v36  ;;  %16585 = vst [vmem:[#allocation35_spill] sm:$0xff] %v13493_v53  ;;  %v13505_v6 = vor.u32 %v2742_v43, %v13128_v45  ;;  %v1932_v53 = vsel %vm1887_vm1, %v1927_v4, %v1931_v3  ;;  %v4049_v4 = vrot.slane %v13188_v58, 4  ;;  %v2115_v41 = vld [vmem:[#allocation2] sm:$0xf0] }
 0x177   : > { %11213 = vmatprep.subr.bf16.mxu1 %v12549_v38  ;;  %v1936_v61 = vsel %vm1887_vm1, %v1931_v3, %v1935_v42  ;;  %v2749_v45 = vor.u32 %v16498_v10, %v13191_v9  ;;  %v1944_v3 = vor.u32 %v1943_v15, %v1940_v2 }
 0x179   : > { %11198 = vmatmul.mubr.bf16.vlgmr.msra.gmra.mrb[36].mxu1 %v3208_v21  ;;  %10996 = vmatpush3.bf16.msra.mxu0 %v13468_v36  ;;  %v13532_v21 = vor.u32 %v4046_v35, %v4045_v50  ;;  %v13543_v58 = vsel %vm2716_vm4, %v2745_v18, %v2749_v45  ;;  %v4054_v50 = vrot.slane %v13191_v9, 5  ;;  %v2131_v9 = vrot.slane %v12906_v25, 4  ;;  %v13566_v18 = vld [vmem:[%s16443_s3 + $0x138] sm:$0xff]  }
 0x17a   : > { %11214 = vmatpush3.bf16.msra.mxu1 %v12549_v38  ;;  %11201 = vmatprep.mubr.bf16.mxu1 %v3216_v60  ;;  %v4050_v38 = vrot.slane %v13141_v16, 5  ;;  %v3223_v60 = vrot.slane %v3221_v31, 1  ;;  %v3219_v16 = vor.u32 %v13458_v40, %v3215_v5  ;;  %v2130_v31 = vrot.slane %v2115_v41, 4  ;;  %v3553_v41 = vld [vmem:[#allocation2] sm:$0xfe] }
 0x17b   : > { %11215 = vmatprep.subr.bf16.mxu1 %v12928_v32  ;;  %10997 = vmatprep.subr.bf16.mxu0 %v13501_v17  ;;  %v13557_v35 = vor.u32 %v4054_v50, %v4053_v0  ;;  %v1945_v15 = vsel %vm1887_vm1, %v1935_v42, %v1944_v3  ;;  %v13590_v42 = vrot.slane %v12985_v12, 4  ;;  %v2116_v0 = vld [vmem:[#allocation2 + $0x20] sm:$0xf]  ;;  %v2117_v50 = vld [vmem:[#allocation2 + $0x28] sm:$0xf0] }
 0x17c   : > { %10982 = vmatmul.mubr.bf16.gmra.mrb[28].mxu0 %v1932_v53  ;;  %v4051_v43 = vor.u32 %v4050_v38, %v4049_v4  ;;  %v13550_v53 = vld [vmem:[%s16443_s3 + $0x130] sm:$0xff]   ;;  %v3224_v5 = vsel %vm1261_vm0, %v3219_v16, %v3223_v60  ;;  %v13578_v4 = vld [vmem:[#allocation2 + $0x48] sm:$0x1]  ;;  %v16496_v60 = vrot.slane %v13458_v40, 7  ;;  %v3567_v16 = vrot.slane %v13362_v46, 1 }
 0x17d   : > { %10985 = vmatprep.mubr.bf16.mxu0 %v1936_v61  ;;  %10998 = vmatpush3.bf16.msra.mxu0 %v13501_v17  ;;  %v13595_v61 = vld [vmem:[%s16443_s3 + $0x140] sm:$0xff]   ;;  %v3257_v45 = vshll.u32 %v13578_v4, 16  ;;  %v2137_v3 = vrot.slane %v2116_v0, 4 }
 0x17e   : > { %11216 = vmatpush3.bf16.msra.mxu1 %v12928_v32  ;;  %10999 = vmatprep.subr.bf16.mxu0 %v13520_v47  ;;  %v13554_v32 = vsel %vm4007_vm5, %v13532_v21, %v4051_v43  ;;  %v13570_v2 = vsel %vm4007_vm5, %v4051_v43, %v13557_v35  ;;  %v13611_v43 = vld [vmem:[%s16443_s3 + $0x148] sm:$0xff]  }
 0x17f   : > { %11217 = vmatprep.subr.bf16.mxu1 %v12974_v59 }
 0x181   : > { %11202 = vmatmul.mubr.bf16.gmra.mrb[40].mxu1 %v3224_v5  ;;  %11000 = vmatpush3.bf16.msra.mxu0 %v13520_v47  ;;  %v13627_v5 = vld [vmem:[%s16443_s3 + $0x150] sm:$0xff]  }
 0x182   : > { %11218 = vmatpush3.bf16.msra.mxu1 %v12974_v59  ;;  %11205 = vmatprep.mubr.bf16.mxu1 %v13156_v34  ;;  %v16497_v59 = vrot.slane %v13400_v56, 7  ;;  %v2132_v34 = vsel %vm2129_vm2, %v2130_v31, %v2131_v9 }
 0x183   : > { %11219 = vmatprep.subr.bf16.mxu1 %v13004_v19  ;;  %11001 = vmatprep.subr.bf16.mxu0 %v13550_v53 }
 0x184   : > { %10986 = vmatmul.mubr.bf16.gmra.mrb[32].mxu0 %v1945_v15  ;;  %v13583_v38 = vor.u32 %v16497_v59, %v13395_v62  ;;  %v13600_v62 = vor.u32 %v16496_v60, %v13455_v23  ;;  %v2134_v23 = vsel %vm2129_vm2, %v2131_v9, %v13590_v42  ;;  %v2139_v9 = vrot.slane %v2117_v50, 4  ;;  %v16587_v50 = vld [vmem:[#allocation14_spill] sm:$0xff]  ;;  %v16594_v60 = vld [vmem:[#allocation27_spill] sm:$0xff]  ;;  %v16595_v59 = vld [vmem:[#allocation29_spill] sm:$0xff] }
 0x185   : > { %11002 = vmatpush3.bf16.msra.mxu0 %v13550_v53  ;;  %11005 = vmatprep.mubr.bf16.mxu0 %v2132_v34  ;;  %v13632_v15 = vrot.slane %v13109_v39, 4  ;;  %v13640_v34 = vld [vmem:[%s16443_s3 + $0x158] sm:$0xff]  }
 0x186   : > { %11220 = vmatpush3.bf16.msra.mxu1 %v13004_v19  ;;  %11003 = vmatprep.subr.bf16.mxu0 %v13566_v18  ;;  %v2135_v19 = vrot.slane %v12981_v8, 4 }
 0x187   : > { %11221 = vmatprep.subr.bf16.mxu1 %v13058_v13 }
 0x189   : > { %11206 = vmatmul.mubr.bf16.gmra.mrb[44].mxu1 %v13207_v44  ;;  %11004 = vmatpush3.bf16.msra.mxu0 %v13566_v18  ;;  %v3259_v44 = vrot.slane %v3257_v45, 1  ;;  %v3569_v45 = vrot.slane %v12985_v12, 1  ;;  %v13657_v12 = vld [vmem:[%s16443_s3 + $0x160] sm:$0xff]  }
 0x18a   : > { %11222 = vmatpush3.bf16.msra.mxu1 %v13058_v13  ;;  %11209 = vmatprep.mubr.bf16.mxu1 %v13210_v26  ;;  %v2136_v13 = vsel %vm2129_vm2, %v13590_v42, %v2135_v19  ;;  %v3566_v26 = vrot.slane %v3553_v41, 1  ;;  %v2141_v41 = vsel %vm2129_vm2, %v2139_v9, %v13632_v15 }
 0x18b   : > { %11223 = vmatprep.subr.bf16.mxu1 %v13079_v33  ;;  %11021 = vmatprep.subr.bf16.mxu0 %v13595_v61  ;;  %v3260_v31 = vsel %vm1261_vm0, %v13232_v51, %v3259_v44  ;;  %v2138_v51 = vsel %vm2129_vm2, %v2135_v19, %v2137_v3  ;;  %v2142_v19 = vrot.slane %v13105_v22, 4  ;;  %v16586_v44 = vld [vmem:[#allocation9_spill] sm:$0xff]  ;;  %v3573_v3 = vrot.slane %v13488_v57, 1 }
 0x18c   : > { %11006 = vmatmul.mubr.bf16.vlgmr.msra.gmra.mrb[20].mxu0 %v2134_v23  ;;  %v3570_v23 = vsel %vm3565_vm6, %v3567_v16, %v3569_v45  ;;  %v16588_v57 = vld [vmem:[#allocation17_spill] sm:$0xff] }
 0x18d   : > { %11009 = vmatprep.mubr.bf16.mxu0 %v2136_v13  ;;  %11022 = vmatpush3.bf16.msra.mxu0 %v13595_v61  ;;  %v13661_v13 = vrot.slane %v16586_v44, 4 }
 0x18e   : > { %11224 = vmatpush3.bf16.msra.mxu1 %v13079_v33  ;;  %11023 = vmatprep.subr.bf16.mxu0 %v13611_v43  ;;  %v3568_v33 = vsel %vm3565_vm6, %v3566_v26, %v3567_v16  ;;  %v13669_v26 = vld [vmem:[%s16443_s3 + $0x168] sm:$0xff]   ;;  %v13674_v16 = vsel %vm2129_vm2, %v13632_v15, %v2142_v19 }
 0x18f   : > { %11225 = vmatprep.subr.bf16.mxu1 %v13096_v30 }
 0x191   : > { %11210 = vmatmul.mubr.bf16.gmra.mrb[48].mxu1 %v3260_v31  ;;  %11024 = vmatpush3.bf16.msra.mxu0 %v13611_v43  ;;  %v2118_v31 = vld [vmem:[#allocation2 + $0x48] sm:$0xf] }
 0x192   : > { %11226 = vmatpush3.bf16.msra.mxu1 %v13096_v30  ;;  %11229 = vmatprep.mubr.bf16.mxu1 %v3568_v33  ;;  %v3571_v30 = vrot.slane %v13426_v49, 1  ;;  %v3576_v33 = vrot.slane %v13109_v39, 1 }
 0x193   : > { %11227 = vmatprep.subr.bf16.mxu1 %v13123_v28  ;;  %11025 = vmatprep.subr.bf16.mxu0 %v13627_v5 }
 0x194   : > { %11010 = vmatmul.mubr.bf16.gmra.mrb[24].mxu0 %v2138_v51  ;;  %v3572_v0 = vsel %vm3565_vm6, %v3569_v45, %v3571_v30  ;;  %v2317_v51 = vld [vmem:[#allocation2 + $0x50] sm:$0xf0]  ;;  %v2146_v45 = vrot.slane %v2118_v31, 4  ;;  %v3578_v31 = vrot.slane %v13105_v22, 1 }
 0x195   : > { %11013 = vmatprep.mubr.bf16.mxu0 %v2141_v41  ;;  %11026 = vmatpush3.bf16.msra.mxu0 %v13627_v5  ;;  %v13692_v41 = vld [vmem:[%s16443_s3 + $0x170] sm:$0xff]   ;;  %v2329_v39 = vrot.slane %v2317_v51, 4  ;;  %v3580_v51 = vrot.slane %v16586_v44, 1  ;;  %v13729_v44 = vld [vmem:[#allocation2] sm:$0xf0] }
 0x196   : > { %11228 = vmatpush3.bf16.msra.mxu1 %v13123_v28  ;;  %11027 = vmatprep.subr.bf16.mxu0 %v13640_v34  ;;  %v3554_v28 = vld [vmem:[#allocation2 + $0x28] sm:$0xfe]  ;;  %v3579_v22 = vsel %vm3565_vm6, %v3576_v33, %v3578_v31 }
 0x197   : > { %11245 = vmatprep.subr.bf16.mxu1 %v13161_v27  ;;  %v3575_v9 = vrot.slane %v3554_v28, 1 }
 0x199   : > { %11230 = vmatmul.mubr.bf16.vlgmr.msra.gmra.mrb[36].mxu1 %v3570_v23  ;;  %11028 = vmatpush3.bf16.msra.mxu0 %v13640_v34  ;;  %v13695_v23 = vld [vmem:[#allocation2 + $0x58] sm:$0xff]  ;;  %v3577_v28 = vsel %vm3565_vm6, %v3575_v9, %v3576_v33 }
 0x19a   : > { %11246 = vmatpush3.bf16.msra.mxu1 %v13161_v27  ;;  %11233 = vmatprep.mubr.bf16.mxu1 %v3572_v0  ;;  %v13681_v27 = vsel %vm2129_vm2, %v2142_v19, %v13661_v13  ;;  %v3574_v19 = vsel %vm3565_vm6, %v3571_v30, %v3573_v3  ;;  %v13698_v0 = vrot.slane %v13695_v23, 4  ;;  %v16589_v30 = vld [vmem:[#allocation20_spill] sm:$0xff]  ;;  %v2147_v3 = vsel %vm2129_vm2, %v13661_v13, %v2146_v45  ;;  %v13723_v45 = vld [vmem:[%s16443_s3 + $0x180] sm:$0xff]  }
 0x19b   : > { %11247 = vmatprep.subr.bf16.mxu1 %v16587_v50  ;;  %11029 = vmatprep.subr.bf16.mxu0 %v13657_v12 }
 0x19c   : > { %11014 = vmatmul.mubr.bf16.gmra.mrb[28].mxu0 %v13674_v16  ;;  %v2331_v9 = vsel %vm2129_vm2, %v2329_v39, %v13698_v0  ;;  %v13734_v39 = vld [vmem:[%s16443_s3 + $0x188] sm:$0xff]  }
 0x19d   : > { %11017 = vmatprep.mubr.bf16.mxu0 %v13681_v27  ;;  %11030 = vmatpush3.bf16.msra.mxu0 %v13657_v12 }
 0x19e   : > { %11248 = vmatpush3.bf16.msra.mxu1 %v16587_v50  ;;  %11031 = vmatprep.subr.bf16.mxu0 %v13669_v26  ;;  %v13706_v50 = vld [vmem:[%s16443_s3 + $0x178] sm:$0xff]  }
 0x19f   : > { %11249 = vmatprep.subr.bf16.mxu1 %v16588_v57 }
 0x1a1   : > { %11234 = vmatmul.mubr.bf16.gmra.mrb[40].mxu1 %v3574_v19  ;;  %11032 = vmatpush3.bf16.msra.mxu0 %v13669_v26  ;;  %v3581_v19 = vsel %vm3565_vm6, %v3578_v31, %v3580_v51  ;;  %v3714_v31 = vrot.slane %v13362_v46, 4 }
 0x1a2   : > { %11250 = vmatpush3.bf16.msra.mxu1 %v16588_v57  ;;  %11237 = vmatprep.mubr.bf16.mxu1 %v3577_v28  ;;  %v16590_v57 = vld [vmem:[#allocation23_spill] sm:$0xff]  ;;  %v16591_v28 = vrot.slane %v12987_v14, 4 }
 0x1a3   : > { %11251 = vmatprep.subr.bf16.mxu1 %v16589_v30  ;;  %11033 = vmatprep.subr.bf16.mxu0 %v13692_v41 }
 0x1a4   : > { %11018 = vmatmul.mubr.bf16.gmra.mrb[32].mxu0 %v2147_v3  ;;  %v13741_v33 = vsel %vm2129_vm2, %v13698_v0, %v16591_v28  ;;  %v3713_v3 = vrot.slane %v13729_v44, 4 }
 0x1a5   : > { %11034 = vmatpush3.bf16.msra.mxu0 %v13692_v41  ;;  %11037 = vmatprep.mubr.bf16.mxu0 %v2331_v9  ;;  %v16592_v9 = vld [vmem:[#allocation28_spill] sm:$0xff] }
 0x1a6   : > { %11252 = vmatpush3.bf16.msra.mxu1 %v16589_v30  ;;  %11035 = vmatprep.subr.bf16.mxu0 %v13706_v50  ;;  %v3582_v30 = vrot.slane %v13578_v4, 1  ;;  %v13756_v4 = vld [vmem:[%s16443_s3 + $0x190] sm:$0xff]   ;;  %v3715_v46 = vsel %vm2129_vm2, %v3713_v3, %v3714_v31  ;;  %v3718_v3 = vrot.slane %v13426_v49, 4 }
 0x1a7   : > { %11253 = vmatprep.subr.bf16.mxu1 %v16590_v57 }
 0x1a8   : > { %v3719_v49 = vsel %vm2129_vm2, %v13590_v42, %v3718_v3 }
 0x1a9   : > { %11238 = vmatmul.mubr.bf16.gmra.mrb[44].mxu1 %v3579_v22  ;;  %11036 = vmatpush3.bf16.msra.mxu0 %v13706_v50  ;;  %v16593_v22 = vld [vmem:[#allocation25_spill] sm:$0xff] }
 0x1aa   : > { %11254 = vmatpush3.bf16.msra.mxu1 %v16590_v57  ;;  %11241 = vmatprep.mubr.bf16.mxu1 %v3581_v19  ;;  %v2318_v57 = vld [vmem:[#allocation2 + $0x78] sm:$0xf0]  ;;  %v3583_v19 = vsel %vm3565_vm6, %v3580_v51, %v3582_v30  ;;  %v16596_v51 = vld [vmem:[#allocation30_spill] sm:$0xff] }
 0x1ab   : > { %11255 = vmatprep.subr.bf16.mxu1 %v13295_v20  ;;  %11053 = vmatprep.subr.bf16.mxu0 %v13723_v45  ;;  %v2338_v28 = vrot.slane %v2318_v57, 4  ;;  %v13780_v57 = vld [vmem:[%s16443_s3 + $0x1a0] sm:$0xff]  }
 0x1ac   : > { %11038 = vmatmul.mubr.bf16.vlgmr.msra.gmra.mrb[20].mxu0 %v13741_v33 }
 0x1ad   : > { %11041 = vmatprep.mubr.bf16.mxu0 %v16592_v9  ;;  %11054 = vmatpush3.bf16.msra.mxu0 %v13723_v45  ;;  %v2340_v30 = vsel %vm2129_vm2, %v2338_v28, %v16596_v51  ;;  %v16597_v28 = vld [vmem:[#allocation32_spill] sm:$0xff] }
 0x1ae   : > { %11256 = vmatpush3.bf16.msra.mxu1 %v13295_v20  ;;  %11055 = vmatprep.subr.bf16.mxu0 %v13734_v39  ;;  %v13765_v20 = vld [vmem:[%s16443_s3 + $0x198] sm:$0xff]  }
 0x1af   : > { %11257 = vmatprep.subr.bf16.mxu1 %v16593_v22 }
 0x1b1   : > { %11242 = vmatmul.mubr.bf16.gmra.mrb[48].mxu1 %v3583_v19  ;;  %11056 = vmatpush3.bf16.msra.mxu0 %v13734_v39  ;;  %v13793_v19 = vld [vmem:[%s16443_s3 + $0x1a8] sm:$0xff]  }
 0x1b2   : > { %11258 = vmatpush3.bf16.msra.mxu1 %v16593_v22  ;;  %11261 = vmatprep.mubr.bf16.mxu1 %v3715_v46  ;;  %v3706_v22 = vld [vmem:[#allocation2 + $0x20] sm:$0xf] }
 0x1b3   : > { %11259 = vmatprep.subr.bf16.mxu1 %v16594_v60  ;;  %11057 = vmatprep.subr.bf16.mxu0 %v13756_v4  ;;  %v16598_v46 = vld [vmem:[#allocation33_spill] sm:$0xff] }
 0x1b4   : > { %11042 = vmatmul.mubr.bf16.gmra.mrb[24].mxu0 %v16595_v59  ;;  %v3717_v59 = vsel %vm2129_vm2, %v3714_v31, %v13590_v42  ;;  %v3720_v31 = vrot.slane %v3706_v22, 4  ;;  %v2526_v22 = vrot.slane %v13695_v23, 7 }
 0x1b5   : > { %11045 = vmatprep.mubr.bf16.mxu0 %v2340_v30  ;;  %11058 = vmatpush3.bf16.msra.mxu0 %v13756_v4  ;;  %v13809_v30 = vld [vmem:[%s16443_s3 + $0x1b0] sm:$0xff]  }
 0x1b6   : > { %11260 = vmatpush3.bf16.msra.mxu1 %v16594_v60  ;;  %11059 = vmatprep.subr.bf16.mxu0 %v13765_v20  ;;  %v13788_v60 = vld [vmem:[#allocation2 + $0x28] sm:$0xf0] }
 0x1b7   : > { %11277 = vmatprep.subr.bf16.mxu1 %v13380_v54  ;;  %v3722_v42 = vrot.slane %v13788_v60, 4 }
 0x1b9   : > { %11262 = vmatmul.mubr.bf16.vlgmr.msra.gmra.mrb[36].mxu1 %v3717_v59  ;;  %11060 = vmatpush3.bf16.msra.mxu0 %v13765_v20  ;;  %v3721_v59 = vsel %vm2129_vm2, %v3718_v3, %v3720_v31  ;;  %v3724_v10 = vsel %vm2129_vm2, %v3722_v42, %v13632_v15  ;;  %v16599_v3 = vld [vmem:[#allocation34_spill] sm:$0xff]  ;;  %v3852_v15 = vld [vmem:[#allocation2 + $0x50] sm:$0xf0]  ;;  %v16600_v31 = vrot.slane %v12987_v14, 7 }
 0x1ba   : > { %11278 = vmatpush3.bf16.msra.mxu1 %v13380_v54  ;;  %11265 = vmatprep.mubr.bf16.mxu1 %v3719_v49  ;;  %v13801_v54 = vld [vmem:[#allocation2 + $0x50] sm:$0x80] }
 0x1bb   : > { %11279 = vmatprep.subr.bf16.mxu1 %v13412_v55  ;;  %11061 = vmatprep.subr.bf16.mxu0 %v13780_v57  ;;  %v2525_v49 = vrot.slane %v13801_v54, 7  ;;  %v2529_v42 = vsel %vm2524_vm3, %v2526_v22, %v16600_v31 }
 0x1bc   : > { %11046 = vmatmul.mubr.bf16.gmra.mrb[28].mxu0 %v16597_v28 }
 0x1bd   : > { %11049 = vmatprep.mubr.bf16.mxu0 %v16598_v46  ;;  %11062 = vmatpush3.bf16.msra.mxu0 %v13780_v57  ;;  %v2527_v23 = vsel %vm2524_vm3, %v2525_v49, %v2526_v22  ;;  %v13860_v49 = vld [vmem:[%s16443_s3 + $0x1d0] sm:$0xff]  }
 0x1be   : > { %11280 = vmatpush3.bf16.msra.mxu1 %v13412_v55  ;;  %11063 = vmatprep.subr.bf16.mxu0 %v13793_v19  ;;  %v13821_v55 = vld [vmem:[%s16443_s3 + $0x1b8] sm:$0xff]  }
 0x1bf   : > { %11281 = vmatprep.subr.bf16.mxu1 %v13452_v29 }
 0x1c1   : > { %11266 = vmatmul.mubr.bf16.gmra.mrb[40].mxu1 %v3721_v59  ;;  %11064 = vmatpush3.bf16.msra.mxu0 %v13793_v19  ;;  %v2517_v59 = vld [vmem:[#allocation2 + $0x70] sm:$0x7f] }
 0x1c2   : > { %11282 = vmatpush3.bf16.msra.mxu1 %v13452_v29  ;;  %11269 = vmatprep.mubr.bf16.mxu1 %v3724_v10  ;;  %v13834_v29 = vld [vmem:[%s16443_s3 + $0x1c0] sm:$0xff]   ;;  %v3708_v10 = vld [vmem:[#allocation2 + $0x48] sm:$0xf]  ;;  %v2532_v14 = vrot.slane %v2517_v59, 7 }
 0x1c3   : > { %11283 = vmatprep.subr.bf16.mxu1 %v13468_v36  ;;  %11065 = vmatprep.subr.bf16.mxu0 %v13809_v30 }
 0x1c4   : > { %11050 = vmatmul.mubr.bf16.gmra.mrb[32].mxu0 %v16599_v3 }
 0x1c5   : > { %11066 = vmatpush3.bf16.msra.mxu0 %v13809_v30  ;;  %11069 = vmatprep.mubr.bf16.mxu0 %v2527_v23 }
 0x1c6   : > { %11284 = vmatpush3.bf16.msra.mxu1 %v13468_v36  ;;  %11067 = vmatprep.subr.bf16.mxu0 %v13821_v55  ;;  %v13843_v36 = vld [vmem:[%s16443_s3 + $0x1c8] sm:$0xff]  }
 0x1c7   : > { %11285 = vmatprep.subr.bf16.mxu1 %v13501_v17 }
 0x1c9   : > { %11270 = vmatmul.mubr.bf16.gmra.mrb[44].mxu1 %v13674_v16  ;;  %11068 = vmatpush3.bf16.msra.mxu0 %v13821_v55  ;;  %v3729_v16 = vrot.slane %v3708_v10, 4 }
 0x1ca   : > { %11286 = vmatpush3.bf16.msra.mxu1 %v13501_v17  ;;  %11273 = vmatprep.mubr.bf16.mxu1 %v13681_v27  ;;  %v3866_v17 = vrot.slane %v3852_v15, 4  ;;  %v13852_v27 = vld [vmem:[#allocation2 + $0x78] sm:$0x80]  ;;  %v13898_v15 = vld [vmem:[%s16443_s3 + $0x1e8] sm:$0xff]  }
 0x1cb   : > { %11287 = vmatprep.subr.bf16.mxu1 %v13520_v47  ;;  %11085 = vmatprep.subr.bf16.mxu0 %v13834_v29  ;;  %v3730_v22 = vsel %vm2129_vm2, %v13661_v13, %v3729_v16  ;;  %v16601_v13 = vrot.slane %v12983_v11, 7  ;;  %v13889_v11 = vld [vmem:[%s16443_s3 + $0x1e0] sm:$0xff]  }
 0x1cc   : > { %11070 = vmatmul.mubr.bf16.vlgmr.msra.gmra.mrb[20].mxu0 %v2529_v42  ;;  %v3868_v3 = vsel %vm2129_vm2, %v3866_v17, %v13698_v0  ;;  %v16602_v0 = vrot.slane %v13111_v48, 7  ;;  %v3853_v48 = vld [vmem:[#allocation2 + $0x70] sm:$0xf]  ;;  %v16604_v17 = vld [vmem:[#allocation26_spill] sm:$0xff] }
 0x1cd   : > { %11073 = vmatprep.mubr.bf16.mxu0 %v13423_v63  ;;  %11086 = vmatpush3.bf16.msra.mxu0 %v13834_v29  ;;  %v2534_v63 = vrot.slane %v13852_v27, 7  ;;  %v2533_v23 = vsel %vm2524_vm3, %v16601_v13, %v2532_v14  ;;  %v3873_v31 = vrot.slane %v3853_v48, 4  ;;  %v16606_v13 = vld [vmem:[#allocation6_spill] sm:$0xff] }
 0x1ce   : > { %11288 = vmatpush3.bf16.msra.mxu1 %v13520_v47  ;;  %11087 = vmatprep.subr.bf16.mxu0 %v13843_v36  ;;  %v13872_v47 = vld [vmem:[%s16443_s3 + $0x1d8] sm:$0xff]  }
 0x1cf   : > { %11289 = vmatprep.subr.bf16.mxu1 %v13550_v53  ;;  %v2536_v10 = vsel %vm2524_vm3, %v2534_v63, %v16602_v0  ;;  %v16607_v0 = vld [vmem:[#allocation10_spill] sm:$0xff] }
 0x1d1   : > { %11274 = vmatmul.mubr.bf16.gmra.mrb[48].mxu1 %v3730_v22  ;;  %11088 = vmatpush3.bf16.msra.mxu0 %v13843_v36  ;;  %v16605_v22 = vshll.u32 %v12906_v25, 16 }
 0x1d2   : > { %11290 = vmatpush3.bf16.msra.mxu1 %v13550_v53  ;;  %11293 = vmatprep.mubr.bf16.mxu1 %v3868_v3  ;;  %v2712_v53 = vld [vmem:[#allocation2] sm:$0x80]  ;;  %v13926_v3 = vld [vmem:[%s16443_s3 + $0x1f8] sm:$0xff]  }
 0x1d3   : > { %11291 = vmatprep.subr.bf16.mxu1 %v13566_v18  ;;  %11089 = vmatprep.subr.bf16.mxu0 %v13860_v49  ;;  %v2718_v42 = vshrl.u32 %v2712_v53, 16  ;;  %v13939_v53 = vld [vmem:[#allocation2 + $0x20] sm:$0xff] }
 0x1d4   : > { %11074 = vmatmul.mubr.bf16.gmra.mrb[24].mxu0 %v2533_v23  ;;  %v13929_v23 = vrot.slane %v16606_v13, 7 }
 0x1d5   : > { %11077 = vmatprep.mubr.bf16.mxu0 %v2536_v10  ;;  %11090 = vmatpush3.bf16.msra.mxu0 %v13860_v49  ;;  %v2720_v14 = vrot.slane %v2718_v42, 7 }
 0x1d6   : > { %11292 = vmatpush3.bf16.msra.mxu1 %v13566_v18  ;;  %11091 = vmatprep.subr.bf16.mxu0 %v13872_v47  ;;  %v3854_v18 = vld [vmem:[#allocation2 + $0x78] sm:$0xf0] }
 0x1d7   : > { %11309 = vmatprep.subr.bf16.mxu1 %v13595_v61  ;;  %v3875_v16 = vrot.slane %v3854_v18, 4  ;;  %v4009_v18 = vshrl.u32 %v13729_v44, 16 }
 0x1d9   : > { %11294 = vmatmul.mubr.bf16.vlgmr.msra.gmra.mrb[36].mxu1 %v13741_v33  ;;  %11092 = vmatpush3.bf16.msra.mxu0 %v13872_v47  ;;  %v2519_v33 = vld [vmem:[#allocation2 + $0x98] sm:$0x7f] }
 0x1da   : > { %11310 = vmatpush3.bf16.msra.mxu1 %v13595_v61  ;;  %11297 = vmatprep.mubr.bf16.mxu1 %v16592_v9  ;;  %v16603_v61 = vshrl.u32 %v12906_v25, 16  ;;  %v2541_v59 = vrot.slane %v2519_v33, 7  ;;  %v16610_v33 = vld [vmem:[#allocation5_spill] sm:$0xff] }
 0x1db   : > { %11311 = vmatprep.subr.bf16.mxu1 %v13611_v43  ;;  %11093 = vmatprep.subr.bf16.mxu0 %v13889_v11  ;;  %v13949_v42 = vor.u32 %v13929_v23, %v16610_v33 }
 0x1dc   : > { %11078 = vmatmul.mubr.bf16.gmra.mrb[28].mxu0 %v13436_v52  ;;  %v2721_v9 = vrot.slane %v16603_v61, 7  ;;  %v13913_v52 = vld [vmem:[%s16443_s3 + $0x1f0] sm:$0xff]   ;;  %v2731_v61 = vshrl.u32 %v13939_v53, 16 }
 0x1dd   : > { %11081 = vmatprep.mubr.bf16.mxu0 %v13442_v24  ;;  %11094 = vmatpush3.bf16.msra.mxu0 %v13889_v11  ;;  %v3874_v24 = vsel %vm2129_vm2, %v16604_v17, %v3873_v31  ;;  %v4012_v31 = vshll.u32 %v13729_v44, 16  ;;  %v4011_v17 = vrot.slane %v4009_v18, 4  ;;  %v4021_v18 = vrot.slane %v16610_v33, 5 }
 0x1de   : > { %11312 = vmatpush3.bf16.msra.mxu1 %v13611_v43  ;;  %11095 = vmatprep.subr.bf16.mxu0 %v13898_v15  ;;  %v3877_v43 = vsel %vm2129_vm2, %v3875_v16, %v16596_v51  ;;  %v2722_v63 = vor.u32 %v2721_v9, %v16605_v22  ;;  %v16608_v51 = vrot.slane %v16607_v0, 7  ;;  %v13954_v16 = vld [vmem:[%s16443_s3 + $0x200] sm:$0xff]  }
 0x1df   : > { %11313 = vmatprep.subr.bf16.mxu1 %v13627_v5 }
 0x1e0   : > { %v2542_v10 = vsel %vm2524_vm3, %v16608_v51, %v2541_v59  ;;  %v2723_v25 = vsel %vm2716_vm4, %v2720_v14, %v2722_v63  ;;  %v16611_v59 = vshll.u32 %v12981_v8, 16  ;;  %v13966_v14 = vld [vmem:[%s16443_s3 + $0x208] sm:$0xff]   ;;  %v2734_v63 = vshll.u32 %v13939_v53, 16  ;;  %v13984_v51 = vld [vmem:[%s16443_s3 + $0x210] sm:$0xff]  }
 0x1e1   : > { %11298 = vmatmul.mubr.bf16.gmra.mrb[40].mxu1 %v3874_v24  ;;  %11096 = vmatpush3.bf16.msra.mxu0 %v13898_v15  ;;  %v4014_v24 = vrot.slane %v4012_v31, 5  ;;  %v4005_v31 = vld [vmem:[#allocation2 + $0x20] sm:$0x1f] }
 0x1e2   : > { %11314 = vmatpush3.bf16.msra.mxu1 %v13627_v5  ;;  %11301 = vmatprep.mubr.bf16.mxu1 %v3877_v43  ;;  %v16609_v5 = vshrl.u32 %v12981_v8, 16  ;;  %v2726_v8 = vsel %vm2716_vm4, %v2721_v9, %v13949_v42  ;;  %v2714_v43 = vld [vmem:[#allocation2 + $0x28] sm:$0x80] }
 0x1e3   : > { %11315 = vmatprep.subr.bf16.mxu1 %v13640_v34  ;;  %11097 = vmatprep.subr.bf16.mxu0 %v13913_v52  ;;  %v2739_v9 = vshrl.u32 %v2714_v43, 16 }
 0x1e4   : > { %11082 = vmatmul.mubr.bf16.gmra.mrb[32].mxu0 %v2542_v10  ;;  %v2727_v48 = vrot.slane %v16609_v5, 7  ;;  %v16612_v10 = vld [vmem:[#allocation31_spill] sm:$0xff]  ;;  %v4020_v5 = vrot.slane %v16606_v13, 4 }
 0x1e5   : > { %11098 = vmatpush3.bf16.msra.mxu0 %v13913_v52  ;;  %11101 = vmatprep.mubr.bf16.mxu0 %v2723_v25 }
 0x1e6   : > { %11316 = vmatpush3.bf16.msra.mxu1 %v13640_v34  ;;  %11099 = vmatprep.subr.bf16.mxu0 %v13926_v3  ;;  %v2728_v44 = vor.u32 %v2727_v48, %v16611_v59  ;;  %v3855_v34 = vld [vmem:[#allocation2 + $0x98] sm:$0xf]  ;;  %v4022_v33 = vor.u32 %v4021_v18, %v4020_v5  ;;  %v16614_v5 = vld [vmem:[#allocation13_spill] sm:$0xff] }
 0x1e7   : > { %11317 = vmatprep.subr.bf16.mxu1 %v13657_v12  ;;  %v3882_v22 = vrot.slane %v3855_v34, 4  ;;  %v13997_v59 = vld [vmem:[%s16443_s3 + $0x218] sm:$0xff]   ;;  %v4032_v34 = vshll.u32 %v4005_v31, 16  ;;  %v2934_v18 = vrot.slane %v16614_v5, 7 }
 0x1e8   : > { %v4023_v43 = vsel %vm4007_vm5, %v13472_v1, %v4022_v33 }
 0x1e9   : > { %11302 = vmatmul.mubr.bf16.gmra.mrb[44].mxu1 %v16597_v28  ;;  %11100 = vmatpush3.bf16.msra.mxu0 %v13926_v3  ;;  %v2733_v28 = vrot.slane %v2731_v61, 7  ;;  %v3883_v25 = vsel %vm2129_vm2, %v16612_v10, %v3882_v22  ;;  %v2741_v61 = vrot.slane %v2739_v9, 7  ;;  %v14028_v9 = vld [vmem:[%s16443_s3 + $0x228] sm:$0xff]  }
 0x1ea   : > { %11318 = vmatpush3.bf16.msra.mxu1 %v13657_v12  ;;  %11305 = vmatprep.mubr.bf16.mxu1 %v16598_v46  ;;  %v2729_v12 = vsel %vm2716_vm4, %v13929_v23, %v2728_v44  ;;  %v4015_v46 = vor.u32 %v4014_v24, %v4011_v17  ;;  %v14005_v17 = vld [vmem:[#allocation2 + $0x48] sm:$0xff]  ;;  %v4038_v24 = vshrl.u32 %v13788_v60, 16 }
 0x1eb   : > { %11319 = vmatprep.subr.bf16.mxu1 %v13669_v26  ;;  %11117 = vmatprep.subr.bf16.mxu0 %v13954_v16  ;;  %v13979_v0 = vor.u32 %v2734_v63, %v2733_v28  ;;  %v2744_v44 = vsel %vm2716_vm4, %v2741_v61, %v13505_v6  ;;  %v2752_v28 = vshrl.u32 %v14005_v17, 16 }
 0x1ec   : > { %11102 = vmatmul.mubr.bf16.vlgmr.msra.gmra.mrb[20].mxu0 %v2726_v8  ;;  %v4041_v8 = vshll.u32 %v13788_v60, 16  ;;  %v16613_v60 = vld [vmem:[#allocation35_spill] sm:$0xff] }
 0x1ed   : > { %11105 = vmatprep.mubr.bf16.mxu0 %v2729_v12  ;;  %11118 = vmatpush3.bf16.msra.mxu0 %v13954_v16  ;;  %v2737_v13 = vsel %vm2716_vm4, %v2727_v48, %v13979_v0  ;;  %v14016_v48 = vld [vmem:[%s16443_s3 + $0x220] sm:$0xff]   ;;  %v4034_v12 = vrot.slane %v4032_v34, 5  ;;  %v14058_v34 = vld [vmem:[%s16443_s3 + $0x238] sm:$0xff]  }
 0x1ee   : > { %11320 = vmatpush3.bf16.msra.mxu1 %v13669_v26  ;;  %11119 = vmatprep.subr.bf16.mxu0 %v13966_v14  ;;  %v4019_v26 = vsel %vm4007_vm5, %v4015_v46, %v13472_v1  ;;  %v4040_v46 = vrot.slane %v4038_v24, 4  ;;  %v4043_v63 = vrot.slane %v4041_v8, 5  ;;  %v2754_v1 = vrot.slane %v2752_v28, 7 }
 0x1ef   : > { %11321 = vmatprep.subr.bf16.mxu1 %v13692_v41  ;;  %v16616_v24 = vrot.slane %v13227_v7, 7 }
 0x1f1   : > { %11306 = vmatmul.mubr.bf16.gmra.mrb[48].mxu1 %v3883_v25  ;;  %11120 = vmatpush3.bf16.msra.mxu0 %v13966_v14  ;;  %v2931_v25 = vshrl.u32 %v13801_v54, 16  ;;  %v14044_v54 = vld [vmem:[%s16443_s3 + $0x230] sm:$0xff]  }
 0x1f2   : > { %11322 = vmatpush3.bf16.msra.mxu1 %v13692_v41  ;;  %11325 = vmatprep.mubr.bf16.mxu1 %v4019_v26  ;;  %v4029_v41 = vshrl.u32 %v4005_v31, 16  ;;  %v4044_v26 = vor.u32 %v4043_v63, %v4040_v46  ;;  %v2928_v46 = vld [vmem:[#allocation2 + $0x70] sm:$0xff] }
 0x1f3   : > { %11323 = vmatprep.subr.bf16.mxu1 %v13706_v50  ;;  %11121 = vmatprep.subr.bf16.mxu0 %v13984_v51 }
 0x1f4   : > { %11106 = vmatmul.mubr.bf16.gmra.mrb[24].mxu0 %v2737_v13  ;;  %v4031_v22 = vrot.slane %v4029_v41, 4  ;;  %v2933_v13 = vrot.slane %v2931_v25, 7  ;;  %v4006_v41 = vld [vmem:[#allocation2 + $0x48] sm:$0x1f]  ;;  %v16619_v25 = vld [vmem:[#allocation8_spill] sm:$0xff] }
 0x1f5   : > { %11109 = vmatprep.mubr.bf16.mxu0 %v2744_v44  ;;  %11122 = vmatpush3.bf16.msra.mxu0 %v13984_v51 }
 0x1f6   : > { %11324 = vmatpush3.bf16.msra.mxu1 %v13706_v50  ;;  %11123 = vmatprep.subr.bf16.mxu0 %v13997_v59  ;;  %v4027_v50 = vsel %vm4007_vm5, %v4022_v33, %v16613_v60  ;;  %v4035_v10 = vor.u32 %v4034_v12, %v4031_v22  ;;  %v16615_v33 = vld [vmem:[#allocation7_spill] sm:$0xff]  ;;  %v4058_v22 = vshrl.u32 %v4006_v41, 16  ;;  %v4061_v12 = vshll.u32 %v4006_v41, 16 }
 0x1f7   : > { %11341 = vmatprep.subr.bf16.mxu1 %v13723_v45  ;;  %v14049_v44 = vor.u32 %v2934_v18, %v16615_v33  ;;  %v12238_v41 = vld [vmem:[%s16447_s7 + $0x14] ss:$8 sps:$4 sm:$0xff]  }
 0x1f8   : > { %v4036_v61 = vsel %vm4007_vm5, %v16613_v60, %v4035_v10  ;;  %v16618_v60 = vld [vmem:[#allocation16_spill] sm:$0xff] }
 0x1f9   : > { %11326 = vmatmul.mubr.bf16.vlgmr.msra.gmra.mrb[36].mxu1 %v4023_v43  ;;  %11124 = vmatpush3.bf16.msra.mxu0 %v13997_v59 }
 0x1fa   : > { %11342 = vmatpush3.bf16.msra.mxu1 %v13723_v45  ;;  %11329 = vmatprep.mubr.bf16.mxu1 %v4027_v50  ;;  %v2755_v45 = vshll.u32 %v14005_v17, 16  ;;  %v2940_v50 = vrot.slane %v16618_v60, 7 }
 0x1fb   : > { %11343 = vmatprep.subr.bf16.mxu1 %v13734_v39  ;;  %11125 = vmatprep.subr.bf16.mxu0 %v14016_v48 }
 0x1fc   : > { %11110 = vmatmul.mubr.bf16.gmra.mrb[28].mxu0 %v13527_v37  ;;  %v2757_v31 = vor.u32 %v2755_v45, %v2754_v1  ;;  %v4187_v1 = vld [vmem:[#allocation2] sm:$0x80]  ;;  %v2944_v45 = vshrl.u32 %v2928_v46, 16 }
 0x1fd   : > { %11113 = vmatprep.mubr.bf16.mxu0 %v13543_v58  ;;  %11126 = vmatpush3.bf16.msra.mxu0 %v14016_v48  ;;  %v4192_v33 = vshrl.u32 %v4187_v1, 16 }
 0x1fe   : > { %11344 = vmatpush3.bf16.msra.mxu1 %v13734_v39  ;;  %11127 = vmatprep.subr.bf16.mxu0 %v14028_v9  ;;  %v4048_v39 = vsel %vm4007_vm5, %v4044_v26, %v13532_v21  ;;  %v14064_v8 = vsel %vm2716_vm4, %v16616_v24, %v2757_v31  ;;  %v16617_v21 = vld [vmem:[#allocation11_spill] sm:$0xff]  ;;  %v12235_v26 = vld [vmem:[%s16447_s7 + $0x4] ss:$8 sps:$4 sm:$0xff]   ;;  %v4060_v31 = vrot.slane %v4058_v22, 4 }
 0x1ff   : > { %11345 = vmatprep.subr.bf16.mxu1 %v13756_v4  ;;  %v2937_v28 = vrot.slane %v16617_v21, 7  ;;  %v2947_v21 = vshll.u32 %v2928_v46, 16  ;;  %v4194_v60 = vrot.slane %v4192_v33, 7  ;;  %v2929_v33 = vld [vmem:[#allocation2 + $0x98] sm:$0xff] }
 0x201   : > { %11330 = vmatmul.mubr.bf16.gmra.mrb[40].mxu1 %v4036_v61  ;;  %11128 = vmatpush3.bf16.msra.mxu0 %v14028_v9  ;;  %v2938_v5 = vor.u32 %v2937_v28, %v16619_v25  ;;  %v4063_v61 = vrot.slane %v4061_v12, 5  ;;  %v16622_v25 = vld [vmem:[#allocation15_spill] sm:$0xff] }
 0x202   : > { %11346 = vmatpush3.bf16.msra.mxu1 %v13756_v4  ;;  %11333 = vmatprep.mubr.bf16.mxu1 %v4048_v39  ;;  %v2936_v4 = vsel %vm2716_vm4, %v2933_v13, %v14049_v44  ;;  %v16620_v13 = vld [vmem:[#allocation12_spill] sm:$0xff]  ;;  %v12233_v39 = vld [vmem:[%s16447_s7] ss:$8 sps:$4 sm:$0xff]  }
 0x203   : > { %11347 = vmatprep.subr.bf16.mxu1 %v13765_v20  ;;  %11129 = vmatprep.subr.bf16.mxu0 %v14044_v54  ;;  %v14101_v24 = vsel %vm2716_vm4, %v2934_v18, %v2938_v5  ;;  %v12236_v18 = vld [vmem:[%s16447_s7 + $0x10] ss:$8 sps:$4 sm:$0xff]  }
 0x204   : > { %v14068_v43 = vpop.f32.mrb[20].mxu1  ;;  %11114 = vmatmul.mubr.bf16.gmra.mrb[32].mxu0 %v14064_v8 }
 0x205   : > { %v14074_v7 = vpop.f32.mrb[21].mxu1  ;;  %11130 = vmatpush3.bf16.msra.mxu0 %v14044_v54  ;;  %11133 = vmatprep.mubr.bf16.mxu0 %v2936_v4  ;;  %v4064_v4 = vor.u32 %v4063_v61, %v4060_v31  ;;  %v16623_v31 = vld [vmem:[#allocation22_spill] sm:$0xff] }
 0x206   : > { %11348 = vmatpush3.bf16.msra.mxu1 %v13765_v20  ;;  %v14078_v63 = vpop.f32.mrb[22].mxu1  ;;  %11131 = vmatprep.subr.bf16.mxu0 %v14058_v34  ;;  %v2941_v20 = vor.u32 %v2940_v50, %v16620_v13  ;;  %v16624_v13 = vld [vmem:[#allocation24_spill] sm:$0xff] }
 0x207   : > { %11349 = vmatprep.subr.bf16.mxu1 %v13780_v57  ;;  %v14082_v10 = vpop.f32.mrb[23].mxu1 }
 0x208   : > { %v14105_v22 = vsel %vm2716_vm4, %v2937_v28, %v2941_v20  ;;  %v4065_v28 = vsel %vm4007_vm5, %v13557_v35, %v4064_v4  ;;  %v12244_v35 = vld [vmem:[%s16447_s7 + $0x34] ss:$8 sps:$4 sm:$0xff]   ;;  %v2961_v20 = vrot.slane %v16624_v13, 7  ;;  %v12253_v13 = vld [vmem:[%s16447_s7 + $0x64] ss:$8 sps:$4 sm:$0xff]  }
 0x209   : > { %11334 = vmatmul.mubr.bf16.gmra.mrb[44].mxu1 %v13554_v32  ;;  %11132 = vmatpush3.bf16.msra.mxu0 %v14058_v34  ;;  %v2946_v32 = vrot.slane %v2944_v45, 7 }
 0x20a   : > { %11350 = vmatpush3.bf16.msra.mxu1 %v13780_v57  ;;  %11337 = vmatprep.mubr.bf16.mxu1 %v13570_v2  ;;  %v2952_v2 = vshrl.u32 %v13852_v27, 16  ;;  %v16621_v57 = vld [vmem:[#allocation19_spill] sm:$0xff]  ;;  %v12241_v27 = vld [vmem:[%s16447_s7 + $0x24] ss:$8 sps:$4 sm:$0xff]  }
 0x20b   : > { %11351 = vmatprep.subr.bf16.mxu1 %v13793_v19  ;;  %5055 = vmatprep.subr.bf16.mxu0 %v12235_v26  ;;  %v2955_v12 = vrot.slane %v16621_v57, 7  ;;  %v2949_v46 = vor.u32 %v2947_v21, %v2946_v32  ;;  %v4197_v26 = vsel %vm2716_vm4, %v4194_v60, %v13583_v38  ;;  %v2958_v38 = vrot.slane %v16623_v31, 7  ;;  %v16625_v21 = vld [vmem:[#allocation18_spill] sm:$0xff] }
 0x20c   : > { %11134 = vmatmul.mubr.bf16.vlgmr.msra.gmra.mrb[20].mxu0 %v14101_v24  ;;  %v2954_v1 = vrot.slane %v2952_v2, 7  ;;  %v12247_v2 = vld [vmem:[%s16447_s7 + $0x44] ss:$8 sps:$4 sm:$0xff]   ;;  %v2965_v57 = vshrl.u32 %v2929_v33, 16  ;;  %v16626_v60 = vrot.slane %v13400_v56, 7 }
 0x20d   : > { %11137 = vmatprep.mubr.bf16.mxu0 %v14105_v22  ;;  %5056 = vmatpush1.bf16.msra.mxu0 %v12233_v39  ;;  %v14121_v5 = vor.u32 %v2955_v12, %v16622_v25  ;;  %v14134_v45 = vsel %vm2716_vm4, %v2940_v50, %v2949_v46  ;;  %v12242_v50 = vld [vmem:[%s16447_s7 + $0x30] ss:$8 sps:$4 sm:$0xff]   ;;  %v2959_v4 = vor.u32 %v2958_v38, %v16625_v21  ;;  %v4189_v46 = vld [vmem:[#allocation2 + $0x28] sm:$0x80]  ;;  %v12250_v56 = vld [vmem:[%s16447_s7 + $0x54] ss:$8 sps:$4 sm:$0xff]  }
 0x20e   : > { %11352 = vmatpush3.bf16.msra.mxu1 %v13793_v19  ;;  %5057 = vmatprep.subr.bf16.mxu0 %v12238_v41  ;;  %v12239_v19 = vld [vmem:[%s16447_s7 + $0x20] ss:$8 sps:$4 sm:$0xff]   ;;  %v4213_v25 = vshrl.u32 %v4189_v46, 16 }
 0x20f   : > { %11353 = vmatprep.subr.bf16.mxu1 %v13809_v30  ;;  %v12251_v21 = vld [vmem:[%s16447_s7 + $0x60] ss:$8 sps:$4 sm:$0xff]  }
 0x211   : > { %11338 = vmatmul.mubr.bf16.gmra.mrb[48].mxu1 %v4065_v28  ;;  %5058 = vmatpush1.bf16.msra.mxu0 %v12236_v18  ;;  %v4200_v18 = vsel %vm2716_vm4, %v16626_v60, %v13949_v42  ;;  %v4203_v28 = vsel %vm2716_vm4, %v13929_v23, %v13600_v62  ;;  %v14175_v42 = vsel %vm2716_vm4, %v2955_v12, %v2959_v4  ;;  %v2967_v62 = vrot.slane %v2965_v57, 7  ;;  %v12248_v12 = vld [vmem:[%s16447_s7 + $0x50] ss:$8 sps:$4 sm:$0xff]   ;;  %v14225_v60 = vld [vmem:[%s12744_s30 + $0x4] sm:$0xf] }
 0x212   : > { %11354 = vmatpush3.bf16.msra.mxu1 %v13809_v30  ;;  %11357 = vmatprep.mubr.bf16.mxu1 %v4197_v26  ;;  %v2957_v30 = vsel %vm2716_vm4, %v2954_v1, %v14121_v5  ;;  %v12245_v1 = vld [vmem:[%s16447_s7 + $0x40] ss:$8 sps:$4 sm:$0xff]   ;;  %v2968_v23 = vshll.u32 %v2929_v33, 16  ;;  %v16631_v33 = vrot.slane %v13458_v40, 7  ;;  %v12256_v40 = vld [vmem:[%s16447_s7 + $0x74] ss:$8 sps:$4 sm:$0xff]  }
 0x213   : > { %11355 = vmatprep.subr.bf16.mxu1 %v13821_v55  ;;  %5059 = vmatprep.subr.bf16.mxu0 %v12241_v27  ;;  %v16627_v27 = vld [vmem:[#allocation21_spill] sm:$0xff]  ;;  %v12254_v4 = vld [vmem:[%s16447_s7 + $0x70] ss:$8 sps:$4 sm:$0xff]   ;;  %v16511_v57 = vmov 0  }
 0x214   : > { %v14137_v61 = vpop.f32.mrb[24].mxu1  ;;  %11138 = vmatmul.mubr.bf16.gmra.mrb[24].mxu0 %v14134_v45 }
 0x215   : > { %v14143_v39 = vpop.f32.mrb[25].mxu1  ;;  %11141 = vmatprep.mubr.bf16.mxu0 %v2957_v30  ;;  %5060 = vmatpush1.bf16.msra.mxu0 %v12239_v19  ;;  %v2970_v30 = vor.u32 %v2968_v23, %v2967_v62 }
 0x216   : > { %v14148_v41 = vpop.f32.mrb[26].mxu1  ;;  %11356 = vmatpush3.bf16.msra.mxu1 %v13821_v55  ;;  %5061 = vmatprep.subr.bf16.mxu0 %v12244_v35  ;;  %v2962_v55 = vor.u32 %v2961_v20, %v16627_v27  ;;  %v12262_v27 = vld [vmem:[%s16447_s7 + $0x104] ss:$8 sps:$4 sm:$0xff]  }
 0x217   : > { %v14151_v32 = vpop.f32.mrb[27].mxu1  ;;  %11373 = vmatprep.subr.bf16.mxu1 %v13834_v29 }
 0x219   : > { %11358 = vmatmul.mubr.bf16.vlgmr.msra.gmra.mrb[36].mxu1 %v4200_v18  ;;  %5062 = vmatpush1.bf16.msra.mxu0 %v12242_v50  ;;  %v4211_v50 = vsel %vm2716_vm4, %v16631_v33, %v13979_v0  ;;  %v14213_v0 = vsel %vm2716_vm4, %v2961_v20, %v2970_v30  ;;  %v14228_v20 = vld [vmem:[%s12744_s30 + $0x8] sm:$0xf]  ;;  %v14286_v33 = vld [vmem:[%s12744_s30 + $0x18] sm:$0xf] }
 0x21a   : > { %11374 = vmatpush3.bf16.msra.mxu1 %v13834_v29  ;;  %11361 = vmatprep.mubr.bf16.mxu1 %v4203_v28  ;;  %v14181_v29 = vsel %vm2716_vm4, %v2958_v38, %v2962_v55  ;;  %v4215_v38 = vrot.slane %v4213_v25, 7  ;;  %v9803_v28 = vcombine.low %v14225_v60, %v14228_v20  ;;  %v14256_v25 = vld [vmem:[%s12744_s30 + $0x10] sm:$0xf]  ;;  %v14280_v30 = vld [vmem:[%s12744_s30 + $0x8] sm:$0xf] }
 0x21b   : > { %11375 = vmatprep.subr.bf16.mxu1 %v13843_v36  ;;  %5063 = vmatprep.subr.bf16.mxu0 %v12247_v2 }
 0x21c   : > { %v14177_v26 = vpop.f32.mrb[28].mxu1  ;;  %11142 = vmatmul.mubr.bf16.gmra.mrb[28].mxu0 %v14175_v42 }
 0x21d   : > { %v14183_v19 = vpop.f32.mrb[29].mxu1  ;;  %11145 = vmatprep.mubr.bf16.mxu0 %v14181_v29  ;;  %5064 = vmatpush1.bf16.msra.mxu0 %v12245_v1  ;;  %v12265_v1 = vld [vmem:[%s16447_s7 + $0x114] ss:$8 sps:$4 sm:$0xff]  }
 0x21e   : > { %16628 = vst [vmem:[#allocation9_spill] sm:$0xff] %v14183_v19  ;;  %11376 = vmatpush3.bf16.msra.mxu1 %v13843_v36  ;;  %v14190_v35 = vpop.f32.mrb[30].mxu1  ;;  %5065 = vmatprep.subr.bf16.mxu0 %v12250_v56  ;;  %v4218_v36 = vsel %vm2716_vm4, %v4215_v38, %v13505_v6  ;;  %v12272_v38 = vld [vmem:[%s16447_s7 + $0x134] ss:$8 sps:$4 sm:$0xff]  }
 0x21f   : > { %16629 = vst [vmem:[#allocation14_spill] sm:$0xff] %v14190_v35  ;;  %v14192_v31 = vpop.f32.mrb[31].mxu1  ;;  %11377 = vmatprep.subr.bf16.mxu1 %v13860_v49 }
 0x220   : > { %16630 = vst [vmem:[#allocation17_spill] sm:$0xff] %v14192_v31 }
 0x221   : > { %11362 = vmatmul.mubr.bf16.gmra.mrb[40].mxu1 %v4211_v50  ;;  %5066 = vmatpush1.bf16.msra.mxu0 %v12248_v12  ;;  %v5144_v12 = vld [vmem:[%s12744_s30 + $0x4] sm:$0xf]  ;;  %v5170_v50 = vshll.u32 %v14280_v30, 16 }
 0x222   : > { %11378 = vmatpush3.bf16.msra.mxu1 %v13860_v49  ;;  %11365 = vmatprep.mubr.bf16.mxu1 %v4218_v36  ;;  %v4354_v49 = vld [vmem:[#allocation2 + $0x50] sm:$0x80]  ;;  %v5174_v36 = vshrl.u32 %v14280_v30, 16 }
 0x223   : > { %11379 = vmatprep.subr.bf16.mxu1 %v13872_v47  ;;  %5067 = vmatprep.subr.bf16.mxu0 %v12253_v13  ;;  %v4359_v55 = vshrl.u32 %v4354_v49, 16  ;;  %v5164_v13 = vshll.u32 %v5144_v12, 16 }
 0x224   : > { %v14215_v6 = vpop.f32.mrb[32].mxu1  ;;  %11146 = vmatmul.mubr.bf16.gmra.mrb[32].mxu0 %v14213_v0 }
 0x225   : > { %16632 = vst [vmem:[#allocation20_spill] sm:$0xff] %v14215_v6  ;;  %v14221_v2 = vpop.f32.mrb[33].mxu1  ;;  %5068 = vmatpush1.bf16.msra.mxu0 %v12251_v21  ;;  %5087 = vmatprep.mubr.bf16.mxu0 %v16511_v57  ;;  %v4361_v56 = vrot.slane %v4359_v55, 7  ;;  %v4356_v21 = vld [vmem:[#allocation2 + $0x78] sm:$0x80] }
 0x226   : > { %16633 = vst [vmem:[#allocation23_spill] sm:$0xff] %v14221_v2  ;;  %11380 = vmatpush3.bf16.msra.mxu1 %v13872_v47  ;;  %v14231_v18 = vpop.f32.mrb[34].mxu1  ;;  %5069 = vmatprep.subr.bf16.mxu0 %v12256_v40  ;;  %v12260_v47 = vld [vmem:[%s16447_s7 + $0x100] ss:$8 sps:$4 sm:$0xff]   ;;  %v12276_v40 = vld [vmem:[%s16447_s7 + $0x144] ss:$8 sps:$4 sm:$0xff]  }
 0x227   : > { %16634 = vst [vmem:[#allocation28_spill] sm:$0xff] %v14231_v18  ;;  %v14233_v46 = vpop.f32.mrb[35].mxu1  ;;  %11381 = vmatprep.subr.bf16.mxu1 %v13889_v11  ;;  %v4364_v23 = vsel %vm2716_vm4, %v4361_v56, %v14049_v44  ;;  %v4671_v44 = vld [vmem:[%s12744_s30 + $0x14] sm:$0xf]  ;;  %v4380_v55 = vshrl.u32 %v4356_v21, 16  ;;  %v16660_v18 = vmov 0  }
 0x228   : > { %16635 = vst [vmem:[#allocation25_spill] sm:$0xff] %v14233_v46  ;;  %v14313_v56 = vld [vmem:[%s12744_s30 + $0x10] sm:$0xf]  ;;  %v12281_v21 = vld [vmem:[%s16447_s7 + $0x160] ss:$8 sps:$4 sm:$0xff]  }
 0x229   : > { %11366 = vmatmul.mubr.bf16.gmra.mrb[44].mxu1 %v13527_v37  ;;  %5070 = vmatpush1.bf16.msra.mxu0 %v12254_v4  ;;  %v14253_v37 = vld [vmem:[%s12744_s30 + $0xc] sm:$0xf]  ;;  %v9805_v4 = vcombine.low %v4671_v44, %v14286_v33  ;;  %v5190_v44 = vshll.u32 %v14313_v56, 16 }
 0x22a   : > { %11382 = vmatpush3.bf16.msra.mxu1 %v13889_v11  ;;  %11369 = vmatprep.mubr.bf16.mxu1 %v13543_v58  ;;  %v12263_v58 = vld [vmem:[%s16447_s7 + $0x110] ss:$8 sps:$4 sm:$0xff]   ;;  %v12269_v11 = vld [vmem:[%s16447_s7 + $0x124] ss:$8 sps:$4 sm:$0xff]   ;;  %v9804_v62 = vcombine.low %v14253_v37, %v14256_v25 }
 0x22b   : > { %11383 = vmatprep.subr.bf16.mxu1 %v13898_v15  ;;  %5429 = vmatprep.subr.bf16.mxu0 %v12262_v27  ;;  %v5166_v27 = vrot.slane %v5164_v13, 5  ;;  %v12283_v13 = vld [vmem:[%s16447_s7 + $0x164] ss:$8 sps:$4 sm:$0xff]  }
 0x22c   : > { %5088 = vmatmul.mubr.bf16.vlgmr.msra.gmra.mrb[36].mxu0 %v9803_v28  ;;  %v5172_v28 = vrot.slane %v5170_v50, 5 }
 0x22d   : > { %5097 = vmatprep.mubr.bf16.mxu0 %v16511_v57  ;;  %5430 = vmatpush1.bf16.msra.mxu0 %v12260_v47  ;;  %v5176_v47 = vrot.slane %v5174_v36, 4 }
 0x22e   : > { %11384 = vmatpush3.bf16.msra.mxu1 %v13898_v15  ;;  %5431 = vmatprep.subr.bf16.mxu0 %v12265_v1  ;;  %v12267_v15 = vld [vmem:[%s16447_s7 + $0x120] ss:$8 sps:$4 sm:$0xff]   ;;  %v12279_v1 = vld [vmem:[%s16447_s7 + $0x154] ss:$8 sps:$4 sm:$0xff]  }
 0x22f   : > { %11385 = vmatprep.subr.bf16.mxu1 %v13913_v52 }
 0x231   : > { %11370 = vmatmul.mubr.bf16.gmra.mrb[48].mxu1 %v14064_v8  ;;  %5432 = vmatpush1.bf16.msra.mxu0 %v12263_v58  ;;  %v5161_v8 = vshrl.u32 %v5144_v12, 16  ;;  %v4673_v58 = vld [vmem:[%s12744_s30 + $0x2c] sm:$0xf]  ;;  %v5538_v12 = vld [vmem:[%s12744_s30 + $0x4] sm:$0x8] }
 0x232   : > { %11386 = vmatpush3.bf16.msra.mxu1 %v13913_v52  ;;  %11389 = vmatprep.mubr.bf16.mxu1 %v4364_v23  ;;  %v12270_v52 = vld [vmem:[%s16447_s7 + $0x130] ss:$8 sps:$4 sm:$0xff]   ;;  %v4382_v23 = vrot.slane %v4380_v55, 7  ;;  %v12286_v55 = vld [vmem:[%s16447_s7 + $0x174] ss:$8 sps:$4 sm:$0xff]  }
 0x233   : > { %11387 = vmatprep.subr.bf16.mxu1 %v13926_v3  ;;  %5433 = vmatprep.subr.bf16.mxu0 %v12269_v11  ;;  %v5163_v49 = vrot.slane %v5161_v8, 4  ;;  %v4674_v11 = vld [vmem:[%s12744_s30 + $0x30] sm:$0xf]  ;;  %v5194_v8 = vshrl.u32 %v14313_v56, 16 }
 0x234   : > { %5098 = vmatmul.mubr.bf16.gmra.mrb[40].mxu0 %v9804_v62 }
 0x235   : > { %5107 = vmatprep.mubr.bf16.mxu0 %v16511_v57  ;;  %5434 = vmatpush1.bf16.msra.mxu0 %v12267_v15  ;;  %v5167_v62 = vor.u32 %v5166_v27, %v5163_v49  ;;  %v4385_v27 = vsel %vm2716_vm4, %v4382_v23, %v14121_v5  ;;  %v5196_v5 = vrot.slane %v5194_v8, 4 }
 0x236   : > { %11388 = vmatpush3.bf16.msra.mxu1 %v13926_v3  ;;  %5435 = vmatprep.subr.bf16.mxu0 %v12272_v38  ;;  %v12274_v3 = vld [vmem:[%s16447_s7 + $0x140] ss:$8 sps:$4 sm:$0xff]  }
 0x237   : > { %11405 = vmatprep.subr.bf16.mxu1 %v13954_v16 }
 0x239   : > { %11390 = vmatmul.mubr.bf16.vlgmr.msra.gmra.mrb[36].mxu1 %v14101_v24  ;;  %5436 = vmatpush1.bf16.msra.mxu0 %v12270_v52  ;;  %v5146_v24 = vld [vmem:[%s12744_s30 + $0xc] sm:$0xf]  ;;  %v9806_v52 = vcombine.low %v4673_v58, %v4674_v11  ;;  %v4676_v58 = vld [vmem:[%s12744_s30 + $0x38] sm:$0xf]  ;;  %v14354_v11 = vld [vmem:[%s12744_s30 + $0x14] sm:$0xf] }
 0x23a   : > { %11406 = vmatpush3.bf16.msra.mxu1 %v13954_v16  ;;  %11393 = vmatprep.mubr.bf16.mxu1 %v14105_v22  ;;  %v12277_v16 = vld [vmem:[%s16447_s7 + $0x150] ss:$8 sps:$4 sm:$0xff]   ;;  %v5177_v22 = vor.u32 %v5176_v47, %v5172_v28  ;;  %v5180_v15 = vshll.u32 %v5146_v24, 16  ;;  %v5184_v38 = vshrl.u32 %v5146_v24, 16  ;;  %v4675_v24 = vld [vmem:[%s12744_s30 + $0x34] sm:$0xf] }
 0x23b   : > { %11407 = vmatprep.subr.bf16.mxu1 %v13966_v14  ;;  %5437 = vmatprep.subr.bf16.mxu0 %v12276_v40  ;;  %v5168_v40 = vrot.slane %v5167_v62, 4  ;;  %v14361_v62 = vld [vmem:[%s12744_s30 + $0x18] sm:$0xf] }
 0x23c   : > { %5108 = vmatmul.mubr.bf16.gmra.mrb[44].mxu0 %v9805_v4  ;;  %v5545_v4 = vshrl.u32 %v5538_v12, 16  ;;  %v14343_v47 = vrot.slane %v5184_v38, 7  ;;  %v12284_v12 = vld [vmem:[%s16447_s7 + $0x170] ss:$8 sps:$4 sm:$0xff]  }
 0x23d   : > { %5115 = vmatprep.mubr.bf16.mxu0 %v16511_v57  ;;  %5438 = vmatpush1.bf16.msra.mxu0 %v12274_v3  ;;  %v5178_v3 = vrot.slane %v5177_v22, 4  ;;  %v14366_v22 = vld [vmem:[%s12744_s30 + $0x54] sm:$0xf] }
 0x23e   : > { %11408 = vmatpush3.bf16.msra.mxu1 %v13966_v14  ;;  %5439 = vmatprep.subr.bf16.mxu0 %v12279_v1  ;;  %v5549_v14 = vrot.slane %v5174_v36, 7  ;;  %v5182_v36 = vrot.slane %v5180_v15, 5  ;;  %v5186_v1 = vrot.slane %v5184_v38, 4  ;;  %v9863_v23 = vrot.slane %v5545_v4, 11 }
 0x23f   : > { %11409 = vmatprep.subr.bf16.mxu1 %v13984_v51  ;;  %v5200_v4 = vshll.u32 %v14354_v11, 16 }
 0x240   : > { %v14374_v38 = vsel %vm14333_vm8, %v5178_v3, %v5182_v36  ;;  %v5552_v30 = vrot.slane %v5549_v14, 4  ;;  %v9807_v3 = vcombine.low %v4675_v24, %v4676_v58 }
 0x241   : > { %11394 = vmatmul.mubr.bf16.gmra.mrb[40].mxu1 %v14134_v45  ;;  %5440 = vmatpush1.bf16.msra.mxu0 %v12277_v16  ;;  %v14348_v45 = vrot.slane %v5190_v44, 5  ;;  %v5550_v16 = vor.u32 %v5549_v14, %v5170_v50  ;;  %v5554_v50 = vor.u32 %v14343_v47, %v5180_v15  ;;  %v16499_v15 = vshrl.u32 %v14354_v11, 16 }
 0x242   : > { %11410 = vmatpush3.bf16.msra.mxu1 %v13984_v51  ;;  %11397 = vmatprep.mubr.bf16.mxu1 %v4385_v27  ;;  %v14358_v51 = vsel %vm14333_vm8, %v5168_v40, %v5172_v28  ;;  %v16500_v14 = vshll.u32 %v14361_v62, 16 }
 0x243   : > { %11411 = vmatprep.subr.bf16.mxu1 %v13997_v59  ;;  %5441 = vmatprep.subr.bf16.mxu0 %v12283_v13  ;;  %v14384_v13 = vld [vmem:[%s12744_s30 + $0x58] sm:$0xf]  ;;  %v5197_v40 = vor.u32 %v5196_v5, %v14348_v45  ;;  %v14413_v5 = vsel %vm14378_vm10, %v5552_v30, %v5554_v50  ;;  %v5150_v50 = vld [vmem:[%s12744_s30 + $0x1c] sm:$0x1] }
 0x244   : > { %5116 = vmatmul.mubr.bf16.gmra.mrb[48].mxu0 %v9806_v52  ;;  %v4707_v52 = vmax.bf16 %v14366_v22, %v14225_v60  ;;  %v4708_v27 = vmax.bf16 %v14384_v13, %v14228_v20  ;;  %v5214_v60 = vshrl.u32 %v14361_v62, 16  ;;  %v14405_v20 = vsel %vm14378_vm10, %v9863_v23, %v5550_v16  ;;  %16641 = vst [vmem:[#allocation29_spill] sm:$0xff] %v14413_v5  ;;  %v4677_v23 = vld [vmem:[%s12744_s30 + $0x3c] sm:$0xf] }
 0x245   : > { %5125 = vmatprep.mubr.bf16.mxu0 %v16511_v57  ;;  %5442 = vmatpush1.bf16.msra.mxu0 %v12281_v21  ;;  %v5187_v21 = vor.u32 %v5186_v1, %v5182_v36  ;;  %v5557_v36 = vrot.slane %v5194_v8, 7  ;;  %v14423_v8 = vrot.slane %v5200_v4, 5  ;;  %v14432_v30 = vrot.slane %v16500_v14, 5  ;;  %v14447_v14 = vld [vmem:[%s12744_s30 + $0x60] sm:$0xf] }
 0x246   : > { %11412 = vmatpush3.bf16.msra.mxu1 %v13997_v59  ;;  %5443 = vmatprep.subr.bf16.mxu0 %v12286_v55  ;;  %v12289_v59 = vld [vmem:[%s16447_s7 + $0x184] ss:$8 sps:$4 sm:$0xff]   ;;  %v14401_v55 = vmax.bf16 %v14358_v51, %v4707_v52  ;;  %v14408_v1 = vmax.bf16 %v14374_v38, %v4708_v27  ;;  %v14417_v52 = vrot.slane %v16499_v15, 7  ;;  %v5556_v27 = vrot.slane %v14343_v47, 4  ;;  %v14444_v15 = vld [vmem:[%s12744_s30 + $0x5c] sm:$0xf] }
 0x247   : > { %11413 = vmatprep.subr.bf16.mxu1 %v14016_v48  ;;  %v5188_v16 = vrot.slane %v5187_v21, 4  ;;  %v5558_v58 = vor.u32 %v5557_v36, %v5190_v44  ;;  %v5560_v24 = vrot.slane %v5557_v36, 4  ;;  %v4710_v47 = vmax.bf16 %v14447_v14, %v14256_v25 }
 0x248   : > { %16640 = vst [vmem:[#allocation27_spill] sm:$0xff] %v14408_v1  ;;  %v5562_v21 = vor.u32 %v14417_v52, %v5200_v4  ;;  %v5220_v4 = vshll.u32 %v5150_v50, 16 }
 0x249   : > { %11398 = vmatmul.mubr.bf16.gmra.mrb[44].mxu1 %v14175_v42  ;;  %5444 = vmatpush1.bf16.msra.mxu0 %v12284_v12  ;;  %v5539_v42 = vld [vmem:[%s12744_s30 + $0x1c] sm:$0xf]  ;;  %v5198_v12 = vrot.slane %v5197_v40, 4  ;;  %v14458_v56 = vsel %vm14333_vm8, %v5188_v16, %v14348_v45  ;;  %v14469_v25 = vsel %vm14378_vm10, %v5556_v27, %v5558_v58  ;;  %v14482_v16 = vrot.slane %v5214_v60, 7  ;;  %v12551_v58 = vld [vmem:[#allocation2 + $0x8] sm:$0xff] }
 0x24a   : > { %11414 = vmatpush3.bf16.msra.mxu1 %v14016_v48  ;;  %11401 = vmatprep.mubr.bf16.mxu1 %v14181_v29  ;;  %v5216_v48 = vrot.slane %v5214_v60, 4  ;;  %v14435_v29 = vld [vmem:[%s12744_s30 + $0x40] sm:$0xf]  ;;  %v5570_v40 = vshrl.u32 %v5539_v42, 16  ;;  %v14480_v36 = vsel %vm14378_vm10, %v5560_v24, %v5562_v21  ;;  %v5222_v24 = vrot.slane %v5220_v4, 5  ;;  %v12552_v4 = vld [vmem:[#allocation2 + $0x10] sm:$0xff] }
 0x24b   : > { %11415 = vmatprep.subr.bf16.mxu1 %v14028_v9  ;;  %5751 = vmatprep.subr.bf16.mxu0 %v12289_v59  ;;  %v4709_v59 = vmax.bf16 %v14444_v15, %v14253_v37  ;;  %v14463_v44 = vsel %vm14333_vm8, %v5198_v12, %v14423_v8  ;;  %v9808_v37 = vcombine.low %v4677_v23, %v14435_v29  ;;  %v5573_v12 = vshll.u32 %v5539_v42, 16  ;;  %v12325_v60 = vld [vmem:[%s16447_s7 + $0x84] ss:$8 sps:$4 sm:$0xff]   ;;  %v14496_v27 = vld [vmem:[%s12744_s30 + $0x68] sm:$0xf] }
 0x24c   : > { %5126 = vmatmul.mubr.bf16.gmra.mrb[52].mxu0 %v9807_v3  ;;  %v14475_v45 = vmax.bf16 %v14463_v44, %v4710_v47  ;;  %16643 = vst [vmem:[#allocation32_spill] sm:$0xff] %v14480_v36  ;;  %v5572_v23 = vrot.slane %v5570_v40, 7  ;;  %v12323_v21 = vld [vmem:[%s16447_s7 + $0x80] ss:$8 sps:$4 sm:$0xff]   ;;  %v4711_v40 = vmax.bf16 %v14496_v27, %v14286_v33  ;;  %v12331_v47 = vld [vmem:[%s16447_s7 + $0x94] ss:$8 sps:$4 sm:$0xff]  }
 0x24d   : > { %5135 = vmatprep.mubr.bf16.mxu0 %v16511_v57  ;;  %v14472_v3 = vmax.bf16 %v14458_v56, %v4709_v59 }
 0x24e   : > { %11416 = vmatpush3.bf16.msra.mxu1 %v14028_v9  ;;  %v5217_v9 = vor.u32 %v5216_v48, %v14432_v30  ;;  %16642 = vst [vmem:[#allocation30_spill] sm:$0xff] %v14475_v45  ;;  %v5575_v42 = vor.u32 %v5573_v12, %v5572_v23  ;;  %v12287_v23 = vld [vmem:[%s16447_s7 + $0x180] ss:$8 sps:$4 sm:$0xff]   ;;  %v5151_v12 = vld [vmem:[%s12744_s30 + $0x2c] sm:$0xf]  ;;  %v12555_v48 = vld [vmem:[#allocation2 + $0x38] sm:$0xff] }
 0x24f   : > { %11417 = vmatprep.subr.bf16.mxu1 %v14044_v54  ;;  %v9910_v45 = vld [vmem:[%s12744_s30 + $0x7c] sm:$0x8] }
 0x251   : > { %11402 = vmatmul.mubr.bf16.gmra.mrb[48].mxu1 %v14213_v0  ;;  %v5218_v0 = vrot.slane %v5217_v9, 4 }
 0x252   : > { %11418 = vmatpush3.bf16.msra.mxu1 %v14044_v54  ;;  %11421 = vmatprep.mubr.bf16.mxu1 %v12551_v58  ;;  %v5568_v54 = vrot.slane %v14482_v16, 4 }
 0x253   : > { %11419 = vmatprep.subr.bf16.mxu1 %v14058_v34  ;;  %v14506_v59 = vsel %vm14333_vm8, %v5218_v0, %v5222_v24  ;;  %v12553_v0 = vld [vmem:[#allocation2 + $0x18] sm:$0xff] }
 0x254   : > { %5136 = vmatmul.mubr.bf16.gmra.mrb[56].mxu0 %v9808_v37  ;;  %v14514_v9 = vmax.bf16 %v14506_v59, %v4711_v40  ;;  %v16645_v37 = vshrl.u32 %v14354_v11, 16  ;;  %v14524_v58 = vsel %vm14378_vm10, %v5568_v54, %v5575_v42  ;;  %v12329_v11 = vld [vmem:[%s16447_s7 + $0x90] ss:$8 sps:$4 sm:$0xff]   ;;  %v5225_v54 = vshrl.u32 %v5151_v12, 16 }
 0x255   : > { %5461 = vmatprep.mubr.bf16.mxu0 %v16511_v57  ;;  %16646 = vst [vmem:[#allocation34_spill] sm:$0xff] %v14524_v58  ;;  %v5228_v42 = vshll.u32 %v5151_v12, 16  ;;  %v12290_v40 = vld [vmem:[%s16447_s7 + $0x190] ss:$8 sps:$4 sm:$0xff]  }
 0x256   : > { %11420 = vmatpush3.bf16.msra.mxu1 %v14058_v34  ;;  %v9841_v34 = vcombine.low %v14358_v51, %v14374_v38  ;;  %16644 = vst [vmem:[#allocation33_spill] sm:$0xff] %v14514_v9  ;;  %v5206_v33 = vrot.slane %v16645_v37, 4  ;;  %v12292_v51 = vld [vmem:[%s16447_s7 + $0x194] ss:$8 sps:$4 sm:$0xff]   ;;  %v14530_v38 = vld [vmem:[%s12744_s30 + $0x30] sm:$0xf] }
 0x257   : > { %4850 = vmatprep.subr.bf16.mxu1 %v12325_v60  ;;  %v12337_v60 = vld [vmem:[%s16447_s7 + $0xa4] ss:$8 sps:$4 sm:$0xff]   ;;  %v12335_v37 = vld [vmem:[%s16447_s7 + $0xa0] ss:$8 sps:$4 sm:$0xff]   ;;  %v5230_v12 = vrot.slane %v5228_v42, 5 }
 0x258   : > { %v12341_v42 = vld [vmem:[%s16447_s7 + $0xb0] ss:$8 sps:$4 sm:$0xff]   ;;  %v9907_v9 = vld [vmem:[%s12744_s30 + $0x64] sm:$0xf] }
 0x259   : > { %11422 = vmatmul.mubr.bf16.vlgmr.msra.gmra.mrb[36].mxu1 %v12552_v4  ;;  %v16501_v4 = vshll.u32 %v14530_v38, 16 }
 0x25a   : > { %11425 = vmatprep.mubr.bf16.mxu1 %v12553_v0  ;;  %4851 = vmatpush1.bf16.msra.mxu1 %v12323_v21  ;;  %v5207_v21 = vor.u32 %v5206_v33, %v14423_v8  ;;  %v9842_v8 = vcombine.low %v14458_v56, %v14463_v44  ;;  %v14556_v33 = vld [vmem:[%s12744_s30 + $0x34] sm:$0xf]  ;;  %v12293_v56 = vld [vmem:[%s16447_s7 + $0x1a0] ss:$8 sps:$4 sm:$0xff]  }
 0x25b   : > { %4852 = vmatprep.subr.bf16.mxu1 %v12331_v47  ;;  %v16506_v47 = vshrl.u32 %v14530_v38, 16  ;;  %v12343_v0 = vld [vmem:[%s16447_s7 + $0xb4] ss:$8 sps:$4 sm:$0xff]   ;;  %v16505_v24 = vshrl.u32 %v14556_v33, 16 }
 0x25c   : > { %5462 = vmatmul.mubr.bf16.vlgmr.msra.gmra.mrb[36].mxu0 %v9841_v34  ;;  %v12295_v34 = vld [vmem:[%s16447_s7 + $0x1a4] ss:$8 sps:$4 sm:$0xff]   ;;  %v12554_v44 = vld [vmem:[#allocation2 + $0x30] sm:$0xff] }
 0x25d   : > { %5471 = vmatprep.mubr.bf16.mxu0 %v16511_v57  ;;  %5752 = vmatpush1.bf16.msra.mxu0 %v12287_v23  ;;  %v5227_v23 = vrot.slane %v5225_v54, 4  ;;  %v12298_v54 = vld [vmem:[%s16447_s7 + $0x1b4] ss:$8 sps:$4 sm:$0xff]   ;;  %v5250_v50 = vrot.slane %v16505_v24, 4 }
 0x25e   : > { %5753 = vmatprep.subr.bf16.mxu0 %v12292_v51  ;;  %4853 = vmatpush1.bf16.msra.mxu1 %v12329_v11  ;;  %v5208_v51 = vrot.slane %v5207_v21, 4  ;;  %v5236_v11 = vrot.slane %v16501_v4, 5 }
 0x25f   : > { %4854 = vmatprep.subr.bf16.mxu1 %v12337_v60  ;;  %v5240_v60 = vrot.slane %v16506_v47, 4  ;;  %v5231_v21 = vor.u32 %v5230_v12, %v5227_v23 }
 0x261   : > { %11426 = vmatmul.mubr.bf16.gmra.mrb[40].mxu1 %v13939_v53  ;;  %5754 = vmatpush1.bf16.msra.mxu0 %v12290_v40  ;;  %v14573_v53 = vld [vmem:[%s12744_s30 + $0x38] sm:$0xf]  ;;  %v16504_v40 = vshll.u32 %v14556_v33, 16 }
 0x262   : > { %11429 = vmatprep.mubr.bf16.mxu1 %v12554_v44  ;;  %5755 = vmatprep.subr.bf16.mxu0 %v12295_v34  ;;  %v12349_v34 = vld [vmem:[%s16447_s7 + $0xc4] ss:$8 sps:$4 sm:$0xff]   ;;  %v5241_v44 = vor.u32 %v5240_v60, %v5236_v11  ;;  %v16502_v23 = vshll.u32 %v14573_v53, 16  ;;  %v16503_v12 = vshrl.u32 %v14573_v53, 16  ;;  %v5232_v60 = vrot.slane %v5231_v21, 4 }
 0x263   : > { %4855 = vmatpush1.bf16.msra.mxu1 %v12335_v37  ;;  %v5213_v37 = vsel %vm14333_vm8, %v5208_v51, %v14432_v30  ;;  %v12347_v30 = vld [vmem:[%s16447_s7 + $0xc0] ss:$8 sps:$4 sm:$0xff]   ;;  %v5246_v4 = vrot.slane %v16504_v40, 5  ;;  %v12355_v40 = vld [vmem:[%s16447_s7 + $0xe4] ss:$8 sps:$4 sm:$0xff]  }
 0x264   : > { %5472 = vmatmul.mubr.bf16.gmra.mrb[40].mxu0 %v9842_v8  ;;  %4856 = vmatprep.subr.bf16.mxu1 %v12343_v0  ;;  %v12296_v8 = vld [vmem:[%s16447_s7 + $0x1b0] ss:$8 sps:$4 sm:$0xff]   ;;  %v12301_v0 = vld [vmem:[%s16447_s7 + $0x1c4] ss:$8 sps:$4 sm:$0xff]   ;;  %v9843_v51 = vcombine.low %v5213_v37, %v14506_v59  ;;  %v5256_v59 = vrot.slane %v16502_v23, 5  ;;  %v5260_v21 = vrot.slane %v16503_v12, 4  ;;  %v14627_v23 = vsel %vm14333_vm8, %v5232_v60, %v5236_v11 }
 0x265   : > { %5481 = vmatprep.mubr.bf16.mxu0 %v16511_v57  ;;  %5756 = vmatpush1.bf16.msra.mxu0 %v12293_v56  ;;  %v14600_v56 = vld [vmem:[%s12744_s30 + $0x3c] sm:$0xf]  ;;  %v12556_v37 = vld [vmem:[#allocation2 + $0x40] sm:$0xff]  ;;  %v5251_v12 = vor.u32 %v5250_v50, %v5246_v4  ;;  %v12302_v50 = vld [vmem:[%s16447_s7 + $0x1d0] ss:$8 sps:$4 sm:$0xff]  }
 0x266   : > { %5757 = vmatprep.subr.bf16.mxu0 %v12298_v54  ;;  %v12352_v54 = vld [vmem:[%s16447_s7 + $0xd4] ss:$8 sps:$4 sm:$0xff]  }
 0x267   : > { %4857 = vmatpush1.bf16.msra.mxu1 %v12341_v42  ;;  %v5242_v42 = vrot.slane %v5241_v44, 4  ;;  %v14620_v44 = vld [vmem:[%s12744_s30 + $0x40] sm:$0xf] }
 0x268   : > { %4858 = vmatprep.subr.bf16.mxu1 %v12349_v34  ;;  %v12299_v34 = vld [vmem:[%s16447_s7 + $0x1c0] ss:$8 sps:$4 sm:$0xff]   ;;  %16647 = vst [vmem:[#allocation26_spill] sm:$0xff] %v14620_v44  ;;  %v16508_v11 = vshll.u32 %v14620_v44, 16  ;;  %v16509_v60 = vshrl.u32 %v14620_v44, 16 }
 0x269   : > { %11430 = vmatmul.mubr.bf16.gmra.mrb[44].mxu1 %v12555_v48  ;;  %5758 = vmatpush1.bf16.msra.mxu0 %v12296_v8  ;;  %v12304_v48 = vld [vmem:[%s16447_s7 + $0x1d4] ss:$8 sps:$4 sm:$0xff]   ;;  %v12350_v8 = vld [vmem:[%s16447_s7 + $0xd0] ss:$8 sps:$4 sm:$0xff]  }
 0x26a   : > { %11433 = vmatprep.mubr.bf16.mxu1 %v12556_v37  ;;  %5759 = vmatprep.subr.bf16.mxu0 %v12301_v0  ;;  %v16507_v37 = vshll.u32 %v14600_v56, 16  ;;  %v16510_v0 = vshrl.u32 %v14600_v56, 16  ;;  %v5276_v47 = vrot.slane %v16508_v11, 5 }
 0x26b   : > { %4859 = vmatpush1.bf16.msra.mxu1 %v12347_v30  ;;  %v14637_v30 = vsel %vm14333_vm8, %v5242_v42, %v5246_v4  ;;  %v12353_v4 = vld [vmem:[%s16447_s7 + $0xe0] ss:$8 sps:$4 sm:$0xff]  }
 0x26c   : > { %5482 = vmatmul.mubr.bf16.gmra.mrb[60].mxu0 %v9843_v51  ;;  %4860 = vmatprep.subr.bf16.mxu1 %v12352_v54  ;;  %v5261_v51 = vor.u32 %v5260_v21, %v5256_v59  ;;  %v12307_v54 = vld [vmem:[%s16447_s7 + $0x1e4] ss:$8 sps:$4 sm:$0xff]   ;;  %v9844_v42 = vcombine.low %v14627_v23, %v14637_v30  ;;  %v5252_v21 = vrot.slane %v5251_v12, 4  ;;  %v5280_v12 = vrot.slane %v16509_v60, 4 }
 0x26d   : > { %5489 = vmatprep.mubr.bf16.mxu0 %v16511_v57  ;;  %5760 = vmatpush1.bf16.msra.mxu0 %v12299_v34  ;;  %v5266_v34 = vrot.slane %v16507_v37, 5  ;;  %v5157_v37 = vld [vmem:[%s12744_s30 + $0x44] sm:$0x1] }
 0x26e   : > { %5761 = vmatprep.subr.bf16.mxu0 %v12304_v48  ;;  %v12358_v48 = vld [vmem:[%s16447_s7 + $0xf4] ss:$8 sps:$4 sm:$0xff]   ;;  %v5262_v24 = vrot.slane %v5261_v51, 4  ;;  %v12356_v51 = vld [vmem:[%s16447_s7 + $0xf0] ss:$8 sps:$4 sm:$0xff]   ;;  %v5281_v60 = vor.u32 %v5280_v12, %v5276_v47 }
 0x26f   : > { %4861 = vmatpush1.bf16.msra.mxu1 %v12350_v8  ;;  %v5270_v8 = vrot.slane %v16510_v0, 4  ;;  %v5284_v0 = vshll.u32 %v5157_v37, 16  ;;  %v14725_v12 = vld [vmem:[%s12744_s30 + $0x80] sm:$0xf] }
 0x270   : > { %4862 = vmatprep.subr.bf16.mxu1 %v12355_v40  ;;  %v12305_v40 = vld [vmem:[%s16447_s7 + $0x1e0] ss:$8 sps:$4 sm:$0xff]   ;;  %v5282_v37 = vrot.slane %v5281_v60, 4  ;;  %v12316_v60 = vld [vmem:[%s16447_s7 + $0x214] ss:$8 sps:$4 sm:$0xff]  }
 0x271   : > { %11434 = vmatmul.mubr.bf16.gmra.mrb[48].mxu1 %v14005_v17  ;;  %5762 = vmatpush1.bf16.msra.mxu0 %v12302_v50  ;;  %v12310_v17 = vld [vmem:[%s16447_s7 + $0x1f4] ss:$8 sps:$4 sm:$0xff]   ;;  %v14677_v50 = vsel %vm14333_vm8, %v5252_v21, %v5256_v59  ;;  %v5271_v11 = vor.u32 %v5270_v8, %v5266_v34  ;;  %v12313_v59 = vld [vmem:[%s16447_s7 + $0x204] ss:$8 sps:$4 sm:$0xff]  }
 0x272   : > { %5763 = vmatprep.subr.bf16.mxu0 %v12307_v54  ;;  %4882 = vmatprep.mubr.bf16.mxu1 %v16511_v57  ;;  %v14682_v54 = vsel %vm14333_vm8, %v5262_v24, %v5266_v34  ;;  %v5286_v34 = vrot.slane %v5284_v0, 5  ;;  %v14722_v8 = vld [vmem:[%s12744_s30 + $0x7c] sm:$0xf] }
 0x273   : > { %4863 = vmatpush1.bf16.msra.mxu1 %v12353_v4  ;;  %v12308_v4 = vld [vmem:[%s16447_s7 + $0x1f0] ss:$8 sps:$4 sm:$0xff]   ;;  %v9845_v24 = vcombine.low %v14677_v50, %v14682_v54  ;;  %v5272_v21 = vrot.slane %v5271_v11, 4  ;;  %v9757_v11 = vld [vmem:[%s12744_s30 + $0x64] sm:$0xf] }
 0x274   : > { %5490 = vmatmul.mubr.bf16.gmra.mrb[48].mxu0 %v9844_v42  ;;  %4864 = vmatprep.subr.bf16.mxu1 %v12358_v48  ;;  %v9781_v42 = vcombine.low %v14366_v22, %v14384_v13  ;;  %v14700_v22 = vsel %vm14333_vm8, %v5282_v37, %v5286_v34  ;;  %v9782_v13 = vcombine.low %v14444_v15, %v14447_v14  ;;  %v12311_v14 = vld [vmem:[%s16447_s7 + $0x200] ss:$8 sps:$4 sm:$0xff]   ;;  %v5540_v34 = vld [vmem:[%s12744_s30 + $0x2c] sm:$0x8] }
 0x275   : > { %5499 = vmatprep.mubr.bf16.mxu0 %v16511_v57  ;;  %5764 = vmatpush1.bf16.msra.mxu0 %v12305_v40  ;;  %v5277_v48 = vsel %vm14333_vm8, %v5272_v21, %v5276_v47  ;;  %v12402_v47 = vld [vmem:[%s16445_s5 + $0x40] sm:$0xff]   ;;  %v9783_v49 = vcombine.low %v9757_v11, %v14496_v27  ;;  %v9881_v15 = vcombine.low %v14405_v20, %v14413_v5  ;;  %v12410_v27 = vld [vmem:[%s16445_s5 + $0x48] sm:$0xff]   ;;  %v12314_v40 = vld [vmem:[%s16447_s7 + $0x210] ss:$8 sps:$4 sm:$0xff]  }
 0x276   : > { %5765 = vmatprep.subr.bf16.mxu0 %v12310_v17  ;;  %v9846_v0 = vcombine.low %v5277_v48, %v14700_v22  ;;  %v12414_v17 = vld [vmem:[%s16445_s5 + $0x50] sm:$0xff]   ;;  %v12317_v37 = vld [vmem:[%s16447_s7 + $0x220] ss:$8 sps:$4 sm:$0xff]  }
 0x277   : > { %4865 = vmatpush1.bf16.msra.mxu1 %v12356_v51  ;;  %v12319_v51 = vld [vmem:[%s16447_s7 + $0x224] ss:$8 sps:$4 sm:$0xff]   ;;  %v12322_v48 = vld [vmem:[%s16447_s7 + $0x234] ss:$8 sps:$4 sm:$0xff]  }
 0x278   : > { %11437 = vmatprep.subr.bf16.mxu1 %v12402_v47 }
 0x279   : > { %5766 = vmatpush1.bf16.msra.mxu0 %v12308_v4  ;;  %v9784_v4 = vcombine.low %v14722_v8, %v14725_v12 }
 0x27a   : > { %6131 = vmatprep.subr.bf16.mxu0 %v12313_v59  ;;  %4883 = vmatmul.mubr.bf16.vlgmr.msra.gmra.mrb[52].mxu1 %v9781_v42  ;;  %v9882_v59 = vcombine.low %v14469_v25, %v14480_v36  ;;  %v5564_v42 = vrot.slane %v14417_v52, 4  ;;  %v14760_v52 = vld [vmem:[%s12744_s30 + $0x88] sm:$0xf] }
 0x27b   : > { %4892 = vmatprep.mubr.bf16.mxu1 %v16511_v57  ;;  %11438 = vmatpush3.bf16.msra.mxu1 %v12402_v47  ;;  %v16650_v47 = vshrl.u32 %v14556_v33, 16 }
 0x27c   : > { %5500 = vmatmul.mubr.bf16.gmra.mrb[52].mxu0 %v9845_v24  ;;  %11439 = vmatprep.subr.bf16.mxu1 %v12410_v27  ;;  %v16648_v24 = vshll.u32 %v14361_v62, 16 }
 0x27d   : > { %5509 = vmatprep.mubr.bf16.mxu0 %v16511_v57 }
 0x27e   : > { %v5566_v21 = vor.u32 %v14482_v16, %v16648_v24  ;;  %v5578_v16 = vshrl.u32 %v5540_v34, 16  ;;  %v16653_v34 = vshrl.u32 %v14573_v53, 16 }
 0x27f   : > { %11440 = vmatpush3.bf16.msra.mxu1 %v12410_v27 }
 0x280   : > { %11441 = vmatprep.subr.bf16.mxu1 %v12414_v17  ;;  %v5567_v62 = vsel %vm14378_vm10, %v5564_v42, %v5566_v21  ;;  %v16652_v42 = vshll.u32 %v14556_v33, 16  ;;  %v12326_v21 = vld [vmem:[%s16447_s7 + $0x240] ss:$8 sps:$4 sm:$0xff]  }
 0x282   : > { %4893 = vmatmul.mubr.bf16.gmra.mrb[56].mxu1 %v9782_v13  ;;  %v14757_v13 = vld [vmem:[%s12744_s30 + $0x84] sm:$0xf] }
 0x283   : > { %4902 = vmatprep.mubr.bf16.mxu1 %v16511_v57  ;;  %11442 = vmatpush3.bf16.msra.mxu1 %v12414_v17  ;;  %v9785_v27 = vcombine.low %v14757_v13, %v14760_v52  ;;  %v9864_v17 = vrot.slane %v5578_v16, 11  ;;  %v14796_v16 = vld [vmem:[%s12744_s30 + $0x90] sm:$0xf] }
 0x284   : > { %5510 = vmatmul.mubr.bf16.gmra.mrb[64].mxu0 %v9846_v0  ;;  %v16649_v0 = vshrl.u32 %v14530_v38, 16 }
 0x285   : > { %5783 = vmatprep.mubr.bf16.mxu0 %v16511_v57 }
 0x286   : > { %v5582_v11 = vrot.slane %v16649_v0, 7  ;;  %v16654_v0 = vshrl.u32 %v14600_v56, 16 }
 0x28a   : > { %4903 = vmatmul.mubr.bf16.gmra.mrb[60].mxu1 %v9783_v49  ;;  %v5586_v49 = vrot.slane %v16650_v47, 7  ;;  %v12423_v47 = vld [vmem:[%s16445_s5 + $0x60] sm:$0xff]  }
 0x28b   : > { %4910 = vmatprep.mubr.bf16.mxu1 %v16511_v57 }
 0x28c   : > { %5784 = vmatmul.mubr.bf16.vlgmr.msra.gmra.mrb[36].mxu0 %v9881_v15  ;;  %v12320_v15 = vld [vmem:[%s16447_s7 + $0x230] ss:$8 sps:$4 sm:$0xff]   ;;  %v5587_v24 = vor.u32 %v5586_v49, %v16652_v42 }
 0x28d   : > { %5793 = vmatprep.mubr.bf16.mxu0 %v16511_v57  ;;  %6132 = vmatpush1.bf16.msra.mxu0 %v12311_v14  ;;  %v12422_v14 = vld [vmem:[%s16445_s5 + $0x58] sm:$0xff]  }
 0x28e   : > { %6133 = vmatprep.subr.bf16.mxu0 %v12316_v60  ;;  %v12328_v60 = vld [vmem:[%s16447_s7 + $0x244] ss:$8 sps:$4 sm:$0xff]   ;;  %11443 = vmatprep.subr.bf16.mxu1 %v12422_v14 }
 0x28f   : > { %11444 = vmatpush3.bf16.msra.mxu1 %v12422_v14 }
 0x290   : > { %11445 = vmatprep.subr.bf16.mxu1 %v12423_v47 }
 0x291   : > { %6134 = vmatpush1.bf16.msra.mxu0 %v12314_v40  ;;  %v9883_v40 = vcombine.low %v5567_v62, %v14524_v58  ;;  %v9763_v62 = vld [vmem:[%s12744_s30 + $0x8c] sm:$0xf] }
 0x292   : > { %6135 = vmatprep.subr.bf16.mxu0 %v12319_v51  ;;  %4911 = vmatmul.mubr.bf16.gmra.mrb[64].mxu1 %v9784_v4  ;;  %v16651_v51 = vshll.u32 %v14530_v38, 16 }
 0x293   : > { %4920 = vmatprep.mubr.bf16.mxu1 %v16511_v57  ;;  %11446 = vmatpush3.bf16.msra.mxu1 %v12423_v47  ;;  %v16658_v47 = vshrl.u32 %v14620_v44, 16 }
 0x294   : > { %5794 = vmatmul.mubr.bf16.gmra.mrb[40].mxu0 %v9882_v59  ;;  %v5583_v4 = vor.u32 %v5582_v11, %v16651_v51  ;;  %v5585_v59 = vrot.slane %v5582_v11, 4  ;;  %v5594_v11 = vrot.slane %v16654_v0, 7  ;;  %v9786_v51 = vcombine.low %v9763_v62, %v14796_v16  ;;  %v12338_v62 = vld [vmem:[%s16447_s7 + $0x260] ss:$8 sps:$4 sm:$0xff]  }
 0x295   : > { %5803 = vmatprep.mubr.bf16.mxu0 %v16511_v57  ;;  %6136 = vmatpush1.bf16.msra.mxu0 %v12317_v37  ;;  %v12334_v37 = vld [vmem:[%s16447_s7 + $0x254] ss:$8 sps:$4 sm:$0xff]  }
 0x296   : > { %6137 = vmatprep.subr.bf16.mxu0 %v12322_v48  ;;  %v5590_v48 = vrot.slane %v16653_v34, 7  ;;  %v14810_v14 = vsel %vm14378_vm10, %v5585_v59, %v5587_v24 }
 0x298   : > { %v5593_v24 = vrot.slane %v5590_v48, 4 }
 0x299   : > { %6138 = vmatpush1.bf16.msra.mxu0 %v12320_v15  ;;  %v14806_v15 = vsel %vm14378_vm10, %v9864_v17, %v5583_v4  ;;  %v5589_v17 = vrot.slane %v5586_v49, 4  ;;  %v16656_v4 = vshll.u32 %v14573_v53, 16  ;;  %v12346_v49 = vld [vmem:[%s16447_s7 + $0x274] ss:$8 sps:$4 sm:$0xff]  }
 0x29a   : > { %6139 = vmatprep.subr.bf16.mxu0 %v12328_v60  ;;  %4921 = vmatmul.mubr.bf16.gmra.mrb[68].mxu1 %v9785_v27  ;;  %v12332_v60 = vld [vmem:[%s16447_s7 + $0x250] ss:$8 sps:$4 sm:$0xff]   ;;  %v14816_v27 = vld [vmem:[%s12744_s30 + $0x44] sm:$0xf]  ;;  %v9884_v42 = vcombine.low %v14806_v15, %v14810_v14 }
 0x29b   : > { %4930 = vmatprep.mubr.bf16.mxu1 %v16511_v57  ;;  %16655 = vst [vmem:[#allocation6_spill] sm:$0xff] %v14816_v27  ;;  %v5591_v59 = vor.u32 %v5590_v48, %v16656_v4 }
 0x29c   : > { %5804 = vmatmul.mubr.bf16.gmra.mrb[68].mxu0 %v9883_v40  ;;  %v12340_v40 = vld [vmem:[%s16447_s7 + $0x264] ss:$8 sps:$4 sm:$0xff]  }
 0x29d   : > { %5811 = vmatprep.mubr.bf16.mxu0 %v16511_v57  ;;  %6140 = vmatpush1.bf16.msra.mxu0 %v12326_v21  ;;  %v16657_v21 = vshll.u32 %v14600_v56, 16  ;;  %v14837_v48 = vsel %vm14378_vm10, %v5589_v17, %v5591_v59  ;;  %v9904_v17 = vld [vmem:[%s12744_s30 + $0x58] sm:$0xf]  ;;  %v9905_v59 = vld [vmem:[%s12744_s30 + $0x5c] sm:$0xf] }
 0x29e   : > { %6141 = vmatprep.subr.bf16.mxu0 %v12334_v37  ;;  %v5603_v37 = vshrl.u32 %v14816_v27, 16  ;;  %v5880_v1 = vshrl.u32 %v9904_v17, 16  ;;  %v5889_v5 = vshrl.u32 %v9905_v59, 16 }
 0x29f   : > { %v5595_v34 = vor.u32 %v5594_v11, %v16657_v21  ;;  %v12424_v21 = vld [vmem:[%s16445_s5 + $0x68] sm:$0xff]  }
 0x2a0   : > { %v5605_v4 = vrot.slane %v5603_v37, 7  ;;  %11447 = vmatprep.subr.bf16.mxu1 %v12424_v21  ;;  %v16659_v37 = vshll.u32 %v14620_v44, 16  ;;  %v12367_v44 = vld [vmem:[%s16447_s7 + $0x2a0] ss:$8 sps:$4 sm:$0xff]  }
 0x2a1   : > { %6142 = vmatpush1.bf16.msra.mxu0 %v12332_v60  ;;  %v14841_v0 = vsel %vm14378_vm10, %v5593_v24, %v5595_v34  ;;  %v5598_v60 = vrot.slane %v16658_v47, 7  ;;  %11448 = vmatpush3.bf16.msra.mxu1 %v12424_v21  ;;  %v5597_v34 = vrot.slane %v5594_v11, 4 }
 0x2a2   : > { %6143 = vmatprep.subr.bf16.mxu0 %v12340_v40  ;;  %4931 = vmatmul.mubr.bf16.gmra.mrb[72].mxu1 %v9786_v51  ;;  %v5606_v40 = vshll.u32 %v14816_v27, 16  ;;  %v12344_v51 = vld [vmem:[%s16447_s7 + $0x270] ss:$8 sps:$4 sm:$0xff]   ;;  %v9885_v24 = vcombine.low %v14837_v48, %v14841_v0 }
 0x2a3   : > { %v5601_v47 = vrot.slane %v5598_v60, 4 }
 0x2a4   : > { %5812 = vmatmul.mubr.bf16.gmra.mrb[48].mxu0 %v9884_v42  ;;  %v12362_v42 = vld [vmem:[%s16447_s7 + $0x284] ss:$8 sps:$4 sm:$0xff]  }
 0x2a5   : > { %5821 = vmatprep.mubr.bf16.mxu0 %v16511_v57  ;;  %6144 = vmatpush1.bf16.msra.mxu0 %v12338_v62  ;;  %v5599_v62 = vor.u32 %v5598_v60, %v16659_v37  ;;  %v5608_v57 = vor.u32 %v5606_v40, %v5605_v4  ;;  %v5882_v60 = vrot.slane %v5880_v1, 7  ;;  %v5883_v37 = vshll.u32 %v9904_v17, 16  ;;  %v12425_v1 = vld [vmem:[%s16445_s5 + $0x70] sm:$0xff]  }
 0x2a6   : > { %6145 = vmatprep.subr.bf16.mxu0 %v12346_v49  ;;  %v9903_v49 = vld [vmem:[%s12744_s30 + $0x54] sm:$0x8]  ;;  %v5891_v4 = vrot.slane %v5889_v5, 7  ;;  %v5892_v40 = vshll.u32 %v9905_v59, 16  ;;  %v5910_v59 = vshll.u32 %v9907_v9, 16  ;;  %11449 = vmatprep.subr.bf16.mxu1 %v12425_v1 }
 0x2a7   : > { %v5600_v46 = vsel %vm14378_vm10, %v5597_v34, %v5599_v62  ;;  %v14867_v21 = vsel %vm14378_vm10, %v5601_v47, %v5608_v57  ;;  %v5875_v11 = vshrl.u32 %v9903_v49, 16  ;;  %v5885_v34 = vor.u32 %v5883_v37, %v5882_v60  ;;  %11450 = vmatpush3.bf16.msra.mxu1 %v12425_v1 }
 0x2a8   : > { %v9886_v58 = vcombine.low %v5600_v46, %v14867_v21  ;;  %v5887_v62 = vrot.slane %v5882_v60, 4  ;;  %v5894_v2 = vor.u32 %v5892_v40, %v5891_v4  ;;  %v5907_v57 = vshrl.u32 %v9907_v9, 16  ;;  %v12365_v9 = vld [vmem:[%s16447_s7 + $0x294] ss:$8 sps:$4 sm:$0xff]  }
 0x2a9   : > { %6146 = vmatpush1.bf16.msra.mxu0 %v12344_v51  ;;  %v9906_v51 = vld [vmem:[%s12744_s30 + $0x60] sm:$0xf]  ;;  %v5896_v37 = vrot.slane %v5891_v4, 4 }
 0x2aa   : > { %6383 = vmatprep.subr.bf16.mxu0 %v12362_v42  ;;  %v9917_v42 = vrot.slane %v5875_v11, 11  ;;  %v5901_v49 = vshll.u32 %v9906_v51, 16  ;;  %v14883_v5 = vsel %vm14378_vm10, %v5887_v62, %v5894_v2  ;;  %v5909_v17 = vrot.slane %v5907_v57, 7  ;;  %v9908_v11 = vld [vmem:[%s12744_s30 + $0x68] sm:$0xf]  ;;  %v12432_v62 = vld [vmem:[%s16445_s5 + $0x78] sm:$0xff]  }
 0x2ab   : > { %16661 = vst [vmem:[#allocation10_spill] sm:$0xff] %v14883_v5  ;;  %v12360_v2 = vld [vmem:[%s16447_s7 + $0x280] ss:$8 sps:$4 sm:$0xff]   ;;  %11451 = vmatprep.subr.bf16.mxu1 %v12432_v62 }
 0x2ac   : > { %5822 = vmatmul.mubr.bf16.gmra.mrb[52].mxu0 %v9885_v24  ;;  %v5898_v24 = vshrl.u32 %v9906_v51, 16  ;;  %v14879_v46 = vsel %vm14378_vm10, %v9917_v42, %v5885_v34  ;;  %v5916_v51 = vshrl.u32 %v9908_v11, 16  ;;  %11452 = vmatpush3.bf16.msra.mxu1 %v12432_v62 }
 0x2ad   : > { %5831 = vmatprep.mubr.bf16.mxu0 %v16660_v18  ;;  %v9935_v60 = vcombine.low %v14879_v46, %v14883_v5 }
 0x2ae   : > { %v5900_v47 = vrot.slane %v5898_v24, 7  ;;  %v5912_v24 = vor.u32 %v5910_v59, %v5909_v17  ;;  %v5918_v57 = vrot.slane %v5916_v51, 7  ;;  %v5919_v59 = vshll.u32 %v9908_v11, 16  ;;  %v9912_v51 = vld [vmem:[%s12744_s30 + $0x84] sm:$0xf] }
 0x2af   : > { %v5947_v19 = vshrl.u32 %v9912_v51, 16 }
 0x2b0   : > { %v5903_v40 = vor.u32 %v5901_v49, %v5900_v47  ;;  %v5905_v42 = vrot.slane %v5900_v47, 4  ;;  %v14903_v47 = vld [vmem:[%s12744_s30 + $0x90] sm:$0xf]  ;;  %v9916_v49 = vld [vmem:[%s12744_s30 + $0x94] sm:$0xf]  ;;  %v5921_v31 = vor.u32 %v5919_v59, %v5918_v57 }
 0x2b1   : > { %v5974_v11 = vshrl.u32 %v14903_v47, 16 }
 0x2b2   : > { %v14900_v4 = vsel %vm14378_vm10, %v5896_v37, %v5903_v40  ;;  %v14909_v1 = vsel %vm14378_vm10, %v5905_v42, %v5912_v24  ;;  %v12436_v37 = vld [vmem:[%s16445_s5] sm:$0xff]  }
 0x2b3   : > { %v9911_v40 = vld [vmem:[%s12744_s30 + $0x80] sm:$0xf]  ;;  %v12369_v42 = vld [vmem:[%s16447_s7 + $0x2a4] ss:$8 sps:$4 sm:$0xff]   ;;  %v9936_v24 = vcombine.low %v14900_v4, %v14909_v1  ;;  %11465 = vmatprep.subr.bf16.mxu1 %v12436_v37  ;;  %v14934_v62 = vrot.slane %v5974_v11, 7  ;;  %v5949_v11 = vrot.slane %v5947_v19, 7 }
 0x2b4   : > { %5832 = vmatmul.mubr.bf16.gmra.mrb[72].mxu0 %v9886_v58  ;;  %v9909_v58 = vld [vmem:[%s12744_s30 + $0x6c] sm:$0xf]  ;;  %v5938_v36 = vshrl.u32 %v9911_v40, 16 }
 0x2b5   : > { %6163 = vmatprep.mubr.bf16.mxu0 %v16660_v18  ;;  %v5925_v34 = vshrl.u32 %v9909_v58, 16  ;;  %v5928_v6 = vshll.u32 %v9909_v58, 16  ;;  %v5983_v58 = vshrl.u32 %v9916_v49, 16 }
 0x2b7   : > { %v5927_v5 = vrot.slane %v5925_v34, 7  ;;  %v5914_v34 = vrot.slane %v5909_v17, 4  ;;  %v12372_v17 = vld [vmem:[%s16447_s7 + $0x2b4] ss:$8 sps:$4 sm:$0xff]  }
 0x2b9   : > { %v5930_v35 = vor.u32 %v5928_v6, %v5927_v5  ;;  %v5933_v6 = vshrl.u32 %v9910_v45, 16  ;;  %v5941_v5 = vshll.u32 %v9911_v40, 16  ;;  %v12370_v45 = vld [vmem:[%s16447_s7 + $0x2b0] ss:$8 sps:$4 sm:$0xff]   ;;  %v9914_v40 = vld [vmem:[%s12744_s30 + $0x8c] sm:$0xf] }
 0x2bc   : > { %6164 = vmatmul.mubr.bf16.vlgmr.msra.gmra.mrb[36].mxu0 %v9935_v60  ;;  %v12363_v60 = vld [vmem:[%s16447_s7 + $0x290] ss:$8 sps:$4 sm:$0xff]  }
 0x2bd   : > { %6173 = vmatprep.mubr.bf16.mxu0 %v16660_v18  ;;  %6384 = vmatpush1.bf16.msra.mxu0 %v12360_v2  ;;  %v5923_v2 = vrot.slane %v5918_v57, 4  ;;  %v5950_v57 = vshll.u32 %v9912_v51, 16 }
 0x2be   : > { %6385 = vmatprep.subr.bf16.mxu0 %v12365_v9  ;;  %v4716_v9 = vmax.bf16 %v14796_v16, %v14435_v29  ;;  %v5985_v29 = vrot.slane %v5983_v58, 7  ;;  %v5986_v16 = vshll.u32 %v9916_v49, 16  ;;  %v9913_v49 = vld [vmem:[%s12744_s30 + $0x88] sm:$0xf]  ;;  %v9918_v58 = vrot.slane %v5933_v6, 11 }
 0x2bf   : > { %v14942_v37 = vsel %vm14378_vm10, %v5923_v2, %v5930_v35  ;;  %v5965_v2 = vshrl.u32 %v9914_v40, 16 }
 0x2c0   : > { %v5307_v59 = vmax.bf16 %v14700_v22, %v4716_v9  ;;  %v12376_v22 = vld [vmem:[%s16447_s7 + $0x2c4] ss:$8 sps:$4 sm:$0xff]   ;;  %v5988_v51 = vor.u32 %v5986_v16, %v5985_v29  ;;  %v12374_v9 = vld [vmem:[%s16447_s7 + $0x2c0] ss:$8 sps:$4 sm:$0xff]   ;;  %v5959_v16 = vshll.u32 %v9913_v49, 16 }
 0x2c1   : > { %6386 = vmatpush1.bf16.msra.mxu0 %v12363_v60  ;;  %v5922_v60 = vsel %vm14378_vm10, %v5914_v34, %v5921_v31  ;;  %v5981_v31 = vrot.slane %v14934_v62, 4  ;;  %v5952_v34 = vor.u32 %v5950_v57, %v5949_v11 }
 0x2c2   : > { %6387 = vmatprep.subr.bf16.mxu0 %v12369_v42  ;;  %v5940_v42 = vrot.slane %v5938_v36, 7  ;;  %v9937_v35 = vcombine.low %v5922_v60, %v14942_v37  ;;  %v5956_v36 = vshrl.u32 %v9913_v49, 16  ;;  %v5629_v19 = vmax.bf16 %v14867_v21, %v5307_v59 }
 0x2c3   : > { %v14963_v29 = vsel %vm14378_vm10, %v5981_v31, %v5988_v51  ;;  %v5967_v59 = vrot.slane %v5965_v2, 7  ;;  %v5968_v60 = vshll.u32 %v9914_v40, 16  ;;  %v14986_v51 = vld [vmem:[%s12744_s30 + $0x60] sm:$0xf] }
 0x2c4   : > { %6174 = vmatmul.mubr.bf16.gmra.mrb[40].mxu0 %v9936_v24  ;;  %v5945_v24 = vrot.slane %v5940_v42, 4  ;;  %v5958_v21 = vrot.slane %v5956_v36, 7  ;;  %v14966_v6 = vmax.bf16 %v14963_v29, %v5629_v19  ;;  %v16522_v36 = vrot.slane %v14986_v51, 7  ;;  %v12386_v19 = vld [vmem:[%s16447_s7 + $0x2f4] ss:$8 sps:$4 sm:$0xff]  }
 0x2c5   : > { %6183 = vmatprep.mubr.bf16.mxu0 %v16660_v18  ;;  %6388 = vmatpush1.bf16.msra.mxu0 %v12367_v44  ;;  %v5943_v44 = vor.u32 %v5941_v5, %v5940_v42  ;;  %v12377_v42 = vld [vmem:[%s16447_s7 + $0x2d0] ss:$8 sps:$4 sm:$0xff]  }
 0x2c6   : > { %6389 = vmatprep.subr.bf16.mxu0 %v12372_v17  ;;  %v12379_v17 = vld [vmem:[%s16447_s7 + $0x2d4] ss:$8 sps:$4 sm:$0xff]   ;;  %16662 = vst [vmem:[#allocation5_spill] sm:$0xff] %v14966_v6  ;;  %v14975_v57 = vsel %vm14378_vm10, %v5945_v24, %v5952_v34  ;;  %v5961_v31 = vor.u32 %v5959_v16, %v5958_v21  ;;  %v5963_v40 = vrot.slane %v5958_v21, 4  ;;  %v6845_v24 = vrot.slane %v16522_v36, 4 }
 0x2c7   : > { %v14971_v5 = vsel %vm14378_vm10, %v9918_v58, %v5943_v44  ;;  %v12381_v58 = vld [vmem:[%s16447_s7 + $0x2e0] ss:$8 sps:$4 sm:$0xff]   ;;  %v10038_v44 = vld [vmem:[%s12744_s30 + $0x64] sm:$0xf]  ;;  %v5977_v16 = vshll.u32 %v14903_v47, 16 }
 0x2c8   : > { %v9938_v49 = vcombine.low %v14971_v5, %v14975_v57  ;;  %v6846_v34 = vrot.slane %v10038_v44, 7  ;;  %v15141_v36 = vld [vmem:[%s12744_s30 + $0x10] sm:$0xf] }
 0x2c9   : > { %6390 = vmatpush1.bf16.msra.mxu0 %v12370_v45  ;;  %v12383_v45 = vld [vmem:[%s16447_s7 + $0x2e4] ss:$8 sps:$4 sm:$0xff]  }
 0x2ca   : > { %6391 = vmatprep.subr.bf16.mxu0 %v12376_v22  ;;  %v5954_v22 = vrot.slane %v5949_v11, 4  ;;  %v10039_v11 = vld [vmem:[%s12744_s30 + $0x68] sm:$0xf] }
 0x2cb   : > { %v6849_v2 = vrot.slane %v10039_v11, 7 }
 0x2cc   : > { %6184 = vmatmul.mubr.bf16.gmra.mrb[76].mxu0 %v9937_v35  ;;  %v5970_v35 = vor.u32 %v5968_v60, %v5967_v59  ;;  %v12384_v60 = vld [vmem:[%s16447_s7 + $0x2f0] ss:$8 sps:$4 sm:$0xff]  }
 0x2cd   : > { %6191 = vmatprep.mubr.bf16.mxu0 %v16660_v18  ;;  %6392 = vmatpush1.bf16.msra.mxu0 %v12374_v9  ;;  %v15001_v9 = vsel %vm14378_vm10, %v5954_v22, %v5961_v31  ;;  %v6851_v44 = vrot.slane %v6849_v2, 4 }
 0x2ce   : > { %6393 = vmatprep.subr.bf16.mxu0 %v12379_v17  ;;  %v15011_v21 = vsel %vm14378_vm10, %v5963_v40, %v5970_v35  ;;  %v5972_v40 = vrot.slane %v5967_v59, 4  ;;  %v5979_v35 = vor.u32 %v5977_v16, %v14934_v62 }
 0x2cf   : > { %v9939_v47 = vcombine.low %v15001_v9, %v15011_v21 }
 0x2d1   : > { %6394 = vmatpush1.bf16.msra.mxu0 %v12377_v42  ;;  %v15019_v42 = vsel %vm15004_vm12, %v6845_v24, %v6846_v34 }
 0x2d2   : > { %6395 = vmatprep.subr.bf16.mxu0 %v12383_v45  ;;  %v6848_v45 = vrot.slane %v6846_v34, 4  ;;  %v5980_v34 = vsel %vm14378_vm10, %v5972_v40, %v5979_v35 }
 0x2d3   : > { %v9940_v40 = vcombine.low %v5980_v34, %v14963_v29 }
 0x2d4   : > { %6192 = vmatmul.mubr.bf16.gmra.mrb[48].mxu0 %v9938_v49  ;;  %v12394_v49 = vld [vmem:[%s16447_s7 + $0x304] ss:$8 sps:$4 sm:$0xff]   ;;  %v15026_v22 = vsel %vm15004_vm12, %v6848_v45, %v6849_v2 }
 0x2d5   : > { %6201 = vmatprep.mubr.bf16.mxu0 %v16660_v18  ;;  %6396 = vmatpush1.bf16.msra.mxu0 %v12381_v58  ;;  %v10040_v58 = vld [vmem:[%s12744_s30 + $0x6c] sm:$0xf] }
 0x2d6   : > { %6397 = vmatprep.subr.bf16.mxu0 %v12386_v19  ;;  %v10041_v19 = vld [vmem:[%s12744_s30 + $0x70] sm:$0x7]  ;;  %v6852_v11 = vrot.slane %v10040_v58, 7  ;;  %v15055_v58 = vld [vmem:[%s16444_s4] ss:$0 sm:$0xff] }
 0x2d7   : > { %v6855_v24 = vrot.slane %v10041_v19, 7 }
 0x2d8   : > { %v15040_v59 = vsel %vm15004_vm12, %v6851_v44, %v6852_v11  ;;  %v6854_v62 = vrot.slane %v6852_v11, 4  ;;  %v12558_v11 = vld [vmem:[%s12744_s30 + $0x30] sm:$0xf] }
 0x2d9   : > { %6398 = vmatpush1.bf16.msra.mxu0 %v12384_v60  ;;  %16665 = vst [vmem:[#allocation31_spill] sm:$0xff] %v15040_v59 }
 0x2da   : > { %6701 = vmatprep.subr.bf16.mxu0 %v12394_v49  ;;  %v15044_v60 = vsel %vm15004_vm12, %v6854_v62, %v6855_v24  ;;  %v12557_v49 = vld [vmem:[%s12744_s30 + $0x2c] sm:$0xf]  ;;  %v12559_v24 = vld [vmem:[%s12744_s30 + $0x34] sm:$0xf]  ;;  %v12560_v62 = vld [vmem:[%s12744_s30 + $0x38] sm:$0xf] }
 0x2dc   : > { %6202 = vmatmul.mubr.bf16.gmra.mrb[52].mxu0 %v9939_v47  ;;  %v4712_v47 = vmax.bf16 %v12557_v49, %v14722_v8  ;;  %v4714_v8 = vmax.bf16 %v12559_v24, %v14757_v13 }
 0x2dd   : > { %6211 = vmatprep.mubr.bf16.mxu0 %v16660_v18 }
 0x2df   : > { %v11135_v16 = vpop.f32.mrb[20].mxu0 }
 0x2e0   : > { %v11689_v2 = vadd.f32 %v11135_v16, %v14068_v43  ;;  %v3062_v45 = vpop.f32.mrb[21].mxu0  ;;  %v4713_v43 = vmax.bf16 %v12558_v11, %v14725_v12  ;;  %v4715_v16 = vmax.bf16 %v12560_v62, %v14760_v52  ;;  %v15077_v52 = vmax.bf16 %v14677_v50, %v4714_v8  ;;  %v15093_v11 = vld [vmem:[%s12744_s30 + $0x8] sm:$0xf]  ;;  %v12397_v62 = vld [vmem:[%s16447_s7 + $0x314] ss:$8 sps:$4 sm:$0xff]  }
 0x2e1   : > { %v11690_v19 = vadd.f32 %v3062_v45, %v14074_v7  ;;  %v11136_v44 = vpop.f32.mrb[22].mxu0  ;;  %v15069_v45 = vmax.bf16 %v14627_v23, %v4712_v47  ;;  %v15087_v47 = vld [vmem:[%s12744_s30 + $0xc] sm:$0xf] }
 0x2e2   : > { %v11691_v29 = vadd.f32 %v11136_v44, %v14078_v63  ;;  %v3065_v34 = vpop.f32.mrb[23].mxu0  ;;  %v3149_v35 = vadd.f32 %v11689_v2, %v15055_v58  ;;  %v15074_v13 = vmax.bf16 %v14637_v30, %v4713_v43  ;;  %v15084_v23 = vmax.bf16 %v14682_v54, %v4715_v16  ;;  %v15096_v43 = vld [vmem:[%s12744_s30 + $0xc] sm:$0xf]  ;;  %v15113_v16 = vld [vmem:[%s12744_s30 + $0x8] sm:$0x8] }
 0x2e3   : > { %v11692_v49 = vadd.f32 %v3065_v34, %v14082_v10  ;;  %v3147_v12 = vadd.f32 %v11690_v19, %v15055_v58  ;;  %v15081_v10 = vld [vmem:[%s12744_s30 + $0x88] sm:$0xf]  ;;  %v9973_v54 = vcombine.low %v15093_v11, %v15096_v43 }
 0x2e4   : > { %v3150_v7 = vadd.f32 %v11691_v29, %v15055_v58  ;;  %6212 = vmatmul.mubr.bf16.gmra.mrb[80].mxu0 %v9940_v40  ;;  %16666 = vst [vmem:[#allocation35_spill] sm:$0xff] %v15081_v10  ;;  %v16524_v24 = vrot.slane %v15081_v10, 7  ;;  %v15154_v10 = vld [vmem:[%s12744_s30 + $0x14] sm:$0xf] }
 0x2e5   : > { %v3148_v63 = vadd.f32 %v11692_v49, %v15055_v58  ;;  %6415 = vmatprep.mubr.bf16.mxu0 %v16660_v18  ;;  %v6524_v49 = vrot.slane %v15087_v47, 7 }
 0x2e6   : > { %v3164_v2 = vpack.c.bf16 %v3150_v7, %v3149_v35  ;;  %v12392_v35 = vld [vmem:[%s16447_s7 + $0x300] ss:$8 sps:$4 sm:$0xff]   ;;  %v6864_v31 = vrot.slane %v16524_v24, 4 }
 0x2e7   : > { %v3163_v40 = vpack.c.bf16 %v3148_v63, %v3147_v12  ;;  %v11139_v19 = vpop.f32.mrb[24].mxu0  ;;  %v15120_v63 = vld [vmem:[%s12744_s30 + $0x10] sm:$0xf] }
 0x2e8   : > { %3172 = vst [vmem:[#allocation3 + $0x8] sm:$0xff] %v3164_v2  ;;  %v11693_v50 = vadd.f32 %v11139_v19, %v14137_v61  ;;  %v3078_v44 = vpop.f32.mrb[25].mxu0  ;;  %v15123_v2 = vld [vmem:[%s12744_s30 + $0x14] sm:$0xf]  ;;  %v10045_v19 = vld [vmem:[%s12744_s30 + $0x8c] sm:$0xf] }
 0x2e9   : > { %3171 = vst [vmem:[#allocation3] sm:$0xff] %v3163_v40  ;;  %v11694_v8 = vadd.f32 %v3078_v44, %v14143_v39  ;;  %v11140_v29 = vpop.f32.mrb[26].mxu0  ;;  %v10046_v44 = vld [vmem:[%s12744_s30 + $0x90] sm:$0xf]  ;;  %v6865_v61 = vrot.slane %v10045_v19, 7 }
 0x2ea   : > { %v11695_v7 = vadd.f32 %v11140_v29, %v14148_v41  ;;  %v3081_v12 = vpop.f32.mrb[27].mxu0  ;;  %v15133_v41 = vld [vmem:[%s12744_s30 + $0x18] sm:$0xf]  ;;  %v15136_v29 = vld [vmem:[%s12744_s30 + $0x1c] sm:$0xf]  ;;  %v6868_v30 = vrot.slane %v10046_v44, 7  ;;  %v3153_v40 = vadd.f32 %v11693_v50, %v15055_v58 }
 0x2eb   : > { %v11696_v34 = vadd.f32 %v3081_v12, %v14151_v32  ;;  %v16667_v32 = vmax.bf16 %v14405_v20, %v14401_v55  ;;  %v3151_v39 = vadd.f32 %v11694_v8, %v15055_v58  ;;  %v12395_v50 = vld [vmem:[%s16447_s7 + $0x310] ss:$8 sps:$4 sm:$0xff]   ;;  %v6867_v55 = vrot.slane %v6865_v61, 4 }
 0x2ec   : > { %v3154_v59 = vadd.f32 %v11695_v7, %v15055_v58  ;;  %6416 = vmatmul.mubr.bf16.vlgmr.msra.gmra.mrb[36].mxu0 %v9973_v54  ;;  %v9995_v54 = vrot.slane %v15113_v16, 11  ;;  %v6526_v8 = vrot.slane %v6524_v49, 4  ;;  %v6527_v7 = vrot.slane %v15141_v36, 7 }
 0x2ed   : > { %v15151_v12 = vmax.bf16 %v14879_v46, %v16667_v32  ;;  %v3152_v19 = vadd.f32 %v11696_v34, %v15055_v58  ;;  %6425 = vmatprep.mubr.bf16.mxu0 %v16660_v18  ;;  %6702 = vmatpush1.bf16.msra.mxu0 %v12392_v35  ;;  %v12401_v46 = vld [vmem:[%s16447_s7 + $0x324] ss:$8 sps:$4 sm:$0xff]   ;;  %v15169_v34 = vsel %vm15004_vm12, %v6864_v31, %v6865_v61 }
 0x2ee   : > { %v3166_v20 = vpack.c.bf16 %v3154_v59, %v3153_v40  ;;  %6703 = vmatprep.subr.bf16.mxu0 %v12397_v62  ;;  %16668 = vst [vmem:[#allocation13_spill] sm:$0xff] %v15169_v34  ;;  %v16670_v32 = vmax.bf16 %v14469_v25, %v14472_v3  ;;  %v15178_v62 = vld [vmem:[%s12744_s30 + $0x18] sm:$0xf]  ;;  %v6530_v40 = vrot.slane %v15154_v10, 7  ;;  %v15183_v24 = vsel %vm15004_vm12, %v6867_v55, %v6868_v30  ;;  %v16675_v25 = vld [vmem:[#allocation30_spill] sm:$0xff] }
 0x2ef   : > { %v15171_v35 = vpack.c.bf16 %v3152_v19, %v3151_v39  ;;  %v11143_v44 = vpop.f32.mrb[28].mxu0  ;;  %16671 = vst [vmem:[#allocation11_spill] sm:$0xff] %v15183_v24  ;;  %v6240_v3 = vmax.bf16 %v15093_v11, %v15151_v12  ;;  %v6529_v39 = vrot.slane %v6527_v7, 4  ;;  %v15209_v6 = vsel %vm15004_vm12, %v9995_v54, %v6524_v49 }
 0x2f0   : > { %v6002_v59 = vmax.bf16 %v14900_v4, %v16670_v32  ;;  %3174 = vst [vmem:[#allocation3 + $0x18] sm:$0xff] %v3166_v20  ;;  %v11697_v31 = vadd.f32 %v11143_v44, %v14177_v26  ;;  %v3094_v61 = vpop.f32.mrb[29].mxu0  ;;  %v16673_v4 = vld [vmem:[#allocation9_spill] sm:$0xff]  ;;  %v12405_v20 = vld [vmem:[%s16447_s7 + $0x334] ss:$8 sps:$4 sm:$0xff]   ;;  %v15213_v27 = vsel %vm15004_vm12, %v6526_v8, %v6527_v7  ;;  %v6532_v24 = vrot.slane %v6530_v40, 4 }
 0x2f1   : > { %16669 = vst [vmem:[#allocation7_spill] sm:$0xff] %v15171_v35  ;;  %3173 = vst [vmem:[#allocation3 + $0x10] sm:$0xff] %v15171_v35  ;;  %v11698_v55 = vadd.f32 %v3094_v61, %v16673_v4  ;;  %v11144_v32 = vpop.f32.mrb[30].mxu0  ;;  %6704 = vmatpush1.bf16.msra.mxu0 %v12395_v50  ;;  %v12399_v26 = vld [vmem:[%s16447_s7 + $0x320] ss:$8 sps:$4 sm:$0xff]   ;;  %v16674_v44 = vld [vmem:[#allocation32_spill] sm:$0xff]  ;;  %v16679_v54 = vcombine.low %v15120_v63, %v15123_v2 }
 0x2f2   : > { %v16676_v11 = vmax.bf16 %v16674_v44, %v16675_v25  ;;  %v16677_v4 = vld [vmem:[#allocation14_spill] sm:$0xff]  ;;  %v3097_v35 = vpop.f32.mrb[31].mxu0  ;;  %6705 = vmatprep.subr.bf16.mxu0 %v12401_v46  ;;  %v6533_v25 = vrot.slane %v15178_v62, 7  ;;  %v10047_v44 = vld [vmem:[%s12744_s30 + $0x94] sm:$0xf]  ;;  %v6242_v61 = vmax.bf16 %v15120_v63, %v6002_v59  ;;  %v6870_v46 = vrot.slane %v6868_v30, 4 }
 0x2f3   : > { %v11699_v50 = vadd.f32 %v11144_v32, %v16677_v4  ;;  %v15221_v32 = vld [vmem:[%s12744_s30 + $0x1c] sm:$0xf]  ;;  %v3157_v4 = vadd.f32 %v11697_v31, %v15055_v58  ;;  %v6871_v8 = vrot.slane %v10047_v44, 7  ;;  %v3155_v34 = vadd.f32 %v11698_v55, %v15055_v58  ;;  %v12403_v30 = vld [vmem:[%s16447_s7 + $0x330] ss:$8 sps:$4 sm:$0xff]  }
 0x2f4   : > { %v6003_v12 = vmax.bf16 %v14909_v1, %v16676_v11  ;;  %v10048_v1 = vld [vmem:[%s12744_s30 + $0x98] sm:$0x7]  ;;  %v16678_v11 = vld [vmem:[#allocation17_spill] sm:$0xff]  ;;  %6426 = vmatmul.mubr.bf16.gmra.mrb[40].mxu0 %v16679_v54  ;;  %v6536_v55 = vrot.slane %v15221_v32, 7 }
 0x2f5   : > { %v11700_v19 = vadd.f32 %v3097_v35, %v16678_v11  ;;  %v3158_v49 = vadd.f32 %v11699_v50, %v15055_v58  ;;  %v6874_v7 = vrot.slane %v10048_v1, 7  ;;  %6435 = vmatprep.mubr.bf16.mxu0 %v16660_v18  ;;  %6706 = vmatpush1.bf16.msra.mxu0 %v12399_v26  ;;  %v12409_v63 = vld [vmem:[%s16447_s7 + $0x344] ss:$8 sps:$4 sm:$0xff]   ;;  %v6873_v26 = vrot.slane %v6871_v8, 4  ;;  %v16683_v11 = vld [vmem:[#allocation20_spill] sm:$0xff] }
 0x2f6   : > { %v6243_v59 = vmax.bf16 %v15123_v2, %v6003_v12  ;;  %6707 = vmatprep.subr.bf16.mxu0 %v12405_v20  ;;  %v15248_v1 = vmax.bf16 %v15209_v6, %v6240_v3  ;;  %v15254_v20 = vsel %vm15004_vm12, %v6529_v39, %v6530_v40  ;;  %v15257_v12 = vld [vmem:[%s12744_s30 + $0x20] sm:$0x7]  ;;  %v16685_v40 = vld [vmem:[#allocation23_spill] sm:$0xff]  ;;  %v6535_v2 = vrot.slane %v6533_v25, 4 }
 0x2f7   : > { %v3156_v35 = vadd.f32 %v11700_v19, %v15055_v58  ;;  %v15235_v31 = vpack.c.bf16 %v3158_v49, %v3157_v4  ;;  %v15243_v19 = vsel %vm15004_vm12, %v6870_v46, %v6871_v8  ;;  %v11147_v44 = vpop.f32.mrb[32].mxu0  ;;  %16682 = vst [vmem:[#allocation12_spill] sm:$0xff] %v15254_v20  ;;  %v15266_v3 = vmax.bf16 %v15254_v20, %v6242_v61  ;;  %v12407_v8 = vld [vmem:[%s16447_s7 + $0x340] ss:$8 sps:$4 sm:$0xff]   ;;  %v15292_v20 = vld [vmem:[%s12744_s30 + $0x34] sm:$0xf] }
 0x2f8   : > { %v11701_v46 = vadd.f32 %v11147_v44, %v16683_v11  ;;  %v3110_v4 = vpop.f32.mrb[33].mxu0  ;;  %v15270_v49 = vsel %vm15004_vm12, %v6873_v26, %v6874_v7  ;;  %v16686_v7 = vld [vmem:[#allocation34_spill] sm:$0xff]  ;;  %v16689_v11 = vld [vmem:[#allocation28_spill] sm:$0xff] }
 0x2f9   : > { %16680 = vst [vmem:[#allocation16_spill] sm:$0xff] %v15235_v31  ;;  %v15245_v50 = vpack.c.bf16 %v3156_v35, %v3155_v34  ;;  %3176 = vst [vmem:[#allocation3 + $0x28] sm:$0xff] %v15235_v31  ;;  %v15263_v34 = vsel %vm15004_vm12, %v6532_v24, %v6533_v25  ;;  %v11702_v39 = vadd.f32 %v3110_v4, %v16685_v40  ;;  %v11148_v54 = vpop.f32.mrb[34].mxu0  ;;  %6708 = vmatpush1.bf16.msra.mxu0 %v12403_v30  ;;  %v12413_v24 = vld [vmem:[%s16447_s7 + $0x354] ss:$8 sps:$4 sm:$0xff]   ;;  %v16687_v35 = vld [vmem:[#allocation33_spill] sm:$0xff] }
 0x2fa   : > { %16684 = vst [vmem:[#allocation19_spill] sm:$0xff] %v15263_v34  ;;  %v15281_v61 = vmax.bf16 %v15263_v34, %v6243_v59  ;;  %v16688_v26 = vmax.bf16 %v16686_v7, %v16687_v35  ;;  %v11703_v4 = vadd.f32 %v11148_v54, %v16689_v11  ;;  %v3113_v40 = vpop.f32.mrb[35].mxu0  ;;  %6709 = vmatprep.subr.bf16.mxu0 %v12409_v63  ;;  %v6538_v31 = vrot.slane %v6536_v55, 4  ;;  %v16690_v34 = vld [vmem:[#allocation25_spill] sm:$0xff] }
 0x2fb   : > { %16681 = vst [vmem:[#allocation8_spill] sm:$0xff] %v15245_v50  ;;  %3175 = vst [vmem:[#allocation3 + $0x20] sm:$0xff] %v15245_v50  ;;  %v6539_v50 = vrot.slane %v15257_v12, 7  ;;  %v3161_v59 = vadd.f32 %v11701_v46, %v15055_v58  ;;  %v11704_v7 = vadd.f32 %v3113_v40, %v16690_v34  ;;  %v16691_v54 = vmax.bf16 %v14806_v15, %v15069_v45  ;;  %v15309_v46 = vld [vmem:[%s12744_s30 + $0x5c] sm:$0xf] }
 0x2fc   : > { %v6004_v44 = vmax.bf16 %v14942_v37, %v16688_v26  ;;  %v12411_v37 = vld [vmem:[%s16447_s7 + $0x350] ss:$8 sps:$4 sm:$0xff]   ;;  %v7129_v25 = vshrl.u32 %v15113_v16, 16  ;;  %v3162_v12 = vadd.f32 %v11703_v4, %v15055_v58  ;;  %v16692_v35 = vcombine.low %v15133_v41, %v15136_v29  ;;  %v12418_v45 = vld [vmem:[%s16447_s7 + $0x364] ss:$8 sps:$4 sm:$0xff]  }
 0x2fd   : > { %v6005_v63 = vmax.bf16 %v14971_v5, %v16691_v54  ;;  %v7134_v34 = vshrl.u32 %v15087_v47, 16  ;;  %v7137_v26 = vshll.u32 %v15087_v47, 16  ;;  %v7143_v11 = vshrl.u32 %v15141_v36, 16  ;;  %6710 = vmatpush1.bf16.msra.mxu0 %v12407_v8  ;;  %v15321_v16 = vld [vmem:[%s12744_s30 + $0x30] sm:$0x8] }
 0x2fe   : > { %6436 = vmatmul.mubr.bf16.gmra.mrb[84].mxu0 %v16692_v35  ;;  %v3159_v15 = vadd.f32 %v11702_v39, %v15055_v58  ;;  %v3160_v5 = vadd.f32 %v11704_v7, %v15055_v58  ;;  %v6543_v41 = vrot.slane %v15292_v20, 7  ;;  %v10089_v4 = vrot.slane %v7129_v25, 11  ;;  %6711 = vmatprep.subr.bf16.mxu0 %v12413_v24  ;;  %v15325_v40 = vld [vmem:[%s12744_s30 + $0x38] sm:$0xf] }
 0x2ff   : > { %6443 = vmatprep.mubr.bf16.mxu0 %v16660_v18  ;;  %v3170_v47 = vpack.c.bf16 %v3162_v12, %v3161_v59  ;;  %v7136_v39 = vrot.slane %v7134_v34, 7  ;;  %v15327_v54 = vrot.slane %v7143_v11, 7  ;;  %v7146_v7 = vshll.u32 %v15141_v36, 16  ;;  %v10035_v59 = vld [vmem:[%s12744_s30 + $0x58] sm:$0x8] }
 0x300   : > { %v15330_v8 = vpack.c.bf16 %v3160_v5, %v3159_v15  ;;  %v6244_v35 = vmax.bf16 %v15136_v29, %v6004_v44  ;;  %v15335_v30 = vsel %vm15004_vm12, %v6535_v2, %v6536_v55  ;;  %v6840_v25 = vrot.slane %v15309_v46, 7  ;;  %v12416_v36 = vld [vmem:[%s16447_s7 + $0x360] ss:$8 sps:$4 sm:$0xff]   ;;  %v12567_v44 = vld [vmem:[%s12744_s30 + $0x30] sm:$0xf] }
 0x301   : > { %3178 = vst [vmem:[#allocation3 + $0x38] sm:$0xff] %v3170_v47  ;;  %v9996_v24 = vrot.slane %v15321_v16, 11  ;;  %v7139_v12 = vor.u32 %v7137_v26, %v7136_v39  ;;  %v7141_v34 = vrot.slane %v7136_v39, 4  ;;  %v7148_v11 = vor.u32 %v7146_v7, %v15327_v54  ;;  %6712 = vmatpush1.bf16.msra.mxu0 %v12411_v37  ;;  %v12421_v37 = vld [vmem:[%s16447_s7 + $0x374] ss:$8 sps:$4 sm:$0xff]  }
 0x302   : > { %3177 = vst [vmem:[#allocation3 + $0x30] sm:$0xff] %v15330_v8  ;;  %v15347_v29 = vsel %vm15004_vm12, %v6538_v31, %v6539_v50  ;;  %v16693_v55 = vmax.bf16 %v14810_v14, %v15074_v13  ;;  %v6245_v46 = vmax.bf16 %v12567_v44, %v6005_v63  ;;  %v6546_v26 = vrot.slane %v15325_v40, 7  ;;  %6713 = vmatprep.subr.bf16.mxu0 %v12418_v45  ;;  %v16695_v13 = vld [vmem:[#allocation27_spill] sm:$0xff]  ;;  %v16697_v63 = vld [vmem:[#allocation10_spill] sm:$0xff] }
 0x303   : > { %v6545_v15 = vrot.slane %v6543_v41, 4  ;;  %v15360_v31 = vsel %vm14378_vm10, %v10089_v4, %v7139_v12  ;;  %v15364_v14 = vsel %vm14378_vm10, %v7141_v34, %v7148_v11  ;;  %v15371_v45 = vmax.bf16 %v15347_v29, %v6244_v35 }
 0x304   : > { %v6006_v2 = vmax.bf16 %v14975_v57, %v16693_v55  ;;  %v16694_v57 = vld [vmem:[#allocation29_spill] sm:$0xff]  ;;  %v10049_v47 = vrot.slane %v10035_v59, 11  ;;  %v6842_v39 = vrot.slane %v6840_v25, 4  ;;  %v16698_v4 = vcombine.low %v14530_v38, %v14556_v33  ;;  %v12419_v59 = vld [vmem:[%s16447_s7 + $0x370] ss:$8 sps:$4 sm:$0xff]  }
 0x305   : > { %v16696_v50 = vmax.bf16 %v16694_v57, %v16695_v13  ;;  %v15380_v12 = vsel %vm15004_vm12, %v9996_v24, %v6543_v41  ;;  %v7152_v11 = vshrl.u32 %v15154_v10, 16  ;;  %v7155_v35 = vshll.u32 %v15154_v10, 16  ;;  %6714 = vmatpush1.bf16.msra.mxu0 %v12416_v36  ;;  %v12568_v38 = vld [vmem:[%s12744_s30 + $0x34] sm:$0xf]  ;;  %v12428_v10 = vld [vmem:[%s16447_s7 + $0x384] ss:$8 sps:$4 sm:$0xff]  }
 0x306   : > { %6444 = vmatmul.mubr.bf16.gmra.mrb[48].mxu0 %v16698_v4  ;;  %v6246_v33 = vmax.bf16 %v12568_v38, %v6006_v2  ;;  %v15391_v55 = vmax.bf16 %v15380_v12, %v6245_v46  ;;  %v7161_v41 = vshrl.u32 %v15178_v62, 16  ;;  %6715 = vmatprep.subr.bf16.mxu0 %v12421_v37  ;;  %v15400_v24 = vsel %vm15004_vm12, %v6545_v15, %v6546_v26  ;;  %v15417_v13 = vld [vmem:[%s12744_s30 + $0x3c] sm:$0xf] }
 0x307   : > { %v6001_v5 = vmax.bf16 %v16697_v63, %v16696_v50  ;;  %6453 = vmatprep.mubr.bf16.mxu0 %v16660_v18  ;;  %v7150_v2 = vrot.slane %v15327_v54, 4  ;;  %v7154_v44 = vrot.slane %v7152_v11, 7  ;;  %v15406_v46 = vsel %vm15004_vm12, %v10049_v47, %v6840_v25 }
 0x308   : > { %v6888_v57 = vmax.bf16 %v15019_v42, %v15266_v3  ;;  %v7163_v15 = vrot.slane %v7161_v41, 7  ;;  %v6889_v54 = vmax.bf16 %v15026_v22, %v15281_v61  ;;  %v6886_v47 = vmax.bf16 %v15406_v46, %v15248_v1  ;;  %v15464_v41 = vld [vmem:[%s12744_s30 + $0x44] sm:$0xf] }
 0x309   : > { %v6241_v34 = vmax.bf16 %v15096_v43, %v6001_v5  ;;  %v7164_v43 = vshll.u32 %v15178_v62, 16  ;;  %v16699_v62 = vrot.slane %v14986_v51, 7  ;;  %v7157_v25 = vor.u32 %v7155_v35, %v7154_v44  ;;  %6716 = vmatpush1.bf16.msra.mxu0 %v12419_v59 }
 0x30a   : > { %v7159_v63 = vrot.slane %v7154_v44, 4  ;;  %v15423_v51 = vmax.bf16 %v15400_v24, %v6246_v33  ;;  %v16700_v5 = vmax.bf16 %v14837_v48, %v15077_v52  ;;  %7017 = vmatprep.subr.bf16.mxu0 %v12428_v10  ;;  %v16701_v61 = vmax.bf16 %v14841_v0, %v15084_v23 }
 0x30b   : > { %v6571_v36 = vmax.bf16 %v15213_v27, %v6241_v34  ;;  %v15412_v37 = vsel %vm15004_vm12, %v6842_v39, %v16699_v62  ;;  %v7166_v39 = vor.u32 %v7164_v43, %v7163_v15  ;;  %v6548_v34 = vrot.slane %v6546_v26, 4  ;;  %v15456_v26 = vld [vmem:[%s12744_s30 + $0x40] sm:$0xf] }
 0x30c   : > { %v15429_v3 = vmax.bf16 %v15001_v9, %v16700_v5  ;;  %v15437_v4 = vmax.bf16 %v15011_v21, %v16701_v61  ;;  %v15441_v11 = vsel %vm14378_vm10, %v7150_v2, %v7157_v25  ;;  %v7126_v9 = vld [vmem:[%s12744_s30 + $0x20] sm:$0xf]  ;;  %v6549_v52 = vrot.slane %v15417_v13, 7 }
 0x30d   : > { %v6887_v50 = vmax.bf16 %v15412_v37, %v6571_v36  ;;  %v15448_v1 = vsel %vm14378_vm10, %v7159_v63, %v7166_v39  ;;  %v7256_v0 = vmax.bf16 %v15441_v11, %v6888_v57  ;;  %v7170_v21 = vshrl.u32 %v15221_v32, 16  ;;  %v15472_v36 = vld [vmem:[%s12744_s30 + $0x84] sm:$0xf] }
 0x30e   : > { %v16702_v23 = vcombine.low %v14573_v53, %v14600_v56  ;;  %v7257_v35 = vmax.bf16 %v15448_v1, %v6889_v54  ;;  %v7173_v38 = vshll.u32 %v15221_v32, 16  ;;  %v7179_v33 = vshrl.u32 %v7126_v9, 16 }
 0x30f   : > { %v7255_v48 = vmax.bf16 %v15364_v14, %v6887_v50  ;;  %v7254_v43 = vmax.bf16 %v15360_v31, %v6886_v47  ;;  %v7168_v53 = vrot.slane %v7163_v15, 4  ;;  %v7172_v56 = vrot.slane %v7170_v21, 7  ;;  %v5109_v25 = vpop.f32.mrb[44].mxu0 }
 0x310   : > { %6454 = vmatmul.mubr.bf16.gmra.mrb[52].mxu0 %v16702_v23  ;;  %v10130_v2 = vcombine.low %v7257_v35, %v7257_v35  ;;  %v7181_v44 = vrot.slane %v7179_v33, 7  ;;  %v7182_v32 = vshll.u32 %v7126_v9, 16  ;;  %v6890_v62 = vmax.bf16 %v15044_v60, %v15371_v45  ;;  %v5110_v39 = vpop.f32.mrb[45].mxu0  ;;  %v10042_v25 = vld [vmem:[%s12744_s30 + $0x80] sm:$0x8] }
 0x311   : > { %6463 = vmatprep.mubr.bf16.mxu0 %v16660_v18  ;;  %v10129_v10 = vcombine.low %v7255_v48, %v7256_v0  ;;  %v7175_v54 = vor.u32 %v7173_v38, %v7172_v56  ;;  %v7177_v50 = vrot.slane %v7172_v56, 4  ;;  %v6551_v63 = vrot.slane %v6549_v52, 4  ;;  %v6505_v38 = vld [vmem:[%s12744_s30 + $0x48] sm:$0x7] }
 0x312   : > { %v16537_v5 = vrot.slane %v15456_v26, 7  ;;  %v7503_v47 = vrot.slane %v10130_v2, 6  ;;  %v7184_v15 = vor.u32 %v7182_v32, %v7181_v44  ;;  %v16536_v61 = vrot.slane %v15464_v41, 7  ;;  %v16703_v56 = vld [vmem:[#allocation26_spill] sm:$0xff]  ;;  %v12569_v44 = vld [vmem:[%s12744_s30 + $0x38] sm:$0xf] }
 0x313   : > { %v7499_v57 = vrot.slane %v10129_v10, 1  ;;  %v6859_v48 = vrot.slane %v15472_v36, 7  ;;  %v15483_v9 = vsel %vm14378_vm10, %v7168_v53, %v7175_v54  ;;  %v7187_v23 = vshrl.u32 %v15321_v16, 16  ;;  %v16704_v36 = vld [vmem:[#allocation6_spill] sm:$0xff] }
 0x314   : > { %v15488_v21 = vsel %vm14378_vm10, %v7177_v50, %v7184_v15  ;;  %v7192_v35 = vshrl.u32 %v15292_v20, 16  ;;  %v7195_v10 = vshll.u32 %v15292_v20, 16  ;;  %v7201_v53 = vshrl.u32 %v15325_v40, 16  ;;  %v12570_v20 = vld [vmem:[%s12744_s30 + $0x3c] sm:$0xf] }
 0x315   : > { %v7525_v45 = vsel %vm7522_vm13, %v7254_v43, %v7499_v57  ;;  %v7258_v33 = vmax.bf16 %v15488_v21, %v6890_v62  ;;  %v16705_v2 = vcombine.low %v16703_v56, %v16704_v36  ;;  %v6247_v16 = vmax.bf16 %v12569_v44, %v15429_v3 }
 0x316   : > { %v7528_v0 = vsel %vm2129_vm2, %v7525_v45, %v7503_v47  ;;  %v10090_v32 = vrot.slane %v7187_v23, 11  ;;  %v7194_v57 = vrot.slane %v7192_v35, 7  ;;  %v7204_v62 = vshll.u32 %v15325_v40, 16 }
 0x317   : > { %v6248_v54 = vmax.bf16 %v12570_v20, %v15437_v4  ;;  %v15514_v50 = vsel %vm15004_vm12, %v6548_v34, %v6549_v52  ;;  %v10131_v3 = vcombine.low %v7258_v33, %v7258_v33  ;;  %v15517_v47 = vrot.slane %v7201_v53, 7  ;;  %v12571_v52 = vld [vmem:[%s12744_s30 + $0x44] sm:$0xf] }
 0x318   : > { %6464 = vmatmul.mubr.bf16.gmra.mrb[88].mxu0 %v16705_v2  ;;  %v6557_v15 = vrot.slane %v16536_v61, 4  ;;  %v6558_v39 = vrot.slane %v6505_v38, 7  ;;  %v7197_v40 = vor.u32 %v7195_v10, %v7194_v57  ;;  %v7199_v45 = vrot.slane %v7194_v57, 4  ;;  %v16706_v33 = vld [vmem:[#allocation5_spill] sm:$0xff]  ;;  %v12431_v57 = vld [vmem:[%s16447_s7 + $0x394] ss:$8 sps:$4 sm:$0xff]  }
 0x319   : > { %6733 = vmatprep.mubr.bf16.mxu0 %v16660_v18  ;;  %v15525_v4 = vsel %vm15004_vm12, %v6551_v63, %v16537_v5  ;;  %v6861_v23 = vrot.slane %v6859_v48, 4  ;;  %v7507_v35 = vrot.slane %v10131_v3, 3  ;;  %v7206_v34 = vor.u32 %v7204_v62, %v15517_v47  ;;  %v12426_v10 = vld [vmem:[%s16447_s7 + $0x380] ss:$8 sps:$4 sm:$0xff]   ;;  %v15644_v5 = vld [vmem:[#allocation3 + $0x38] sm:$0xf] }
 0x31a   : > { %v6249_v53 = vmax.bf16 %v12571_v52, %v16706_v33  ;;  %v10050_v56 = vrot.slane %v10042_v25, 11  ;;  %v15533_v38 = vsel %vm14378_vm10, %v10090_v32, %v7197_v40  ;;  %v6577_v63 = vmax.bf16 %v15514_v50, %v6247_v16  ;;  %v15585_v52 = vpop.f32.mrb[46].mxu0 }
 0x31b   : > { %v6578_v36 = vmax.bf16 %v15525_v4, %v6248_v54  ;;  %v7531_v2 = vsel %vm7529_vm14, %v7528_v0, %v7507_v35  ;;  %v15543_v44 = vsel %vm14378_vm10, %v7199_v45, %v7206_v34  ;;  %v15550_v32 = vsel %vm15004_vm12, %v6557_v15, %v6558_v39  ;;  %v16708_v54 = vld [vmem:[#allocation35_spill] sm:$0xff] }
 0x31c   : > { %16707 = vst [vmem:[#allocation15_spill] sm:$0xff] %v15543_v44  ;;  %v7541_v62 = vunpack.c.l.bf16 %v7531_v2  ;;  %v7542_v20 = vunpack.c.h.bf16 %v7531_v2  ;;  %v16709_v25 = vrot.slane %v16708_v54, 7  ;;  %v7210_v3 = vshrl.u32 %v15417_v13, 16  ;;  %v12429_v45 = vld [vmem:[%s16447_s7 + $0x390] ss:$8 sps:$4 sm:$0xff]   ;;  %v16712_v2 = vld [vmem:[#allocation13_spill] sm:$0xff] }
 0x31d   : > { %v7213_v15 = vshll.u32 %v15417_v13, 16  ;;  %v7219_v39 = vshrl.u32 %v15456_v26, 16  ;;  %v16710_v40 = vcombine.low %v15209_v6, %v15213_v27  ;;  %v15579_v35 = vsel %vm15004_vm12, %v10050_v56, %v6859_v48  ;;  %v15590_v6 = vld [vmem:[#allocation3 + $0x10] sm:$0xff]  ;;  %v12435_v56 = vld [vmem:[%s16447_s7 + $0x3a4] ss:$8 sps:$4 sm:$0xff]  }
 0x31e   : > { %v15558_v0 = vsel %vm15004_vm12, %v6861_v23, %v16709_v25  ;;  %v15575_v23 = vmax.bf16 %v15550_v32, %v6249_v53  ;;  %7545 = vst [vmem:[%s15563_s20] sm:$0xff] %v7541_v62  ;;  %v7222_v34 = vshll.u32 %v15456_v26, 16  ;;  %v6891_v27 = vmax.bf16 %v15579_v35, %v15391_v55  ;;  %16711 = vst [vmem:[#allocation22_spill] sm:$0xff] %v15590_v6  ;;  %v16713_v62 = vld [vmem:[#allocation11_spill] sm:$0xff]  ;;  %v15603_v55 = vld [vmem:[#allocation3 + $0x18] sm:$0xf] }
 0x31f   : > { %v6892_v13 = vmax.bf16 %v15558_v0, %v15423_v51  ;;  %7546 = vst [vmem:[%s15563_s20 + $0x20] sm:$0xff] %v7542_v20  ;;  %v7208_v48 = vrot.slane %v15517_v47, 4  ;;  %v7212_v33 = vrot.slane %v7210_v3, 7  ;;  %v15594_v53 = vrot.slane %v7219_v39, 7  ;;  %v15596_v51 = vpop.f32.mrb[47].mxu0  ;;  %v16714_v25 = vld [vmem:[#allocation19_spill] sm:$0xff] }
 0x320   : > { %6734 = vmatmul.mubr.bf16.vlgmr.msra.gmra.mrb[36].mxu0 %v16710_v40  ;;  %v6894_v54 = vmax.bf16 %v16713_v62, %v6578_v36  ;;  %v16715_v20 = vld [vmem:[#allocation12_spill] sm:$0xff]  ;;  %v15607_v47 = vld [vmem:[#allocation3 + $0x8] sm:$0xff]  ;;  %v6895_v43 = vmax.bf16 %v15270_v49, %v15575_v23  ;;  %v8633_v36 = vrot.slane %v15590_v6, 4 }
 0x321   : > { %6743 = vmatprep.mubr.bf16.mxu0 %v16660_v18  ;;  %7018 = vmatpush1.bf16.msra.mxu0 %v12426_v10  ;;  %v6893_v10 = vmax.bf16 %v16712_v2, %v6577_v63  ;;  %v10014_v40 = vcombine.low %v16715_v20, %v16714_v25  ;;  %v7215_v3 = vor.u32 %v7213_v15, %v7212_v33  ;;  %v7217_v39 = vrot.slane %v7212_v33, 4  ;;  %v12433_v25 = vld [vmem:[%s16447_s7 + $0x3a0] ss:$8 sps:$4 sm:$0xff]   ;;  %v15634_v20 = vld [vmem:[#allocation3 + $0x30] sm:$0xff] }
 0x322   : > { %7019 = vmatprep.subr.bf16.mxu0 %v12431_v57  ;;  %v7224_v16 = vor.u32 %v7222_v34, %v15594_v53  ;;  %v7260_v63 = vmax.bf16 %v15543_v44, %v6892_v13  ;;  %v15619_v15 = vld [vmem:[#allocation3 + $0x28] sm:$0xff]  ;;  %v7259_v34 = vmax.bf16 %v15533_v38, %v6891_v27  ;;  %v8635_v13 = vrot.slane %v15603_v55, 4  ;;  %16718 = vst [vmem:[#allocation21_spill] sm:$0xff] %v15634_v20 }
 0x323   : > { %v15624_v33 = vsel %vm14378_vm10, %v7208_v48, %v7215_v3  ;;  %v7127_v3 = vld [vmem:[%s12744_s30 + $0x48] sm:$0xf]  ;;  %v12437_v48 = vld [vmem:[%s16447_s7 + $0x3b0] ss:$8 sps:$4 sm:$0xff]  }
 0x324   : > { %16716 = vst [vmem:[#allocation24_spill] sm:$0xff] %v15624_v33  ;;  %v15628_v23 = vsel %vm14378_vm10, %v7217_v39, %v7224_v16  ;;  %v7261_v59 = vmax.bf16 %v15624_v33, %v6893_v10  ;;  %v16540_v16 = vrot.slane %v15607_v47, 4  ;;  %v7228_v39 = vshrl.u32 %v15464_v41, 16 }
 0x325   : > { %7020 = vmatpush1.bf16.msra.mxu0 %v12429_v45  ;;  %16717 = vst [vmem:[#allocation18_spill] sm:$0xff] %v15628_v23  ;;  %v12439_v45 = vld [vmem:[%s16447_s7 + $0x3b4] ss:$8 sps:$4 sm:$0xff]   ;;  %v7262_v27 = vmax.bf16 %v15628_v23, %v6894_v54  ;;  %v7237_v7 = vshrl.u32 %v7127_v3, 16  ;;  %v7240_v61 = vshll.u32 %v7127_v3, 16  ;;  %v7226_v3 = vrot.slane %v15594_v53, 4 }
 0x326   : > { %7021 = vmatprep.subr.bf16.mxu0 %v12435_v56  ;;  %v7231_v56 = vshll.u32 %v15464_v41, 16  ;;  %v10132_v57 = vcombine.low %v7260_v63, %v7261_v59  ;;  %v15649_v10 = vsel %vm2129_vm2, %v16540_v16, %v8633_v36  ;;  %v7230_v23 = vrot.slane %v7228_v39, 7  ;;  %v12443_v63 = vld [vmem:[%s16447_s7 + $0x3c4] ss:$8 sps:$4 sm:$0xff]  }
 0x327   : > { %v10133_v44 = vcombine.low %v7262_v27, %v7262_v27  ;;  %16719 = vst [vmem:[#allocation9_spill] sm:$0xff] %v15649_v10  ;;  %v15658_v59 = vsel %vm2129_vm2, %v8633_v36, %v8635_v13  ;;  %v8642_v54 = vrot.slane %v15644_v5, 4  ;;  %v15666_v10 = vshrl.u32 %v15607_v47, 16  ;;  %v5137_v53 = vpop.f32.mrb[56].mxu0 }
 0x328   : > { %6744 = vmatmul.mubr.bf16.gmra.mrb[40].mxu0 %v10014_v40  ;;  %v7239_v40 = vrot.slane %v7237_v7, 7  ;;  %16720 = vst [vmem:[#allocation32_spill] sm:$0xff] %v15658_v59  ;;  %v7513_v27 = vrot.slane %v10132_v57, 1  ;;  %v7233_v39 = vor.u32 %v7231_v56, %v7230_v23  ;;  %v7235_v7 = vrot.slane %v7230_v23, 4  ;;  %v5138_v13 = vpop.f32.mrb[57].mxu0 }
 0x329   : > { %6753 = vmatprep.mubr.bf16.mxu0 %v16660_v18  ;;  %7022 = vmatpush1.bf16.msra.mxu0 %v12433_v25  ;;  %v7517_v16 = vrot.slane %v10133_v44, 6  ;;  %v8640_v25 = vrot.slane %v15634_v20, 4  ;;  %v16543_v57 = vrot.slane %v15607_v47, 7  ;;  %v12441_v56 = vld [vmem:[%s16447_s7 + $0x3c0] ss:$8 sps:$4 sm:$0xff]   ;;  %v15682_v23 = vpop.f32.mrb[58].mxu0 }
 0x32a   : > { %7023 = vmatprep.subr.bf16.mxu0 %v12439_v45  ;;  %v7242_v33 = vor.u32 %v7240_v61, %v7239_v40  ;;  %v7535_v36 = vsel %vm7522_vm13, %v7259_v34, %v7513_v27  ;;  %v16721_v45 = vrot.slane %v15619_v15, 4  ;;  %v15686_v34 = vsel %vm14378_vm10, %v7226_v3, %v7233_v39  ;;  %v15696_v27 = vpop.f32.mrb[59].mxu0 }
 0x32b   : > { %v15675_v44 = vsel %vm2129_vm2, %v8640_v25, %v8642_v54  ;;  %v7537_v61 = vsel %vm2129_vm2, %v7535_v36, %v7517_v16  ;;  %v16542_v54 = vrot.slane %v15590_v6, 7  ;;  %v15702_v3 = vshrl.u32 %v15590_v6, 16  ;;  %v12445_v36 = vld [vmem:[%s16447_s7 + $0x3d0] ss:$8 sps:$4 sm:$0xff]  }
 0x32c   : > { %v15672_v59 = vsel %vm2129_vm2, %v16721_v45, %v8640_v25  ;;  %16723 = vst [vmem:[#allocation14_spill] sm:$0xff] %v15675_v44  ;;  %v15690_v40 = vsel %vm14378_vm10, %v7235_v7, %v7242_v33  ;;  %v16545_v33 = vrot.slane %v15619_v15, 7  ;;  %v11423_v53 = vpop.f32.mrb[36].mxu1  ;;  %v15721_v13 = vshll.u32 %v15607_v47, 16 }
 0x32d   : > { %16722 = vst [vmem:[#allocation30_spill] sm:$0xff] %v15672_v59  ;;  %7024 = vmatpush1.bf16.msra.mxu0 %v12437_v48  ;;  %v12447_v48 = vld [vmem:[%s16447_s7 + $0x3d4] ss:$8 sps:$4 sm:$0xff]   ;;  %v7263_v16 = vmax.bf16 %v15690_v40, %v6895_v43  ;;  %v15709_v28 = vsel %vm2524_vm3, %v16543_v57, %v16542_v54  ;;  %v16725_v43 = vcombine.low %v15335_v30, %v15347_v29  ;;  %v4555_v7 = vpop.f32.mrb[37].mxu1  ;;  %v9178_v30 = vrot.slane %v15666_v10, 7 }
 0x32e   : > { %7025 = vmatprep.subr.bf16.mxu0 %v12443_v63  ;;  %16724 = vst [vmem:[#allocation17_spill] sm:$0xff] %v15709_v28  ;;  %v16544_v63 = vrot.slane %v15634_v20, 7  ;;  %v11424_v29 = vpop.f32.mrb[38].mxu1  ;;  %v15740_v54 = vshrl.u32 %v15634_v20, 16  ;;  %v15751_v28 = vshll.u32 %v15590_v6, 16 }
 0x32f   : > { %v10134_v39 = vcombine.low %v7263_v16, %v7263_v16  ;;  %v12451_v16 = vld [vmem:[%s16447_s7 + $0x3e4] ss:$8 sps:$4 sm:$0xff]   ;;  %v4558_v25 = vpop.f32.mrb[39].mxu1 }
 0x330   : > { %6754 = vmatmul.mubr.bf16.gmra.mrb[92].mxu0 %v16725_v43  ;;  %v15728_v45 = vsel %vm2524_vm3, %v16545_v33, %v16544_v63  ;;  %v15737_v43 = vshrl.u32 %v15619_v15, 16  ;;  %v4636_v63 = vadd.f32 %v11423_v53, %v15055_v58  ;;  %v4637_v33 = vadd.f32 %v11424_v29, %v15055_v58 }
 0x331   : > { %6761 = vmatprep.mubr.bf16.mxu0 %v16660_v18  ;;  %7026 = vmatpush1.bf16.msra.mxu0 %v12441_v56  ;;  %16726 = vst [vmem:[#allocation20_spill] sm:$0xff] %v15728_v45  ;;  %v10016_v56 = vcombine.low %v15380_v12, %v15400_v24  ;;  %v7521_v57 = vrot.slane %v10134_v39, 3  ;;  %v15745_v45 = vor.u32 %v9178_v30, %v15721_v13  ;;  %v12440_v12 = vld [vmem:[%s16445_s5 + $0x8] sm:$0xff]  }
 0x332   : > { %7027 = vmatprep.subr.bf16.mxu0 %v12447_v48  ;;  %v4634_v24 = vadd.f32 %v15055_v58, %v4555_v7  ;;  %v4635_v48 = vadd.f32 %v15055_v58, %v4558_v25  ;;  %v4651_v44 = vpack.c.bf16 %v4637_v33, %v4636_v63  ;;  %v12449_v25 = vld [vmem:[%s16447_s7 + $0x3e0] ss:$8 sps:$4 sm:$0xff]   ;;  %v16728_v7 = vrot.slane %v15702_v3, 7 }
 0x333   : > { %16727 = vst [vmem:[#allocation23_spill] sm:$0xff] %v15745_v45  ;;  %v7539_v39 = vsel %vm7529_vm14, %v7537_v61, %v7521_v57  ;;  %v12455_v57 = vld [vmem:[%s16447_s7 + $0x3f4] ss:$8 sps:$4 sm:$0xff]   ;;  %v15767_v61 = vshll.u32 %v15619_v15, 16  ;;  %v15770_v33 = vshll.u32 %v15634_v20, 16  ;;  %v9196_v63 = vrot.slane %v15737_v43, 7 }
 0x334   : > { %v7543_v53 = vunpack.c.l.bf16 %v7539_v39  ;;  %v7544_v29 = vunpack.c.h.bf16 %v7539_v39  ;;  %v4650_v59 = vpack.c.bf16 %v4635_v48, %v4634_v24  ;;  %v9182_v45 = vor.u32 %v16728_v7, %v15751_v28  ;;  %4660 = vst [vmem:[#allocation3 + $0x48] sm:$0xff] %v4651_v44 }
 0x335   : > { %7028 = vmatpush1.bf16.msra.mxu0 %v12445_v36  ;;  %v16546_v36 = vrot.slane %v15740_v54, 7  ;;  %v15781_v39 = vor.u32 %v9196_v63, %v15767_v61 }
 0x336   : > { %7029 = vmatprep.subr.bf16.mxu0 %v12451_v16  ;;  %7547 = vst [vmem:[%s15563_s20 + $0x40] sm:$0xff] %v7543_v53  ;;  %4659 = vst [vmem:[#allocation3 + $0x40] sm:$0xff] %v4650_v59  ;;  %v11427_v16 = vpop.f32.mrb[40].mxu1  ;;  %11453 = vmatprep.mubr.bf16.mxu1 %v4650_v59  ;;  %v15777_v24 = vsel %vm2716_vm4, %v9178_v30, %v9182_v45  ;;  %v12572_v59 = vld [vmem:[%s16445_s5] sm:$0xff]  }
 0x337   : > { %7548 = vst [vmem:[%s15563_s20 + $0x60] sm:$0xff] %v7544_v29  ;;  %16729 = vst [vmem:[#allocation34_spill] sm:$0xff] %v15777_v24  ;;  %v4571_v48 = vpop.f32.mrb[41].mxu1  ;;  %11454 = vmatmul.mubr.bf16.vlgmr.msra.gmra.mrb[76].mxu1 %v4651_v44  ;;  %v9200_v53 = vor.u32 %v16546_v36, %v15770_v33  ;;  %v12453_v44 = vld [vmem:[%s16447_s7 + $0x3f0] ss:$8 sps:$4 sm:$0xff]   ;;  %v4640_v45 = vadd.f32 %v11427_v16, %v15055_v58  ;;  %v16731_v24 = vrot.slane %v15456_v26, 7 }
 0x338   : > { %6762 = vmatmul.mubr.bf16.gmra.mrb[48].mxu0 %v10016_v56  ;;  %16730 = vst [vmem:[#allocation33_spill] sm:$0xff] %v15781_v39  ;;  %v11428_v7 = vpop.f32.mrb[42].mxu1  ;;  %11466 = vmatpush3.bf16.msra.mxu1 %v12572_v59  ;;  %v12444_v29 = vld [vmem:[%s16445_s5 + $0x10] sm:$0xff]   ;;  %v12463_v59 = vld [vmem:[%s16447_s7 + $0x404] ss:$8 sps:$4 sm:$0xff]   ;;  %v4638_v36 = vadd.f32 %v15055_v58, %v4571_v48  ;;  %v16732_v26 = vrot.slane %v15464_v41, 7 }
 0x339   : > { %6771 = vmatprep.mubr.bf16.mxu0 %v16660_v18  ;;  %7030 = vmatpush1.bf16.msra.mxu0 %v12449_v25  ;;  %v4641_v30 = vadd.f32 %v11428_v7, %v15055_v58  ;;  %v4574_v56 = vpop.f32.mrb[43].mxu1  ;;  %v15801_v25 = vsel %vm2716_vm4, %v9196_v63, %v9200_v53  ;;  %v10017_v7 = vcombine.low %v15514_v50, %v15525_v4  ;;  %v6554_v20 = vrot.slane %v16731_v24, 4  ;;  %v12573_v41 = vld [vmem:[%s16444_s4] ss:$0 sm:$0xff] }
 0x33a   : > { %11467 = vmatprep.subr.bf16.mxu1 %v12440_v12  ;;  %7031 = vmatprep.subr.bf16.mxu0 %v12455_v57  ;;  %v4639_v16 = vadd.f32 %v15055_v58, %v4574_v56  ;;  %v12448_v57 = vld [vmem:[%s16445_s5 + $0x18] sm:$0xff]  }
 0x33b   : > { %v4653_v39 = vpack.c.bf16 %v4641_v30, %v4640_v45  ;;  %v6556_v50 = vsel %vm15004_vm12, %v6554_v20, %v16732_v26 }
 0x33c   : > { %v4652_v6 = vpack.c.bf16 %v4639_v16, %v4638_v36  ;;  %11468 = vmatpush3.bf16.msra.mxu1 %v12440_v12  ;;  %v11431_v63 = vpop.f32.mrb[44].mxu1  ;;  %v10018_v20 = vcombine.low %v6556_v50, %v15550_v32 }
 0x33d   : > { %7032 = vmatpush1.bf16.msra.mxu0 %v12453_v44  ;;  %4662 = vst [vmem:[#allocation3 + $0x58] sm:$0xff] %v4653_v39  ;;  %11469 = vmatprep.subr.bf16.mxu1 %v12444_v29  ;;  %v4587_v48 = vpop.f32.mrb[45].mxu1  ;;  %v4644_v12 = vadd.f32 %v11431_v63, %v15055_v58 }
 0x33e   : > { %7385 = vmatprep.subr.bf16.mxu0 %v12463_v59  ;;  %4661 = vst [vmem:[#allocation3 + $0x50] sm:$0xff] %v4652_v6  ;;  %11457 = vmatprep.mubr.bf16.mxu1 %v4652_v6  ;;  %v11432_v4 = vpop.f32.mrb[46].mxu1  ;;  %v12452_v6 = vld [vmem:[%s16445_s5 + $0x20] sm:$0xff]   ;;  %v4642_v53 = vadd.f32 %v12573_v41, %v4587_v48  ;;  %v12456_v59 = vld [vmem:[%s16445_s5 + $0x28] sm:$0xff]  }
 0x33f   : > { %v4645_v36 = vadd.f32 %v11432_v4, %v15055_v58  ;;  %v4590_v24 = vpop.f32.mrb[47].mxu1  ;;  %v5483_v39 = vpop.f32.mrb[60].mxu0  ;;  %v15828_v58 = vld [vmem:[#allocation3 + $0x48] sm:$0xff] }
 0x340   : > { %6772 = vmatmul.mubr.bf16.gmra.mrb[52].mxu0 %v10017_v7  ;;  %11470 = vmatpush3.bf16.msra.mxu1 %v12444_v29  ;;  %v4643_v17 = vadd.f32 %v12573_v41, %v4590_v24  ;;  %v5484_v44 = vpop.f32.mrb[61].mxu0  ;;  %v16552_v7 = vrot.slane %v15828_v58, 7 }
 0x341   : > { %6781 = vmatprep.mubr.bf16.mxu0 %v16660_v18  ;;  %11471 = vmatprep.subr.bf16.mxu1 %v12448_v57  ;;  %v4655_v45 = vpack.c.bf16 %v4645_v36, %v4644_v12  ;;  %v15826_v30 = vpop.f32.mrb[62].mxu0  ;;  %v12457_v36 = vld [vmem:[%s16445_s5 + $0x30] sm:$0xff]   ;;  %v12458_v44 = vld [vmem:[%s16445_s5 + $0x38] sm:$0xff]  }
 0x342   : > { %v4654_v56 = vpack.c.bf16 %v4643_v17, %v4642_v53  ;;  %v15830_v29 = vpop.f32.mrb[63].mxu0 }
 0x343   : > { %4664 = vst [vmem:[#allocation3 + $0x68] sm:$0xff] %v4655_v45 }
 0x344   : > { %11472 = vmatpush3.bf16.msra.mxu1 %v12448_v57  ;;  %4663 = vst [vmem:[#allocation3 + $0x60] sm:$0xff] %v4654_v56  ;;  %v11435_v32 = vpop.f32.mrb[48].mxu1 }
 0x345   : > { %11473 = vmatprep.subr.bf16.mxu1 %v12452_v6  ;;  %v15835_v16 = vld [vmem:[#allocation3 + $0x50] sm:$0xff]  ;;  %11458 = vmatmul.mubr.bf16.gmra.mrb[80].mxu1 %v4654_v56  ;;  %v4603_v48 = vpop.f32.mrb[49].mxu1  ;;  %v4648_v50 = vadd.f32 %v12573_v41, %v11435_v32  ;;  %v12471_v32 = vld [vmem:[%s16447_s7 + $0x424] ss:$8 sps:$4 sm:$0xff]  }
 0x346   : > { %v16551_v63 = vrot.slane %v15835_v16, 7  ;;  %11461 = vmatprep.mubr.bf16.mxu1 %v4655_v45  ;;  %v11436_v57 = vpop.f32.mrb[50].mxu1  ;;  %v4646_v24 = vadd.f32 %v12573_v41, %v4603_v48  ;;  %v12465_v45 = vld [vmem:[%s16447_s7 + $0x410] ss:$8 sps:$4 sm:$0xff]  }
 0x347   : > { %v4649_v4 = vadd.f32 %v12573_v41, %v11436_v57  ;;  %v4606_v12 = vpop.f32.mrb[51].mxu1 }
 0x348   : > { %6782 = vmatmul.mubr.bf16.gmra.mrb[96].mxu0 %v10018_v20  ;;  %11474 = vmatpush3.bf16.msra.mxu1 %v12452_v6  ;;  %v15845_v26 = vsel %vm2524_vm3, %v16552_v7, %v16551_v63  ;;  %v4647_v39 = vadd.f32 %v12573_v41, %v4606_v12  ;;  %v10067_v6 = vcombine.low %v15406_v46, %v15412_v37  ;;  %v12461_v20 = vld [vmem:[%s16447_s7 + $0x400] ss:$8 sps:$4 sm:$0xff]   ;;  %v12467_v41 = vld [vmem:[%s16447_s7 + $0x414] ss:$8 sps:$4 sm:$0xff]  }
 0x349   : > { %7049 = vmatprep.mubr.bf16.mxu0 %v16660_v18  ;;  %11475 = vmatprep.subr.bf16.mxu1 %v12456_v59  ;;  %v4657_v53 = vpack.c.bf16 %v4649_v4, %v4648_v50  ;;  %v12574_v46 = vld [vmem:[#allocation3] sm:$0xff]  ;;  %v12460_v4 = vld [vmem:[%s16445_s5 + $0x88] sm:$0xff]   ;;  %v16738_v63 = vld [vmem:[#allocation31_spill] sm:$0xff] }
 0x34a   : > { %v4656_v17 = vpack.c.bf16 %v4647_v39, %v4646_v24  ;;  %v15879_v50 = vld [vmem:[#allocation3 + $0x68] sm:$0xff]  ;;  %v16733_v24 = vcombine.low %v15019_v42, %v15026_v22  ;;  %v12475_v39 = vld [vmem:[%s16447_s7 + $0x434] ss:$8 sps:$4 sm:$0xff]  }
 0x34b   : > { %4666 = vst [vmem:[#allocation3 + $0x78] sm:$0xff] %v4657_v53  ;;  %v12469_v12 = vld [vmem:[%s16447_s7 + $0x420] ss:$8 sps:$4 sm:$0xff]   ;;  %v16740_v7 = vld [vmem:[#allocation8_spill] sm:$0xff] }
 0x34c   : > { %11476 = vmatpush3.bf16.msra.mxu1 %v12456_v59  ;;  %4665 = vst [vmem:[#allocation3 + $0x70] sm:$0xff] %v4656_v17  ;;  %v12459_v59 = vld [vmem:[%s16445_s5 + $0x80] sm:$0xff]  }
 0x34d   : > { %11477 = vmatprep.subr.bf16.mxu1 %v12457_v36  ;;  %11462 = vmatmul.mubr.bf16.gmra.mrb[84].mxu1 %v4656_v17  ;;  %v15862_v37 = vpop.f32.mrb[52].mxu1  ;;  %v12575_v17 = vld [vmem:[#allocation3 + $0x8] sm:$0xff] }
 0x34e   : > { %11481 = vmatprep.mubr.bf16.mxu1 %v12574_v46  ;;  %v15867_v56 = vpop.f32.mrb[53].mxu1  ;;  %v12464_v46 = vld [vmem:[%s16445_s5 + $0x90] sm:$0xff]  }
 0x34f   : > { %v15875_v48 = vpop.f32.mrb[54].mxu1 }
 0x350   : > { %7050 = vmatmul.mubr.bf16.vlgmr.msra.gmra.mrb[36].mxu0 %v10067_v6  ;;  %11478 = vmatpush3.bf16.msra.mxu1 %v12457_v36  ;;  %v15877_v57 = vpop.f32.mrb[55].mxu1  ;;  %v16550_v6 = vrot.slane %v15879_v50, 7 }
 0x351   : > { %7059 = vmatprep.mubr.bf16.mxu0 %v16660_v18  ;;  %7386 = vmatpush1.bf16.msra.mxu0 %v12461_v20 }
 0x352   : > { %11479 = vmatprep.subr.bf16.mxu1 %v12458_v44  ;;  %7387 = vmatprep.subr.bf16.mxu0 %v12467_v41  ;;  %v7944_v41 = vld [vmem:[#allocation3] sm:$0xff] }
 0x353   : > { %v15887_v36 = vld [vmem:[#allocation3 + $0x70] sm:$0xff] }
 0x354   : > { %11480 = vmatpush3.bf16.msra.mxu1 %v12458_v44  ;;  %v16549_v53 = vrot.slane %v15887_v36, 7  ;;  %v16734_v44 = vld [vmem:[#allocation7_spill] sm:$0xff] }
 0x355   : > { %7388 = vmatpush1.bf16.msra.mxu0 %v12465_v45  ;;  %11493 = vmatprep.subr.bf16.mxu1 %v12459_v59  ;;  %v15898_v20 = vpop.f32.mrb[56].mxu1  ;;  %v12473_v45 = vld [vmem:[%s16447_s7 + $0x430] ss:$8 sps:$4 sm:$0xff]  }
 0x356   : > { %7389 = vmatprep.subr.bf16.mxu0 %v12471_v32  ;;  %v15901_v42 = vpop.f32.mrb[57].mxu1  ;;  %v15908_v22 = vsel %vm2524_vm3, %v16550_v6, %v16549_v53  ;;  %v7955_v53 = vshll.u32 %v7944_v41, 16 }
 0x357   : > { %11482 = vmatmul.mubr.bf16.vlgmr.msra.gmra.mrb[76].mxu1 %v12575_v17  ;;  %16735 = vst [vmem:[#allocation28_spill] sm:$0xff] %v15901_v42  ;;  %v15916_v32 = vpop.f32.mrb[58].mxu1 }
 0x358   : > { %7060 = vmatmul.mubr.bf16.gmra.mrb[40].mxu0 %v16733_v24  ;;  %11485 = vmatprep.mubr.bf16.mxu1 %v16734_v44  ;;  %16736 = vst [vmem:[#allocation25_spill] sm:$0xff] %v15916_v32  ;;  %v12479_v24 = vld [vmem:[%s16447_s7 + $0x444] ss:$8 sps:$4 sm:$0xff]   ;;  %v15921_v44 = vpop.f32.mrb[59].mxu1 }
 0x359   : > { %7069 = vmatprep.mubr.bf16.mxu0 %v16660_v18  ;;  %11494 = vmatpush3.bf16.msra.mxu1 %v12459_v59  ;;  %v5511_v59 = vpop.f32.mrb[64].mxu0  ;;  %16737 = vst [vmem:[#allocation29_spill] sm:$0xff] %v15921_v44  ;;  %v7957_v44 = vrot.slane %v7955_v53, 1  ;;  %v10070_v53 = vcombine.low %v15579_v35, %v15558_v0  ;;  %v12476_v0 = vld [vmem:[%s16445_s5 + $0xa8] sm:$0xff]  }
 0x35a   : > { %11495 = vmatprep.subr.bf16.mxu1 %v12460_v4  ;;  %7390 = vmatpush1.bf16.msra.mxu0 %v12469_v12  ;;  %v5512_v17 = vpop.f32.mrb[65].mxu0  ;;  %v12468_v59 = vld [vmem:[%s16445_s5 + $0x98] sm:$0xff]   ;;  %v12485_v35 = vld [vmem:[%s16447_s7 + $0x460] ss:$8 sps:$4 sm:$0xff]  }
 0x35b   : > { %7391 = vmatprep.subr.bf16.mxu0 %v12475_v39  ;;  %v15923_v6 = vpop.f32.mrb[66].mxu0  ;;  %v12477_v39 = vld [vmem:[%s16447_s7 + $0x440] ss:$8 sps:$4 sm:$0xff]   ;;  %v16739_v17 = vcombine.low %v16738_v63, %v15044_v60  ;;  %v7953_v63 = vshrl.u32 %v7944_v41, 16 }
 0x35c   : > { %v15925_v12 = vpop.f32.mrb[67].mxu0  ;;  %v12472_v60 = vld [vmem:[%s16445_s5 + $0xa0] sm:$0xff]  }
 0x35d   : > { %11496 = vmatpush3.bf16.msra.mxu1 %v12460_v4  ;;  %v12483_v4 = vld [vmem:[%s16447_s7 + $0x454] ss:$8 sps:$4 sm:$0xff]   ;;  %v4904_v32 = vpop.f32.mrb[60].mxu1 }
 0x35e   : > { %11497 = vmatprep.subr.bf16.mxu1 %v12464_v46  ;;  %7392 = vmatpush1.bf16.msra.mxu0 %v12473_v45  ;;  %v16741_v45 = vld [vmem:[#allocation16_spill] sm:$0xff]  ;;  %v4905_v42 = vpop.f32.mrb[61].mxu1 }
 0x35f   : > { %7393 = vmatprep.subr.bf16.mxu0 %v12479_v24  ;;  %11486 = vmatmul.mubr.bf16.gmra.mrb[88].mxu1 %v16740_v7  ;;  %v12481_v24 = vld [vmem:[%s16447_s7 + $0x450] ss:$8 sps:$4 sm:$0xff]   ;;  %v4906_v7 = vpop.f32.mrb[62].mxu1  ;;  %v12487_v42 = vld [vmem:[%s16447_s7 + $0x464] ss:$8 sps:$4 sm:$0xff]  }
 0x360   : > { %7070 = vmatmul.mubr.bf16.gmra.mrb[100].mxu0 %v16739_v17  ;;  %11489 = vmatprep.mubr.bf16.mxu1 %v16741_v45  ;;  %v4908_v32 = vpop.f32.mrb[63].mxu1  ;;  %v7958_v17 = vor.u32 %v7957_v44, %v7953_v63  ;;  %v7962_v45 = vrot.slane %v15721_v13, 1 }
 0x361   : > { %7077 = vmatprep.mubr.bf16.mxu0 %v16660_v18  ;;  %11498 = vmatpush3.bf16.msra.mxu1 %v12464_v46  ;;  %v5112_v46 = vadd.f32 %v15585_v52, %v4906_v7  ;;  %v5114_v41 = vadd.f32 %v15596_v51, %v4908_v32  ;;  %v12491_v51 = vld [vmem:[%s16447_s7 + $0x474] ss:$8 sps:$4 sm:$0xff]   ;;  %v7947_v7 = vld [vmem:[#allocation3 + $0x18] sm:$0x1] }
 0x362   : > { %11499 = vmatprep.subr.bf16.mxu1 %v12468_v59  ;;  %7394 = vmatpush1.bf16.msra.mxu0 %v12477_v39 }
 0x363   : > { %7395 = vmatprep.subr.bf16.mxu0 %v12483_v4  ;;  %v5526_v39 = vadd.f32 %v15826_v30, %v5112_v46  ;;  %v5527_v52 = vadd.f32 %v15830_v29, %v5114_v41  ;;  %v7963_v30 = vsel %vm1261_vm0, %v7958_v17, %v7962_v45  ;;  %v12480_v29 = vld [vmem:[%s16445_s5 + $0xb0] sm:$0xff]   ;;  %v12488_v17 = vld [vmem:[%s16445_s5 + $0xc0] sm:$0xff]   ;;  %v7976_v41 = vshll.u32 %v7947_v7, 16  ;;  %v12492_v7 = vld [vmem:[%s16445_s5 + $0xc8] sm:$0xff]  }
 0x365   : > { %11500 = vmatpush3.bf16.msra.mxu1 %v12468_v59  ;;  %v15970_v44 = vpop.f32.mrb[64].mxu1 }
 0x366   : > { %11501 = vmatprep.subr.bf16.mxu1 %v12472_v60  ;;  %7396 = vmatpush1.bf16.msra.mxu0 %v12481_v24  ;;  %v15972_v59 = vpop.f32.mrb[65].mxu1  ;;  %v16742_v24 = vcombine.low %v16712_v2, %v16713_v62 }
 0x367   : > { %7397 = vmatprep.subr.bf16.mxu0 %v12487_v42  ;;  %11490 = vmatmul.mubr.bf16.gmra.mrb[92].mxu1 %v15330_v8  ;;  %v12489_v8 = vld [vmem:[%s16447_s7 + $0x470] ss:$8 sps:$4 sm:$0xff]   ;;  %v15980_v4 = vpop.f32.mrb[66].mxu1  ;;  %v7948_v42 = vld [vmem:[#allocation3 + $0x20] sm:$0xff] }
 0x368   : > { %7078 = vmatmul.mubr.bf16.gmra.mrb[48].mxu0 %v10070_v53  ;;  %11509 = vmatprep.mubr.bf16.mxu1 %v7963_v30  ;;  %v15982_v63 = vpop.f32.mrb[67].mxu1  ;;  %v7970_v53 = vrot.slane %v15751_v28, 1  ;;  %v7983_v62 = vshll.u32 %v7948_v42, 16 }
 0x369   : > { %7087 = vmatprep.mubr.bf16.mxu0 %v16660_v18  ;;  %11502 = vmatpush3.bf16.msra.mxu1 %v12472_v60  ;;  %v12484_v60 = vld [vmem:[%s16445_s5 + $0xb8] sm:$0xff]  }
 0x36a   : > { %11503 = vmatprep.subr.bf16.mxu1 %v12476_v0  ;;  %7398 = vmatpush1.bf16.msra.mxu0 %v12485_v35  ;;  %v7974_v30 = vor.u32 %v15702_v3, %v7970_v53 }
 0x36b   : > { %7399 = vmatprep.subr.bf16.mxu0 %v12491_v51 }
 0x36d   : > { %11504 = vmatpush3.bf16.msra.mxu1 %v12476_v0  ;;  %v15992_v46 = vpop.f32.mrb[68].mxu1 }
 0x36e   : > { %11505 = vmatprep.subr.bf16.mxu1 %v12480_v29  ;;  %7400 = vmatpush1.bf16.msra.mxu0 %v12489_v8  ;;  %16743 = vst [vmem:[#allocation27_spill] sm:$0xff] %v15992_v46  ;;  %v15994_v32 = vpop.f32.mrb[69].mxu1  ;;  %v7978_v46 = vrot.slane %v7976_v41, 1  ;;  %v7981_v41 = vshrl.u32 %v7948_v42, 16 }
 0x36f   : > { %16744 = vst [vmem:[#allocation10_spill] sm:$0xff] %v15994_v32  ;;  %v5805_v0 = vpop.f32.mrb[68].mxu0  ;;  %v15999_v2 = vpop.f32.mrb[70].mxu1 }
 0x370   : > { %7088 = vmatmul.mubr.bf16.gmra.mrb[52].mxu0 %v16742_v24  ;;  %16745 = vst [vmem:[#allocation26_spill] sm:$0xff] %v15999_v2  ;;  %v5806_v35 = vpop.f32.mrb[69].mxu0  ;;  %v16001_v51 = vpop.f32.mrb[71].mxu1  ;;  %v7985_v2 = vrot.slane %v7983_v62, 1 }
 0x371   : > { %7097 = vmatprep.mubr.bf16.mxu0 %v16660_v18  ;;  %11506 = vmatpush3.bf16.msra.mxu1 %v12480_v29  ;;  %16746 = vst [vmem:[#allocation6_spill] sm:$0xff] %v16001_v51  ;;  %v5807_v8 = vpop.f32.mrb[70].mxu0  ;;  %v7966_v29 = vor.u32 %v15666_v10, %v7962_v45  ;;  %v16747_v35 = vcombine.low %v15243_v19, %v15270_v49  ;;  %v12493_v19 = vld [vmem:[%s16445_s5 + $0xd0] sm:$0xff]  }
 0x372   : > { %11507 = vmatprep.subr.bf16.mxu1 %v12484_v60  ;;  %v5809_v24 = vpop.f32.mrb[71].mxu0  ;;  %v16005_v32 = vadd.f32 %v5807_v8, %v5526_v39  ;;  %v7979_v45 = vsel %vm1261_vm0, %v7974_v30, %v7978_v46  ;;  %v8168_v39 = vld [vmem:[#allocation3] sm:$0xf8]  ;;  %v7998_v30 = vrot.slane %v15770_v33, 1 }
 0x373   : > { %v16010_v0 = vadd.f32 %v5809_v24, %v5527_v52  ;;  %v7971_v51 = vsel %vm1261_vm0, %v7966_v29, %v7970_v53  ;;  %v7990_v52 = vrot.slane %v15767_v61, 1  ;;  %v7986_v53 = vor.u32 %v7985_v2, %v7981_v41  ;;  %v7951_v2 = vld [vmem:[#allocation3 + $0x38] sm:$0x1] }
 0x374   : > { %v8173_v62 = vshrl.u32 %v8168_v39, 16  ;;  %v8176_v29 = vshll.u32 %v8168_v39, 16  ;;  %v8181_v41 = vrot.slane %v15721_v13, 4  ;;  %v16749_v13 = vcombine.low %v15441_v11, %v15448_v1 }
 0x375   : > { %11508 = vmatpush3.bf16.msra.mxu1 %v12484_v60  ;;  %v4932_v60 = vpop.f32.mrb[72].mxu1  ;;  %v7994_v24 = vor.u32 %v15737_v43, %v7990_v52  ;;  %v7991_v39 = vsel %vm1261_vm0, %v7986_v53, %v7990_v52  ;;  %v8192_v11 = vshll.u32 %v15603_v55, 16 }
 0x376   : > { %11521 = vmatprep.subr.bf16.mxu1 %v12488_v17  ;;  %v4933_v8 = vpop.f32.mrb[73].mxu1  ;;  %v8180_v60 = vrot.slane %v15666_v10, 3  ;;  %v12496_v10 = vld [vmem:[%s16445_s5 + $0xe8] sm:$0xff]  }
 0x377   : > { %v4934_v49 = vpop.f32.mrb[74].mxu1 }
 0x378   : > { %7098 = vmatmul.mubr.bf16.gmra.mrb[104].mxu0 %v16747_v35  ;;  %11510 = vmatmul.mubr.bf16.vlgmr.msra.gmra.mrb[76].mxu1 %v7971_v51  ;;  %v5140_v46 = vadd.f32 %v15682_v23, %v4934_v49  ;;  %v4936_v51 = vpop.f32.mrb[75].mxu1  ;;  %v12494_v35 = vld [vmem:[%s16445_s5 + $0xd8] sm:$0xff]   ;;  %v16748_v23 = vcombine.low %v15360_v31, %v15364_v14  ;;  %v12495_v31 = vld [vmem:[%s16445_s5 + $0xe0] sm:$0xff]   ;;  %v8002_v14 = vor.u32 %v15740_v54, %v7998_v30 }
 0x379   : > { %7417 = vmatprep.mubr.bf16.mxu0 %v16660_v18  ;;  %11513 = vmatprep.mubr.bf16.mxu1 %v7979_v45  ;;  %v8182_v52 = vor.u32 %v8181_v41, %v8180_v60 }
 0x37a   : > { %11522 = vmatpush3.bf16.msra.mxu1 %v12488_v17  ;;  %v5142_v17 = vadd.f32 %v15696_v27, %v4936_v51  ;;  %v5536_v42 = vadd.f32 %v15923_v6, %v5140_v46  ;;  %v8175_v27 = vrot.slane %v8173_v62, 3  ;;  %v7999_v6 = vsel %vm1261_vm0, %v7994_v24, %v7998_v30  ;;  %v12497_v62 = vld [vmem:[%s16445_s5 + $0xf0] sm:$0xff]   ;;  %v12498_v24 = vld [vmem:[%s16445_s5 + $0xf8] sm:$0xff]  }
 0x37b   : > { %11523 = vmatprep.subr.bf16.mxu1 %v12492_v7  ;;  %v8189_v30 = vshrl.u32 %v15603_v55, 16  ;;  %v8170_v55 = vld [vmem:[#allocation3 + $0x20] sm:$0xf8] }
 0x37c   : > { %v5537_v45 = vadd.f32 %v15925_v12, %v5142_v17  ;;  %v8004_v12 = vshll.u32 %v7951_v2, 16  ;;  %v8185_v2 = vrot.slane %v15751_v28, 4  ;;  %v8198_v60 = vshrl.u32 %v8170_v55, 16 }
 0x37d   : > { %v8201_v28 = vshll.u32 %v8170_v55, 16 }
 0x37e   : > { %11524 = vmatpush3.bf16.msra.mxu1 %v12492_v7  ;;  %v8178_v7 = vrot.slane %v8176_v29, 4  ;;  %v8006_v49 = vrot.slane %v8004_v12, 1 }
 0x37f   : > { %11525 = vmatprep.subr.bf16.mxu1 %v12493_v19  ;;  %v8203_v12 = vrot.slane %v8201_v28, 4 }
 0x380   : > { %7418 = vmatmul.mubr.bf16.vlgmr.msra.gmra.mrb[36].mxu0 %v16748_v23  ;;  %11514 = vmatmul.mubr.bf16.gmra.mrb[96].mxu1 %v7991_v39  ;;  %v8179_v8 = vor.u32 %v8178_v7, %v8175_v27  ;;  %v16750_v39 = vcombine.low %v15483_v9, %v15488_v21  ;;  %v8194_v27 = vrot.slane %v8192_v11, 4  ;;  %v12499_v7 = vld [vmem:[%s16445_s5 + $0x100] sm:$0xff]   ;;  %v12500_v9 = vld [vmem:[%s16445_s5 + $0x108] sm:$0xff]   ;;  %v8200_v21 = vrot.slane %v8198_v60, 3 }
 0x381   : > { %7427 = vmatprep.mubr.bf16.mxu0 %v16660_v18  ;;  %11517 = vmatprep.mubr.bf16.mxu1 %v7999_v6  ;;  %v8402_v11 = vshll.u32 %v15828_v58, 16  ;;  %v12503_v60 = vld [vmem:[%s16445_s5 + $0x120] sm:$0xff]  }
 0x382   : > { %11526 = vmatpush3.bf16.msra.mxu1 %v12493_v19  ;;  %v8007_v19 = vsel %vm1261_vm0, %v8002_v14, %v8006_v49  ;;  %v8183_v53 = vsel %vm1887_vm1, %v8179_v8, %v8182_v52  ;;  %v8205_v8 = vrot.slane %v15737_v43, 3  ;;  %v8206_v49 = vrot.slane %v15767_v61, 4 }
 0x383   : > { %11527 = vmatprep.subr.bf16.mxu1 %v12494_v35 }
 0x384   : > { %v8207_v43 = vor.u32 %v8206_v49, %v8205_v8  ;;  %v16756_v49 = vcombine.low %v15686_v34, %v15690_v40  ;;  %v12506_v40 = vld [vmem:[%s16445_s5 + $0x138] sm:$0xff]  }
 0x386   : > { %11528 = vmatpush3.bf16.msra.mxu1 %v12494_v35  ;;  %v8184_v35 = vrot.slane %v15702_v3, 3 }
 0x387   : > { %11529 = vmatprep.subr.bf16.mxu1 %v12495_v31  ;;  %v5833_v46 = vpop.f32.mrb[72].mxu0 }
 0x388   : > { %7428 = vmatmul.mubr.bf16.gmra.mrb[40].mxu0 %v16749_v13  ;;  %11518 = vmatmul.mubr.bf16.gmra.mrb[100].mxu1 %v8007_v19  ;;  %v5834_v51 = vpop.f32.mrb[73].mxu0  ;;  %v8186_v6 = vor.u32 %v8185_v2, %v8184_v35  ;;  %v8210_v13 = vrot.slane %v15770_v33, 4  ;;  %v8382_v19 = vld [vmem:[#allocation3 + $0x40] sm:$0xf8]  ;;  %v8217_v33 = vshll.u32 %v15644_v5, 16 }
 0x389   : > { %7437 = vmatprep.mubr.bf16.mxu0 %v16660_v18  ;;  %11537 = vmatprep.mubr.bf16.mxu1 %v8183_v53  ;;  %v5835_v1 = vpop.f32.mrb[74].mxu0  ;;  %v8204_v53 = vor.u32 %v8203_v12, %v8200_v21  ;;  %v8391_v46 = vshrl.u32 %v8382_v19, 16  ;;  %v8394_v51 = vshll.u32 %v8382_v19, 16  ;;  %v8411_v19 = vshll.u32 %v15835_v16, 16 }
 0x38a   : > { %11530 = vmatpush3.bf16.msra.mxu1 %v12495_v31  ;;  %v5837_v29 = vpop.f32.mrb[75].mxu0  ;;  %v16057_v17 = vadd.f32 %v5835_v1, %v5536_v42  ;;  %v8191_v42 = vrot.slane %v8189_v30, 3  ;;  %v8187_v41 = vsel %vm1887_vm1, %v8182_v52, %v8186_v6  ;;  %v16751_v31 = vld [vmem:[#allocation15_spill] sm:$0xff]  ;;  %v8399_v30 = vshrl.u32 %v15828_v58, 16  ;;  %v12502_v1 = vld [vmem:[%s16445_s5 + $0x118] sm:$0xff]  }
 0x38b   : > { %11531 = vmatprep.subr.bf16.mxu1 %v12496_v10  ;;  %v16064_v23 = vadd.f32 %v5837_v29, %v5537_v45  ;;  %v16752_v14 = vcombine.low %v15533_v38, %v16751_v31  ;;  %v12501_v38 = vld [vmem:[%s16445_s5 + $0x110] sm:$0xff]   ;;  %v16753_v29 = vld [vmem:[#allocation24_spill] sm:$0xff]  ;;  %v8208_v2 = vsel %vm1887_vm1, %v8204_v53, %v8207_v43  ;;  %v8219_v55 = vrot.slane %v8217_v33, 4  ;;  %v8386_v33 = vld [vmem:[#allocation3 + $0x60] sm:$0xf8] }
 0x38c   : > { %v8195_v45 = vor.u32 %v8194_v27, %v8191_v42  ;;  %v8393_v42 = vrot.slane %v8391_v46, 3  ;;  %v8396_v27 = vrot.slane %v8394_v51, 4  ;;  %v12507_v51 = vld [vmem:[%s16445_s5 + $0x140] sm:$0xff]  }
 0x38e   : > { %11532 = vmatpush3.bf16.msra.mxu1 %v12496_v10  ;;  %v8209_v10 = vrot.slane %v15740_v54, 3  ;;  %v8196_v52 = vsel %vm1887_vm1, %v8186_v6, %v8195_v45  ;;  %v8401_v6 = vrot.slane %v8399_v30, 3  ;;  %v8426_v30 = vshrl.u32 %v8386_v33, 16 }
 0x38f   : > { %11533 = vmatprep.subr.bf16.mxu1 %v12497_v62 }
 0x390   : > { %7438 = vmatmul.mubr.bf16.gmra.mrb[108].mxu0 %v16750_v39  ;;  %v8211_v61 = vor.u32 %v8210_v13, %v8209_v10 }
 0x391   : > { %7445 = vmatprep.mubr.bf16.mxu0 %v16660_v18 }
 0x392   : > { %11534 = vmatpush3.bf16.msra.mxu1 %v12497_v62  ;;  %v8214_v62 = vshrl.u32 %v15644_v5, 16  ;;  %v8212_v5 = vsel %vm1887_vm1, %v8207_v43, %v8211_v61  ;;  %v8413_v43 = vrot.slane %v8411_v19, 4 }
 0x393   : > { %11535 = vmatprep.subr.bf16.mxu1 %v12498_v24 }
 0x394   : > { %v8216_v39 = vrot.slane %v8214_v62, 3 }
 0x396   : > { %11536 = vmatpush3.bf16.msra.mxu1 %v12498_v24  ;;  %v16754_v24 = vld [vmem:[#allocation18_spill] sm:$0xff]  ;;  %v8220_v45 = vor.u32 %v8219_v55, %v8216_v39  ;;  %v8428_v55 = vrot.slane %v8426_v30, 3  ;;  %v12513_v30 = vld [vmem:[%s16445_s5 + $0x170] sm:$0xff]  }
 0x397   : > { %11549 = vmatprep.subr.bf16.mxu1 %v12499_v7  ;;  %v16755_v35 = vcombine.low %v16753_v29, %v16754_v24  ;;  %v8437_v29 = vshll.u32 %v15879_v50, 16  ;;  %v12508_v39 = vld [vmem:[%s16445_s5 + $0x148] sm:$0xff]  }
 0x398   : > { %7446 = vmatmul.mubr.bf16.gmra.mrb[48].mxu0 %v16752_v14  ;;  %v12504_v14 = vld [vmem:[%s16445_s5 + $0x128] sm:$0xff]   ;;  %v8221_v10 = vsel %vm1887_vm1, %v8211_v61, %v8220_v45  ;;  %v8389_v45 = vld [vmem:[#allocation3 + $0x78] sm:$0xf] }
 0x399   : > { %11538 = vmatmul.mubr.bf16.vlgmr.msra.gmra.mrb[76].mxu1 %v8187_v41  ;;  %7455 = vmatprep.mubr.bf16.mxu0 %v16660_v18 }
 0x39a   : > { %11541 = vmatprep.mubr.bf16.mxu1 %v8196_v52  ;;  %11550 = vmatpush3.bf16.msra.mxu1 %v12499_v7  ;;  %v8404_v7 = vrot.slane %v8402_v11, 4  ;;  %v12505_v52 = vld [vmem:[%s16445_s5 + $0x130] sm:$0xff]   ;;  %v8429_v11 = vshll.u32 %v8386_v33, 16 }
 0x39b   : > { %11551 = vmatprep.subr.bf16.mxu1 %v12500_v9 }
 0x39c   : > { %v8405_v21 = vor.u32 %v8404_v7, %v8401_v6  ;;  %v8439_v6 = vrot.slane %v8437_v29, 4  ;;  %v12515_v29 = vld [vmem:[%s16445_s5 + $0x180] sm:$0xff]  }
 0x39e   : > { %11552 = vmatpush3.bf16.msra.mxu1 %v12500_v9  ;;  %v8397_v9 = vor.u32 %v8396_v27, %v8393_v42  ;;  %v8431_v42 = vrot.slane %v8429_v11, 4  ;;  %v12514_v11 = vld [vmem:[%s16445_s5 + $0x178] sm:$0xff]  }
 0x39f   : > { %11553 = vmatprep.subr.bf16.mxu1 %v12501_v38  ;;  %v6185_v28 = vpop.f32.mrb[76].mxu0 }
 0x3a0   : > { %7456 = vmatmul.mubr.bf16.gmra.mrb[52].mxu0 %v16755_v35  ;;  %v6186_v41 = vpop.f32.mrb[77].mxu0  ;;  %v8406_v13 = vsel %vm1887_vm1, %v8397_v9, %v8405_v21  ;;  %v8443_v35 = vshrl.u32 %v15887_v36, 16 }
 0x3a1   : > { %11542 = vmatmul.mubr.bf16.gmra.mrb[104].mxu1 %v8208_v2  ;;  %7465 = vmatprep.mubr.bf16.mxu0 %v16660_v18  ;;  %v6187_v12 = vpop.f32.mrb[78].mxu0  ;;  %v8446_v2 = vshll.u32 %v15887_v36, 16  ;;  %v12509_v41 = vld [vmem:[%s16445_s5 + $0x150] sm:$0xff]  }
 0x3a2   : > { %11545 = vmatprep.mubr.bf16.mxu1 %v8212_v5  ;;  %11554 = vmatpush3.bf16.msra.mxu1 %v12501_v38  ;;  %v16106_v18 = vadd.f32 %v6187_v12, %v16005_v32  ;;  %v6189_v31 = vpop.f32.mrb[79].mxu0  ;;  %v8385_v32 = vld [vmem:[#allocation3 + $0x58] sm:$0xf] }
 0x3a3   : > { %11555 = vmatprep.subr.bf16.mxu1 %v12502_v1  ;;  %v16112_v8 = vadd.f32 %v6189_v31, %v16010_v0  ;;  %v8408_v0 = vshrl.u32 %v15835_v16, 16  ;;  %v8417_v53 = vshrl.u32 %v8385_v32, 16  ;;  %v8420_v34 = vshll.u32 %v8385_v32, 16 }
 0x3a4   : > { %v8448_v28 = vrot.slane %v8446_v2, 4  ;;  %v8452_v31 = vshrl.u32 %v8389_v45, 16 }
 0x3a5   : > { %v8410_v38 = vrot.slane %v8408_v0, 3  ;;  %v8419_v61 = vrot.slane %v8417_v53, 3  ;;  %v8422_v62 = vrot.slane %v8420_v34, 4  ;;  %v12510_v0 = vld [vmem:[%s16445_s5 + $0x158] sm:$0xff]  }
 0x3a6   : > { %11556 = vmatpush3.bf16.msra.mxu1 %v12502_v1  ;;  %v8434_v1 = vshrl.u32 %v15879_v50, 16  ;;  %v8454_v34 = vrot.slane %v8452_v31, 3  ;;  %v16762_v31 = vld [vmem:[#allocation14_spill] sm:$0xff] }
 0x3a7   : > { %11557 = vmatprep.subr.bf16.mxu1 %v12503_v60  ;;  %v8414_v46 = vor.u32 %v8413_v43, %v8410_v38  ;;  %v8423_v24 = vor.u32 %v8422_v62, %v8419_v61  ;;  %v12511_v43 = vld [vmem:[%s16445_s5 + $0x160] sm:$0xff]  }
 0x3a8   : > { %7466 = vmatmul.mubr.bf16.gmra.mrb[112].mxu0 %v16756_v49  ;;  %v8436_v27 = vrot.slane %v8434_v1, 3 }
 0x3a9   : > { %11546 = vmatmul.mubr.bf16.gmra.mrb[108].mxu1 %v8221_v10  ;;  %v8415_v5 = vsel %vm1887_vm1, %v8405_v21, %v8414_v46  ;;  %v8424_v7 = vsel %vm1887_vm1, %v8414_v46, %v8423_v24  ;;  %v8432_v21 = vor.u32 %v8431_v42, %v8428_v55  ;;  %v16757_v46 = vrot.slane %v15607_v47, 4  ;;  %v12516_v55 = vld [vmem:[%s16445_s5 + $0x188] sm:$0xff]   ;;  %v16758_v42 = vld [vmem:[#allocation9_spill] sm:$0xff] }
 0x3aa   : > { %11558 = vmatpush3.bf16.msra.mxu1 %v12503_v60  ;;  %11565 = vmatprep.mubr.bf16.mxu1 %v8406_v13  ;;  %v8445_v60 = vrot.slane %v8443_v35, 3  ;;  %v8440_v12 = vor.u32 %v8439_v6, %v8436_v27  ;;  %v8621_v27 = vld [vmem:[#allocation3 + $0x20] sm:$0xf0]  ;;  %v16759_v6 = vld [vmem:[#allocation32_spill] sm:$0xff] }
 0x3ab   : > { %11559 = vmatprep.subr.bf16.mxu1 %v12504_v14 }
 0x3ac   : > { %v8449_v10 = vor.u32 %v8448_v28, %v8445_v60  ;;  %v8441_v53 = vsel %vm1887_vm1, %v8432_v21, %v8440_v12  ;;  %v16760_v60 = vrot.slane %v15619_v15, 4 }
 0x3ae   : > { %11560 = vmatpush3.bf16.msra.mxu1 %v12504_v14  ;;  %v8455_v14 = vshll.u32 %v8389_v45, 16  ;;  %v8450_v38 = vsel %vm1887_vm1, %v8440_v12, %v8449_v10  ;;  %v16761_v45 = vld [vmem:[#allocation30_spill] sm:$0xff] }
 0x3af   : > { %11561 = vmatprep.subr.bf16.mxu1 %v12505_v52  ;;  %v12520_v12 = vld [vmem:[%s16445_s5 + $0x1a8] sm:$0xff]  }
 0x3b2   : > { %11562 = vmatpush3.bf16.msra.mxu1 %v12505_v52 }
 0x3b3   : > { %11563 = vmatprep.subr.bf16.mxu1 %v12506_v40 }
 0x3b6   : > { %11564 = vmatpush3.bf16.msra.mxu1 %v12506_v40  ;;  %v8457_v40 = vrot.slane %v8455_v14, 4  ;;  %v16763_v14 = vrot.slane %v15607_v47, 7  ;;  %v12522_v47 = vld [vmem:[%s16445_s5 + $0x1b8] sm:$0xff]  }
 0x3b7   : > { %11577 = vmatprep.subr.bf16.mxu1 %v12507_v51  ;;  %v6213_v9 = vpop.f32.mrb[80].mxu0 }
 0x3b8   : > { %v6214_v49 = vpop.f32.mrb[81].mxu0  ;;  %v8458_v61 = vor.u32 %v8457_v40, %v8454_v34  ;;  %v12519_v9 = vld [vmem:[%s16445_s5 + $0x1a0] sm:$0xff]  }
 0x3b9   : > { %11566 = vmatmul.mubr.bf16.vlgmr.msra.gmra.mrb[76].mxu1 %v8415_v5  ;;  %v6215_v13 = vpop.f32.mrb[82].mxu0 }
 0x3ba   : > { %11569 = vmatprep.mubr.bf16.mxu1 %v8424_v7  ;;  %11578 = vmatpush3.bf16.msra.mxu1 %v12507_v51  ;;  %v16143_v32 = vadd.f32 %v6215_v13, %v16057_v17  ;;  %v6217_v52 = vpop.f32.mrb[83].mxu0  ;;  %v8620_v17 = vld [vmem:[#allocation3] sm:$0xf0]  ;;  %v8459_v33 = vsel %vm1887_vm1, %v8449_v10, %v8458_v61  ;;  %v8637_v7 = vrot.slane %v8621_v27, 4  ;;  %v12521_v13 = vld [vmem:[%s16445_s5 + $0x1b0] sm:$0xff]   ;;  %v16765_v61 = vld [vmem:[#allocation22_spill] sm:$0xff] }
 0x3bb   : > { %11579 = vmatprep.subr.bf16.mxu1 %v12508_v39  ;;  %v16149_v19 = vadd.f32 %v6217_v52, %v16064_v23  ;;  %v8630_v62 = vrot.slane %v8620_v17, 4  ;;  %v12512_v23 = vld [vmem:[%s16445_s5 + $0x168] sm:$0xff]   ;;  %v12523_v17 = vld [vmem:[%s16445_s5 + $0x1c0] sm:$0xff]  }
 0x3bc   : > { %v8639_v28 = vsel %vm2129_vm2, %v8637_v7, %v16760_v60  ;;  %v12528_v60 = vld [vmem:[%s16445_s5 + $0x1e8] sm:$0xff]  }
 0x3bd   : > { %v8632_v51 = vsel %vm2129_vm2, %v8630_v62, %v16757_v46  ;;  %v16766_v62 = vrot.slane %v16765_v61, 7  ;;  %v12525_v46 = vld [vmem:[%s16445_s5 + $0x1d0] sm:$0xff]  }
 0x3be   : > { %11580 = vmatpush3.bf16.msra.mxu1 %v12508_v39 }
 0x3bf   : > { %11581 = vmatprep.subr.bf16.mxu1 %v12509_v41 }
 0x3c1   : > { %11570 = vmatmul.mubr.bf16.gmra.mrb[112].mxu1 %v8441_v53 }
 0x3c2   : > { %11573 = vmatprep.mubr.bf16.mxu1 %v8450_v38  ;;  %11582 = vmatpush3.bf16.msra.mxu1 %v12509_v41  ;;  %v16193_v41 = vld [vmem:[#allocation3] sm:$0x80]  ;;  %v8805_v38 = vld [vmem:[#allocation3 + $0x18] sm:$0x7f] }
 0x3c3   : > { %11583 = vmatprep.subr.bf16.mxu1 %v12510_v0  ;;  %v8812_v21 = vrot.slane %v16193_v41, 7 }
 0x3c5   : > { %v8814_v49 = vsel %vm2524_vm3, %v8812_v21, %v16763_v14  ;;  %v16771_v21 = vrot.slane %v15828_v58, 7  ;;  %v12531_v58 = vld [vmem:[%s16445_s5 + $0x200] sm:$0xff]  }
 0x3c6   : > { %11584 = vmatpush3.bf16.msra.mxu1 %v12510_v0 }
 0x3c7   : > { %11585 = vmatprep.subr.bf16.mxu1 %v12511_v43 }
 0x3c9   : > { %11574 = vmatmul.mubr.bf16.gmra.mrb[116].mxu1 %v8459_v33  ;;  %v16228_v33 = vld [vmem:[#allocation3 + $0x20] sm:$0x80] }
 0x3ca   : > { %11586 = vmatpush3.bf16.msra.mxu1 %v12511_v43  ;;  %11593 = vmatprep.mubr.bf16.mxu1 %v8632_v51  ;;  %v8817_v43 = vrot.slane %v8805_v38, 7  ;;  %v8819_v51 = vrot.slane %v16228_v33, 7 }
 0x3cb   : > { %11587 = vmatprep.subr.bf16.mxu1 %v12512_v23 }
 0x3ce   : > { %11588 = vmatpush3.bf16.msra.mxu1 %v12512_v23  ;;  %v8818_v23 = vsel %vm2524_vm3, %v16766_v62, %v8817_v43 }
 0x3cf   : > { %11589 = vmatprep.subr.bf16.mxu1 %v12513_v30 }
 0x3d1   : > { %v6437_v1 = vpop.f32.mrb[84].mxu0 }
 0x3d2   : > { %11590 = vmatpush3.bf16.msra.mxu1 %v12513_v30  ;;  %v6438_v24 = vpop.f32.mrb[85].mxu0  ;;  %v12526_v30 = vld [vmem:[%s16445_s5 + $0x1d8] sm:$0xff]  }
 0x3d3   : > { %11591 = vmatprep.subr.bf16.mxu1 %v12514_v11  ;;  %v6439_v35 = vpop.f32.mrb[86].mxu0  ;;  %v16768_v24 = vld [vmem:[#allocation20_spill] sm:$0xff] }
 0x3d4   : > { %v16173_v2 = vadd.f32 %v6439_v35, %v16106_v18  ;;  %v6441_v5 = vpop.f32.mrb[87].mxu0  ;;  %v12517_v18 = vld [vmem:[%s16445_s5 + $0x190] sm:$0xff]   ;;  %v8986_v35 = vld [vmem:[#allocation3 + $0x40] sm:$0x80] }
 0x3d5   : > { %v16176_v39 = vadd.f32 %v6441_v5, %v16112_v8  ;;  %v12518_v8 = vld [vmem:[%s16445_s5 + $0x198] sm:$0xff]  }
 0x3d6   : > { %11592 = vmatpush3.bf16.msra.mxu1 %v12514_v11  ;;  %v16767_v11 = vrot.slane %v15619_v15, 7 }
 0x3d7   : > { %11605 = vmatprep.subr.bf16.mxu1 %v12515_v29 }
 0x3d8   : > { %v8821_v1 = vsel %vm2524_vm3, %v8819_v51, %v16767_v11 }
 0x3d9   : > { %11594 = vmatmul.mubr.bf16.vlgmr.msra.gmra.mrb[76].mxu1 %v16758_v42 }
 0x3da   : > { %11597 = vmatprep.mubr.bf16.mxu1 %v16759_v6  ;;  %11606 = vmatpush3.bf16.msra.mxu1 %v12515_v29  ;;  %v8807_v29 = vld [vmem:[#allocation3 + $0x38] sm:$0x7f] }
 0x3db   : > { %11607 = vmatprep.subr.bf16.mxu1 %v12516_v55  ;;  %v8824_v27 = vrot.slane %v8807_v29, 7 }
 0x3de   : > { %11608 = vmatpush3.bf16.msra.mxu1 %v12516_v55  ;;  %v12527_v55 = vld [vmem:[%s16445_s5 + $0x1e0] sm:$0xff]  }
 0x3df   : > { %11609 = vmatprep.subr.bf16.mxu1 %v12517_v18 }
 0x3e1   : > { %11598 = vmatmul.mubr.bf16.gmra.mrb[120].mxu1 %v8639_v28  ;;  %v16769_v28 = vld [vmem:[#allocation21_spill] sm:$0xff] }
 0x3e2   : > { %11601 = vmatprep.mubr.bf16.mxu1 %v16761_v45  ;;  %11610 = vmatpush3.bf16.msra.mxu1 %v12517_v18  ;;  %v8998_v18 = vrot.slane %v8986_v35, 7  ;;  %v16770_v45 = vrot.slane %v16769_v28, 7 }
 0x3e3   : > { %11611 = vmatprep.subr.bf16.mxu1 %v12518_v8 }
 0x3e6   : > { %11612 = vmatpush3.bf16.msra.mxu1 %v12518_v8 }
 0x3e7   : > { %11613 = vmatprep.subr.bf16.mxu1 %v12519_v9 }
 0x3e9   : > { %11602 = vmatmul.mubr.bf16.gmra.mrb[124].mxu1 %v16762_v31  ;;  %v8987_v31 = vld [vmem:[#allocation3 + $0x58] sm:$0x7f] }
 0x3ea   : > { %11614 = vmatpush3.bf16.msra.mxu1 %v12519_v9  ;;  %11621 = vmatprep.mubr.bf16.mxu1 %v8814_v49  ;;  %v8825_v9 = vsel %vm2524_vm3, %v16770_v45, %v8824_v27  ;;  %v9003_v14 = vrot.slane %v8987_v31, 7  ;;  %v12532_v49 = vld [vmem:[%s16445_s5 + $0x208] sm:$0xff]   ;;  %v9172_v27 = vld [vmem:[#allocation3 + $0x18] sm:$0xff] }
 0x3eb   : > { %v6465_v10 = vpop.f32.mrb[88].mxu0  ;;  %11615 = vmatprep.subr.bf16.mxu1 %v12520_v12  ;;  %v9188_v28 = vshll.u32 %v9172_v27, 16 }
 0x3ec   : > { %v6466_v52 = vpop.f32.mrb[89].mxu0  ;;  %v16772_v10 = vrot.slane %v15835_v16, 7 }
 0x3ed   : > { %v6467_v0 = vpop.f32.mrb[90].mxu0  ;;  %v8988_v52 = vld [vmem:[#allocation3 + $0x60] sm:$0x80] }
 0x3ee   : > { %v16210_v53 = vadd.f32 %v6467_v0, %v16143_v32  ;;  %v6469_v34 = vpop.f32.mrb[91].mxu0  ;;  %11616 = vmatpush3.bf16.msra.mxu1 %v12520_v12  ;;  %v12524_v32 = vld [vmem:[%s16445_s5 + $0x1c8] sm:$0xff]   ;;  %v12530_v12 = vld [vmem:[%s16445_s5 + $0x1f8] sm:$0xff]   ;;  %v9005_v43 = vrot.slane %v8988_v52, 7 }
 0x3ef   : > { %v16213_v40 = vadd.f32 %v6469_v34, %v16149_v19  ;;  %11617 = vmatprep.subr.bf16.mxu1 %v12521_v13  ;;  %v16764_v19 = vld [vmem:[#allocation17_spill] sm:$0xff] }
 0x3f2   : > { %11618 = vmatpush3.bf16.msra.mxu1 %v12521_v13  ;;  %v9004_v13 = vsel %vm2524_vm3, %v16772_v10, %v9003_v14 }
 0x3f3   : > { %11619 = vmatprep.subr.bf16.mxu1 %v12522_v47 }
 0x3f6   : > { %11620 = vmatpush3.bf16.msra.mxu1 %v12522_v47  ;;  %v12533_v47 = vld [vmem:[%s16445_s5 + $0x210] sm:$0xff]  }
 0x3f7   : > { %11633 = vmatprep.subr.bf16.mxu1 %v12523_v17 }
 0x3f9   : > { %11622 = vmatmul.mubr.bf16.vlgmr.msra.gmra.mrb[76].mxu1 %v16764_v19 }
 0x3fa   : > { %11625 = vmatprep.mubr.bf16.mxu1 %v8818_v23  ;;  %11634 = vmatpush3.bf16.msra.mxu1 %v12523_v17  ;;  %v12534_v23 = vld [vmem:[%s16445_s5 + $0x218] sm:$0xff]  }
 0x3fb   : > { %11635 = vmatprep.subr.bf16.mxu1 %v12524_v32 }
 0x3fe   : > { %11636 = vmatpush3.bf16.msra.mxu1 %v12524_v32 }
 0x3ff   : > { %11637 = vmatprep.subr.bf16.mxu1 %v12525_v46 }
 0x401   : > { %11626 = vmatmul.mubr.bf16.gmra.mrb[128].mxu1 %v8821_v1 }
 0x402   : > { %11629 = vmatprep.mubr.bf16.mxu1 %v16768_v24  ;;  %11638 = vmatpush3.bf16.msra.mxu1 %v12525_v46  ;;  %v16773_v46 = vrot.slane %v15879_v50, 7 }
 0x403   : > { %v6755_v5 = vpop.f32.mrb[92].mxu0  ;;  %11639 = vmatprep.subr.bf16.mxu1 %v12526_v30 }
 0x404   : > { %v6756_v42 = vpop.f32.mrb[93].mxu0  ;;  %v9007_v51 = vsel %vm2524_vm3, %v9005_v43, %v16773_v46 }
 0x405   : > { %v6757_v6 = vpop.f32.mrb[94].mxu0 }
 0x406   : > { %v16245_v15 = vadd.f32 %v6757_v6, %v16173_v2  ;;  %v6759_v7 = vpop.f32.mrb[95].mxu0  ;;  %11640 = vmatpush3.bf16.msra.mxu1 %v12526_v30  ;;  %v9000_v2 = vsel %vm2524_vm3, %v8998_v18, %v16771_v21  ;;  %v8989_v30 = vld [vmem:[#allocation3 + $0x78] sm:$0x7f]  ;;  %v12537_v6 = vld [vmem:[%s16445_s5 + $0x230] sm:$0xff]   ;;  %v9185_v18 = vshrl.u32 %v9172_v27, 16 }
 0x407   : > { %v16248_v8 = vadd.f32 %v6759_v7, %v16176_v39  ;;  %11641 = vmatprep.subr.bf16.mxu1 %v12527_v55  ;;  %v12529_v39 = vld [vmem:[%s16445_s5 + $0x1f0] sm:$0xff]   ;;  %v9010_v29 = vrot.slane %v8989_v30, 7 }
 0x408   : > { %v9187_v7 = vrot.slane %v9185_v18, 7 }
 0x409   : > { %11630 = vmatmul.mubr.bf16.gmra.mrb[132].mxu1 %v8825_v9 }
 0x40a   : > { %11642 = vmatpush3.bf16.msra.mxu1 %v12527_v55  ;;  %11649 = vmatprep.mubr.bf16.mxu1 %v9000_v2  ;;  %v16775_v55 = vld [vmem:[#allocation23_spill] sm:$0xff] }
 0x40b   : > { %11643 = vmatprep.subr.bf16.mxu1 %v12528_v60 }
 0x40e   : > { %11644 = vmatpush3.bf16.msra.mxu1 %v12528_v60 }
 0x40f   : > { %11645 = vmatprep.subr.bf16.mxu1 %v12529_v39 }
 0x412   : > { %11646 = vmatpush3.bf16.msra.mxu1 %v12529_v39 }
 0x413   : > { %11647 = vmatprep.subr.bf16.mxu1 %v12530_v12 }
 0x416   : > { %11648 = vmatpush3.bf16.msra.mxu1 %v12530_v12  ;;  %v9190_v12 = vor.u32 %v9188_v28, %v9187_v7 }
 0x417   : > { %11661 = vmatprep.subr.bf16.mxu1 %v12531_v58 }
 0x418   : > { %v11459_v34 = vpop.f32.mrb[80].mxu1 }
 0x419   : > { %11650 = vmatmul.mubr.bf16.vlgmr.msra.gmra.mrb[76].mxu1 %v15845_v26  ;;  %v7788_v17 = vpop.f32.mrb[81].mxu1 }
 0x41a   : > { %11653 = vmatprep.mubr.bf16.mxu1 %v9004_v13  ;;  %11662 = vmatpush3.bf16.msra.mxu1 %v12531_v58  ;;  %v11460_v19 = vpop.f32.mrb[82].mxu1  ;;  %v9173_v17 = vld [vmem:[#allocation3 + $0x38] sm:$0xff] }
 0x41b   : > { %v6783_v0 = vpop.f32.mrb[96].mxu0  ;;  %11663 = vmatprep.subr.bf16.mxu1 %v12532_v49  ;;  %v7790_v61 = vpop.f32.mrb[83].mxu1 }
 0x41c   : > { %v6784_v38 = vpop.f32.mrb[97].mxu0  ;;  %v9193_v0 = vshrl.u32 %v16228_v33, 16 }
 0x41d   : > { %v6785_v32 = vpop.f32.mrb[98].mxu0 }
 0x41e   : > { %v16279_v26 = vadd.f32 %v6785_v32, %v16210_v53  ;;  %v6787_v16 = vpop.f32.mrb[99].mxu0  ;;  %11664 = vmatpush3.bf16.msra.mxu1 %v12532_v49  ;;  %v9175_v53 = vshrl.u32 %v16193_v41, 16  ;;  %v12536_v41 = vld [vmem:[%s16445_s5 + $0x228] sm:$0xff]   ;;  %v9195_v43 = vrot.slane %v9193_v0, 7  ;;  %v9203_v32 = vshrl.u32 %v9173_v17, 16 }
 0x41f   : > { %v16282_v62 = vadd.f32 %v6787_v16, %v16213_v40  ;;  %11665 = vmatprep.subr.bf16.mxu1 %v12533_v47  ;;  %v12535_v40 = vld [vmem:[%s16445_s5 + $0x220] sm:$0xff]  }
 0x420   : > { %v11463_v11 = vpop.f32.mrb[84].mxu1  ;;  %v9177_v35 = vrot.slane %v9175_v53, 7  ;;  %v9205_v30 = vrot.slane %v9203_v32, 7 }
 0x421   : > { %11654 = vmatmul.mubr.bf16.gmra.mrb[136].mxu1 %v9007_v51  ;;  %v7803_v1 = vpop.f32.mrb[85].mxu1  ;;  %v16779_v11 = vrot.slane %v15740_v54, 7 }
 0x422   : > { %11657 = vmatprep.mubr.bf16.mxu1 %v15908_v22  ;;  %11666 = vmatpush3.bf16.msra.mxu1 %v12533_v47  ;;  %v11464_v24 = vpop.f32.mrb[86].mxu1  ;;  %v16774_v22 = vrot.slane %v15887_v36, 7  ;;  %v9180_v42 = vsel %vm2716_vm4, %v9177_v35, %v16775_v55  ;;  %v12538_v36 = vld [vmem:[%s16445_s5 + $0x238] sm:$0xff]   ;;  %v16776_v47 = vld [vmem:[#allocation34_spill] sm:$0xff] }
 0x423   : > { %11667 = vmatprep.subr.bf16.mxu1 %v12534_v23  ;;  %v7806_v50 = vpop.f32.mrb[87].mxu1 }
 0x424   : > { %v9011_v5 = vsel %vm2524_vm3, %v16774_v22, %v9010_v29 }
 0x426   : > { %11668 = vmatpush3.bf16.msra.mxu1 %v12534_v23 }
 0x427   : > { %11669 = vmatprep.subr.bf16.mxu1 %v12535_v40 }
 0x429   : > { %11658 = vmatmul.mubr.bf16.gmra.mrb[140].mxu1 %v9011_v5 }
 0x42a   : > { %11670 = vmatpush3.bf16.msra.mxu1 %v12535_v40  ;;  %11677 = vmatprep.mubr.bf16.mxu1 %v9180_v42 }
 0x42b   : > { %11671 = vmatprep.subr.bf16.mxu1 %v12536_v41 }
 0x42e   : > { %11672 = vmatpush3.bf16.msra.mxu1 %v12536_v41  ;;  %v7551_v41 = vlaneseq }
 0x42f   : > { %11673 = vmatprep.subr.bf16.mxu1 %v12537_v6 }
 0x430   : > { %v7552_v5 = vshrl.u32 %v7551_v41, 7 }
 0x432   : > { %11674 = vmatpush3.bf16.msra.mxu1 %v12537_v6  ;;  %v11487_v9 = vpop.f32.mrb[88].mxu1  ;;  %v7553_v7 = vsub.s32 0, %v7552_v5 }
 0x433   : > { %v7071_v60 = vpop.f32.mrb[100].mxu0  ;;  %11675 = vmatprep.subr.bf16.mxu1 %v12538_v36  ;;  %v7923_v2 = vadd.f32 %v11487_v9, %v11459_v34  ;;  %v7915_v39 = vpop.f32.mrb[89].mxu1  ;;  %v16777_v34 = vrot.slane %v15702_v3, 7  ;;  %v9206_v3 = vshll.u32 %v9173_v17, 16 }
 0x434   : > { %v7072_v45 = vpop.f32.mrb[101].mxu0  ;;  %v11488_v14 = vpop.f32.mrb[90].mxu1 }
 0x435   : > { %v7073_v21 = vpop.f32.mrb[102].mxu0  ;;  %v7926_v10 = vadd.f32 %v11488_v14, %v11460_v19  ;;  %v7917_v13 = vpop.f32.mrb[91].mxu1  ;;  %v9191_v38 = vsel %vm2716_vm4, %v16777_v34, %v9190_v12  ;;  %v9208_v53 = vor.u32 %v9206_v3, %v9205_v30  ;;  %v7557_v45 = vsub.s32 1, %v7552_v5 }
 0x436   : > { %v16310_v31 = vadd.f32 %v7073_v21, %v16245_v15  ;;  %v7075_v58 = vpop.f32.mrb[103].mxu0  ;;  %11676 = vmatpush3.bf16.msra.mxu1 %v12538_v36  ;;  %v7918_v52 = vadd.f32 %v7917_v13, %v7790_v61  ;;  %v16778_v61 = vld [vmem:[#allocation33_spill] sm:$0xff] }
 0x437   : > { %v16313_v49 = vadd.f32 %v7075_v58, %v16248_v8  ;;  %v9198_v33 = vsel %vm2716_vm4, %v9195_v43, %v16778_v61  ;;  %v9209_v40 = vsel %vm2716_vm4, %v16779_v11, %v9208_v53 }
 0x439   : > { %11678 = vmatmul.mubr.bf16.vlgmr.msra.gmra.mrb[76].mxu1 %v16776_v47  ;;  %v16780_v47 = vld [vmem:[#allocation28_spill] sm:$0xff] }
 0x43a   : > { %11681 = vmatprep.mubr.bf16.mxu1 %v9191_v38  ;;  %v11491_v15 = vpop.f32.mrb[92].mxu1  ;;  %v16781_v38 = vld [vmem:[#allocation25_spill] sm:$0xff] }
 0x43b   : > { %v7930_v16 = vpop.f32.mrb[93].mxu1 }
 0x43c   : > { %v7931_v23 = vadd.f32 %v7930_v16, %v7803_v1  ;;  %v11492_v8 = vpop.f32.mrb[94].mxu1 }
 0x43d   : > { %v7941_v46 = vadd.f32 %v11492_v8, %v11464_v24  ;;  %v7933_v19 = vpop.f32.mrb[95].mxu1 }
 0x43e   : > { %v7934_v51 = vadd.f32 %v7933_v19, %v7806_v50 }
 0x441   : > { %11682 = vmatmul.mubr.bf16.gmra.mrb[144].mxu1 %v9198_v33 }
 0x442   : > { %11685 = vmatprep.mubr.bf16.mxu1 %v15801_v25 }
 0x449   : > { %11686 = vmatmul.mubr.bf16.gmra.mrb[148].mxu1 %v9209_v40 }
 0x44b   : > { %v7099_v29 = vpop.f32.mrb[104].mxu0 }
 0x44c   : > { %v7100_v1 = vpop.f32.mrb[105].mxu0 }
 0x44d   : > { %v7101_v35 = vpop.f32.mrb[106].mxu0 }
 0x44e   : > { %v16327_v24 = vadd.f32 %v7101_v35, %v16279_v26  ;;  %v7103_v50 = vpop.f32.mrb[107].mxu0 }
 0x44f   : > { %v16330_v22 = vadd.f32 %v7103_v50, %v16282_v62  ;;  %v7549_v62 = vld [vmem:[%s16448_s8] sm:$0x3] }
 0x450   : > { %v16347_v39 = vrot.slane %v7549_v62, %v7557_v45 }
 0x453   : > { %v7419_v25 = vpop.f32.mrb[36].mxu0  ;;  %v11515_v54 = vpop.f32.mrb[96].mxu1 }
 0x454   : > { %v11705_v55 = vadd.f32 %v7419_v25, %v15862_v37  ;;  %v7421_v42 = vpop.f32.mrb[37].mxu0  ;;  %v16334_v18 = vadd.f32 %v11515_v54, %v7923_v2  ;;  %v8129_v36 = vpop.f32.mrb[97].mxu1  ;;  %v16345_v2 = vrot.slane %v7549_v62, %v7553_v7 }
 0x455   : > { %v11706_v27 = vadd.f32 %v7421_v42, %v15867_v56  ;;  %v7423_v6 = vpop.f32.mrb[38].mxu0  ;;  %v11516_v28 = vpop.f32.mrb[98].mxu1 }
 0x456   : > { %v11707_v26 = vadd.f32 %v7423_v6, %v15875_v48  ;;  %v7425_v60 = vpop.f32.mrb[39].mxu0  ;;  %v16341_v9 = vadd.f32 %v11516_v28, %v7926_v10  ;;  %v8131_v21 = vpop.f32.mrb[99].mxu1  ;;  %v7561_v53 = vadd.f32 %v11705_v55, %v16345_v2 }
 0x457   : > { %v11708_v37 = vadd.f32 %v7425_v60, %v15877_v57  ;;  %v16343_v56 = vadd.f32 %v8131_v21, %v7918_v52 }
 0x458   : > { %v7563_v48 = vadd.f32 %v11707_v26, %v16345_v2 }
 0x459   : > { %v7564_v0 = vadd.f32 %v11708_v37, %v16347_v39 }
 0x45a   : > { %v7585_v33 = vrot.slane %v7563_v48, 2 }
 0x45b   : > { %v7429_v12 = vpop.f32.mrb[40].mxu0  ;;  %v11519_v13 = vpop.f32.mrb[100].mxu1  ;;  %v7588_v11 = vrot.slane %v7564_v0, 2  ;;  %v16783_v0 = vld [vmem:[#allocation27_spill] sm:$0xff] }
 0x45c   : > { %v11709_v58 = vadd.f32 %v7429_v12, %v15898_v20  ;;  %v7431_v14 = vpop.f32.mrb[41].mxu0  ;;  %v8144_v34 = vpop.f32.mrb[101].mxu1  ;;  %v16782_v20 = vld [vmem:[#allocation29_spill] sm:$0xff] }
 0x45d   : > { %v11710_v57 = vadd.f32 %v7431_v14, %v16780_v47  ;;  %v7433_v10 = vpop.f32.mrb[42].mxu0  ;;  %v16355_v43 = vadd.f32 %v8144_v34, %v7931_v23  ;;  %v11520_v32 = vpop.f32.mrb[102].mxu1  ;;  %v7562_v23 = vadd.f32 %v11706_v27, %v16347_v39  ;;  %v16784_v34 = vld [vmem:[#allocation10_spill] sm:$0xff] }
 0x45e   : > { %v7565_v52 = vadd.f32 %v11709_v58, %v16345_v2  ;;  %v11711_v17 = vadd.f32 %v7433_v10, %v16781_v38  ;;  %v7435_v15 = vpop.f32.mrb[43].mxu0  ;;  %v16359_v19 = vadd.f32 %v11520_v32, %v7941_v46  ;;  %v8147_v61 = vpop.f32.mrb[103].mxu1 }
 0x45f   : > { %v7566_v16 = vadd.f32 %v11710_v57, %v16347_v39  ;;  %v11712_v8 = vadd.f32 %v7435_v15, %v16782_v20  ;;  %v16361_v3 = vadd.f32 %v8147_v61, %v7934_v51  ;;  %v16785_v15 = vld [vmem:[#allocation26_spill] sm:$0xff] }
 0x460   : > { %v7586_v30 = vrot.slane %v7565_v52, 2  ;;  %v7567_v5 = vadd.f32 %v11711_v17, %v16345_v2 }
 0x461   : > { %v7589_v40 = vrot.slane %v7566_v16, 2  ;;  %v7568_v42 = vadd.f32 %v11712_v8, %v16347_v39  ;;  %v16786_v8 = vld [vmem:[#allocation6_spill] sm:$0xff] }
 0x462   : > { %v7587_v29 = vsel %vm7529_vm14, %v7585_v33, %v7586_v30  ;;  %v7595_v36 = vrot.slane %v7567_v5, 4 }
 0x463   : > { %v7629_v1 = vsel %vm2129_vm2, %v7561_v53, %v7587_v29  ;;  %v7590_v35 = vsel %vm7529_vm14, %v7588_v11, %v7589_v40  ;;  %v7439_v46 = vpop.f32.mrb[108].mxu0  ;;  %v7596_v26 = vrot.slane %v7568_v42, 4 }
 0x464   : > { %7637 = vst [vmem:[%s15563_s20 + $0x10] sm:$0xff] %v7629_v1  ;;  %v7630_v50 = vsel %vm2129_vm2, %v7562_v23, %v7590_v35  ;;  %v7440_v41 = vpop.f32.mrb[109].mxu0 }
 0x465   : > { %7638 = vst [vmem:[%s15563_s20 + $0x18] sm:$0xff] %v7630_v50  ;;  %v7441_v51 = vpop.f32.mrb[110].mxu0 }
 0x466   : > { %v7482_v25 = vadd.f32 %v7441_v51, %v16310_v31  ;;  %v7443_v55 = vpop.f32.mrb[111].mxu0 }
 0x467   : > { %v7483_v54 = vadd.f32 %v7443_v55, %v16313_v49 }
 0x468   : > { %v7569_v27 = vadd.f32 %v16345_v2, %v7482_v25 }
 0x469   : > { %v7570_v6 = vadd.f32 %v16347_v39, %v7483_v54 }
 0x46a   : > { %v7601_v7 = vrot.slane %v7569_v27, 6 }
 0x46b   : > { %v7602_v60 = vrot.slane %v7570_v6, 6  ;;  %v7447_v28 = vpop.f32.mrb[48].mxu0 }
 0x46c   : > { %v7631_v62 = vsel %vm2129_vm2, %v7595_v36, %v7601_v7  ;;  %v11713_v45 = vadd.f32 %v7447_v28, %v15970_v44  ;;  %v7449_v31 = vpop.f32.mrb[49].mxu0 }
 0x46d   : > { %7639 = vst [vmem:[%s15563_s20 + $0x30] sm:$0xff] %v7631_v62  ;;  %v7632_v37 = vsel %vm2129_vm2, %v7596_v26, %v7602_v60  ;;  %v11714_v21 = vadd.f32 %v7449_v31, %v15972_v59  ;;  %v7451_v49 = vpop.f32.mrb[50].mxu0 }
 0x46e   : > { %7640 = vst [vmem:[%s15563_s20 + $0x38] sm:$0xff] %v7632_v37  ;;  %v11715_v12 = vadd.f32 %v7451_v49, %v15980_v4  ;;  %v7453_v48 = vpop.f32.mrb[51].mxu0  ;;  %v7571_v40 = vadd.f32 %v11713_v45, %v16345_v2 }
 0x46f   : > { %v11716_v58 = vadd.f32 %v7453_v48, %v15982_v63  ;;  %v7572_v1 = vadd.f32 %v11714_v21, %v16347_v39 }
 0x470   : > { %v7573_v13 = vadd.f32 %v11715_v12, %v16345_v2 }
 0x471   : > { %v7574_v10 = vadd.f32 %v11716_v58, %v16347_v39 }
 0x472   : > { %v7609_v53 = vrot.slane %v7573_v13, 2 }
 0x473   : > { %v7457_v14 = vpop.f32.mrb[52].mxu0  ;;  %v7612_v23 = vrot.slane %v7574_v10, 2 }
 0x474   : > { %v11717_v47 = vadd.f32 %v7457_v14, %v16783_v0  ;;  %v7459_v57 = vpop.f32.mrb[53].mxu0  ;;  %v11543_v44 = vpop.f32.mrb[104].mxu1 }
 0x475   : > { %v11718_v52 = vadd.f32 %v7459_v57, %v16784_v34  ;;  %v7461_v38 = vpop.f32.mrb[54].mxu0  ;;  %v8377_v59 = vadd.f32 %v11543_v44, %v16334_v18  ;;  %v8343_v17 = vpop.f32.mrb[105].mxu1 }
 0x476   : > { %v7575_v4 = vadd.f32 %v11717_v47, %v16345_v2  ;;  %v11719_v32 = vadd.f32 %v7461_v38, %v16785_v15  ;;  %v7463_v63 = vpop.f32.mrb[55].mxu0  ;;  %v11544_v16 = vpop.f32.mrb[106].mxu1 }
 0x477   : > { %v7576_v20 = vadd.f32 %v11718_v52, %v16347_v39  ;;  %v11720_v61 = vadd.f32 %v7463_v63, %v16786_v8  ;;  %v8378_v33 = vadd.f32 %v11544_v16, %v16341_v9  ;;  %v8345_v30 = vpop.f32.mrb[107].mxu1 }
 0x478   : > { %v7610_v11 = vrot.slane %v7575_v4, 2  ;;  %v8376_v18 = vadd.f32 %v8345_v30, %v16343_v56  ;;  %v7577_v55 = vadd.f32 %v11719_v32, %v16345_v2 }
 0x479   : > { %v7613_v29 = vrot.slane %v7576_v20, 2  ;;  %v7578_v36 = vadd.f32 %v11720_v61, %v16347_v39 }
 0x47a   : > { %v7611_v35 = vsel %vm7529_vm14, %v7609_v53, %v7610_v11 }
 0x47b   : > { %v7633_v46 = vsel %vm2129_vm2, %v7571_v40, %v7611_v35  ;;  %v7614_v50 = vsel %vm7529_vm14, %v7612_v23, %v7613_v29  ;;  %v7467_v41 = vpop.f32.mrb[112].mxu0  ;;  %v7620_v37 = vrot.slane %v7578_v36, 4 }
 0x47c   : > { %7641 = vst [vmem:[%s15563_s20 + $0x50] sm:$0xff] %v7633_v46  ;;  %v7634_v9 = vsel %vm2129_vm2, %v7572_v1, %v7614_v50  ;;  %v7468_v51 = vpop.f32.mrb[113].mxu0  ;;  %v11547_v5 = vpop.f32.mrb[108].mxu1 }
 0x47d   : > { %7642 = vst [vmem:[%s15563_s20 + $0x58] sm:$0xff] %v7634_v9  ;;  %v7469_v56 = vpop.f32.mrb[114].mxu0  ;;  %v8358_v25 = vpop.f32.mrb[109].mxu1 }
 0x47e   : > { %v7492_v42 = vadd.f32 %v7469_v56, %v16327_v24  ;;  %v7471_v54 = vpop.f32.mrb[115].mxu0  ;;  %v8379_v27 = vadd.f32 %v8358_v25, %v16355_v43  ;;  %v11548_v6 = vpop.f32.mrb[110].mxu1  ;;  %v7619_v24 = vrot.slane %v7577_v55, 4 }
 0x47f   : > { %v7493_v7 = vadd.f32 %v7471_v54, %v16330_v22  ;;  %v8381_v26 = vadd.f32 %v11548_v6, %v16359_v19  ;;  %v8361_v60 = vpop.f32.mrb[111].mxu1 }
 0x480   : > { %v7579_v28 = vadd.f32 %v16345_v2, %v7492_v42  ;;  %v8380_v62 = vadd.f32 %v8361_v60, %v16361_v3 }
 0x481   : > { %v7580_v45 = vadd.f32 %v16347_v39, %v7493_v7 }
 0x482   : > { %v7625_v31 = vrot.slane %v7579_v28, 6 }
 0x483   : > { %v7626_v21 = vrot.slane %v7580_v45, 6 }
 0x484   : > { %v7635_v43 = vsel %vm2129_vm2, %v7619_v24, %v7625_v31 }
 0x485   : > { %7643 = vst [vmem:[%s15563_s20 + $0x70] sm:$0xff] %v7635_v43  ;;  %v7636_v49 = vsel %vm2129_vm2, %v7620_v37, %v7626_v21 }
 0x486   : > { %7644 = vst [vmem:[%s15563_s20 + $0x78] sm:$0xff] %v7636_v49 }
 0x494   : > { %v11571_v22 = vpop.f32.mrb[112].mxu1 }
 0x495   : > { %v8615_v12 = vadd.f32 %v11571_v22, %v8377_v59  ;;  %v8581_v19 = vpop.f32.mrb[113].mxu1 }
 0x496   : > { %v11572_v48 = vpop.f32.mrb[114].mxu1 }
 0x497   : > { %v8616_v58 = vadd.f32 %v11572_v48, %v8378_v33  ;;  %v8583_v2 = vpop.f32.mrb[115].mxu1 }
 0x498   : > { %v8614_v14 = vadd.f32 %v8583_v2, %v8376_v18 }
 0x49c   : > { %v11575_v3 = vpop.f32.mrb[116].mxu1 }
 0x49d   : > { %v8596_v13 = vpop.f32.mrb[117].mxu1 }
 0x49e   : > { %v8617_v39 = vadd.f32 %v8596_v13, %v8379_v27  ;;  %v11576_v0 = vpop.f32.mrb[118].mxu1 }
 0x49f   : > { %v8619_v47 = vadd.f32 %v11576_v0, %v8381_v26  ;;  %v8599_v57 = vpop.f32.mrb[119].mxu1 }
 0x4a0   : > { %v8618_v44 = vadd.f32 %v8599_v57, %v8380_v62  ;;  %v10335_v62 = vld [vmem:[%s16446_s6] ss:$0 sm:$0xff] }
 0x4b4   : > { %v11599_v10 = vpop.f32.mrb[120].mxu1 }
 0x4b5   : > { %v8799_v34 = vadd.f32 %v11599_v10, %v8615_v12  ;;  %v8765_v52 = vpop.f32.mrb[121].mxu1 }
 0x4b6   : > { %v11600_v38 = vpop.f32.mrb[122].mxu1 }
 0x4b7   : > { %v8800_v17 = vadd.f32 %v11600_v38, %v8616_v58  ;;  %v8767_v4 = vpop.f32.mrb[123].mxu1 }
 0x4b8   : > { %v8798_v15 = vadd.f32 %v8767_v4, %v8614_v14 }
 0x4bc   : > { %v11603_v59 = vpop.f32.mrb[124].mxu1 }
 0x4bd   : > { %v8780_v32 = vpop.f32.mrb[125].mxu1 }
 0x4be   : > { %v8801_v63 = vadd.f32 %v8780_v32, %v8617_v39  ;;  %v11604_v16 = vpop.f32.mrb[126].mxu1 }
 0x4bf   : > { %v8803_v20 = vadd.f32 %v11604_v16, %v8619_v47  ;;  %v8783_v8 = vpop.f32.mrb[127].mxu1 }
 0x4c0   : > { %v8802_v61 = vadd.f32 %v8783_v8, %v8618_v44 }
 0x4d4   : > { %v11627_v33 = vpop.f32.mrb[128].mxu1 }
 0x4d5   : > { %v8981_v30 = vadd.f32 %v11627_v33, %v8799_v34  ;;  %v8947_v53 = vpop.f32.mrb[129].mxu1 }
 0x4d6   : > { %v11628_v11 = vpop.f32.mrb[130].mxu1 }
 0x4d7   : > { %v8982_v18 = vadd.f32 %v11628_v11, %v8800_v17  ;;  %v8949_v40 = vpop.f32.mrb[131].mxu1 }
 0x4d8   : > { %v8980_v23 = vadd.f32 %v8949_v40, %v8798_v15 }
 0x4dc   : > { %v11631_v29 = vpop.f32.mrb[132].mxu1 }
 0x4dd   : > { %v8962_v1 = vpop.f32.mrb[133].mxu1 }
 0x4de   : > { %v8983_v35 = vadd.f32 %v8962_v1, %v8801_v63  ;;  %v11632_v46 = vpop.f32.mrb[134].mxu1 }
 0x4df   : > { %v8985_v50 = vadd.f32 %v11632_v46, %v8803_v20  ;;  %v8965_v41 = vpop.f32.mrb[135].mxu1 }
 0x4e0   : > { %v8984_v9 = vadd.f32 %v8965_v41, %v8802_v61 }
 0x4f4   : > { %v11655_v51 = vpop.f32.mrb[136].mxu1 }
 0x4f5   : > { %v9167_v5 = vadd.f32 %v11655_v51, %v8981_v30  ;;  %v9133_v56 = vpop.f32.mrb[137].mxu1 }
 0x4f6   : > { %v11656_v25 = vpop.f32.mrb[138].mxu1 }
 0x4f7   : > { %v9168_v55 = vadd.f32 %v11656_v25, %v8982_v18  ;;  %v9135_v42 = vpop.f32.mrb[139].mxu1 }
 0x4f8   : > { %v9166_v54 = vadd.f32 %v9135_v42, %v8980_v23 }
 0x4fc   : > { %v11659_v27 = vpop.f32.mrb[140].mxu1 }
 0x4fd   : > { %v9148_v6 = vpop.f32.mrb[141].mxu1 }
 0x4fe   : > { %v9169_v36 = vadd.f32 %v9148_v6, %v8983_v35  ;;  %v11660_v7 = vpop.f32.mrb[142].mxu1 }
 0x4ff   : > { %v9171_v26 = vadd.f32 %v11660_v7, %v8985_v50  ;;  %v9151_v60 = vpop.f32.mrb[143].mxu1 }
 0x500   : > { %v9170_v28 = vadd.f32 %v9151_v60, %v8984_v9 }
 0x50c   : > { %v11679_v45 = vpop.f32.mrb[76].mxu1 }
 0x50d   : > { %v9315_v24 = vpop.f32.mrb[77].mxu1  ;;  %v9379_v31 = vadd.f32 %v11679_v45, %v10335_v62 }
 0x50e   : > { %v11680_v37 = vpop.f32.mrb[78].mxu1  ;;  %v9377_v12 = vadd.f32 %v10335_v62, %v9315_v24 }
 0x50f   : > { %v9318_v21 = vpop.f32.mrb[79].mxu1  ;;  %v9390_v49 = vrot.slane %v9379_v31, 2  ;;  %v9380_v0 = vadd.f32 %v11680_v37, %v10335_v62 }
 0x510   : > { %v9378_v43 = vadd.f32 %v10335_v62, %v9318_v21 }
 0x511   : > { %v9394_v44 = vrot.slane %v9380_v0, 4 }
 0x512   : > { %v9389_v22 = vrot.slane %v9378_v43, 2 }
 0x514   : > { %v9391_v19 = vsel %vm7529_vm14, %v9389_v22, %v9390_v49  ;;  %v11683_v48 = vpop.f32.mrb[144].mxu1 }
 0x515   : > { %v9411_v58 = vsel %vm2129_vm2, %v9377_v12, %v9391_v19  ;;  %v9365_v2 = vadd.f32 %v11683_v48, %v9167_v5  ;;  %v9331_v14 = vpop.f32.mrb[145].mxu1 }
 0x516   : > { %9415 = vst [vmem:[%s15563_s20 + $0x8] sm:$0xff] %v9411_v58  ;;  %v11684_v3 = vpop.f32.mrb[146].mxu1 }
 0x517   : > { %v9366_v13 = vadd.f32 %v11684_v3, %v9168_v55  ;;  %v9333_v39 = vpop.f32.mrb[147].mxu1  ;;  %v9382_v30 = vadd.f32 %v10335_v62, %v9365_v2 }
 0x518   : > { %v9364_v47 = vadd.f32 %v9333_v39, %v9166_v54 }
 0x519   : > { %v9383_v38 = vadd.f32 %v10335_v62, %v9366_v13 }
 0x51a   : > { %v9381_v57 = vadd.f32 %v10335_v62, %v9364_v47 }
 0x51b   : > { %v9401_v8 = vrot.slane %v9383_v38, 2 }
 0x51c   : > { %v9397_v10 = vrot.slane %v9381_v57, 6  ;;  %v11687_v34 = vpop.f32.mrb[148].mxu1 }
 0x51d   : > { %v9346_v52 = vpop.f32.mrb[149].mxu1 }
 0x51e   : > { %v9412_v17 = vsel %vm2129_vm2, %v9394_v44, %v9397_v10  ;;  %v9367_v4 = vadd.f32 %v9346_v52, %v9169_v36  ;;  %v11688_v15 = vpop.f32.mrb[150].mxu1 }
 0x51f   : > { %9416 = vst [vmem:[%s15563_s20 + $0x28] sm:$0xff] %v9412_v17  ;;  %v9369_v59 = vadd.f32 %v11688_v15, %v9171_v26  ;;  %v9349_v32 = vpop.f32.mrb[151].mxu1 }
 0x520   : > { %v9384_v63 = vadd.f32 %v10335_v62, %v9367_v4  ;;  %v9368_v16 = vadd.f32 %v9349_v32, %v9170_v28 }
 0x521   : > { %v9386_v20 = vadd.f32 %v10335_v62, %v9369_v59 }
 0x522   : > { %v9402_v61 = vrot.slane %v9384_v63, 2  ;;  %v9385_v33 = vadd.f32 %v10335_v62, %v9368_v16 }
 0x523   : > { %v9409_v53 = vrot.slane %v9386_v20, 6 }
 0x524   : > { %v9403_v11 = vsel %vm7529_vm14, %v9401_v8, %v9402_v61  ;;  %v9406_v18 = vrot.slane %v9385_v33, 4 }
 0x525   : > { %v9413_v40 = vsel %vm2129_vm2, %v9382_v30, %v9403_v11 }
 0x526   : > { %9417 = vst [vmem:[%s15563_s20 + $0x48] sm:$0xff] %v9413_v40  ;;  %v9414_v23 = vsel %vm2129_vm2, %v9406_v18, %v9409_v53 }
 0x527   : > { %9418 = vst [vmem:[%s15563_s20 + $0x68] sm:$0xff] %v9414_v23 }
 0x528 PF: > { %p16_p9 = scmp.ge.s32.totalorder %s12668_s13, 4   ;;  %s16787_s30 = smov %s12594_s10 }
 0x529   : > { %s16788_s10 = smov %s12677_s16  ;;  %s16789_s11 = smov %s12668_s13 }
 0x52a   :  { %18 = sbr.rel (!%p16_p9) target bundleno = 2 (0x2), region = 160 }

</bundles_post_ra>
